<compile_context>
chip_gen: v6e
topology: v6e:2x2x1
jax: 0.10.0
libtpu: 0.0.40
codegen_flags: <defaults>
</compile_context>

<pallas_src>
import jax
import jax.numpy as jnp
import numpy as np
from jax import lax
from jax.experimental import pallas as pl
from jax.experimental.pallas import tpu as pltpu

LANE = 128


# ----------------------------- helpers (traceable inside the kernel) ---------

def _bn_stats(x2d, eps=1e-5):
    """Training-mode BN stats per column of (N, C) f32: (mean, 1/sqrt(var+eps)).

    One-pass sum / sum-of-squares in f32 (variance clamped >= 0 against
    cancellation); rsqrt lands on the EUP.  gamma=1, beta=0 per init_bn.
    eps > 0 keeps all-zero padded hidden channels finite (mean=var=0 -> out 0).
    """
    n = x2d.shape[0]
    inv_n = 1.0 / n
    s = jnp.sum(x2d, axis=0, keepdims=True)
    ss = jnp.sum(x2d * x2d, axis=0, keepdims=True)
    mean = s * inv_n
    var = jnp.maximum(ss * inv_n - mean * mean, 0.0)
    return mean, lax.rsqrt(var + eps)


# ----------------------------- the Pallas kernel ------------------------------

def inverted_residual_kernel(x_ref, w1_ref, wd_ref, w2_ref, o_ref, pad_ref):
    # x_ref : (B, H, W, Cin)      f32 (real channels, no HBM padding)
    # w1_ref: (Cin, Chp)          bf16 1x1 expand weight (hidden dim zero-padded)
    # wd_ref: (9, Chp)            f32 3x3 depthwise weights, row k = ky*3 + kx
    # w2_ref: (Chp, Cout)         bf16 1x1 project weight
    # o_ref : (B, H, W, Cout)     f32 output
    # pad_ref:(B, H+2, W, Chp)    f32 VMEM scratch, H halo only
    B, H, W, Cin = x_ref.shape
    Chp = w1_ref.shape[1]
    Cout = w2_ref.shape[1]
    BHW = B * H * W

    # ---- 1x1 expand conv on the MXU (bf16 operands, f32 accumulation) ----
    # (B,H,W,C)->(B*H*W,C) is layout-free: the channel dim stays the lane dim.
    xf = x_ref[...].reshape(BHW, Cin).astype(jnp.bfloat16)
    h = jnp.dot(xf, w1_ref[...], preferred_element_type=jnp.float32)
    mean_h, istd_h = _bn_stats(h)                       # stats as h leaves the MXU
    # BN apply + ReLU6 fused into the single pass that stages the depthwise input.
    h4 = jnp.clip((h - mean_h) * istd_h, 0.0, 6.0).reshape(B, H, W, Chp)

    # ---- 3x3 depthwise conv, stride 1, padding 1 ----
    # Zero only the two H-halo row strips; write the interior once (aligned,
    # lane-dense).  dy offsets are plane-address changes (H is a non-tiled dim).
    pad_ref[:, 0:1, :, :] = jnp.zeros((B, 1, W, Chp), jnp.float32)
    pad_ref[:, H + 1:H + 2, :, :] = jnp.zeros((B, 1, W, Chp), jnp.float32)
    pad_ref[:, 1:H + 1, :, :] = h4

    # W halo in-register: sublane roll (XLU) + precomputed boundary mask.
    wd = wd_ref[...]                                              # loaded once
    col = lax.broadcasted_iota(jnp.int32, (W, Chp), 0).reshape(1, 1, W, Chp)
    acc = None
    for dy in range(3):
        plane = pad_ref[:, dy:dy + H, :, :]                       # aligned read
        left = jnp.where(col > 0, pltpu.roll(plane, 1, axis=2), 0.0)          # x-1
        right = jnp.where(col < W - 1, pltpu.roll(plane, W - 1, axis=2), 0.0)  # x+1
        term = (left * wd[3 * dy + 0:3 * dy + 1, :].reshape(1, 1, 1, Chp)
                + plane * wd[3 * dy + 1:3 * dy + 2, :].reshape(1, 1, 1, Chp)
                + right * wd[3 * dy + 2:3 * dy + 3, :].reshape(1, 1, 1, Chp))
        acc = term if acc is None else acc + term
    # AvgPool2d(stride=1) == AvgPool2d(kernel_size=1) == identity.

    a2 = acc.reshape(BHW, Chp)
    mean_a, istd_a = _bn_stats(a2)
    a = jnp.clip((a2 - mean_a) * istd_a, 0.0, 6.0).astype(jnp.bfloat16)

    # ---- 1x1 project conv on the MXU (bf16 operands, f32 accumulation) ----
    o = jnp.dot(a, w2_ref[...], preferred_element_type=jnp.float32)
    mean_o, istd_o = _bn_stats(o)

    # ---- BN apply + residual connection fused into the single output store ----
    o_ref[...] = x_ref[...] + ((o - mean_o) * istd_o).reshape(B, H, W, Cout)


# ----------------------------- wrapper ----------------------------------------

def _vmem_limit_bytes():
    # ~80% of physical VMEM: ~100 MiB on v5e/v6e (128 MiB), ~51 MiB on v7x (64 MiB).
    try:
        cap = int(pltpu.get_tpu_info().vmem_capacity_bytes)
    except Exception:
        cap = 64 * 1024 * 1024
    return max(32 * 1024 * 1024, min(int(cap * 0.8), 100 * 1024 * 1024))


def inverted_residual(x_nchw, w1, wd, w2):
    """x_nchw: (B, Cin, H, W) float32, like the PyTorch module. Returns NCHW.

    w1: (Cin, Chid)  1x1 expand weight
    wd: (9, Chid)    3x3 depthwise weight, row k = ky*3 + kx
    w2: (Chid, Cout) 1x1 project weight
    """
    B, Cin, H, W = x_nchw.shape
    Chid = w1.shape[1]
    Cout = w2.shape[1]
    assert Cin == Cout, "residual path requires inp == oup"

    # Only the VMEM-internal hidden dim is padded to the lane width; the
    # HBM-resident activations keep their real Cin/Cout channels.
    Chp = int(pl.cdiv(Chid, LANE)) * LANE

    # Layout glue: NCHW -> NHWC.  In a full network the channels-last layout
    # would be carried end-to-end so this happens once.
    x = jnp.transpose(x_nchw, (0, 2, 3, 1)).astype(jnp.float32)

    w1p = jnp.pad(w1.astype(jnp.float32), ((0, 0), (0, Chp - Chid))).astype(jnp.bfloat16)
    wdp = jnp.pad(wd.astype(jnp.float32), ((0, 0), (0, Chp - Chid)))
    w2p = jnp.pad(w2.astype(jnp.float32), ((0, Chp - Chid), (0, 0))).astype(jnp.bfloat16)

    out = pl.pallas_call(
        inverted_residual_kernel,
        out_shape=jax.ShapeDtypeStruct((B, H, W, Cout), jnp.float32),
        in_specs=[
            pl.BlockSpec(memory_space=pltpu.MemorySpace.VMEM),  # x
            pl.BlockSpec(memory_space=pltpu.MemorySpace.VMEM),  # w1
            pl.BlockSpec(memory_space=pltpu.MemorySpace.VMEM),  # wd
            pl.BlockSpec(memory_space=pltpu.MemorySpace.VMEM),  # w2
        ],
        out_specs=pl.BlockSpec(memory_space=pltpu.MemorySpace.VMEM),
        scratch_shapes=[pltpu.VMEM((B, H + 2, W, Chp), jnp.float32)],
        compiler_params=pltpu.CompilerParams(vmem_limit_bytes=_vmem_limit_bytes()),
    )(x, w1p, wdp, w2p)

    return jnp.transpose(out, (0, 3, 1, 2))    # NHWC -> NCHW


# ----------------------------- pure-JAX reference (f32, two-pass BN) ----------

def _bn_ref(x, eps=1e-5):
    mean = jnp.mean(x, axis=(0, 1, 2), keepdims=True)
    var = jnp.mean(jnp.square(x - mean), axis=(0, 1, 2), keepdims=True)
    return (x - mean) * lax.rsqrt(var + eps)


def _relu6(x):
    return jnp.clip(x, 0.0, 6.0)


def reference(x_nchw, w1, wd, w2):
    x = jnp.transpose(x_nchw, (0, 2, 3, 1)).astype(jnp.float32)
    B, H, W, Cin = x.shape
    Chid = w1.shape[1]

    h = _relu6(_bn_ref(jnp.einsum("bhwc,cd->bhwd", x, w1)))
    hp = jnp.pad(h, ((0, 0), (1, 1), (1, 1), (0, 0)))
    acc = jnp.zeros_like(h)
    k = 0
    for dy in range(3):
        for dx in range(3):
            acc = acc + hp[:, dy:dy + H, dx:dx + W, :] * wd[k].reshape(1, 1, 1, Chid)
            k += 1
    a = _relu6(_bn_ref(acc))
    o = _bn_ref(jnp.einsum("bhwc,cd->bhwd", a, w2))
    return jnp.transpose(x + o, (0, 3, 1, 2))


# ----------------------------- main --------------------------------------------

if __name__ == "__main__":
    # Small config consistent with the module: stride=1, inp==oup -> residual.
    B, Cin, H, W = 2, 8, 16, 16
    expand_ratio = 4
    Cout = Cin
    Chid = round(Cin * expand_ratio)

    key = jax.random.PRNGKey(0)
    k1, k2, k3, kx = jax.random.split(key, 4)

    # Deterministic xavier_uniform-style init (matches init_layer; conv biases
    # absent, BN affine identity per init_bn).
    b1 = float(np.sqrt(6.0 / (Cin + Chid)))
    w1 = jax.random.uniform(k1, (Cin, Chid), jnp.float32, -b1, b1)

    bd = float(np.sqrt(6.0 / (1 * 9 + Chid * 9)))
    wd = jax.random.uniform(k2, (9, Chid), jnp.float32, -bd, bd)

    b2 = float(np.sqrt(6.0 / (Chid + Cout)))
    w2 = jax.random.uniform(k3, (Chid, Cout), jnp.float32, -b2, b2)

    x = jax.random.normal(kx, (B, Cin, H, W), jnp.float32)

    out = jax.block_until_ready(inverted_residual(x, w1, wd, w2))
    ref = jax.block_until_ready(reference(x, w1, wd, w2))

    assert out.shape == (B, Cout, H, W)
    # Tolerance accounts for bf16 matmul operands (f32 accumulation + BN renorm).
    np.testing.assert_allclose(np.asarray(out), np.asarray(ref), rtol=5e-2, atol=5e-2)
    print("KERNEL_OK")
</pallas_src>

<mosaic_0001>
module attributes {stable_mosaic.version = 11 : i64} {
  func.func @inverted_residual_kernel(%arg0: memref<2x16x16x8xf32, #tpu.memory_space<vmem>>, %arg1: memref<8x128xbf16, #tpu.memory_space<vmem>>, %arg2: memref<9x128xf32, #tpu.memory_space<vmem>>, %arg3: memref<128x8xbf16, #tpu.memory_space<vmem>>, %arg4: memref<2x16x16x8xf32, #tpu.memory_space<vmem>>, %arg5: memref<2x18x16x128xf32, #tpu.memory_space<vmem>>) attributes {dimension_semantics = [], scalar_prefetch = 0 : i64, scratch_operands = 1 : i64, tpu.core_type = #tpu.core_type<tc>} {
    %c0 = arith.constant 0 : index
    %c0_0 = arith.constant 0 : index
    %c0_1 = arith.constant 0 : index
    %c0_2 = arith.constant 0 : index
    %0 = vector.load %arg0[%c0, %c0_0, %c0_1, %c0_2] : memref<2x16x16x8xf32, #tpu.memory_space<vmem>>, vector<2x16x16x8xf32>
    %1 = vector.shape_cast %0 : vector<2x16x16x8xf32> to vector<512x8xf32>
    %2 = arith.truncf %1 : vector<512x8xf32> to vector<512x8xbf16>
    %c0_3 = arith.constant 0 : index
    %c0_4 = arith.constant 0 : index
    %3 = vector.load %arg1[%c0_3, %c0_4] : memref<8x128xbf16, #tpu.memory_space<vmem>>, vector<8x128xbf16>
    %cst = arith.constant dense<0.000000e+00> : vector<512x128xf32>
    %4 = tpu.matmul %2, %3, %cst {dimension_numbers = #tpu.dot_dimension_numbers<[1], [0], [0], [1], [0, 0, 1, 1], [], []>} : vector<512x8xbf16>, vector<8x128xbf16>, vector<512x128xf32> -> vector<512x128xf32>
    %cst_5 = arith.constant dense<0.000000e+00> : vector<128xf32>
    %5 = vector.multi_reduction <add>, %4, %cst_5 [0] : vector<512x128xf32> to vector<128xf32>
    %6 = vector.shape_cast %5 : vector<128xf32> to vector<1x128xf32>
    %7 = arith.mulf %4, %4 : vector<512x128xf32>
    %cst_6 = arith.constant dense<0.000000e+00> : vector<128xf32>
    %8 = vector.multi_reduction <add>, %7, %cst_6 [0] : vector<512x128xf32> to vector<128xf32>
    %9 = vector.shape_cast %8 : vector<128xf32> to vector<1x128xf32>
    %cst_7 = arith.constant 0.001953125 : f32
    %10 = vector.broadcast %cst_7 : f32 to vector<1x128xf32>
    %11 = arith.mulf %6, %10 : vector<1x128xf32>
    %cst_8 = arith.constant 0.001953125 : f32
    %12 = vector.broadcast %cst_8 : f32 to vector<1x128xf32>
    %13 = arith.mulf %9, %12 : vector<1x128xf32>
    %14 = arith.mulf %11, %11 : vector<1x128xf32>
    %15 = arith.subf %13, %14 : vector<1x128xf32>
    %cst_9 = arith.constant 0.000000e+00 : f32
    %16 = vector.broadcast %cst_9 : f32 to vector<1x128xf32>
    %17 = arith.maximumf %15, %16 : vector<1x128xf32>
    %cst_10 = arith.constant 9.99999974E-6 : f32
    %18 = vector.broadcast %cst_10 : f32 to vector<1x128xf32>
    %19 = arith.addf %17, %18 : vector<1x128xf32>
    %20 = math.rsqrt %19 : vector<1x128xf32>
    %21 = vector.broadcast %11 : vector<1x128xf32> to vector<512x128xf32>
    %22 = arith.subf %4, %21 : vector<512x128xf32>
    %23 = vector.broadcast %20 : vector<1x128xf32> to vector<512x128xf32>
    %24 = arith.mulf %22, %23 : vector<512x128xf32>
    %cst_11 = arith.constant 0.000000e+00 : f32
    %cst_12 = arith.constant 6.000000e+00 : f32
    %25 = vector.broadcast %cst_11 : f32 to vector<512x128xf32>
    %26 = arith.maximumf %25, %24 : vector<512x128xf32>
    %27 = vector.broadcast %cst_12 : f32 to vector<512x128xf32>
    %28 = arith.minimumf %27, %26 : vector<512x128xf32>
    %29 = vector.shape_cast %28 : vector<512x128xf32> to vector<2x16x16x128xf32>
    %cst_13 = arith.constant 0.000000e+00 : f32
    %30 = vector.broadcast %cst_13 : f32 to vector<2x1x16x128xf32>
    %c0_14 = arith.constant 0 : index
    %c0_15 = arith.constant 0 : index
    %c0_16 = arith.constant 0 : index
    %c0_17 = arith.constant 0 : index
    %31 = vector.load %arg5[%c0_14, %c0_15, %c0_16, %c0_17] : memref<2x18x16x128xf32, #tpu.memory_space<vmem>>, vector<2x1x16x128xf32>
    tpu.vector_store %arg5[%c0_14, %c0_15, %c0_16, %c0_17], %30 {strides = array<i32>} : memref<2x18x16x128xf32, #tpu.memory_space<vmem>>, vector<2x1x16x128xf32>,
    %cst_18 = arith.constant 0.000000e+00 : f32
    %32 = vector.broadcast %cst_18 : f32 to vector<2x1x16x128xf32>
    %c0_19 = arith.constant 0 : index
    %c17 = arith.constant 17 : index
    %c0_20 = arith.constant 0 : index
    %c0_21 = arith.constant 0 : index
    %33 = vector.load %arg5[%c0_19, %c17, %c0_20, %c0_21] : memref<2x18x16x128xf32, #tpu.memory_space<vmem>>, vector<2x1x16x128xf32>
    tpu.vector_store %arg5[%c0_19, %c17, %c0_20, %c0_21], %32 {strides = array<i32>} : memref<2x18x16x128xf32, #tpu.memory_space<vmem>>, vector<2x1x16x128xf32>,
    %c0_22 = arith.constant 0 : index
    %c1 = arith.constant 1 : index
    %c0_23 = arith.constant 0 : index
    %c0_24 = arith.constant 0 : index
    %34 = vector.load %arg5[%c0_22, %c1, %c0_23, %c0_24] : memref<2x18x16x128xf32, #tpu.memory_space<vmem>>, vector<2x16x16x128xf32>
    tpu.vector_store %arg5[%c0_22, %c1, %c0_23, %c0_24], %29 {strides = array<i32>} : memref<2x18x16x128xf32, #tpu.memory_space<vmem>>, vector<2x16x16x128xf32>,
    %c0_25 = arith.constant 0 : index
    %c0_26 = arith.constant 0 : index
    %35 = vector.load %arg2[%c0_25, %c0_26] : memref<9x128xf32, #tpu.memory_space<vmem>>, vector<9x128xf32>
    %36 = tpu.iota {dimensions = array<i32: 0>} : vector<16x128xi32>
    %37 = vector.shape_cast %36 : vector<16x128xi32> to vector<1x1x16x128xi32>
    %c0_27 = arith.constant 0 : index
    %c0_28 = arith.constant 0 : index
    %c0_29 = arith.constant 0 : index
    %c0_30 = arith.constant 0 : index
    %38 = vector.load %arg5[%c0_27, %c0_28, %c0_29, %c0_30] : memref<2x18x16x128xf32, #tpu.memory_space<vmem>>, vector<2x16x16x128xf32>
    %c0_i32 = arith.constant 0 : i32
    %39 = vector.broadcast %c0_i32 : i32 to vector<1x1x16x128xi32>
    %40 = arith.cmpi sgt, %37, %39 : vector<1x1x16x128xi32>
    %c1_i32 = arith.constant 1 : i32
    %41 = tpu.dynamic_rotate %38 by %c1_i32 dim 2 : vector<2x16x16x128xf32>, i32 -> vector<2x16x16x128xf32>
    %cst_31 = arith.constant 0.000000e+00 : f32
    %42 = vector.shape_cast %40 : vector<1x1x16x128xi1> to vector<1x1x16x128xi1>
    %43 = vector.broadcast %42 : vector<1x1x16x128xi1> to vector<2x16x16x128xi1>
    %44 = vector.broadcast %cst_31 : f32 to vector<2x16x16x128xf32>
    %45 = arith.select %43, %41, %44 : vector<2x16x16x128xi1>, vector<2x16x16x128xf32>
    %c15_i32 = arith.constant 15 : i32
    %46 = vector.broadcast %c15_i32 : i32 to vector<1x1x16x128xi32>
    %47 = arith.cmpi slt, %37, %46 : vector<1x1x16x128xi32>
    %c15_i32_32 = arith.constant 15 : i32
    %48 = tpu.dynamic_rotate %38 by %c15_i32_32 dim 2 : vector<2x16x16x128xf32>, i32 -> vector<2x16x16x128xf32>
    %cst_33 = arith.constant 0.000000e+00 : f32
    %49 = vector.shape_cast %47 : vector<1x1x16x128xi1> to vector<1x1x16x128xi1>
    %50 = vector.broadcast %49 : vector<1x1x16x128xi1> to vector<2x16x16x128xi1>
    %51 = vector.broadcast %cst_33 : f32 to vector<2x16x16x128xf32>
    %52 = arith.select %50, %48, %51 : vector<2x16x16x128xi1>, vector<2x16x16x128xf32>
    %53 = vector.extract_strided_slice %35 {offsets = [0, 0], sizes = [1, 128], strides = [1, 1]} : vector<9x128xf32> to vector<1x128xf32>
    %54 = vector.shape_cast %53 : vector<1x128xf32> to vector<1x1x1x128xf32>
    %55 = vector.broadcast %54 : vector<1x1x1x128xf32> to vector<2x16x16x128xf32>
    %56 = arith.mulf %45, %55 : vector<2x16x16x128xf32>
    %57 = vector.extract_strided_slice %35 {offsets = [1, 0], sizes = [1, 128], strides = [1, 1]} : vector<9x128xf32> to vector<1x128xf32>
    %58 = vector.shape_cast %57 : vector<1x128xf32> to vector<1x1x1x128xf32>
    %59 = vector.broadcast %58 : vector<1x1x1x128xf32> to vector<2x16x16x128xf32>
    %60 = arith.mulf %38, %59 : vector<2x16x16x128xf32>
    %61 = arith.addf %56, %60 : vector<2x16x16x128xf32>
    %62 = vector.extract_strided_slice %35 {offsets = [2, 0], sizes = [1, 128], strides = [1, 1]} : vector<9x128xf32> to vector<1x128xf32>
    %63 = vector.shape_cast %62 : vector<1x128xf32> to vector<1x1x1x128xf32>
    %64 = vector.broadcast %63 : vector<1x1x1x128xf32> to vector<2x16x16x128xf32>
    %65 = arith.mulf %52, %64 : vector<2x16x16x128xf32>
    %66 = arith.addf %61, %65 : vector<2x16x16x128xf32>
    %c0_34 = arith.constant 0 : index
    %c1_35 = arith.constant 1 : index
    %c0_36 = arith.constant 0 : index
    %c0_37 = arith.constant 0 : index
    %67 = vector.load %arg5[%c0_34, %c1_35, %c0_36, %c0_37] : memref<2x18x16x128xf32, #tpu.memory_space<vmem>>, vector<2x16x16x128xf32>
    %c0_i32_38 = arith.constant 0 : i32
    %68 = vector.broadcast %c0_i32_38 : i32 to vector<1x1x16x128xi32>
    %69 = arith.cmpi sgt, %37, %68 : vector<1x1x16x128xi32>
    %c1_i32_39 = arith.constant 1 : i32
    %70 = tpu.dynamic_rotate %67 by %c1_i32_39 dim 2 : vector<2x16x16x128xf32>, i32 -> vector<2x16x16x128xf32>
    %cst_40 = arith.constant 0.000000e+00 : f32
    %71 = vector.shape_cast %69 : vector<1x1x16x128xi1> to vector<1x1x16x128xi1>
    %72 = vector.broadcast %71 : vector<1x1x16x128xi1> to vector<2x16x16x128xi1>
    %73 = vector.broadcast %cst_40 : f32 to vector<2x16x16x128xf32>
    %74 = arith.select %72, %70, %73 : vector<2x16x16x128xi1>, vector<2x16x16x128xf32>
    %c15_i32_41 = arith.constant 15 : i32
    %75 = vector.broadcast %c15_i32_41 : i32 to vector<1x1x16x128xi32>
    %76 = arith.cmpi slt, %37, %75 : vector<1x1x16x128xi32>
    %c15_i32_42 = arith.constant 15 : i32
    %77 = tpu.dynamic_rotate %67 by %c15_i32_42 dim 2 : vector<2x16x16x128xf32>, i32 -> vector<2x16x16x128xf32>
    %cst_43 = arith.constant 0.000000e+00 : f32
    %78 = vector.shape_cast %76 : vector<1x1x16x128xi1> to vector<1x1x16x128xi1>
    %79 = vector.broadcast %78 : vector<1x1x16x128xi1> to vector<2x16x16x128xi1>
    %80 = vector.broadcast %cst_43 : f32 to vector<2x16x16x128xf32>
    %81 = arith.select %79, %77, %80 : vector<2x16x16x128xi1>, vector<2x16x16x128xf32>
    %82 = vector.extract_strided_slice %35 {offsets = [3, 0], sizes = [1, 128], strides = [1, 1]} : vector<9x128xf32> to vector<1x128xf32>
    %83 = vector.shape_cast %82 : vector<1x128xf32> to vector<1x1x1x128xf32>
    %84 = vector.broadcast %83 : vector<1x1x1x128xf32> to vector<2x16x16x128xf32>
    %85 = arith.mulf %74, %84 : vector<2x16x16x128xf32>
    %86 = vector.extract_strided_slice %35 {offsets = [4, 0], sizes = [1, 128], strides = [1, 1]} : vector<9x128xf32> to vector<1x128xf32>
    %87 = vector.shape_cast %86 : vector<1x128xf32> to vector<1x1x1x128xf32>
    %88 = vector.broadcast %87 : vector<1x1x1x128xf32> to vector<2x16x16x128xf32>
    %89 = arith.mulf %67, %88 : vector<2x16x16x128xf32>
    %90 = arith.addf %85, %89 : vector<2x16x16x128xf32>
    %91 = vector.extract_strided_slice %35 {offsets = [5, 0], sizes = [1, 128], strides = [1, 1]} : vector<9x128xf32> to vector<1x128xf32>
    %92 = vector.shape_cast %91 : vector<1x128xf32> to vector<1x1x1x128xf32>
    %93 = vector.broadcast %92 : vector<1x1x1x128xf32> to vector<2x16x16x128xf32>
    %94 = arith.mulf %81, %93 : vector<2x16x16x128xf32>
    %95 = arith.addf %90, %94 : vector<2x16x16x128xf32>
    %96 = arith.addf %66, %95 : vector<2x16x16x128xf32>
    %c0_44 = arith.constant 0 : index
    %c2 = arith.constant 2 : index
    %c0_45 = arith.constant 0 : index
    %c0_46 = arith.constant 0 : index
    %97 = vector.load %arg5[%c0_44, %c2, %c0_45, %c0_46] : memref<2x18x16x128xf32, #tpu.memory_space<vmem>>, vector<2x16x16x128xf32>
    %c0_i32_47 = arith.constant 0 : i32
    %98 = vector.broadcast %c0_i32_47 : i32 to vector<1x1x16x128xi32>
    %99 = arith.cmpi sgt, %37, %98 : vector<1x1x16x128xi32>
    %c1_i32_48 = arith.constant 1 : i32
    %100 = tpu.dynamic_rotate %97 by %c1_i32_48 dim 2 : vector<2x16x16x128xf32>, i32 -> vector<2x16x16x128xf32>
    %cst_49 = arith.constant 0.000000e+00 : f32
    %101 = vector.shape_cast %99 : vector<1x1x16x128xi1> to vector<1x1x16x128xi1>
    %102 = vector.broadcast %101 : vector<1x1x16x128xi1> to vector<2x16x16x128xi1>
    %103 = vector.broadcast %cst_49 : f32 to vector<2x16x16x128xf32>
    %104 = arith.select %102, %100, %103 : vector<2x16x16x128xi1>, vector<2x16x16x128xf32>
    %c15_i32_50 = arith.constant 15 : i32
    %105 = vector.broadcast %c15_i32_50 : i32 to vector<1x1x16x128xi32>
    %106 = arith.cmpi slt, %37, %105 : vector<1x1x16x128xi32>
    %c15_i32_51 = arith.constant 15 : i32
    %107 = tpu.dynamic_rotate %97 by %c15_i32_51 dim 2 : vector<2x16x16x128xf32>, i32 -> vector<2x16x16x128xf32>
    %cst_52 = arith.constant 0.000000e+00 : f32
    %108 = vector.shape_cast %106 : vector<1x1x16x128xi1> to vector<1x1x16x128xi1>
    %109 = vector.broadcast %108 : vector<1x1x16x128xi1> to vector<2x16x16x128xi1>
    %110 = vector.broadcast %cst_52 : f32 to vector<2x16x16x128xf32>
    %111 = arith.select %109, %107, %110 : vector<2x16x16x128xi1>, vector<2x16x16x128xf32>
    %112 = vector.extract_strided_slice %35 {offsets = [6, 0], sizes = [1, 128], strides = [1, 1]} : vector<9x128xf32> to vector<1x128xf32>
    %113 = vector.shape_cast %112 : vector<1x128xf32> to vector<1x1x1x128xf32>
    %114 = vector.broadcast %113 : vector<1x1x1x128xf32> to vector<2x16x16x128xf32>
    %115 = arith.mulf %104, %114 : vector<2x16x16x128xf32>
    %116 = vector.extract_strided_slice %35 {offsets = [7, 0], sizes = [1, 128], strides = [1, 1]} : vector<9x128xf32> to vector<1x128xf32>
    %117 = vector.shape_cast %116 : vector<1x128xf32> to vector<1x1x1x128xf32>
    %118 = vector.broadcast %117 : vector<1x1x1x128xf32> to vector<2x16x16x128xf32>
    %119 = arith.mulf %97, %118 : vector<2x16x16x128xf32>
    %120 = arith.addf %115, %119 : vector<2x16x16x128xf32>
    %121 = vector.extract_strided_slice %35 {offsets = [8, 0], sizes = [1, 128], strides = [1, 1]} : vector<9x128xf32> to vector<1x128xf32>
    %122 = vector.shape_cast %121 : vector<1x128xf32> to vector<1x1x1x128xf32>
    %123 = vector.broadcast %122 : vector<1x1x1x128xf32> to vector<2x16x16x128xf32>
    %124 = arith.mulf %111, %123 : vector<2x16x16x128xf32>
    %125 = arith.addf %120, %124 : vector<2x16x16x128xf32>
    %126 = arith.addf %96, %125 : vector<2x16x16x128xf32>
    %127 = vector.shape_cast %126 : vector<2x16x16x128xf32> to vector<512x128xf32>
    %cst_53 = arith.constant dense<0.000000e+00> : vector<128xf32>
    %128 = vector.multi_reduction <add>, %127, %cst_53 [0] : vector<512x128xf32> to vector<128xf32>
    %129 = vector.shape_cast %128 : vector<128xf32> to vector<1x128xf32>
    %130 = arith.mulf %127, %127 : vector<512x128xf32>
    %cst_54 = arith.constant dense<0.000000e+00> : vector<128xf32>
    %131 = vector.multi_reduction <add>, %130, %cst_54 [0] : vector<512x128xf32> to vector<128xf32>
    %132 = vector.shape_cast %131 : vector<128xf32> to vector<1x128xf32>
    %cst_55 = arith.constant 0.001953125 : f32
    %133 = vector.broadcast %cst_55 : f32 to vector<1x128xf32>
    %134 = arith.mulf %129, %133 : vector<1x128xf32>
    %cst_56 = arith.constant 0.001953125 : f32
    %135 = vector.broadcast %cst_56 : f32 to vector<1x128xf32>
    %136 = arith.mulf %132, %135 : vector<1x128xf32>
    %137 = arith.mulf %134, %134 : vector<1x128xf32>
    %138 = arith.subf %136, %137 : vector<1x128xf32>
    %cst_57 = arith.constant 0.000000e+00 : f32
    %139 = vector.broadcast %cst_57 : f32 to vector<1x128xf32>
    %140 = arith.maximumf %138, %139 : vector<1x128xf32>
    %cst_58 = arith.constant 9.99999974E-6 : f32
    %141 = vector.broadcast %cst_58 : f32 to vector<1x128xf32>
    %142 = arith.addf %140, %141 : vector<1x128xf32>
    %143 = math.rsqrt %142 : vector<1x128xf32>
    %144 = vector.broadcast %134 : vector<1x128xf32> to vector<512x128xf32>
    %145 = arith.subf %127, %144 : vector<512x128xf32>
    %146 = vector.broadcast %143 : vector<1x128xf32> to vector<512x128xf32>
    %147 = arith.mulf %145, %146 : vector<512x128xf32>
    %cst_59 = arith.constant 0.000000e+00 : f32
    %cst_60 = arith.constant 6.000000e+00 : f32
    %148 = vector.broadcast %cst_59 : f32 to vector<512x128xf32>
    %149 = arith.maximumf %148, %147 : vector<512x128xf32>
    %150 = vector.broadcast %cst_60 : f32 to vector<512x128xf32>
    %151 = arith.minimumf %150, %149 : vector<512x128xf32>
    %152 = arith.truncf %151 : vector<512x128xf32> to vector<512x128xbf16>
    %c0_61 = arith.constant 0 : index
    %c0_62 = arith.constant 0 : index
    %153 = vector.load %arg3[%c0_61, %c0_62] : memref<128x8xbf16, #tpu.memory_space<vmem>>, vector<128x8xbf16>
    %cst_63 = arith.constant dense<0.000000e+00> : vector<512x8xf32>
    %154 = tpu.matmul %152, %153, %cst_63 {dimension_numbers = #tpu.dot_dimension_numbers<[1], [0], [0], [1], [0, 0, 1, 1], [], []>} : vector<512x128xbf16>, vector<128x8xbf16>, vector<512x8xf32> -> vector<512x8xf32>
    %cst_64 = arith.constant dense<0.000000e+00> : vector<8xf32>
    %155 = vector.multi_reduction <add>, %154, %cst_64 [0] : vector<512x8xf32> to vector<8xf32>
    %156 = vector.shape_cast %155 : vector<8xf32> to vector<1x8xf32>
    %157 = arith.mulf %154, %154 : vector<512x8xf32>
    %cst_65 = arith.constant dense<0.000000e+00> : vector<8xf32>
    %158 = vector.multi_reduction <add>, %157, %cst_65 [0] : vector<512x8xf32> to vector<8xf32>
    %159 = vector.shape_cast %158 : vector<8xf32> to vector<1x8xf32>
    %cst_66 = arith.constant 0.001953125 : f32
    %160 = vector.broadcast %cst_66 : f32 to vector<1x8xf32>
    %161 = arith.mulf %156, %160 : vector<1x8xf32>
    %cst_67 = arith.constant 0.001953125 : f32
    %162 = vector.broadcast %cst_67 : f32 to vector<1x8xf32>
    %163 = arith.mulf %159, %162 : vector<1x8xf32>
    %164 = arith.mulf %161, %161 : vector<1x8xf32>
    %165 = arith.subf %163, %164 : vector<1x8xf32>
    %cst_68 = arith.constant 0.000000e+00 : f32
    %166 = vector.broadcast %cst_68 : f32 to vector<1x8xf32>
    %167 = arith.maximumf %165, %166 : vector<1x8xf32>
    %cst_69 = arith.constant 9.99999974E-6 : f32
    %168 = vector.broadcast %cst_69 : f32 to vector<1x8xf32>
    %169 = arith.addf %167, %168 : vector<1x8xf32>
    %170 = math.rsqrt %169 : vector<1x8xf32>
    %c0_70 = arith.constant 0 : index
    %c0_71 = arith.constant 0 : index
    %c0_72 = arith.constant 0 : index
    %c0_73 = arith.constant 0 : index
    %171 = vector.load %arg0[%c0_70, %c0_71, %c0_72, %c0_73] : memref<2x16x16x8xf32, #tpu.memory_space<vmem>>, vector<2x16x16x8xf32>
    %172 = vector.broadcast %161 : vector<1x8xf32> to vector<512x8xf32>
    %173 = arith.subf %154, %172 : vector<512x8xf32>
    %174 = vector.broadcast %170 : vector<1x8xf32> to vector<512x8xf32>
    %175 = arith.mulf %173, %174 : vector<512x8xf32>
    %176 = vector.shape_cast %175 : vector<512x8xf32> to vector<2x16x16x8xf32>
    %177 = arith.addf %171, %176 : vector<2x16x16x8xf32>
    %c0_74 = arith.constant 0 : index
    %c0_75 = arith.constant 0 : index
    %c0_76 = arith.constant 0 : index
    %c0_77 = arith.constant 0 : index
    %178 = vector.load %arg4[%c0_74, %c0_75, %c0_76, %c0_77] : memref<2x16x16x8xf32, #tpu.memory_space<vmem>>, vector<2x16x16x8xf32>
    tpu.vector_store %arg4[%c0_74, %c0_75, %c0_76, %c0_77], %177 {strides = array<i32>} : memref<2x16x16x8xf32, #tpu.memory_space<vmem>>, vector<2x16x16x8xf32>,
    return
  }
}

</mosaic_0001>

<bundles_post_ra>
// kernel: tpu_custom_call.1
= control target key start
LH: loop header
LB: loop body
LE: loop exit
PB: predicated region body
PF: predicated region fallthrough
CT: control target
= control target key end

     0   :  { %vm212_vm0 = vcmask 1043456   ;;  %vm115_vm1 = vcmask 64512   ;;  %s12144_s1 = inlined_call_operand.vmem [shape: bf16[8,128], index: 1, kind: input, shape index: {}]   ;;  %s12145_s0 = inlined_call_operand.vmem [shape: f32[2,16,16,8], index: 0, kind: input, shape index: {}]   ;;  %s12146_s3 = inlined_call_operand.vmem [shape: bf16[128,8], index: 3, kind: input, shape index: {}]   ;;  %s12147_s2 = inlined_call_operand.vmem [shape: f32[9,128], index: 2, kind: input, shape index: {}]   ;;  %s12148_s4 = inlined_call_operand.vmem [shape: f32[2,16,16,8], index: 4, kind: output, shape index: {}]  }
   0x1   :  { %v114_v0 = vld [vmem:[%s12144_s1] sm:$0xf]  ;;  %v19_v2 = vld [vmem:[%s12145_s0 + $0x8] sm:$0xff]  ;;  %v20_v5 = vld [vmem:[%s12145_s0 + $0x10] sm:$0xff] }
   0x2   :  { %v18_v1 = vld [vmem:[%s12145_s0] sm:$0xff]  ;;  %5319 = vmatprep.subr.msk.bf16.mxu0 %vm212_vm0, %v114_v0  ;;  %v214_v3 = vsel %vm212_vm0, %v114_v0, 0  ;;  %v21_v6 = vld [vmem:[%s12145_s0 + $0x18] sm:$0xff]  ;;  %v23_v9 = vld [vmem:[%s12145_s0 + $0x28] sm:$0xff] }
   0x3   :  { %v82_v4 = vpack.c.bf16 %v19_v2, %v18_v1  ;;  %v22_v7 = vld [vmem:[%s12145_s0 + $0x20] sm:$0xff]  ;;  %5158 = vmatpush3.bf16.msra.mxu0 %v214_v3  ;;  %v83_v8 = vpack.c.bf16 %v21_v6, %v20_v5  ;;  %v24_v11 = vld [vmem:[%s12145_s0 + $0x30] sm:$0xff]  ;;  %v25_v12 = vld [vmem:[%s12145_s0 + $0x38] sm:$0xff] }
   0x4   :  { %v84_v10 = vpack.c.bf16 %v23_v9, %v22_v7  ;;  %v26_v13 = vld [vmem:[%s12145_s0 + $0x40] sm:$0xff]  ;;  %v27_v14 = vld [vmem:[%s12145_s0 + $0x48] sm:$0xff]  ;;  %v85_v15 = vpack.c.bf16 %v25_v12, %v24_v11  ;;  %v28_v17 = vld [vmem:[%s12145_s0 + $0x50] sm:$0xff] }
   0x5   :  { %5159 = vmatprep.mubr.msk.bf16.mxu0 %vm115_vm1, %v82_v4  ;;  %v86_v16 = vpack.c.bf16 %v27_v14, %v26_v13  ;;  %v29_v18 = vld [vmem:[%s12145_s0 + $0x58] sm:$0xff]  ;;  %v30_v19 = vld [vmem:[%s12145_s0 + $0x60] sm:$0xff]  ;;  %v31_v20 = vld [vmem:[%s12145_s0 + $0x68] sm:$0xff] }
   0x6   :  { %5160 = vmatmul.mubr.msk.bf16.vlgmr.msra.gmra.mxu0 %vm115_vm1, %v83_v8  ;;  %v87_v21 = vpack.c.bf16 %v29_v18, %v28_v17  ;;  %v88_v22 = vpack.c.bf16 %v31_v20, %v30_v19  ;;  %v32_v23 = vld [vmem:[%s12145_s0 + $0x70] sm:$0xff]  ;;  %v33_v24 = vld [vmem:[%s12145_s0 + $0x78] sm:$0xff]  ;;  %v34_v25 = vld [vmem:[%s12145_s0 + $0x80] sm:$0xff] }
   0x7   :  { %5163 = vmatprep.mubr.msk.bf16.mxu0 %vm115_vm1, %v84_v10  ;;  %v35_v26 = vld [vmem:[%s12145_s0 + $0x88] sm:$0xff]  ;;  %v89_v27 = vpack.c.bf16 %v33_v24, %v32_v23  ;;  %v36_v29 = vld [vmem:[%s12145_s0 + $0x90] sm:$0xff]  ;;  %v37_v30 = vld [vmem:[%s12145_s0 + $0x98] sm:$0xff] }
   0x8   :  { %v90_v28 = vpack.c.bf16 %v35_v26, %v34_v25  ;;  %v38_v31 = vld [vmem:[%s12145_s0 + $0xa0] sm:$0xff]  ;;  %v39_v32 = vld [vmem:[%s12145_s0 + $0xa8] sm:$0xff]  ;;  %v91_v33 = vpack.c.bf16 %v37_v30, %v36_v29  ;;  %v40_v35 = vld [vmem:[%s12145_s0 + $0xb0] sm:$0xff] }
   0x9   :  { %v92_v34 = vpack.c.bf16 %v39_v32, %v38_v31  ;;  %v41_v36 = vld [vmem:[%s12145_s0 + $0xb8] sm:$0xff]  ;;  %v42_v37 = vld [vmem:[%s12145_s0 + $0xc0] sm:$0xff]  ;;  %v43_v38 = vld [vmem:[%s12145_s0 + $0xc8] sm:$0xff] }
   0xa   :  { %v93_v39 = vpack.c.bf16 %v41_v36, %v40_v35  ;;  %v94_v40 = vpack.c.bf16 %v43_v38, %v42_v37  ;;  %v44_v41 = vld [vmem:[%s12145_s0 + $0xd0] sm:$0xff]  ;;  %v45_v42 = vld [vmem:[%s12145_s0 + $0xd8] sm:$0xff]  ;;  %v46_v43 = vld [vmem:[%s12145_s0 + $0xe0] sm:$0xff] }
   0xb   :  { %v47_v44 = vld [vmem:[%s12145_s0 + $0xe8] sm:$0xff]  ;;  %v95_v45 = vpack.c.bf16 %v45_v42, %v44_v41  ;;  %v48_v47 = vld [vmem:[%s12145_s0 + $0xf0] sm:$0xff]  ;;  %v49_v48 = vld [vmem:[%s12145_s0 + $0xf8] sm:$0xff] }
   0xc   :  { %v96_v46 = vpack.c.bf16 %v47_v44, %v46_v43  ;;  %v50_v49 = vld [vmem:[%s12145_s0 + $0x100] sm:$0xff]  ;;  %v51_v50 = vld [vmem:[%s12145_s0 + $0x108] sm:$0xff]  ;;  %v97_v51 = vpack.c.bf16 %v49_v48, %v48_v47  ;;  %v52_v53 = vld [vmem:[%s12145_s0 + $0x110] sm:$0xff] }
   0xd   :  { %v98_v52 = vpack.c.bf16 %v51_v50, %v50_v49  ;;  %v53_v54 = vld [vmem:[%s12145_s0 + $0x118] sm:$0xff]  ;;  %v54_v55 = vld [vmem:[%s12145_s0 + $0x120] sm:$0xff]  ;;  %v55_v56 = vld [vmem:[%s12145_s0 + $0x128] sm:$0xff] }
   0xe   :  { %5164 = vmatmul.mubr.msk.bf16.gmra.mxu0 %vm115_vm1, %v85_v15  ;;  %v99_v57 = vpack.c.bf16 %v53_v54, %v52_v53  ;;  %v100_v58 = vpack.c.bf16 %v55_v56, %v54_v55  ;;  %v56_v59 = vld [vmem:[%s12145_s0 + $0x130] sm:$0xff]  ;;  %v57_v60 = vld [vmem:[%s12145_s0 + $0x138] sm:$0xff]  ;;  %v58_v61 = vld [vmem:[%s12145_s0 + $0x140] sm:$0xff] }
   0xf   :  { %5167 = vmatprep.mubr.msk.bf16.mxu0 %vm115_vm1, %v86_v16  ;;  %v59_v62 = vld [vmem:[%s12145_s0 + $0x148] sm:$0xff]  ;;  %v101_v63 = vpack.c.bf16 %v57_v60, %v56_v59  ;;  %v60_v1 = vld [vmem:[%s12145_s0 + $0x150] sm:$0xff]  ;;  %v61_v2 = vld [vmem:[%s12145_s0 + $0x158] sm:$0xff] }
  0x10   :  { %v102_v0 = vpack.c.bf16 %v59_v62, %v58_v61  ;;  %v62_v3 = vld [vmem:[%s12145_s0 + $0x160] sm:$0xff]  ;;  %v63_v4 = vld [vmem:[%s12145_s0 + $0x168] sm:$0xff]  ;;  %v103_v5 = vpack.c.bf16 %v61_v2, %v60_v1  ;;  %v64_v7 = vld [vmem:[%s12145_s0 + $0x170] sm:$0xff] }
  0x11   :  { %v104_v6 = vpack.c.bf16 %v63_v4, %v62_v3  ;;  %v65_v8 = vld [vmem:[%s12145_s0 + $0x178] sm:$0xff]  ;;  %v66_v9 = vld [vmem:[%s12145_s0 + $0x180] sm:$0xff]  ;;  %v67_v10 = vld [vmem:[%s12145_s0 + $0x188] sm:$0xff] }
  0x12   :  { %v105_v11 = vpack.c.bf16 %v65_v8, %v64_v7  ;;  %v106_v12 = vpack.c.bf16 %v67_v10, %v66_v9  ;;  %v68_v13 = vld [vmem:[%s12145_s0 + $0x190] sm:$0xff]  ;;  %v69_v14 = vld [vmem:[%s12145_s0 + $0x198] sm:$0xff]  ;;  %v70_v15 = vld [vmem:[%s12145_s0 + $0x1a0] sm:$0xff] }
  0x13   :  { %v71_v16 = vld [vmem:[%s12145_s0 + $0x1a8] sm:$0xff]  ;;  %v107_v17 = vpack.c.bf16 %v69_v14, %v68_v13  ;;  %v72_v19 = vld [vmem:[%s12145_s0 + $0x1b0] sm:$0xff]  ;;  %v73_v20 = vld [vmem:[%s12145_s0 + $0x1b8] sm:$0xff] }
  0x14   :  { %v108_v18 = vpack.c.bf16 %v71_v16, %v70_v15  ;;  %v109_v23 = vpack.c.bf16 %v73_v20, %v72_v19  ;;  %v76_v25 = vld [vmem:[%s12145_s0 + $0x1d0] sm:$0xff]  ;;  %v77_v26 = vld [vmem:[%s12145_s0 + $0x1d8] sm:$0xff] }
  0x15   :  { %v111_v29 = vpack.c.bf16 %v77_v26, %v76_v25  ;;  %v80_v31 = vld [vmem:[%s12145_s0 + $0x1f0] sm:$0xff]  ;;  %v81_v32 = vld [vmem:[%s12145_s0 + $0x1f8] sm:$0xff] }
  0x16   :  { %5168 = vmatmul.mubr.msk.bf16.gmra.mxu0 %vm115_vm1, %v87_v21  ;;  %v74_v21 = vld [vmem:[%s12145_s0 + $0x1c0] sm:$0xff] }
  0x17   :  { %5171 = vmatprep.mubr.msk.bf16.mxu0 %vm115_vm1, %v88_v22  ;;  %v75_v22 = vld [vmem:[%s12145_s0 + $0x1c8] sm:$0xff] }
  0x18   :  { %v110_v24 = vpack.c.bf16 %v75_v22, %v74_v21 }
  0x1e   :  { %5172 = vmatmul.mubr.msk.bf16.gmra.mxu0 %vm115_vm1, %v89_v27  ;;  %v78_v27 = vld [vmem:[%s12145_s0 + $0x1e0] sm:$0xff] }
  0x1f   :  { %5175 = vmatprep.mubr.msk.bf16.mxu0 %vm115_vm1, %v90_v28  ;;  %v79_v28 = vld [vmem:[%s12145_s0 + $0x1e8] sm:$0xff] }
  0x20   :  { %v112_v30 = vpack.c.bf16 %v79_v28, %v78_v27 }
  0x26   :  { %5176 = vmatmul.mubr.msk.bf16.gmra.mxu0 %vm115_vm1, %v91_v33  ;;  %v113_v33 = vpack.c.bf16 %v81_v32, %v80_v31 }
  0x27   :  { %5179 = vmatprep.mubr.msk.bf16.mxu0 %vm115_vm1, %v92_v34 }
  0x2e   :  { %5180 = vmatmul.mubr.msk.bf16.gmra.mxu0 %vm115_vm1, %v93_v39 }
  0x2f   :  { %5183 = vmatprep.mubr.msk.bf16.mxu0 %vm115_vm1, %v94_v40 }
  0x36   :  { %5184 = vmatmul.mubr.msk.bf16.gmra.mxu0 %vm115_vm1, %v95_v45 }
  0x37   :  { %5187 = vmatprep.mubr.msk.bf16.mxu0 %vm115_vm1, %v96_v46 }
  0x3e   :  { %5188 = vmatmul.mubr.msk.bf16.gmra.mxu0 %vm115_vm1, %v97_v51 }
  0x3f   :  { %5191 = vmatprep.mubr.msk.bf16.mxu0 %vm115_vm1, %v98_v52 }
  0x46   :  { %5192 = vmatmul.mubr.msk.bf16.gmra.mxu0 %vm115_vm1, %v99_v57 }
  0x47   :  { %5195 = vmatprep.mubr.msk.bf16.mxu0 %vm115_vm1, %v100_v58 }
  0x4e   :  { %5196 = vmatmul.mubr.msk.bf16.gmra.mxu0 %vm115_vm1, %v101_v63 }
  0x4f   :  { %5199 = vmatprep.mubr.msk.bf16.mxu0 %vm115_vm1, %v102_v0 }
  0x56   :  { %5200 = vmatmul.mubr.msk.bf16.gmra.mxu0 %vm115_vm1, %v103_v5 }
  0x57   :  { %5203 = vmatprep.mubr.msk.bf16.mxu0 %vm115_vm1, %v104_v6 }
  0x5e   :  { %5204 = vmatmul.mubr.msk.bf16.gmra.mxu0 %vm115_vm1, %v105_v11 }
  0x5f   :  { %5207 = vmatprep.mubr.msk.bf16.mxu0 %vm115_vm1, %v106_v12 }
  0x66   :  { %5208 = vmatmul.mubr.msk.bf16.gmra.mxu0 %vm115_vm1, %v107_v17 }
  0x67   :  { %5211 = vmatprep.mubr.msk.bf16.mxu0 %vm115_vm1, %v108_v18 }
  0x6e   :  { %5212 = vmatmul.mubr.msk.bf16.gmra.mxu0 %vm115_vm1, %v109_v23 }
  0x6f   :  { %5215 = vmatprep.mubr.msk.bf16.mxu0 %vm115_vm1, %v110_v24 }
  0x76   :  { %5216 = vmatmul.mubr.msk.bf16.gmra.mxu0 %vm115_vm1, %v111_v29 }
  0x77   :  { %5219 = vmatprep.mubr.msk.bf16.mxu0 %vm115_vm1, %v112_v30 }
  0x7e   :  { %5220 = vmatmul.mubr.msk.bf16.gmra.mxu0 %vm115_vm1, %v113_v33 }
  0xc6   :  { %v5589_v34 = vpop.f32.mrf.mxu0 }
  0xc7   :  { %12652 = vst [vmem:[#allocation3_spill] sm:$0xff] %v5589_v34  ;;  %v576_v42 = vmul.f32 %v5589_v34, %v5589_v34 }
  0xc8   :  { %v5591_v35 = vpop.f32.mrf.mxu0 }
  0xc9   :  { %12653 = vst [vmem:[#allocation4_spill] sm:$0xff] %v5591_v35  ;;  %v574_v38 = vmul.f32 %v5591_v35, %v5591_v35 }
  0xca   :  { %v5593_v36 = vpop.f32.mrf.mxu0 }
  0xcb   :  { %12654 = vst [vmem:[#allocation5_spill] sm:$0xff] %v5593_v36  ;;  %v577_v46 = vmul.f32 %v5593_v36, %v5593_v36 }
  0xcc   :  { %v5595_v37 = vpop.f32.mrf.mxu0 }
  0xcd   :  { %12655 = vst [vmem:[#allocation6_spill] sm:$0xff] %v5595_v37  ;;  %v505_v39 = vadd.f32 %v5595_v37, %v5591_v35  ;;  %v575_v40 = vmul.f32 %v5595_v37, %v5595_v37 }
  0xce   :  { %v5603_v41 = vpop.f32.mrf.mxu0 }
  0xcf   :  { %12656 = vst [vmem:[#allocation7_spill] sm:$0xff] %v5603_v41  ;;  %v506_v43 = vadd.f32 %v5589_v34, %v505_v39  ;;  %v638_v44 = vadd.f32 %v575_v40, %v574_v38  ;;  %v580_v58 = vmul.f32 %v5603_v41, %v5603_v41 }
  0xd0   :  { %v5608_v45 = vpop.f32.mrf.mxu0 }
  0xd1   :  { %12657 = vst [vmem:[#allocation8_spill] sm:$0xff] %v5608_v45  ;;  %v639_v47 = vadd.f32 %v638_v44, %v576_v42  ;;  %v507_v48 = vadd.f32 %v5593_v36, %v506_v43  ;;  %v578_v51 = vmul.f32 %v5608_v45, %v5608_v45 }
  0xd2   :  { %v5613_v49 = vpop.f32.mrf.mxu0 }
  0xd3   :  { %12658 = vst [vmem:[#allocation9_spill] sm:$0xff] %v5613_v49  ;;  %v508_v50 = vadd.f32 %v507_v48, %v5608_v45  ;;  %v640_v52 = vadd.f32 %v639_v47, %v577_v46  ;;  %v581_v62 = vmul.f32 %v5613_v49, %v5613_v49 }
  0xd4   :  { %v5618_v53 = vpop.f32.mrf.mxu0 }
  0xd5   :  { %12659 = vst [vmem:[#allocation10_spill] sm:$0xff] %v5618_v53  ;;  %v641_v54 = vadd.f32 %v640_v52, %v578_v51  ;;  %v509_v55 = vadd.f32 %v508_v50, %v5618_v53  ;;  %v579_v56 = vmul.f32 %v5618_v53, %v5618_v53 }
  0xd6   :  { %v5623_v57 = vpop.f32.mrf.mxu0 }
  0xd7   :  { %12660 = vst [vmem:[#allocation11_spill] sm:$0xff] %v5623_v57  ;;  %v510_v59 = vadd.f32 %v5603_v41, %v509_v55  ;;  %v642_v60 = vadd.f32 %v641_v54, %v579_v56  ;;  %v584_v10 = vmul.f32 %v5623_v57, %v5623_v57 }
  0xd8   :  { %v5628_v61 = vpop.f32.mrf.mxu0 }
  0xd9   :  { %12661 = vst [vmem:[#allocation12_spill] sm:$0xff] %v5628_v61  ;;  %v643_v63 = vadd.f32 %v642_v60, %v580_v58  ;;  %v511_v0 = vadd.f32 %v5613_v49, %v510_v59  ;;  %v582_v3 = vmul.f32 %v5628_v61, %v5628_v61 }
  0xda   :  { %v5633_v1 = vpop.f32.mrf.mxu0 }
  0xdb   :  { %12662 = vst [vmem:[#allocation13_spill] sm:$0xff] %v5633_v1  ;;  %v512_v2 = vadd.f32 %v511_v0, %v5628_v61  ;;  %v644_v4 = vadd.f32 %v643_v63, %v581_v62  ;;  %v585_v14 = vmul.f32 %v5633_v1, %v5633_v1 }
  0xdc   :  { %v5638_v5 = vpop.f32.mrf.mxu0 }
  0xdd   :  { %12663 = vst [vmem:[#allocation14_spill] sm:$0xff] %v5638_v5  ;;  %v645_v6 = vadd.f32 %v644_v4, %v582_v3  ;;  %v513_v7 = vadd.f32 %v512_v2, %v5638_v5  ;;  %v583_v8 = vmul.f32 %v5638_v5, %v5638_v5 }
  0xde   :  { %v5643_v9 = vpop.f32.mrf.mxu0 }
  0xdf   :  { %12664 = vst [vmem:[#allocation15_spill] sm:$0xff] %v5643_v9  ;;  %v514_v11 = vadd.f32 %v5623_v57, %v513_v7  ;;  %v646_v12 = vadd.f32 %v645_v6, %v583_v8  ;;  %v588_v26 = vmul.f32 %v5643_v9, %v5643_v9 }
  0xe0   :  { %v5648_v13 = vpop.f32.mrf.mxu0 }
  0xe1   :  { %12665 = vst [vmem:[#allocation16_spill] sm:$0xff] %v5648_v13  ;;  %v647_v15 = vadd.f32 %v646_v12, %v584_v10  ;;  %v515_v16 = vadd.f32 %v5633_v1, %v514_v11  ;;  %v586_v19 = vmul.f32 %v5648_v13, %v5648_v13 }
  0xe2   :  { %v5653_v17 = vpop.f32.mrf.mxu0 }
  0xe3   :  { %12666 = vst [vmem:[#allocation17_spill] sm:$0xff] %v5653_v17  ;;  %v516_v18 = vadd.f32 %v515_v16, %v5648_v13  ;;  %v648_v20 = vadd.f32 %v647_v15, %v585_v14  ;;  %v589_v30 = vmul.f32 %v5653_v17, %v5653_v17 }
  0xe4   :  { %v5658_v21 = vpop.f32.mrf.mxu0 }
  0xe5   :  { %12667 = vst [vmem:[#allocation18_spill] sm:$0xff] %v5658_v21  ;;  %v649_v22 = vadd.f32 %v648_v20, %v586_v19  ;;  %v517_v23 = vadd.f32 %v516_v18, %v5658_v21  ;;  %v587_v24 = vmul.f32 %v5658_v21, %v5658_v21 }
  0xe6   :  { %v5663_v25 = vpop.f32.mrf.mxu0 }
  0xe7   :  { %12668 = vst [vmem:[#allocation19_spill] sm:$0xff] %v5663_v25  ;;  %v518_v27 = vadd.f32 %v5643_v9, %v517_v23  ;;  %v650_v28 = vadd.f32 %v649_v22, %v587_v24  ;;  %v592_v48 = vmul.f32 %v5663_v25, %v5663_v25 }
  0xe8   :  { %v5668_v29 = vpop.f32.mrf.mxu0 }
  0xe9   :  { %12669 = vst [vmem:[#allocation20_spill] sm:$0xff] %v5668_v29  ;;  %v651_v31 = vadd.f32 %v650_v28, %v588_v26  ;;  %v519_v32 = vadd.f32 %v5653_v17, %v518_v27  ;;  %v590_v39 = vmul.f32 %v5668_v29, %v5668_v29 }
  0xea   :  { %v5673_v33 = vpop.f32.mrf.mxu0 }
  0xeb   :  { %12670 = vst [vmem:[#allocation21_spill] sm:$0xff] %v5673_v33  ;;  %v520_v38 = vadd.f32 %v519_v32, %v5668_v29  ;;  %v652_v40 = vadd.f32 %v651_v31, %v589_v30  ;;  %v593_v54 = vmul.f32 %v5673_v33, %v5673_v33 }
  0xec   :  { %v5678_v42 = vpop.f32.mrf.mxu0 }
  0xed   :  { %12671 = vst [vmem:[#allocation22_spill] sm:$0xff] %v5678_v42  ;;  %v653_v43 = vadd.f32 %v652_v40, %v590_v39  ;;  %v521_v44 = vadd.f32 %v520_v38, %v5678_v42  ;;  %v591_v46 = vmul.f32 %v5678_v42, %v5678_v42 }
  0xee   :  { %v5683_v47 = vpop.f32.mrf.mxu0 }
  0xef   :  { %12672 = vst [vmem:[#allocation23_spill] sm:$0xff] %v5683_v47  ;;  %v522_v50 = vadd.f32 %v5663_v25, %v521_v44  ;;  %v654_v51 = vadd.f32 %v653_v43, %v591_v46  ;;  %v596_v6 = vmul.f32 %v5683_v47, %v5683_v47 }
  0xf0   :  { %v5688_v52 = vpop.f32.mrf.mxu0 }
  0xf1   :  { %12673 = vst [vmem:[#allocation24_spill] sm:$0xff] %v5688_v52  ;;  %v655_v55 = vadd.f32 %v654_v51, %v592_v48  ;;  %v523_v56 = vadd.f32 %v5673_v33, %v522_v50  ;;  %v594_v60 = vmul.f32 %v5688_v52, %v5688_v52 }
  0xf2   :  { %v5693_v58 = vpop.f32.mrf.mxu0 }
  0xf3   :  { %12674 = vst [vmem:[#allocation25_spill] sm:$0xff] %v5693_v58  ;;  %v524_v59 = vadd.f32 %v523_v56, %v5688_v52  ;;  %v656_v62 = vadd.f32 %v655_v55, %v593_v54  ;;  %v597_v11 = vmul.f32 %v5693_v58, %v5693_v58 }
  0xf4   :  { %v5698_v63 = vpop.f32.mrf.mxu0 }
  0xf5   :  { %12675 = vst [vmem:[#allocation26_spill] sm:$0xff] %v5698_v63  ;;  %v657_v0 = vadd.f32 %v656_v62, %v594_v60  ;;  %v525_v2 = vadd.f32 %v524_v59, %v5698_v63  ;;  %v595_v3 = vmul.f32 %v5698_v63, %v5698_v63 }
  0xf6   :  { %v5703_v4 = vpop.f32.mrf.mxu0 }
  0xf7   :  { %12676 = vst [vmem:[#allocation27_spill] sm:$0xff] %v5703_v4  ;;  %v526_v7 = vadd.f32 %v5683_v47, %v525_v2  ;;  %v658_v8 = vadd.f32 %v657_v0, %v595_v3  ;;  %v600_v27 = vmul.f32 %v5703_v4, %v5703_v4 }
  0xf8   :  { %v5708_v10 = vpop.f32.mrf.mxu0 }
  0xf9   :  { %12677 = vst [vmem:[#allocation28_spill] sm:$0xff] %v5708_v10  ;;  %v659_v12 = vadd.f32 %v658_v8, %v596_v6  ;;  %v527_v14 = vadd.f32 %v5693_v58, %v526_v7  ;;  %v598_v18 = vmul.f32 %v5708_v10, %v5708_v10 }
  0xfa   :  { %v5713_v15 = vpop.f32.mrf.mxu0 }
  0xfb   :  { %12678 = vst [vmem:[#allocation29_spill] sm:$0xff] %v5713_v15  ;;  %v528_v16 = vadd.f32 %v527_v14, %v5708_v10  ;;  %v660_v19 = vadd.f32 %v659_v12, %v597_v11  ;;  %v601_v32 = vmul.f32 %v5713_v15, %v5713_v15 }
  0xfc   :  { %v5718_v20 = vpop.f32.mrf.mxu0 }
  0xfd   :  { %12679 = vst [vmem:[#allocation30_spill] sm:$0xff] %v5718_v20  ;;  %v661_v22 = vadd.f32 %v660_v19, %v598_v18  ;;  %v529_v23 = vadd.f32 %v528_v16, %v5718_v20  ;;  %v599_v24 = vmul.f32 %v5718_v20, %v5718_v20 }
  0xfe   :  { %v5723_v26 = vpop.f32.mrf.mxu0 }
  0xff   :  { %v530_v28 = vadd.f32 %v5703_v4, %v529_v23  ;;  %v662_v30 = vadd.f32 %v661_v22, %v599_v24  ;;  %v604_v56 = vmul.f32 %v5723_v26, %v5723_v26 }
 0x100   :  { %v5728_v31 = vpop.f32.mrf.mxu0 }
 0x101   :  { %v663_v38 = vadd.f32 %v662_v30, %v600_v27  ;;  %v531_v39 = vadd.f32 %v5713_v15, %v530_v28  ;;  %v602_v44 = vmul.f32 %v5728_v31, %v5728_v31 }
 0x102   :  { %v5733_v40 = vpop.f32.mrf.mxu0 }
 0x103   :  { %v532_v43 = vadd.f32 %v531_v39, %v5728_v31  ;;  %v664_v46 = vadd.f32 %v663_v38, %v601_v32  ;;  %v605_v0 = vmul.f32 %v5733_v40, %v5733_v40 }
 0x104   :  { %v5738_v48 = vpop.f32.mrf.mxu0 }
 0x105   :  { %v665_v50 = vadd.f32 %v664_v46, %v602_v44  ;;  %v533_v51 = vadd.f32 %v532_v43, %v5738_v48  ;;  %v603_v54 = vmul.f32 %v5738_v48, %v5738_v48 }
 0x106   :  { %v5743_v55 = vpop.f32.mrf.mxu0 }
 0x107   :  { %v534_v59 = vadd.f32 %v5723_v26, %v533_v51  ;;  %v666_v60 = vadd.f32 %v665_v50, %v603_v54  ;;  %v608_v22 = vmul.f32 %v5743_v55, %v5743_v55 }
 0x108   :  { %v5748_v62 = vpop.f32.mrf.mxu0 }
 0x109   :  { %v667_v2 = vadd.f32 %v666_v60, %v604_v56  ;;  %v535_v3 = vadd.f32 %v5733_v40, %v534_v59  ;;  %v606_v8 = vmul.f32 %v5748_v62, %v5748_v62 }
 0x10a   :  { %v5753_v6 = vpop.f32.mrf.mxu0 }
 0x10b   :  { %v536_v7 = vadd.f32 %v535_v3, %v5748_v62  ;;  %v668_v11 = vadd.f32 %v667_v2, %v605_v0  ;;  %v609_v28 = vmul.f32 %v5753_v6, %v5753_v6 }
 0x10c   :  { %v5758_v12 = vpop.f32.mrf.mxu0 }
 0x10d   :  { %v669_v14 = vadd.f32 %v668_v11, %v606_v8  ;;  %v537_v16 = vadd.f32 %v536_v7, %v5758_v12  ;;  %v607_v18 = vmul.f32 %v5758_v12, %v5758_v12 }
 0x10e   :  { %v5763_v19 = vpop.f32.mrf.mxu0 }
 0x10f   :  { %v538_v23 = vadd.f32 %v5743_v55, %v537_v16  ;;  %v670_v24 = vadd.f32 %v669_v14, %v607_v18  ;;  %v612_v59 = vmul.f32 %v5763_v19, %v5763_v19 }
 0x110   :  { %v5768_v27 = vpop.f32.mrf.mxu0 }
 0x111   :  { %v671_v30 = vadd.f32 %v670_v24, %v608_v22  ;;  %v539_v32 = vadd.f32 %v5753_v6, %v538_v23  ;;  %v610_v43 = vmul.f32 %v5768_v27, %v5768_v27 }
 0x112   :  { %v5773_v38 = vpop.f32.mrf.mxu0 }
 0x113   :  { %v540_v39 = vadd.f32 %v539_v32, %v5768_v27  ;;  %v672_v44 = vadd.f32 %v671_v30, %v609_v28  ;;  %v613_v3 = vmul.f32 %v5773_v38, %v5773_v38 }
 0x114   :  { %v5778_v46 = vpop.f32.mrf.mxu0 }
 0x115   :  { %v673_v50 = vadd.f32 %v672_v44, %v610_v43  ;;  %v541_v51 = vadd.f32 %v540_v39, %v5778_v46  ;;  %v611_v54 = vmul.f32 %v5778_v46, %v5778_v46 }
 0x116   :  { %v5783_v56 = vpop.f32.mrf.mxu0 }
 0x117   :  { %12680 = vst [vmem:[#allocation31_spill] sm:$0xff] %v5783_v56  ;;  %v542_v60 = vadd.f32 %v5763_v19, %v541_v51  ;;  %v674_v0 = vadd.f32 %v673_v50, %v611_v54  ;;  %v616_v32 = vmul.f32 %v5783_v56, %v5783_v56 }
 0x118   :  { %v5788_v2 = vpop.f32.mrf.mxu0 }
 0x119   :  { %v675_v7 = vadd.f32 %v674_v0, %v612_v59  ;;  %v543_v8 = vadd.f32 %v5773_v38, %v542_v60  ;;  %v614_v16 = vmul.f32 %v5788_v2, %v5788_v2 }
 0x11a   :  { %v5793_v11 = vpop.f32.mrf.mxu0 }
 0x11b   :  { %12681 = vst [vmem:[#allocation32_spill] sm:$0xff] %v5793_v11  ;;  %v544_v14 = vadd.f32 %v543_v8, %v5788_v2  ;;  %v676_v18 = vadd.f32 %v675_v7, %v613_v3  ;;  %v617_v50 = vmul.f32 %v5793_v11, %v5793_v11 }
 0x11c   :  { %v5798_v22 = vpop.f32.mrf.mxu0 }
 0x11d   :  { %v677_v23 = vadd.f32 %v676_v18, %v614_v16  ;;  %v545_v24 = vadd.f32 %v544_v14, %v5798_v22  ;;  %v615_v28 = vmul.f32 %v5798_v22, %v5798_v22 }
 0x11e   :  { %v5803_v30 = vpop.f32.mrf.mxu0 }
 0x11f   :  { %12682 = vst [vmem:[#allocation33_spill] sm:$0xff] %v5803_v30  ;;  %v546_v39 = vadd.f32 %v5783_v56, %v545_v24  ;;  %v678_v43 = vadd.f32 %v677_v23, %v615_v28  ;;  %v620_v23 = vmul.f32 %v5803_v30, %v5803_v30 }
 0x120   :  { %v5808_v44 = vpop.f32.mrf.mxu0 }
 0x121   :  { %12683 = vst [vmem:[#allocation34_spill] sm:$0xff] %v5808_v44  ;;  %v679_v51 = vadd.f32 %v678_v43, %v616_v32  ;;  %v547_v54 = vadd.f32 %v5793_v11, %v546_v39  ;;  %v618_v0 = vmul.f32 %v5808_v44, %v5808_v44 }
 0x122   :  { %v5813_v59 = vpop.f32.mrf.mxu0 }
 0x123   :  { %12684 = vst [vmem:[#allocation35_spill] sm:$0xff] %v5813_v59  ;;  %v548_v60 = vadd.f32 %v547_v54, %v5808_v44  ;;  %v680_v3 = vadd.f32 %v679_v51, %v617_v50  ;;  %v621_v39 = vmul.f32 %v5813_v59, %v5813_v59 }
 0x124   :  { %v5818_v7 = vpop.f32.mrf.mxu0 }
 0x125   :  { %12685 = vst [vmem:[#allocation36_spill] sm:$0xff] %v5818_v7  ;;  %v681_v8 = vadd.f32 %v680_v3, %v618_v0  ;;  %v549_v14 = vadd.f32 %v548_v60, %v5818_v7  ;;  %v619_v16 = vmul.f32 %v5818_v7, %v5818_v7 }
 0x126   :  { %v5823_v18 = vpop.f32.mrf.mxu0 }
 0x127   :  { %12686 = vst [vmem:[#allocation37_spill] sm:$0xff] %v5823_v18  ;;  %v550_v24 = vadd.f32 %v5803_v30, %v549_v14  ;;  %v682_v28 = vadd.f32 %v681_v8, %v619_v16 }
 0x128   :  { %v5828_v32 = vpop.f32.mrf.mxu0 }
 0x129   :  { %12687 = vst [vmem:[#allocation38_spill] sm:$0xff] %v5828_v32  ;;  %v683_v43 = vadd.f32 %v682_v28, %v620_v23  ;;  %v551_v50 = vadd.f32 %v5813_v59, %v550_v24  ;;  %v622_v60 = vmul.f32 %v5828_v32, %v5828_v32  ;;  %v624_v23 = vmul.f32 %v5823_v18, %v5823_v18 }
 0x12a   :  { %v5833_v51 = vpop.f32.mrf.mxu0 }
 0x12b   :  { %12688 = vst [vmem:[#allocation39_spill] sm:$0xff] %v5833_v51  ;;  %v552_v54 = vadd.f32 %v551_v50, %v5828_v32  ;;  %v684_v0 = vadd.f32 %v683_v43, %v621_v39  ;;  %v625_v39 = vmul.f32 %v5833_v51, %v5833_v51 }
 0x12c   :  { %v5838_v3 = vpop.f32.mrf.mxu0 }
 0x12d   :  { %12689 = vst [vmem:[#allocation40_spill] sm:$0xff] %v5838_v3  ;;  %v685_v14 = vadd.f32 %v684_v0, %v622_v60  ;;  %v553_v8 = vadd.f32 %v552_v54, %v5838_v3  ;;  %v623_v16 = vmul.f32 %v5838_v3, %v5838_v3 }
 0x12e   :  { %v5843_v15 = vpop.f32.mrf.mxu0 }
 0x12f   :  { %12690 = vst [vmem:[#allocation41_spill] sm:$0xff] %v5843_v15  ;;  %v554_v24 = vadd.f32 %v5823_v18, %v553_v8  ;;  %v686_v28 = vadd.f32 %v685_v14, %v623_v16 }
 0x130   :  { %v5848_v50 = vpop.f32.mrf.mxu0 }
 0x131   :  { %12691 = vst [vmem:[#allocation42_spill] sm:$0xff] %v5848_v50  ;;  %v687_v43 = vadd.f32 %v686_v28, %v624_v23  ;;  %v555_v60 = vadd.f32 %v5833_v51, %v554_v24  ;;  %v626_v4 = vmul.f32 %v5848_v50, %v5848_v50  ;;  %v628_v23 = vmul.f32 %v5843_v15, %v5843_v15 }
 0x132   :  { %v5853_v54 = vpop.f32.mrf.mxu0 }
 0x133   :  { %12692 = vst [vmem:[#allocation43_spill] sm:$0xff] %v5853_v54  ;;  %v556_v0 = vadd.f32 %v555_v60, %v5848_v50  ;;  %v688_v20 = vadd.f32 %v687_v43, %v625_v39  ;;  %v629_v39 = vmul.f32 %v5853_v54, %v5853_v54 }
 0x134   :  { %v5858_v10 = vpop.f32.mrf.mxu0 }
 0x135   :  { %12693 = vst [vmem:[#allocation44_spill] sm:$0xff] %v5858_v10  ;;  %v689_v8 = vadd.f32 %v688_v20, %v626_v4  ;;  %v557_v14 = vadd.f32 %v556_v0, %v5858_v10  ;;  %v627_v16 = vmul.f32 %v5858_v10, %v5858_v10 }
 0x136   :  { %v5863_v58 = vpop.f32.mrf.mxu0 }
 0x137   :  { %v558_v24 = vadd.f32 %v5843_v15, %v557_v14  ;;  %v690_v28 = vadd.f32 %v689_v8, %v627_v16 }
 0x138   :  { %v5868_v60 = vpop.f32.mrf.mxu0 }
 0x139   :  { %v691_v43 = vadd.f32 %v690_v28, %v628_v23  ;;  %v559_v4 = vadd.f32 %v5853_v54, %v558_v24  ;;  %v630_v47 = vmul.f32 %v5868_v60, %v5868_v60  ;;  %v632_v23 = vmul.f32 %v5863_v58, %v5863_v58 }
 0x13a   :  { %v5873_v20 = vpop.f32.mrf.mxu0 }
 0x13b   :  { %v560_v0 = vadd.f32 %v559_v4, %v5868_v60  ;;  %v692_v63 = vadd.f32 %v691_v43, %v629_v39  ;;  %v633_v39 = vmul.f32 %v5873_v20, %v5873_v20 }
 0x13c   :  { %v5878_v52 = vpop.f32.mrf.mxu0 }
 0x13d   :  { %v693_v14 = vadd.f32 %v692_v63, %v630_v47  ;;  %v561_v8 = vadd.f32 %v560_v0, %v5878_v52  ;;  %v631_v16 = vmul.f32 %v5878_v52, %v5878_v52 }
 0x13e   :  { %v5883_v33 = vpop.f32.mrf.mxu0 }
 0x13f   :  { %v562_v24 = vadd.f32 %v5863_v58, %v561_v8  ;;  %v694_v28 = vadd.f32 %v693_v14, %v631_v16 }
 0x140   :  { %v5888_v4 = vpop.f32.mrf.mxu0 }
 0x141   :  { %v695_v43 = vadd.f32 %v694_v28, %v632_v23  ;;  %v563_v47 = vadd.f32 %v5873_v20, %v562_v24  ;;  %v634_v25 = vmul.f32 %v5888_v4, %v5888_v4  ;;  %v636_v23 = vmul.f32 %v5883_v33, %v5883_v33 }
 0x142   :  { %v5893_v63 = vpop.f32.mrf.mxu0 }
 0x143   :  { %v564_v0 = vadd.f32 %v563_v47, %v5888_v4  ;;  %v696_v42 = vadd.f32 %v695_v43, %v633_v39  ;;  %v637_v47 = vmul.f32 %v5893_v63, %v5893_v63 }
 0x144   :  { %v5898_v29 = vpop.f32.mrf.mxu0 }
 0x145   :  { %v697_v8 = vadd.f32 %v696_v42, %v634_v25  ;;  %v565_v14 = vadd.f32 %v564_v0, %v5898_v29  ;;  %v635_v16 = vmul.f32 %v5898_v29, %v5898_v29 }
 0x147   :  { %v566_v24 = vadd.f32 %v5883_v33, %v565_v14  ;;  %v698_v28 = vadd.f32 %v697_v8, %v635_v16 }
 0x149   :  { %v567_v17 = vadd.f32 %v5893_v63, %v566_v24  ;;  %v699_v39 = vadd.f32 %v698_v28, %v636_v23 }
 0x14b   :  { %v568_v43 = vrot.slane %v567_v17, 4  ;;  %v700_v9 = vadd.f32 %v699_v39, %v637_v47  ;;  %v1044_v39 = vld [vmem:[%s12147_s2] sm:$0xff] }
 0x14d   :  { %v569_v25 = vadd.f32 %v568_v43, %v567_v17  ;;  %v701_v42 = vrot.slane %v700_v9, 4 }
 0x14f   :  { %v570_v0 = vrot.slane %v569_v25, 2  ;;  %v702_v21 = vadd.f32 %v701_v42, %v700_v9 }
 0x151   :  { %v571_v13 = vadd.f32 %v570_v0, %v569_v25  ;;  %v703_v1 = vrot.slane %v702_v21, 2 }
 0x153   :  { %v572_v57 = vrot.slane %v571_v13, 1  ;;  %v704_v5 = vadd.f32 %v703_v1, %v702_v21  ;;  %v1046_v21 = vlaneseq }
 0x155   :  { %v573_v61 = vadd.f32 %v572_v57, %v571_v13  ;;  %v705_v49 = vrot.slane %v704_v5, 1 }
 0x157   :  { %v706_v14 = vadd.f32 %v705_v49, %v704_v5  ;;  %v5909_v8 = vmul.f32 0.001953125, %v573_v61 }
 0x159   :  { %v708_v16 = vmul.f32 0.001953125, %v706_v14  ;;  %v709_v24 = vmul.f32 %v5909_v8, %v5909_v8  ;;  %v770_v23 = vsub.f32 %v5868_v60, %v5909_v8  ;;  %v771_v17 = vsub.f32 %v5878_v52, %v5909_v8 }
 0x15a   :  { %v772_v9 = vsub.f32 %v5863_v58, %v5909_v8  ;;  %v773_v57 = vsub.f32 %v5873_v20, %v5909_v8  ;;  %v774_v49 = vsub.f32 %v5888_v4, %v5909_v8  ;;  %v776_v1 = vsub.f32 %v5883_v33, %v5909_v8 }
 0x15b   :  { %v710_v61 = vsub.f32 %v708_v16, %v709_v24  ;;  %v777_v5 = vsub.f32 %v5893_v63, %v5909_v8  ;;  %v5927_v52 = vshrl.u32 %v1046_v21, 7 }
 0x15d   :  { %v711_v13 = vmax.f32 %v710_v61, 0.0  ;;  %12694 = vst [vmem:[#allocation45_spill] sm:$0xff] %v5927_v52  ;;  %v1513_v58 = vsub.s32 0, %v5927_v52  ;;  %v1581_v20 = vsub.s32 1, %v5927_v52  ;;  %v1713_v28 = vsub.s32 2, %v5927_v52 }
 0x15e   :  { %v2293_v4 = vsub.s32 3, %v5927_v52  ;;  %v2361_v47 = vsub.s32 4, %v5927_v52  ;;  %v2493_v43 = vsub.s32 5, %v5927_v52  ;;  %v3138_v14 = vsub.s32 6, %v5927_v52 }
 0x15f   :  { %v712_v60 = vadd.f32 1e-05, %v711_v13  ;;  %v3206_v16 = vsub.s32 7, %v5927_v52  ;;  %v5955_v13 = vadd.s32 8, %v5927_v52  ;;  %vm1179_vm2 = vcmp.lt.s32.totalorder %v5927_v52, 1 }
 0x160   :  { %v5958_v21 = vrot.slane %v1044_v39, %v1581_v20  ;;  %vm1113_vm3 = vcmp.gt.s32.totalorder %v5927_v52, 0  ;;  %v5963_v0 = vrot.slane %v1044_v39, %v1713_v28  ;;  %v5965_v42 = vrot.slane %v1044_v39, %v2293_v4 }
 0x161   :  { %5329 = vrsqrt.f32 %v712_v60  ;;  %12695 = vst [vmem:[#allocation46_spill] sm:$0xff] %v5955_v13  ;;  %v5961_v60 = vrot.slane %v1044_v39, %v1513_v58  ;;  %v5967_v25 = vrot.slane %v1044_v39, %v2361_v47  ;;  %v775_v61 = vsub.f32 %v5898_v29, %v5909_v8 }
 0x162   :  { %12696 = vst [vmem:[#allocation47_spill] sm:$0xff] %v5958_v21  ;;  %12698 = vst [vmem:[#allocation49_spill] sm:$0xff] %v5963_v0  ;;  %v5973_v63 = vrot.slane %v1044_v39, %v2493_v43  ;;  %v5975_v33 = vrot.slane %v1044_v39, %v3138_v14  ;;  %v5977_v20 = vrot.slane %v1044_v39, %v3206_v16  ;;  %vm1378_vm4 = vcmp.lt.s32.totalorder %v5927_v52, 7 }
 0x163   :  { %12697 = vst [vmem:[#allocation48_spill] sm:$0xff] %v5961_v60  ;;  %12699 = vst [vmem:[#allocation50_spill] sm:$0xff] %v5965_v42  ;;  %vm1313_vm5 = vcmp.lt.s32.totalorder %v5955_v13, 15 }
 0x164   :  { %12700 = vst [vmem:[#allocation51_spill] sm:$0xff] %v5967_v25  ;;  %12702 = vst [vmem:[#allocation53_spill] sm:$0xff] %v5973_v63 }
 0x165   :  { %12703 = vst [vmem:[#allocation54_spill] sm:$0xff] %v5975_v33  ;;  %12704 = vst [vmem:[#allocation55_spill] sm:$0xff] %v5977_v20 }
 0x16e   :  { %v5969_v24 = vpop.eup %5329 }
 0x16f   :  { %12701 = vst [vmem:[#allocation52_spill] sm:$0xff] %v5969_v24  ;;  %v834_v58 = vmul.f32 %v5969_v24, %v770_v23  ;;  %v835_v28 = vmul.f32 %v5969_v24, %v771_v17  ;;  %v836_v4 = vmul.f32 %v5969_v24, %v772_v9  ;;  %v837_v47 = vmul.f32 %v5969_v24, %v773_v57 }
 0x170   :  { %v838_v41 = vmul.f32 %v5969_v24, %v774_v49  ;;  %v839_v53 = vmul.f32 %v5969_v24, %v775_v61  ;;  %v840_v29 = vmul.f32 %v5969_v24, %v776_v1  ;;  %v841_v43 = vmul.f32 %v5969_v24, %v777_v5 }
 0x171   :  { %v898_v39 = vmax.f32 %v834_v58, 0.0  ;;  %v899_v23 = vmax.f32 %v835_v28, 0.0  ;;  %v900_v14 = vmax.f32 %v836_v4, 0.0  ;;  %v901_v17 = vmax.f32 %v837_v47, 0.0 }
 0x172   :  { %v902_v16 = vmax.f32 %v838_v41, 0.0  ;;  %v903_v9 = vmax.f32 %v839_v53, 0.0  ;;  %v904_v45 = vmax.f32 %v840_v29, 0.0  ;;  %v905_v57 = vmax.f32 %v841_v43, 0.0 }
 0x173   :  { %v5989_v36 = vmin.f32 %v898_v39, 6.0  ;;  %v5991_v49 = vmin.f32 %v899_v23, 6.0  ;;  %v5993_v61 = vmin.f32 %v900_v14, 6.0  ;;  %v5995_v1 = vmin.f32 %v901_v17, 6.0 }
 0x174   :  { %v5997_v5 = vmin.f32 %v902_v16, 6.0  ;;  %v5999_v34 = vmin.f32 %v903_v9, 6.0  ;;  %v6001_v58 = vmin.f32 %v904_v45, 6.0  ;;  %v6003_v28 = vmin.f32 %v905_v57, 6.0 }
 0x175   :  { %12705 = vst [vmem:[#allocation56_spill] sm:$0xff] %v5989_v36  ;;  %12706 = vst [vmem:[#allocation57_spill] sm:$0xff] %v5991_v49  ;;  %v1144_v41 = vrot.slane %v5989_v36, 7  ;;  %v1145_v53 = vrot.slane %v5993_v61, 7  ;;  %v1176_v4 = vrot.slane %v5991_v49, 7  ;;  %v1177_v47 = vrot.slane %v5995_v1, 7 }
 0x176   :  { %12707 = vst [vmem:[#allocation58_spill] sm:$0xff] %v5993_v61  ;;  %12708 = vst [vmem:[#allocation59_spill] sm:$0xff] %v5995_v1  ;;  %v1146_v29 = vrot.slane %v5997_v5, 7  ;;  %v1178_v43 = vrot.slane %v5999_v34, 7  ;;  %v1343_v39 = vrot.slane %v5989_v36, 1  ;;  %v1344_v23 = vrot.slane %v5993_v61, 1 }
 0x177   :  { %v6015_v45 = vsel %vm1179_vm2, %v1144_v41, %v1176_v4  ;;  %v6019_v14 = vsel %vm1179_vm2, %v1145_v53, %v1177_v47  ;;  %v1241_v17 = vsel %vm1179_vm2, %v1176_v4, %v1144_v41  ;;  %v1242_v16 = vsel %vm1179_vm2, %v1177_v47, %v1145_v53 }
 0x178   :  { %12709 = vst [vmem:[#allocation60_spill] sm:$0xff] %v6015_v45  ;;  %12710 = vst [vmem:[#allocation61_spill] sm:$0xff] %v6019_v14  ;;  %v6027_v9 = vsel %vm1179_vm2, %v1146_v29, %v1178_v43  ;;  %v1243_v57 = vsel %vm1179_vm2, %v1178_v43, %v1146_v29  ;;  %v6033_v37 = vsel %vm1113_vm3, %v1241_v17, 0.0  ;;  %v6037_v35 = vsel %vm1113_vm3, %v1242_v16, 0.0 }
 0x179   :  { %12711 = vst [vmem:[#allocation62_spill] sm:$0xff] %v6033_v37  ;;  %12712 = vst [vmem:[#allocation63_spill] sm:$0xff] %v6037_v35  ;;  %v6041_v41 = vsel %vm1113_vm3, %v1243_v57, 0.0  ;;  %v1345_v53 = vrot.slane %v5997_v5, 1  ;;  %v1375_v4 = vrot.slane %v5991_v49, 1  ;;  %v1376_v47 = vrot.slane %v5995_v1, 1 }
 0x17a   :  { %v1377_v29 = vrot.slane %v5999_v34, 1  ;;  %v1573_v43 = vmul.f32 %v5961_v60, %v6033_v37  ;;  %v1574_v17 = vmul.f32 %v5961_v60, %v6015_v45  ;;  %v1575_v16 = vmul.f32 %v5961_v60, %v6037_v35 }
 0x17b   :  { %v6055_v57 = vsel %vm1378_vm4, %v1343_v39, %v1375_v4  ;;  %v6059_v54 = vsel %vm1378_vm4, %v1344_v23, %v1376_v47  ;;  %v1440_v15 = vsel %vm1378_vm4, %v1375_v4, %v1343_v39  ;;  %v1441_v37 = vsel %vm1378_vm4, %v1376_v47, %v1344_v23 }
 0x17c   :  { %12713 = vst [vmem:[#allocation64_spill] sm:$0xff] %v6055_v57  ;;  %12714 = vst [vmem:[#allocation65_spill] sm:$0xff] %v6059_v54  ;;  %v6067_v45 = vsel %vm1378_vm4, %v1345_v53, %v1377_v29  ;;  %v1442_v10 = vsel %vm1378_vm4, %v1377_v29, %v1345_v53  ;;  %v6073_v50 = vsel %vm1313_vm5, %v1440_v15, 0.0  ;;  %v6077_v51 = vsel %vm1313_vm5, %v1441_v37, 0.0 }
 0x17d   :  { %12715 = vst [vmem:[#allocation66_spill] sm:$0xff] %v6073_v50  ;;  %12716 = vst [vmem:[#allocation67_spill] sm:$0xff] %v6077_v51  ;;  %v6081_v39 = vsel %vm1313_vm5, %v1442_v10, 0.0  ;;  %v1576_v23 = vmul.f32 %v5961_v60, %v6019_v14  ;;  %v1577_v4 = vmul.f32 %v5961_v60, %v6041_v41  ;;  %v1578_v53 = vmul.f32 %v5961_v60, %v6027_v9 }
 0x17e   :  { %v1641_v15 = vmul.f32 %v5958_v21, %v5989_v36  ;;  %v1642_v37 = vmul.f32 %v5958_v21, %v5991_v49  ;;  %v1643_v47 = vmul.f32 %v5958_v21, %v5993_v61  ;;  %v1644_v10 = vmul.f32 %v5958_v21, %v5995_v1 }
 0x17f   :  { %v1645_v29 = vmul.f32 %v5958_v21, %v5997_v5  ;;  %v1646_v3 = vmul.f32 %v5958_v21, %v5999_v34  ;;  %v1773_v60 = vmul.f32 %v5963_v0, %v6055_v57  ;;  %v1774_v36 = vmul.f32 %v5963_v0, %v6073_v50 }
 0x180   :  { %v1705_v32 = vadd.f32 %v1641_v15, %v1573_v43  ;;  %v1706_v49 = vadd.f32 %v1642_v37, %v1574_v17  ;;  %v1707_v24 = vadd.f32 %v1643_v47, %v1575_v16  ;;  %v1708_v18 = vadd.f32 %v1644_v10, %v1576_v23 }
 0x181   :  { %v1709_v59 = vadd.f32 %v1645_v29, %v1577_v4  ;;  %v1710_v30 = vadd.f32 %v1646_v3, %v1578_v53  ;;  %v1775_v7 = vmul.f32 %v5963_v0, %v6059_v54  ;;  %v1776_v44 = vmul.f32 %v5963_v0, %v6077_v51 }
 0x182   :  { %v1777_v21 = vmul.f32 %v5963_v0, %v6067_v45  ;;  %v1778_v57 = vmul.f32 %v5963_v0, %v6081_v39  ;;  %v1837_v11 = vadd.f32 %v1773_v60, %v1705_v32  ;;  %v1838_v50 = vadd.f32 %v1774_v36, %v1706_v49 }
 0x183   :  { %v1839_v43 = vadd.f32 %v1775_v7, %v1707_v24  ;;  %v1840_v17 = vadd.f32 %v1776_v44, %v1708_v18  ;;  %v1938_v16 = vrot.slane %v6001_v58, 7  ;;  %v1970_v3 = vrot.slane %v6003_v28, 7 }
 0x184   :  { %v1841_v23 = vadd.f32 %v1777_v21, %v1709_v59  ;;  %v1842_v4 = vadd.f32 %v1778_v57, %v1710_v30  ;;  %v2130_v53 = vrot.slane %v6001_v58, 1  ;;  %v2162_v15 = vrot.slane %v6003_v28, 1 }
 0x185   :  { %v2002_v37 = vsel %vm1179_vm2, %v1938_v16, %v1970_v3  ;;  %v2034_v47 = vsel %vm1179_vm2, %v1970_v3, %v1938_v16  ;;  %v2353_v36 = vmul.f32 %v5965_v42, %v6037_v35  ;;  %v2354_v44 = vmul.f32 %v5965_v42, %v6019_v14 }
 0x186   :  { %v2097_v59 = vsel %vm1113_vm3, %v2034_v47, 0.0  ;;  %v2194_v30 = vsel %vm1378_vm4, %v2130_v53, %v2162_v15  ;;  %v2226_v7 = vsel %vm1378_vm4, %v2162_v15, %v2130_v53  ;;  %v2355_v18 = vmul.f32 %v5965_v42, %v6041_v41 }
 0x187   :  { %v2290_v32 = vsel %vm1313_vm5, %v2226_v7, 0.0  ;;  %v2356_v24 = vmul.f32 %v5965_v42, %v6027_v9  ;;  %v2357_v21 = vmul.f32 %v5965_v42, %v2097_v59  ;;  %v2358_v60 = vmul.f32 %v5965_v42, %v2002_v37 }
 0x188   :  { %v2421_v49 = vmul.f32 %v5967_v25, %v5993_v61  ;;  %v2422_v57 = vmul.f32 %v5967_v25, %v5995_v1  ;;  %v2423_v10 = vmul.f32 %v5967_v25, %v5997_v5  ;;  %v2424_v29 = vmul.f32 %v5967_v25, %v5999_v34 }
 0x189   :  { %v2425_v16 = vmul.f32 %v5967_v25, %v6001_v58  ;;  %v2426_v3 = vmul.f32 %v5967_v25, %v6003_v28  ;;  %v2553_v53 = vmul.f32 %v5973_v63, %v6059_v54  ;;  %v2554_v15 = vmul.f32 %v5973_v63, %v6077_v51 }
 0x18a   :  { %v2485_v47 = vadd.f32 %v2421_v49, %v2353_v36  ;;  %v2486_v7 = vadd.f32 %v2422_v57, %v2354_v44  ;;  %v2487_v0 = vadd.f32 %v2423_v10, %v2355_v18  ;;  %v2488_v13 = vadd.f32 %v2424_v29, %v2356_v24  ;;  %v6168_v18 = vld [vmem:[%s12147_s2 + $0x8] ss:$0 sm:$0xff] }
 0x18b   :  { %v2489_v1 = vadd.f32 %v2425_v16, %v2357_v21  ;;  %v2490_v61 = vadd.f32 %v2426_v3, %v2358_v60  ;;  %v2555_v14 = vmul.f32 %v5973_v63, %v6067_v45  ;;  %v2556_v35 = vmul.f32 %v5973_v63, %v6081_v39 }
 0x18c   :  { %v2557_v25 = vmul.f32 %v5973_v63, %v2194_v30  ;;  %v2558_v42 = vmul.f32 %v5973_v63, %v2290_v32  ;;  %v2617_v54 = vadd.f32 %v2553_v53, %v2485_v47  ;;  %v2618_v52 = vadd.f32 %v2554_v15, %v2486_v7 }
 0x18d   :  { %v2619_v56 = vadd.f32 %v2555_v14, %v2487_v0  ;;  %v2620_v51 = vadd.f32 %v2556_v35, %v2488_v13  ;;  %v3198_v36 = vmul.f32 %v5975_v33, %v6041_v41  ;;  %v3199_v44 = vmul.f32 %v5975_v33, %v6027_v9 }
 0x18e   :  { %v2621_v24 = vadd.f32 %v2557_v25, %v2489_v1  ;;  %v2622_v21 = vadd.f32 %v2558_v42, %v2490_v61  ;;  %v2681_v60 = vadd.f32 %v2617_v54, %v1837_v11  ;;  %v2682_v49 = vadd.f32 %v2618_v52, %v1838_v50 }
 0x18f   :  { %v2683_v57 = vadd.f32 %v2619_v56, %v1839_v43  ;;  %v2684_v10 = vadd.f32 %v2620_v51, %v1840_v17  ;;  %v3200_v0 = vmul.f32 %v5975_v33, %v2097_v59  ;;  %v3201_v35 = vmul.f32 %v5975_v33, %v2002_v37 }
 0x190   :  { %v6172_v13 = vadd.f32 %v2621_v24, %v1841_v23  ;;  %v6174_v14 = vadd.f32 %v2622_v21, %v1842_v4  ;;  %v3266_v9 = vmul.f32 %v5977_v20, %v5997_v5  ;;  %v3267_v41 = vmul.f32 %v5977_v20, %v5999_v34 }
 0x191   :  { %v3268_v11 = vmul.f32 %v5977_v20, %v6001_v58  ;;  %v3269_v56 = vmul.f32 %v5977_v20, %v6003_v28  ;;  %v3399_v51 = vmul.f32 %v6168_v18, %v6081_v39  ;;  %v3398_v52 = vmul.f32 %v6168_v18, %v6067_v45 }
 0x192   :  { %12717 = vst [vmem:[#allocation68_spill] sm:$0xff] %v6172_v13  ;;  %12718 = vst [vmem:[#allocation69_spill] sm:$0xff] %v6174_v14  ;;  %v3330_v50 = vadd.f32 %v3266_v9, %v3198_v36  ;;  %v3331_v54 = vadd.f32 %v3267_v41, %v3199_v44  ;;  %v3401_v25 = vmul.f32 %v6168_v18, %v2290_v32  ;;  %v12730_v44 = vld [vmem:[#allocation52_spill] sm:$0xff] }
 0x193   :  { %v3332_v42 = vadd.f32 %v3268_v11, %v3200_v0  ;;  %v3333_v61 = vadd.f32 %v3269_v56, %v3201_v35  ;;  %v3400_v34 = vmul.f32 %v6168_v18, %v2194_v30  ;;  %v742_v45 = vsub.f32 %v5728_v31, %v5909_v8 }
 0x194   :  { %v3462_v1 = vadd.f32 %v3398_v52, %v3330_v50  ;;  %v3463_v5 = vadd.f32 %v3399_v51, %v3331_v54  ;;  %v743_v4 = vsub.f32 %v5738_v48, %v5909_v8  ;;  %v744_v37 = vsub.f32 %v5723_v26, %v5909_v8 }
 0x195   :  { %v3464_v58 = vadd.f32 %v3400_v34, %v3332_v42  ;;  %v3465_v43 = vadd.f32 %v3401_v25, %v3333_v61  ;;  %v745_v59 = vsub.f32 %v5733_v40, %v5909_v8  ;;  %v746_v30 = vsub.f32 %v5748_v62, %v5909_v8 }
 0x196   :  { %v6190_v17 = vadd.f32 %v3462_v1, %v2681_v60  ;;  %v6192_v28 = vadd.f32 %v3463_v5, %v2682_v49  ;;  %v747_v32 = vsub.f32 %v5758_v12, %v5909_v8  ;;  %v748_v29 = vsub.f32 %v5743_v55, %v5909_v8  ;;  %v12733_v1 = vld [vmem:[#allocation38_spill] sm:$0xff] }
 0x197   :  { %v6194_v39 = vadd.f32 %v3464_v58, %v2683_v57  ;;  %v6196_v23 = vadd.f32 %v3465_v43, %v2684_v10  ;;  %v749_v31 = vsub.f32 %v5753_v6, %v5909_v8  ;;  %v750_v48 = vsub.f32 %v5768_v27, %v5909_v8  ;;  %v12723_v6 = vld [vmem:[#allocation31_spill] sm:$0xff]  ;;  %v12724_v27 = vld [vmem:[#allocation32_spill] sm:$0xff] }
 0x198   :  { %12719 = vst [vmem:[#allocation70_spill] sm:$0xff] %v6190_v17  ;;  %12720 = vst [vmem:[#allocation71_spill] sm:$0xff] %v6192_v28  ;;  %v751_v26 = vsub.f32 %v5778_v46, %v5909_v8  ;;  %v752_v40 = vsub.f32 %v5763_v19, %v5909_v8  ;;  %v753_v62 = vsub.f32 %v5773_v38, %v5909_v8  ;;  %v12725_v46 = vld [vmem:[#allocation34_spill] sm:$0xff]  ;;  %v12726_v19 = vld [vmem:[#allocation36_spill] sm:$0xff] }
 0x199   :  { %12721 = vst [vmem:[#allocation72_spill] sm:$0xff] %v6194_v39  ;;  %12722 = vst [vmem:[#allocation73_spill] sm:$0xff] %v6196_v23  ;;  %v754_v12 = vsub.f32 %v5788_v2, %v5909_v8  ;;  %v755_v55 = vsub.f32 %v5798_v22, %v5909_v8  ;;  %v756_v16 = vsub.f32 %v12723_v6, %v5909_v8  ;;  %v12727_v38 = vld [vmem:[#allocation33_spill] sm:$0xff]  ;;  %v12728_v2 = vld [vmem:[#allocation35_spill] sm:$0xff] }
 0x19a   :  { %v757_v3 = vsub.f32 %v12724_v27, %v5909_v8  ;;  %v758_v53 = vsub.f32 %v12725_v46, %v5909_v8  ;;  %v759_v15 = vsub.f32 %v12726_v19, %v5909_v8  ;;  %v760_v47 = vsub.f32 %v12727_v38, %v5909_v8  ;;  %v12729_v22 = vld [vmem:[#allocation37_spill] sm:$0xff]  ;;  %v12735_v43 = vld [vmem:[#allocation40_spill] sm:$0xff]  ;;  %v12748_v19 = vld [vmem:[#allocation6_spill] sm:$0xff] }
 0x19b   :  { %v761_v7 = vsub.f32 %v12728_v2, %v5909_v8  ;;  %v764_v36 = vsub.f32 %v12729_v22, %v5909_v8  ;;  %v6241_v24 = vmul.f32 %v12730_v44, %v742_v45  ;;  %v6244_v21 = vmul.f32 %v12730_v44, %v743_v4  ;;  %v12747_v46 = vld [vmem:[#allocation4_spill] sm:$0xff]  ;;  %v12749_v38 = vld [vmem:[#allocation3_spill] sm:$0xff]  ;;  %v12750_v2 = vld [vmem:[#allocation5_spill] sm:$0xff] }
 0x19c   :  { %v6247_v60 = vmul.f32 %v12730_v44, %v744_v37  ;;  %v6250_v49 = vmul.f32 %v12730_v44, %v745_v59  ;;  %v6253_v57 = vmul.f32 %v12730_v44, %v746_v30  ;;  %v6256_v10 = vmul.f32 %v12730_v44, %v747_v32  ;;  %v12737_v59 = vld [vmem:[#allocation39_spill] sm:$0xff]  ;;  %v12751_v22 = vld [vmem:[#allocation8_spill] sm:$0xff] }
 0x19d   :  { %v6259_v0 = vmul.f32 %v12730_v44, %v748_v29  ;;  %v6262_v35 = vmul.f32 %v12730_v44, %v749_v31  ;;  %v6265_v9 = vmul.f32 %v12730_v44, %v750_v48  ;;  %v6268_v41 = vmul.f32 %v12730_v44, %v751_v26  ;;  %v12739_v29 = vld [vmem:[#allocation42_spill] sm:$0xff]  ;;  %v12741_v26 = vld [vmem:[#allocation44_spill] sm:$0xff] }
 0x19e   :  { %12731 = vst [vmem:[#allocation31_spill] sm:$0xff] %v6247_v60  ;;  %12732 = vst [vmem:[#allocation32_spill] sm:$0xff] %v6250_v49  ;;  %v6271_v11 = vmul.f32 %v12730_v44, %v752_v40  ;;  %v6274_v56 = vmul.f32 %v12730_v44, %v753_v62  ;;  %v6277_v51 = vmul.f32 %v12730_v44, %v754_v12  ;;  %v12743_v12 = vld [vmem:[#allocation41_spill] sm:$0xff]  ;;  %v871_v14 = vmax.f32 %v6244_v21, 0.0 }
 0x19f   :  { %v6280_v50 = vmul.f32 %v12730_v44, %v755_v55  ;;  %v6283_v54 = vmul.f32 %v12730_v44, %v756_v16  ;;  %v6286_v52 = vmul.f32 %v12730_v44, %v757_v3  ;;  %v6289_v25 = vmul.f32 %v12730_v44, %v758_v53  ;;  %v12745_v16 = vld [vmem:[#allocation43_spill] sm:$0xff] }
 0x1a0   :  { %v6292_v42 = vmul.f32 %v12730_v44, %v759_v15  ;;  %v6295_v61 = vmul.f32 %v12730_v44, %v760_v47  ;;  %v6298_v34 = vmul.f32 %v12730_v44, %v761_v7  ;;  %v12734_v5 = vsub.f32 %v12733_v1, %v5909_v8  ;;  %v12752_v1 = vld [vmem:[#allocation10_spill] sm:$0xff] }
 0x1a1   :  { %v12736_v45 = vsub.f32 %v12735_v43, %v5909_v8  ;;  %v6313_v37 = vmul.f32 %v12730_v44, %v764_v36  ;;  %v12738_v30 = vsub.f32 %v12737_v59, %v5909_v8  ;;  %v12740_v31 = vsub.f32 %v12739_v29, %v5909_v8  ;;  %v12753_v43 = vld [vmem:[#allocation7_spill] sm:$0xff]  ;;  %v12754_v59 = vld [vmem:[#allocation9_spill] sm:$0xff]  ;;  %v12755_v29 = vld [vmem:[#allocation12_spill] sm:$0xff] }
 0x1a2   :  { %v6304_v58 = vmul.f32 %v12730_v44, %v12734_v5  ;;  %v12742_v40 = vsub.f32 %v12741_v26, %v5909_v8  ;;  %v12744_v55 = vsub.f32 %v12743_v12, %v5909_v8  ;;  %v12746_v27 = vsub.f32 %v12745_v16, %v5909_v8  ;;  %v12756_v26 = vld [vmem:[#allocation14_spill] sm:$0xff]  ;;  %v12757_v12 = vld [vmem:[#allocation11_spill] sm:$0xff]  ;;  %v12758_v16 = vld [vmem:[#allocation13_spill] sm:$0xff] }
 0x1a3   :  { %v6310_v4 = vmul.f32 %v12730_v44, %v12736_v45  ;;  %v6319_v32 = vmul.f32 %v12730_v44, %v12738_v30  ;;  %v6325_v48 = vmul.f32 %v12730_v44, %v12740_v31  ;;  %v870_v47 = vmax.f32 %v6241_v24, 0.0  ;;  %v12823_v30 = vld [vmem:[#allocation57_spill] sm:$0xff] }
 0x1a4   :  { %v6331_v62 = vmul.f32 %v12730_v44, %v12742_v40  ;;  %v6337_v6 = vmul.f32 %v12730_v44, %v12744_v55  ;;  %v6343_v3 = vmul.f32 %v12730_v44, %v12746_v27  ;;  %v874_v15 = vmax.f32 %v6253_v57, 0.0  ;;  %v12816_v27 = vld [vmem:[#allocation50_spill] sm:$0xff]  ;;  %v12820_v40 = vld [vmem:[#allocation56_spill] sm:$0xff] }
 0x1a5   :  { %v875_v53 = vmax.f32 %v6256_v10, 0.0  ;;  %v876_v13 = vmax.f32 %v6259_v0, 0.0  ;;  %v877_v23 = vmax.f32 %v6262_v35, 0.0  ;;  %v878_v39 = vmax.f32 %v6265_v9, 0.0 }
 0x1a6   :  { %v879_v49 = vmax.f32 %v6268_v41, 0.0  ;;  %v880_v28 = vmax.f32 %v6271_v11, 0.0  ;;  %v881_v17 = vmax.f32 %v6274_v56, 0.0  ;;  %v882_v24 = vmax.f32 %v6277_v51, 0.0 }
 0x1a7   :  { %v883_v21 = vmax.f32 %v6280_v50, 0.0  ;;  %v884_v57 = vmax.f32 %v6283_v54, 0.0  ;;  %v885_v10 = vmax.f32 %v6286_v52, 0.0  ;;  %v886_v0 = vmax.f32 %v6289_v25, 0.0 }
 0x1a8   :  { %v887_v35 = vmax.f32 %v6292_v42, 0.0  ;;  %v888_v9 = vmax.f32 %v6295_v61, 0.0  ;;  %v889_v41 = vmax.f32 %v6298_v34, 0.0  ;;  %v890_v11 = vmax.f32 %v6304_v58, 0.0 }
 0x1a9   :  { %v891_v56 = vmax.f32 %v6310_v4, 0.0  ;;  %v892_v51 = vmax.f32 %v6313_v37, 0.0  ;;  %v893_v50 = vmax.f32 %v6319_v32, 0.0  ;;  %v894_v54 = vmax.f32 %v6325_v48, 0.0 }
 0x1aa   :  { %v895_v52 = vmax.f32 %v6331_v62, 0.0  ;;  %v896_v25 = vmax.f32 %v6337_v6, 0.0  ;;  %v897_v42 = vmax.f32 %v6343_v3, 0.0  ;;  %v6413_v60 = vmin.f32 %v870_v47, 6.0 }
 0x1ab   :  { %v6415_v61 = vmin.f32 %v871_v14, 6.0  ;;  %v6417_v34 = vmin.f32 %v874_v15, 6.0  ;;  %v6419_v58 = vmin.f32 %v875_v53, 6.0  ;;  %v6421_v4 = vmin.f32 %v876_v13, 6.0 }
 0x1ac   :  { %12768 = vst [vmem:[#allocation34_spill] sm:$0xff] %v6413_v60  ;;  %v6423_v37 = vmin.f32 %v877_v23, 6.0  ;;  %v6425_v32 = vmin.f32 %v878_v39, 6.0  ;;  %v6427_v48 = vmin.f32 %v879_v49, 6.0  ;;  %v6429_v62 = vmin.f32 %v880_v28, 6.0 }
 0x1ad   :  { %12769 = vst [vmem:[#allocation36_spill] sm:$0xff] %v6415_v61  ;;  %12770 = vst [vmem:[#allocation33_spill] sm:$0xff] %v6417_v34  ;;  %v6431_v6 = vmin.f32 %v881_v17, 6.0  ;;  %v6433_v3 = vmin.f32 %v882_v24, 6.0  ;;  %v6435_v14 = vmin.f32 %v883_v21, 6.0  ;;  %v6437_v15 = vmin.f32 %v884_v57, 6.0 }
 0x1ae   :  { %12771 = vst [vmem:[#allocation35_spill] sm:$0xff] %v6419_v58  ;;  %12772 = vst [vmem:[#allocation37_spill] sm:$0xff] %v6421_v4  ;;  %v6439_v53 = vmin.f32 %v885_v10, 6.0  ;;  %v6441_v13 = vmin.f32 %v886_v0, 6.0  ;;  %v6443_v23 = vmin.f32 %v887_v35, 6.0  ;;  %v6445_v39 = vmin.f32 %v888_v9, 6.0 }
 0x1af   :  { %12773 = vst [vmem:[#allocation52_spill] sm:$0xff] %v6423_v37  ;;  %12774 = vst [vmem:[#allocation38_spill] sm:$0xff] %v6425_v32  ;;  %v6447_v49 = vmin.f32 %v889_v41, 6.0  ;;  %v6449_v28 = vmin.f32 %v890_v11, 6.0  ;;  %v6451_v17 = vmin.f32 %v891_v56, 6.0  ;;  %v6453_v47 = vmin.f32 %v892_v51, 6.0 }
 0x1b0   :  { %12775 = vst [vmem:[#allocation40_spill] sm:$0xff] %v6427_v48  ;;  %12776 = vst [vmem:[#allocation39_spill] sm:$0xff] %v6429_v62  ;;  %v6455_v24 = vmin.f32 %v894_v54, 6.0  ;;  %v6457_v21 = vmin.f32 %v893_v50, 6.0  ;;  %v6459_v57 = vmin.f32 %v895_v52, 6.0  ;;  %v6461_v10 = vmin.f32 %v896_v25, 6.0 }
 0x1b1   :  { %12777 = vst [vmem:[#allocation42_spill] sm:$0xff] %v6431_v6  ;;  %12778 = vst [vmem:[#allocation44_spill] sm:$0xff] %v6433_v3  ;;  %v6463_v0 = vmin.f32 %v897_v42, 6.0  ;;  %v1130_v35 = vrot.slane %v6413_v60, 7  ;;  %v1132_v9 = vrot.slane %v6417_v34, 7  ;;  %v1133_v41 = vrot.slane %v6421_v4, 7 }
 0x1b2   :  { %12779 = vst [vmem:[#allocation41_spill] sm:$0xff] %v6435_v14  ;;  %12780 = vst [vmem:[#allocation43_spill] sm:$0xff] %v6437_v15  ;;  %v1134_v11 = vrot.slane %v6425_v32, 7  ;;  %v1135_v56 = vrot.slane %v6429_v62, 7  ;;  %v1136_v51 = vrot.slane %v6433_v3, 7  ;;  %v1137_v50 = vrot.slane %v6437_v15, 7 }
 0x1b3   :  { %12781 = vst [vmem:[#allocation4_spill] sm:$0xff] %v6439_v53  ;;  %12782 = vst [vmem:[#allocation6_spill] sm:$0xff] %v6441_v13  ;;  %v1138_v54 = vrot.slane %v6441_v13, 7  ;;  %v1139_v52 = vrot.slane %v6445_v39, 7  ;;  %v1140_v25 = vrot.slane %v6449_v28, 7  ;;  %v1141_v42 = vrot.slane %v6453_v47, 7 }
 0x1b4   :  { %12783 = vst [vmem:[#allocation3_spill] sm:$0xff] %v6443_v23  ;;  %12784 = vst [vmem:[#allocation5_spill] sm:$0xff] %v6445_v39  ;;  %v1142_v34 = vrot.slane %v6455_v24, 7  ;;  %v1162_v4 = vrot.slane %v6415_v61, 7  ;;  %v1164_v32 = vrot.slane %v6419_v58, 7  ;;  %v1165_v62 = vrot.slane %v6423_v37, 7 }
 0x1b5   :  { %12785 = vst [vmem:[#allocation8_spill] sm:$0xff] %v6447_v49  ;;  %12786 = vst [vmem:[#allocation10_spill] sm:$0xff] %v6449_v28  ;;  %v1166_v3 = vrot.slane %v6427_v48, 7  ;;  %v1167_v15 = vrot.slane %v6431_v6, 7  ;;  %v1168_v13 = vrot.slane %v6435_v14, 7  ;;  %v1169_v39 = vrot.slane %v6439_v53, 7 }
 0x1b6   :  { %12787 = vst [vmem:[#allocation7_spill] sm:$0xff] %v6451_v17  ;;  %12788 = vst [vmem:[#allocation9_spill] sm:$0xff] %v6453_v47  ;;  %v1170_v28 = vrot.slane %v6443_v23, 7  ;;  %v1171_v47 = vrot.slane %v6447_v49, 7  ;;  %v1173_v61 = vrot.slane %v6457_v21, 7  ;;  %v1174_v58 = vrot.slane %v6459_v57, 7 }
 0x1b7   :  { %12789 = vst [vmem:[#allocation12_spill] sm:$0xff] %v6455_v24  ;;  %12790 = vst [vmem:[#allocation14_spill] sm:$0xff] %v6457_v21  ;;  %v1172_v24 = vrot.slane %v6451_v17, 7  ;;  %v1143_v14 = vrot.slane %v6461_v10, 7  ;;  %v1175_v53 = vrot.slane %v6463_v0, 7  ;;  %v6497_v23 = vsel %vm1179_vm2, %v1130_v35, %v1162_v4  ;;  %v12813_v48 = vld [vmem:[#allocation27_spill] sm:$0xff] }
 0x1b8   :  { %12791 = vst [vmem:[#allocation11_spill] sm:$0xff] %v6459_v57  ;;  %12792 = vst [vmem:[#allocation13_spill] sm:$0xff] %v6461_v10  ;;  %v6501_v17 = vsel %vm1179_vm2, %v1132_v9, %v1164_v32  ;;  %v6505_v57 = vsel %vm1179_vm2, %v1133_v41, %v1165_v62  ;;  %v6509_v60 = vsel %vm1179_vm2, %v1134_v11, %v1166_v3  ;;  %v12814_v37 = vld [vmem:[#allocation29_spill] sm:$0xff]  ;;  %v13092_v7 = vld [vmem:[#allocation42_spill] sm:$0xff] }
 0x1b9   :  { %12793 = vst [vmem:[#allocation74_spill] sm:$0xff] %v6463_v0  ;;  %12797 = vst [vmem:[#allocation75_spill] sm:$0xff] %v6497_v23  ;;  %v6513_v6 = vsel %vm1179_vm2, %v1135_v56, %v1167_v15  ;;  %v6517_v0 = vsel %vm1179_vm2, %v1136_v51, %v1168_v13  ;;  %v6521_v23 = vsel %vm1179_vm2, %v1137_v50, %v1169_v39 }
 0x1ba   :  { %12798 = vst [vmem:[#allocation76_spill] sm:$0xff] %v6501_v17  ;;  %12799 = vst [vmem:[#allocation77_spill] sm:$0xff] %v6505_v57  ;;  %v6525_v17 = vsel %vm1179_vm2, %v1138_v54, %v1170_v28  ;;  %v6529_v57 = vsel %vm1179_vm2, %v1139_v52, %v1171_v47  ;;  %v741_v36 = vsub.f32 %v12814_v37, %v5909_v8  ;;  %v12827_v37 = vld [vmem:[#allocation66_spill] sm:$0xff] }
 0x1bb   :  { %12800 = vst [vmem:[#allocation78_spill] sm:$0xff] %v6509_v60  ;;  %12801 = vst [vmem:[#allocation79_spill] sm:$0xff] %v6513_v6  ;;  %v6533_v60 = vsel %vm1179_vm2, %v1140_v25, %v1172_v24  ;;  %v6537_v6 = vsel %vm1179_vm2, %v1141_v42, %v1173_v61  ;;  %v6579_v5 = vmul.f32 %v5973_v63, %v12827_v37 }
 0x1bc   :  { %12802 = vst [vmem:[#allocation80_spill] sm:$0xff] %v6517_v0  ;;  %12803 = vst [vmem:[#allocation81_spill] sm:$0xff] %v6521_v23  ;;  %v6541_v0 = vsel %vm1179_vm2, %v1142_v34, %v1174_v58  ;;  %v12809_v23 = vld [vmem:[#allocation25_spill] sm:$0xff] }
 0x1bd   :  { %12804 = vst [vmem:[#allocation82_spill] sm:$0xff] %v6525_v17  ;;  %12805 = vst [vmem:[#allocation83_spill] sm:$0xff] %v6529_v57  ;;  %v737_v10 = vsub.f32 %v12809_v23, %v5909_v8  ;;  %v12810_v17 = vld [vmem:[#allocation28_spill] sm:$0xff]  ;;  %v12811_v57 = vld [vmem:[#allocation30_spill] sm:$0xff] }
 0x1be   :  { %12806 = vst [vmem:[#allocation84_spill] sm:$0xff] %v6533_v60  ;;  %12807 = vst [vmem:[#allocation85_spill] sm:$0xff] %v6537_v6  ;;  %v738_v21 = vsub.f32 %v12810_v17, %v5909_v8  ;;  %v739_v49 = vsub.f32 %v12811_v57, %v5909_v8  ;;  %v6551_v60 = vsel %vm1179_vm2, %v1143_v14, %v1175_v53  ;;  %v12818_v23 = vld [vmem:[#allocation60_spill] sm:$0xff]  ;;  %v12821_v57 = vld [vmem:[#allocation51_spill] sm:$0xff] }
 0x1bf   :  { %12808 = vst [vmem:[#allocation86_spill] sm:$0xff] %v6541_v0  ;;  %12812 = vst [vmem:[#allocation25_spill] sm:$0xff] %v6551_v60  ;;  %v740_v6 = vsub.f32 %v12813_v48, %v5909_v8  ;;  %v12815_v0 = vld [vmem:[#allocation62_spill] sm:$0xff]  ;;  %v6563_v17 = vmul.f32 %v12816_v27, %v12818_v23  ;;  %v6567_v31 = vmul.f32 %v12821_v57, %v12820_v40  ;;  %v12825_v48 = vld [vmem:[#allocation64_spill] sm:$0xff] }
 0x1c0   :  { %v6559_v55 = vmul.f32 %v12816_v27, %v12815_v0  ;;  %v6571_v60 = vmul.f32 %v12821_v57, %v12823_v30  ;;  %v6575_v45 = vmul.f32 %v5973_v63, %v12825_v48  ;;  %12828 = vst [vmem:[#allocation60_spill] sm:$0xff] %v6579_v5  ;;  %v12905_v5 = vld [vmem:[#allocation5_spill] sm:$0xff]  ;;  %v12906_v63 = vld [vmem:[#allocation10_spill] sm:$0xff] }
 0x1c1   :  { %12819 = vst [vmem:[#allocation30_spill] sm:$0xff] %v6563_v17  ;;  %12822 = vst [vmem:[#allocation27_spill] sm:$0xff] %v6567_v31  ;;  %v6587_v17 = vmul.f32 %v5975_v33, %v12818_v23  ;;  %v6591_v31 = vsel %vm1179_vm2, %v1162_v4, %v1130_v35  ;;  %v6607_v23 = vsel %vm1179_vm2, %v1167_v15, %v1135_v56  ;;  %v12841_v35 = vld [vmem:[#allocation63_spill] sm:$0xff]  ;;  %v12856_v56 = vld [vmem:[#allocation65_spill] sm:$0xff] }
 0x1c2   :  { %12817 = vst [vmem:[#allocation28_spill] sm:$0xff] %v6559_v55  ;;  %12824 = vst [vmem:[#allocation29_spill] sm:$0xff] %v6571_v60  ;;  %v6583_v55 = vmul.f32 %v5975_v33, %v12815_v0  ;;  %v6595_v60 = vsel %vm1179_vm2, %v1164_v32, %v1132_v9  ;;  %v6603_v0 = vsel %vm1179_vm2, %v1166_v3, %v1134_v11  ;;  %v12846_v9 = vld [vmem:[#allocation61_spill] sm:$0xff]  ;;  %v12850_v11 = vld [vmem:[#allocation58_spill] sm:$0xff] }
 0x1c3   :  { %12826 = vst [vmem:[#allocation62_spill] sm:$0xff] %v6575_v45  ;;  %12830 = vst [vmem:[#allocation57_spill] sm:$0xff] %v6587_v17  ;;  %v6599_v45 = vsel %vm1179_vm2, %v1165_v62, %v1133_v41  ;;  %v6611_v4 = vsel %vm1179_vm2, %v1168_v13, %v1136_v51  ;;  %v6615_v32 = vsel %vm1179_vm2, %v1169_v39, %v1137_v50  ;;  %v12858_v51 = vld [vmem:[#allocation67_spill] sm:$0xff]  ;;  %v12900_v17 = vld [vmem:[#allocation38_spill] sm:$0xff] }
 0x1c4   :  { %12829 = vst [vmem:[#allocation56_spill] sm:$0xff] %v6583_v55  ;;  %12831 = vst [vmem:[#allocation64_spill] sm:$0xff] %v6591_v31  ;;  %v6619_v62 = vsel %vm1179_vm2, %v1170_v28, %v1138_v54  ;;  %v6623_v3 = vsel %vm1179_vm2, %v1171_v47, %v1139_v52  ;;  %v6627_v15 = vsel %vm1179_vm2, %v1172_v24, %v1140_v25  ;;  %v12902_v55 = vld [vmem:[#allocation44_spill] sm:$0xff]  ;;  %v12907_v57 = vld [vmem:[#allocation9_spill] sm:$0xff] }
 0x1c5   :  { %12832 = vst [vmem:[#allocation66_spill] sm:$0xff] %v6595_v60  ;;  %12833 = vst [vmem:[#allocation87_spill] sm:$0xff] %v6599_v45  ;;  %v6631_v13 = vmul.f32 %v5975_v33, %v12841_v35  ;;  %v6635_v39 = vsel %vm1179_vm2, %v1173_v61, %v1141_v42  ;;  %v6639_v28 = vsel %vm1179_vm2, %v1174_v58, %v1142_v34  ;;  %v12852_v58 = vld [vmem:[#allocation59_spill] sm:$0xff]  ;;  %v1340_v27 = vrot.slane %v12907_v57, 1  ;;  %v12919_v45 = vld [vmem:[#allocation14_spill] sm:$0xff] }
 0x1c6   :  { %12834 = vst [vmem:[#allocation88_spill] sm:$0xff] %v6603_v0  ;;  %12835 = vst [vmem:[#allocation89_spill] sm:$0xff] %v6607_v23  ;;  %v6643_v47 = vsel %vm1179_vm2, %v1175_v53, %v1143_v14  ;;  %v6647_v24 = vmul.f32 %v5975_v33, %v12846_v9  ;;  %v6651_v41 = vmul.f32 %v5977_v20, %v12820_v40  ;;  %v12904_v33 = vld [vmem:[#allocation6_spill] sm:$0xff]  ;;  %v12917_v23 = vld [vmem:[#allocation8_spill] sm:$0xff] }
 0x1c7   :  { %12836 = vst [vmem:[#allocation90_spill] sm:$0xff] %v6611_v4  ;;  %12837 = vst [vmem:[#allocation91_spill] sm:$0xff] %v6615_v32  ;;  %v6655_v61 = vmul.f32 %v5977_v20, %v12823_v30  ;;  %v6659_v34 = vmul.f32 %v5977_v20, %v12850_v11  ;;  %v6663_v14 = vmul.f32 %v5977_v20, %v12852_v58  ;;  %v12903_v20 = vld [vmem:[#allocation43_spill] sm:$0xff]  ;;  %v12915_v32 = vld [vmem:[#allocation4_spill] sm:$0xff]  ;;  %v1370_v57 = vrot.slane %v12917_v23, 1 }
 0x1c8   :  { %12838 = vst [vmem:[#allocation92_spill] sm:$0xff] %v6619_v62  ;;  %12839 = vst [vmem:[#allocation93_spill] sm:$0xff] %v6623_v3  ;;  %v6667_v53 = vmul.f32 %v6168_v18, %v12825_v48  ;;  %v6671_v40 = vmul.f32 %v6168_v18, %v12827_v37  ;;  %v6675_v30 = vmul.f32 %v6168_v18, %v12856_v56  ;;  %v12913_v3 = vld [vmem:[#allocation42_spill] sm:$0xff]  ;;  %v12914_v62 = vld [vmem:[#allocation41_spill] sm:$0xff] }
 0x1c9   :  { %12840 = vst [vmem:[#allocation94_spill] sm:$0xff] %v6627_v15  ;;  %12842 = vst [vmem:[#allocation63_spill] sm:$0xff] %v6631_v13  ;;  %v6679_v50 = vmul.f32 %v6168_v18, %v12858_v51  ;;  %v12860_v54 = vsub.f32 %v12747_v46, %v5909_v8  ;;  %v12861_v25 = vsub.f32 %v12748_v19, %v5909_v8  ;;  %v12898_v13 = vld [vmem:[#allocation33_spill] sm:$0xff]  ;;  %v12912_v15 = vld [vmem:[#allocation40_spill] sm:$0xff] }
 0x1ca   :  { %12843 = vst [vmem:[#allocation95_spill] sm:$0xff] %v6635_v39  ;;  %12844 = vst [vmem:[#allocation96_spill] sm:$0xff] %v6639_v28  ;;  %v12862_v48 = vsub.f32 %v12749_v38, %v5909_v8  ;;  %v12863_v18 = vsub.f32 %v12750_v2, %v5909_v8  ;;  %v12864_v35 = vsub.f32 %v12751_v22, %v5909_v8  ;;  %v12910_v28 = vld [vmem:[#allocation35_spill] sm:$0xff]  ;;  %v12911_v39 = vld [vmem:[#allocation52_spill] sm:$0xff] }
 0x1cb   :  { %12845 = vst [vmem:[#allocation97_spill] sm:$0xff] %v6643_v47  ;;  %12847 = vst [vmem:[#allocation61_spill] sm:$0xff] %v6647_v24  ;;  %v6685_v52 = vmul.f32 %v12730_v44, %v12860_v54  ;;  %v6691_v42 = vmul.f32 %v12730_v44, %v12861_v25  ;;  %v12865_v9 = vsub.f32 %v12752_v1, %v5909_v8  ;;  %v1338_v24 = vrot.slane %v12905_v5, 1  ;;  %v12909_v47 = vld [vmem:[#allocation36_spill] sm:$0xff]  ;;  %v12916_v4 = vld [vmem:[#allocation3_spill] sm:$0xff] }
 0x1cc   :  { %12848 = vst [vmem:[#allocation98_spill] sm:$0xff] %v6651_v41  ;;  %12849 = vst [vmem:[#allocation99_spill] sm:$0xff] %v6655_v61  ;;  %v6697_v37 = vmul.f32 %v12730_v44, %v12862_v48  ;;  %v6703_v46 = vmul.f32 %v12730_v44, %v12863_v18  ;;  %v6709_v19 = vmul.f32 %v12730_v44, %v12864_v35  ;;  %v12872_v48 = vld [vmem:[#allocation16_spill] sm:$0xff]  ;;  %v12874_v35 = vld [vmem:[#allocation18_spill] sm:$0xff]  ;;  %v1368_v5 = vrot.slane %v12915_v32, 1 }
 0x1cd   :  { %12851 = vst [vmem:[#allocation58_spill] sm:$0xff] %v6659_v34  ;;  %12853 = vst [vmem:[#allocation59_spill] sm:$0xff] %v6663_v14  ;;  %v6715_v38 = vmul.f32 %v12730_v44, %v12865_v9  ;;  %v12866_v11 = vsub.f32 %v12753_v43, %v5909_v8  ;;  %v12867_v58 = vsub.f32 %v12754_v59, %v5909_v8  ;;  %v1331_v34 = vrot.slane %v12898_v13, 1  ;;  %v12899_v61 = vld [vmem:[#allocation37_spill] sm:$0xff]  ;;  %v12901_v41 = vld [vmem:[#allocation39_spill] sm:$0xff] }
 0x1ce   :  { %12854 = vst [vmem:[#allocation100_spill] sm:$0xff] %v6667_v53  ;;  %12855 = vst [vmem:[#allocation101_spill] sm:$0xff] %v6671_v40  ;;  %v12868_v56 = vsub.f32 %v12755_v29, %v5909_v8  ;;  %v12869_v51 = vsub.f32 %v12756_v26, %v5909_v8  ;;  %v12870_v54 = vsub.f32 %v12757_v12, %v5909_v8  ;;  %v12918_v0 = vld [vmem:[#allocation7_spill] sm:$0xff] }
 0x1cf   :  { %12857 = vst [vmem:[#allocation65_spill] sm:$0xff] %v6675_v30  ;;  %12859 = vst [vmem:[#allocation67_spill] sm:$0xff] %v6679_v50  ;;  %v6721_v2 = vmul.f32 %v12730_v44, %v12866_v11  ;;  %v6727_v22 = vmul.f32 %v12730_v44, %v12867_v58  ;;  %v12871_v25 = vsub.f32 %v12758_v16, %v5909_v8  ;;  %v12876_v11 = vld [vmem:[#allocation15_spill] sm:$0xff] }
 0x1d0   :  { %v6733_v1 = vmul.f32 %v12730_v44, %v12868_v56  ;;  %v6739_v43 = vmul.f32 %v12730_v44, %v12869_v51  ;;  %v6745_v59 = vmul.f32 %v12730_v44, %v12870_v54  ;;  %v12873_v18 = vsub.f32 %v12872_v48, %v5909_v8  ;;  %v12878_v56 = vld [vmem:[#allocation17_spill] sm:$0xff]  ;;  %v12920_v60 = vld [vmem:[#allocation11_spill] sm:$0xff] }
 0x1d1   :  { %v6751_v29 = vmul.f32 %v12730_v44, %v12871_v25  ;;  %v12875_v9 = vsub.f32 %v12874_v35, %v5909_v8  ;;  %v12877_v58 = vsub.f32 %v12876_v11, %v5909_v8  ;;  %v12879_v51 = vsub.f32 %v12878_v56, %v5909_v8  ;;  %v12880_v25 = vld [vmem:[#allocation20_spill] sm:$0xff]  ;;  %v12882_v35 = vld [vmem:[#allocation22_spill] sm:$0xff]  ;;  %v12921_v31 = vld [vmem:[#allocation31_spill] sm:$0xff] }
 0x1d2   :  { %v6757_v26 = vmul.f32 %v12730_v44, %v12873_v18  ;;  %v12881_v48 = vsub.f32 %v12880_v25, %v5909_v8 }
 0x1d3   :  { %v6763_v12 = vmul.f32 %v12730_v44, %v12875_v9  ;;  %v6769_v16 = vmul.f32 %v12730_v44, %v12877_v58  ;;  %v6775_v54 = vmul.f32 %v12730_v44, %v12879_v51  ;;  %v12883_v9 = vsub.f32 %v12882_v35, %v5909_v8  ;;  %v12884_v58 = vld [vmem:[#allocation19_spill] sm:$0xff]  ;;  %v12886_v51 = vld [vmem:[#allocation21_spill] sm:$0xff] }
 0x1d4   :  { %v6781_v18 = vmul.f32 %v12730_v44, %v12881_v48  ;;  %v12885_v50 = vsub.f32 %v12884_v58, %v5909_v8  ;;  %v12887_v30 = vsub.f32 %v12886_v51, %v5909_v8  ;;  %v12888_v48 = vld [vmem:[#allocation24_spill] sm:$0xff] }
 0x1d5   :  { %v6787_v11 = vmul.f32 %v12730_v44, %v12883_v9  ;;  %v12889_v40 = vsub.f32 %v12888_v48, %v5909_v8  ;;  %v12890_v9 = vld [vmem:[#allocation26_spill] sm:$0xff]  ;;  %v6823_v48 = vmul.f32 %v12730_v44, %v738_v21  ;;  %v1337_v21 = vrot.slane %v12904_v33, 1 }
 0x1d6   :  { %v6793_v56 = vmul.f32 %v12730_v44, %v12885_v50  ;;  %v6799_v25 = vmul.f32 %v12730_v44, %v12887_v30  ;;  %v12891_v53 = vsub.f32 %v12890_v9, %v5909_v8  ;;  %v12892_v50 = vld [vmem:[#allocation23_spill] sm:$0xff]  ;;  %v6820_v30 = vmul.f32 %v12730_v44, %v737_v10 }
 0x1d7   :  { %v6805_v35 = vmul.f32 %v12730_v44, %v12889_v40  ;;  %v12893_v14 = vsub.f32 %v12892_v50, %v5909_v8  ;;  %12894 = vst [vmem:[#allocation16_spill] sm:$0xff] %v6823_v48  ;;  %v6826_v40 = vmul.f32 %v12730_v44, %v739_v49  ;;  %v6829_v9 = vmul.f32 %v12730_v44, %v740_v6  ;;  %v12897_v8 = vld [vmem:[#allocation34_spill] sm:$0xff] }
 0x1d8   :  { %v6811_v58 = vmul.f32 %v12730_v44, %v12891_v53  ;;  %v6832_v53 = vmul.f32 %v12730_v44, %v741_v36  ;;  %v1329_v6 = vrot.slane %v12897_v8, 1  ;;  %v1333_v36 = vrot.slane %v12900_v17, 1  ;;  %v12908_v8 = vld [vmem:[#allocation12_spill] sm:$0xff] }
 0x1d9   :  { %v6817_v51 = vmul.f32 %v12730_v44, %v12893_v14  ;;  %12895 = vst [vmem:[#allocation18_spill] sm:$0xff] %v6826_v40  ;;  %12896 = vst [vmem:[#allocation15_spill] sm:$0xff] %v6829_v9  ;;  %v1332_v44 = vrot.slane %v12899_v61, 1  ;;  %v1334_v14 = vrot.slane %v12901_v41, 1  ;;  %v1335_v50 = vrot.slane %v12902_v55, 1  ;;  %v12922_v9 = vld [vmem:[#allocation13_spill] sm:$0xff] }
 0x1da   :  { %v1336_v10 = vrot.slane %v12903_v20, 1  ;;  %v1339_v49 = vrot.slane %v12906_v63, 1  ;;  %v1341_v13 = vrot.slane %v12908_v8, 1  ;;  %v1361_v61 = vrot.slane %v12909_v47, 1  ;;  %v12923_v40 = vld [vmem:[#allocation74_spill] sm:$0xff] }
 0x1db   :  { %v1363_v17 = vrot.slane %v12910_v28, 1  ;;  %v1364_v41 = vrot.slane %v12911_v39, 1  ;;  %v1365_v55 = vrot.slane %v12912_v15, 1  ;;  %v1366_v20 = vrot.slane %v12913_v3, 1 }
 0x1dc   :  { %v1367_v33 = vrot.slane %v12914_v62, 1  ;;  %v1369_v63 = vrot.slane %v12916_v4, 1  ;;  %v1371_v8 = vrot.slane %v12918_v0, 1  ;;  %v1372_v47 = vrot.slane %v12919_v45, 1 }
 0x1dd   :  { %v1373_v28 = vrot.slane %v12920_v60, 1  ;;  %v869_v39 = vmax.f32 %v6832_v53, 0.0  ;;  %v872_v15 = vmax.f32 %v12921_v31, 0.0  ;;  %v1342_v3 = vrot.slane %v12922_v9, 1 }
 0x1de   :  { %v1374_v62 = vrot.slane %v12923_v40, 1  ;;  %v6891_v32 = vsel %vm1378_vm4, %v1329_v6, %v1361_v61  ;;  %v6895_v23 = vsel %vm1378_vm4, %v1331_v34, %v1363_v17  ;;  %v6899_v45 = vsel %vm1378_vm4, %v1332_v44, %v1364_v41 }
 0x1df   :  { %12924 = vst [vmem:[#allocation17_spill] sm:$0xff] %v6891_v32  ;;  %12925 = vst [vmem:[#allocation20_spill] sm:$0xff] %v6895_v23  ;;  %v6903_v53 = vsel %vm1378_vm4, %v1333_v36, %v1365_v55  ;;  %v6907_v31 = vsel %vm1378_vm4, %v1334_v14, %v1366_v20  ;;  %v6911_v40 = vsel %vm1378_vm4, %v1335_v50, %v1367_v33  ;;  %v12950_v9 = vmax.f32 %v6721_v2, 0.0 }
 0x1e0   :  { %12926 = vst [vmem:[#allocation22_spill] sm:$0xff] %v6899_v45  ;;  %12927 = vst [vmem:[#allocation19_spill] sm:$0xff] %v6903_v53  ;;  %v6915_v32 = vsel %vm1378_vm4, %v1336_v10, %v1368_v5  ;;  %v6919_v23 = vsel %vm1378_vm4, %v1337_v21, %v1369_v63  ;;  %v6923_v45 = vsel %vm1378_vm4, %v1338_v24, %v1370_v57  ;;  %v12960_v2 = vmax.f32 %v6751_v29, 0.0 }
 0x1e1   :  { %12928 = vst [vmem:[#allocation21_spill] sm:$0xff] %v6907_v31  ;;  %12929 = vst [vmem:[#allocation24_spill] sm:$0xff] %v6911_v40  ;;  %v6927_v53 = vsel %vm1378_vm4, %v1339_v49, %v1371_v8  ;;  %v6931_v31 = vsel %vm1378_vm4, %v1340_v27, %v1372_v47  ;;  %v6935_v40 = vsel %vm1378_vm4, %v1341_v13, %v1373_v28 }
 0x1e2   :  { %12930 = vst [vmem:[#allocation26_spill] sm:$0xff] %v6915_v32  ;;  %12931 = vst [vmem:[#allocation23_spill] sm:$0xff] %v6919_v23  ;;  %v12937_v23 = vmax.f32 %v6685_v52, 0.0  ;;  %v12946_v52 = vmax.f32 %v6709_v19, 0.0  ;;  %v6968_v32 = vmin.f32 %v12950_v9, 6.0  ;;  %v12956_v19 = vmax.f32 %v6739_v43, 0.0 }
 0x1e3   :  { %12932 = vst [vmem:[#allocation31_spill] sm:$0xff] %v6923_v45  ;;  %12933 = vst [vmem:[#allocation102_spill] sm:$0xff] %v6927_v53  ;;  %v12939_v45 = vmax.f32 %v6691_v42, 0.0  ;;  %v6948_v53 = vsel %vm1378_vm4, %v1342_v3, %v1374_v62  ;;  %v12948_v42 = vmax.f32 %v6715_v38, 0.0  ;;  %v12958_v38 = vmax.f32 %v6745_v59, 0.0 }
 0x1e4   :  { %12934 = vst [vmem:[#allocation103_spill] sm:$0xff] %v6931_v31  ;;  %12935 = vst [vmem:[#allocation104_spill] sm:$0xff] %v6935_v40  ;;  %v6940_v60 = vmin.f32 %v12937_v23, 6.0  ;;  %v12942_v31 = vmax.f32 %v6697_v37, 0.0  ;;  %v12944_v40 = vmax.f32 %v6703_v46, 0.0  ;;  %v6960_v23 = vmin.f32 %v12946_v52, 6.0 }
 0x1e5   :  { %v6944_v0 = vmin.f32 %v12939_v45, 6.0  ;;  %12941 = vst [vmem:[#allocation107_spill] sm:$0xff] %v6948_v53  ;;  %v6964_v45 = vmin.f32 %v12948_v42, 6.0  ;;  %12951 = vst [vmem:[#allocation112_spill] sm:$0xff] %v6968_v32  ;;  %v12952_v37 = vmax.f32 %v6727_v22, 0.0  ;;  %v12954_v46 = vmax.f32 %v6733_v1, 0.0 }
 0x1e6   :  { %12938 = vst [vmem:[#allocation105_spill] sm:$0xff] %v6940_v60  ;;  %v6952_v4 = vmin.f32 %v12942_v31, 6.0  ;;  %v6956_v48 = vmin.f32 %v12944_v40, 6.0  ;;  %12947 = vst [vmem:[#allocation110_spill] sm:$0xff] %v6960_v23  ;;  %v6980_v52 = vmin.f32 %v12956_v19, 6.0  ;;  %v6984_v42 = vmin.f32 %v12958_v38, 6.0 }
 0x1e7   :  { %12940 = vst [vmem:[#allocation106_spill] sm:$0xff] %v6944_v0  ;;  %12949 = vst [vmem:[#allocation111_spill] sm:$0xff] %v6964_v45  ;;  %v6972_v31 = vmin.f32 %v12952_v37, 6.0  ;;  %v6976_v40 = vmin.f32 %v12954_v46, 6.0  ;;  %v6988_v9 = vmin.f32 %v12960_v2, 6.0  ;;  %v6992_v22 = vsel %vm1378_vm4, %v1361_v61, %v1329_v6  ;;  %v13002_v46 = vld [vmem:[#allocation18_spill] sm:$0xff] }
 0x1e8   :  { %12943 = vst [vmem:[#allocation108_spill] sm:$0xff] %v6952_v4  ;;  %12945 = vst [vmem:[#allocation109_spill] sm:$0xff] %v6956_v48  ;;  %v6996_v1 = vsel %vm1378_vm4, %v1363_v17, %v1331_v34  ;;  %v7000_v43 = vsel %vm1378_vm4, %v1364_v41, %v1332_v44  ;;  %v7004_v59 = vsel %vm1378_vm4, %v1365_v55, %v1333_v36  ;;  %v12972_v34 = vmax.f32 %v6757_v26, 0.0  ;;  %v12999_v36 = vld [vmem:[#allocation16_spill] sm:$0xff]  ;;  %v13005_v38 = vld [vmem:[#allocation15_spill] sm:$0xff] }
 0x1e9   :  { %12953 = vst [vmem:[#allocation113_spill] sm:$0xff] %v6972_v31  ;;  %12955 = vst [vmem:[#allocation114_spill] sm:$0xff] %v6976_v40  ;;  %v7008_v29 = vsel %vm1378_vm4, %v1366_v20, %v1334_v14  ;;  %v7012_v61 = vsel %vm1378_vm4, %v1367_v33, %v1335_v50  ;;  %v7016_v17 = vsel %vm1378_vm4, %v1368_v5, %v1336_v10  ;;  %v12979_v26 = vmax.f32 %v6769_v16, 0.0 }
 0x1ea   :  { %12957 = vst [vmem:[#allocation115_spill] sm:$0xff] %v6980_v52  ;;  %12959 = vst [vmem:[#allocation116_spill] sm:$0xff] %v6984_v42  ;;  %v7020_v41 = vsel %vm1378_vm4, %v1369_v63, %v1337_v21  ;;  %v7024_v55 = vsel %vm1378_vm4, %v1370_v57, %v1338_v24  ;;  %v7028_v20 = vsel %vm1378_vm4, %v1371_v8, %v1339_v49  ;;  %v7032_v33 = vmin.f32 %v12972_v34, 6.0 }
 0x1eb   :  { %12961 = vst [vmem:[#allocation117_spill] sm:$0xff] %v6988_v9  ;;  %12962 = vst [vmem:[#allocation118_spill] sm:$0xff] %v6992_v22  ;;  %v7036_v5 = vsel %vm1378_vm4, %v1372_v47, %v1340_v27  ;;  %v7040_v63 = vsel %vm1378_vm4, %v1373_v28, %v1341_v13  ;;  %v7044_v57 = vsel %vm1378_vm4, %v1374_v62, %v1342_v3  ;;  %v12977_v24 = vmax.f32 %v6763_v12, 0.0  ;;  %v13082_v22 = vld [vmem:[#allocation34_spill] sm:$0xff] }
 0x1ec   :  { %12963 = vst [vmem:[#allocation119_spill] sm:$0xff] %v6996_v1  ;;  %12964 = vst [vmem:[#allocation120_spill] sm:$0xff] %v7000_v43  ;;  %v7052_v14 = vmin.f32 %v12979_v26, 6.0  ;;  %v12981_v50 = vmax.f32 %v6775_v54, 0.0  ;;  %v12983_v47 = vmax.f32 %v6781_v18, 0.0  ;;  %v12985_v28 = vmax.f32 %v6787_v11, 0.0 }
 0x1ed   :  { %12965 = vst [vmem:[#allocation121_spill] sm:$0xff] %v7004_v59  ;;  %12966 = vst [vmem:[#allocation122_spill] sm:$0xff] %v7008_v29  ;;  %v7048_v8 = vmin.f32 %v12977_v24, 6.0  ;;  %v12987_v3 = vmax.f32 %v6793_v56, 0.0  ;;  %v12989_v16 = vmax.f32 %v6799_v25, 0.0  ;;  %v12991_v54 = vmax.f32 %v6805_v35, 0.0 }
 0x1ee   :  { %12967 = vst [vmem:[#allocation123_spill] sm:$0xff] %v7012_v61  ;;  %12968 = vst [vmem:[#allocation124_spill] sm:$0xff] %v7016_v17  ;;  %v7056_v27 = vmin.f32 %v12981_v50, 6.0  ;;  %v7060_v13 = vmin.f32 %v12983_v47, 6.0  ;;  %v7064_v62 = vmin.f32 %v12985_v28, 6.0  ;;  %v12993_v18 = vmax.f32 %v6811_v58, 0.0 }
 0x1ef   :  { %12969 = vst [vmem:[#allocation125_spill] sm:$0xff] %v7020_v41  ;;  %12970 = vst [vmem:[#allocation126_spill] sm:$0xff] %v7024_v55  ;;  %v7068_v12 = vmin.f32 %v12987_v3, 6.0  ;;  %v7072_v10 = vmin.f32 %v12989_v16, 6.0  ;;  %v7076_v21 = vmin.f32 %v12991_v54, 6.0  ;;  %v12995_v11 = vmax.f32 %v6817_v51, 0.0 }
 0x1f0   :  { %12971 = vst [vmem:[#allocation127_spill] sm:$0xff] %v7028_v20  ;;  %12973 = vst [vmem:[#allocation128_spill] sm:$0xff] %v7032_v33  ;;  %v7080_v49 = vmin.f32 %v12993_v18, 6.0  ;;  %v12997_v56 = vmax.f32 %v6820_v30, 0.0  ;;  %v13000_v25 = vmax.f32 %v12999_v36, 0.0  ;;  %v13003_v35 = vmax.f32 %v13002_v46, 0.0 }
 0x1f1   :  { %12974 = vst [vmem:[#allocation129_spill] sm:$0xff] %v7036_v5  ;;  %12975 = vst [vmem:[#allocation130_spill] sm:$0xff] %v7040_v63  ;;  %v7084_v6 = vmin.f32 %v12995_v11, 6.0  ;;  %v13006_v58 = vmax.f32 %v13005_v38, 0.0  ;;  %v7102_v34 = vmin.f32 %v869_v39, 6.0  ;;  %v7104_v51 = vmin.f32 %v872_v15, 6.0 }
 0x1f2   :  { %12976 = vst [vmem:[#allocation131_spill] sm:$0xff] %v7044_v57  ;;  %12978 = vst [vmem:[#allocation132_spill] sm:$0xff] %v7048_v8  ;;  %v7088_v44 = vmin.f32 %v12997_v56, 6.0  ;;  %v7092_v37 = vmin.f32 %v13000_v25, 6.0  ;;  %v7096_v19 = vmin.f32 %v13003_v35, 6.0  ;;  %v1116_v30 = vrot.slane %v6940_v60, 7 }
 0x1f3   :  { %12980 = vst [vmem:[#allocation133_spill] sm:$0xff] %v7052_v14  ;;  %12982 = vst [vmem:[#allocation134_spill] sm:$0xff] %v7056_v27  ;;  %v7100_v2 = vmin.f32 %v13006_v58, 6.0  ;;  %v1118_v26 = vrot.slane %v6960_v23, 7  ;;  %v1119_v50 = vrot.slane %v6968_v32, 7  ;;  %v1120_v47 = vrot.slane %v6976_v40, 7 }
 0x1f4   :  { %12984 = vst [vmem:[#allocation135_spill] sm:$0xff] %v7060_v13  ;;  %12986 = vst [vmem:[#allocation136_spill] sm:$0xff] %v7064_v62  ;;  %v1121_v28 = vrot.slane %v6984_v42, 7  ;;  %v1122_v3 = vrot.slane %v7032_v33, 7  ;;  %v1123_v16 = vrot.slane %v7052_v14, 7  ;;  %v1124_v39 = vrot.slane %v7060_v13, 7 }
 0x1f5   :  { %12988 = vst [vmem:[#allocation137_spill] sm:$0xff] %v7068_v12  ;;  %12990 = vst [vmem:[#allocation138_spill] sm:$0xff] %v7072_v10  ;;  %v1125_v15 = vrot.slane %v7068_v12, 7  ;;  %v1126_v54 = vrot.slane %v7076_v21, 7  ;;  %v1127_v18 = vrot.slane %v7084_v6, 7  ;;  %v1128_v11 = vrot.slane %v7092_v37, 7 }
 0x1f6   :  { %12992 = vst [vmem:[#allocation139_spill] sm:$0xff] %v7076_v21  ;;  %12994 = vst [vmem:[#allocation140_spill] sm:$0xff] %v7080_v49  ;;  %v1148_v56 = vrot.slane %v6944_v0, 7  ;;  %v1150_v25 = vrot.slane %v6964_v45, 7  ;;  %v1151_v46 = vrot.slane %v6972_v31, 7  ;;  %v1152_v35 = vrot.slane %v6980_v52, 7 }
 0x1f7   :  { %12996 = vst [vmem:[#allocation141_spill] sm:$0xff] %v7084_v6  ;;  %12998 = vst [vmem:[#allocation142_spill] sm:$0xff] %v7088_v44  ;;  %v1153_v38 = vrot.slane %v6988_v9, 7  ;;  %v1154_v58 = vrot.slane %v7048_v8, 7  ;;  %v1155_v24 = vrot.slane %v7056_v27, 7  ;;  %v1157_v53 = vrot.slane %v7072_v10, 7 }
 0x1f8   :  { %13001 = vst [vmem:[#allocation16_spill] sm:$0xff] %v7092_v37  ;;  %13004 = vst [vmem:[#allocation18_spill] sm:$0xff] %v7096_v19  ;;  %v1158_v57 = vrot.slane %v7080_v49, 7  ;;  %v1129_v36 = vrot.slane %v7100_v2, 7  ;;  %v1159_v63 = vrot.slane %v7088_v44, 7  ;;  %v1160_v5 = vrot.slane %v7096_v19, 7 }
 0x1f9   :  { %13007 = vst [vmem:[#allocation15_spill] sm:$0xff] %v7100_v2  ;;  %13008 = vst [vmem:[#allocation143_spill] sm:$0xff] %v7102_v34  ;;  %v1161_v20 = vrot.slane %v7102_v34, 7  ;;  %v13010_v55 = vld [vmem:[#allocation32_spill] sm:$0xff]  ;;  %v7140_v61 = vsel %vm1179_vm2, %v1116_v30, %v1148_v56  ;;  %v13014_v29 = vrot.slane %v6956_v48, 7  ;;  %v13015_v59 = vrot.slane %v6952_v4, 7 }
 0x1fa   :  { %13009 = vst [vmem:[#allocation144_spill] sm:$0xff] %v7104_v51  ;;  %v1156_v51 = vrot.slane %v7064_v62, 7  ;;  %v13011_v41 = vmax.f32 %v13010_v55, 0.0  ;;  %13013 = vst [vmem:[#allocation145_spill] sm:$0xff] %v7140_v61  ;;  %v7152_v1 = vsel %vm1179_vm2, %v1118_v26, %v1150_v25  ;;  %v7160_v55 = vsel %vm1179_vm2, %v1120_v47, %v1152_v35  ;;  %v13084_v13 = vld [vmem:[#allocation36_spill] sm:$0xff]  ;;  %v13085_v14 = vld [vmem:[#allocation33_spill] sm:$0xff] }
 0x1fb   :  { %v7148_v43 = vsel %vm1179_vm2, %v13015_v59, %v13014_v29  ;;  %13017 = vst [vmem:[#allocation147_spill] sm:$0xff] %v7152_v1  ;;  %13019 = vst [vmem:[#allocation149_spill] sm:$0xff] %v7160_v55  ;;  %v7164_v61 = vsel %vm1179_vm2, %v1121_v28, %v1153_v38  ;;  %v7168_v59 = vsel %vm1179_vm2, %v1122_v3, %v1154_v58  ;;  %v13086_v33 = vld [vmem:[#allocation35_spill] sm:$0xff]  ;;  %v13087_v42 = vld [vmem:[#allocation37_spill] sm:$0xff] }
 0x1fc   :  { %v7136_v17 = vmin.f32 %v13011_v41, 6.0  ;;  %13016 = vst [vmem:[#allocation146_spill] sm:$0xff] %v7148_v43  ;;  %v7156_v41 = vsel %vm1179_vm2, %v1119_v50, %v1151_v46  ;;  %13020 = vst [vmem:[#allocation150_spill] sm:$0xff] %v7164_v61  ;;  %v7172_v29 = vsel %vm1179_vm2, %v1123_v16, %v1155_v24  ;;  %v7176_v1 = vsel %vm1179_vm2, %v1124_v39, %v1156_v51  ;;  %v13088_v40 = vld [vmem:[#allocation52_spill] sm:$0xff]  ;;  %v13089_v32 = vld [vmem:[#allocation38_spill] sm:$0xff] }
 0x1fd   :  { %13018 = vst [vmem:[#allocation148_spill] sm:$0xff] %v7156_v41  ;;  %13021 = vst [vmem:[#allocation151_spill] sm:$0xff] %v7168_v59  ;;  %v7180_v41 = vsel %vm1179_vm2, %v1125_v15, %v1157_v53  ;;  %v7184_v55 = vsel %vm1179_vm2, %v1126_v54, %v1158_v57  ;;  %v7188_v61 = vsel %vm1179_vm2, %v1127_v18, %v1159_v63  ;;  %v13091_v23 = vld [vmem:[#allocation39_spill] sm:$0xff]  ;;  %v13093_v60 = vld [vmem:[#allocation44_spill] sm:$0xff] }
 0x1fe   :  { %13012 = vst [vmem:[#allocation32_spill] sm:$0xff] %v7136_v17  ;;  %13022 = vst [vmem:[#allocation152_spill] sm:$0xff] %v7172_v29  ;;  %v7192_v59 = vsel %vm1179_vm2, %v1128_v11, %v1160_v5  ;;  %v7196_v29 = vsel %vm1179_vm2, %v1129_v36, %v1161_v20  ;;  %v1218_v43 = vsel %vm1179_vm2, %v1153_v38, %v1121_v28  ;;  %v13050_v38 = vld [vmem:[#allocation89_spill] sm:$0xff]  ;;  %v13095_v48 = vld [vmem:[#allocation43_spill] sm:$0xff] }
 0x1ff   :  { %13023 = vst [vmem:[#allocation153_spill] sm:$0xff] %v7176_v1  ;;  %13024 = vst [vmem:[#allocation154_spill] sm:$0xff] %v7180_v41  ;;  %v1213_v1 = vsel %vm1179_vm2, %v1148_v56, %v1116_v30  ;;  %v1215_v41 = vsel %vm1179_vm2, %v1150_v25, %v1118_v26  ;;  %v1221_v30 = vsel %vm1179_vm2, %v1156_v51, %v1124_v39  ;;  %v13081_v17 = vld [vmem:[#allocation25_spill] sm:$0xff]  ;;  %v13096_v2 = vld [vmem:[#allocation4_spill] sm:$0xff] }
 0x200   :  { %13025 = vst [vmem:[#allocation155_spill] sm:$0xff] %v7184_v55  ;;  %13026 = vst [vmem:[#allocation156_spill] sm:$0xff] %v7188_v61  ;;  %v1216_v55 = vsel %vm1179_vm2, %v1151_v46, %v1119_v50  ;;  %v1217_v61 = vsel %vm1179_vm2, %v1152_v35, %v1120_v47  ;;  %v1222_v26 = vsel %vm1179_vm2, %v1157_v53, %v1125_v15  ;;  %v7230_v51 = vsel %vm1113_vm3, %v1215_v41, 0.0  ;;  %v13048_v46 = vld [vmem:[#allocation88_spill] sm:$0xff]  ;;  %v13052_v41 = vld [vmem:[#allocation90_spill] sm:$0xff] }
 0x201   :  { %13027 = vst [vmem:[#allocation157_spill] sm:$0xff] %v7192_v59  ;;  %13028 = vst [vmem:[#allocation158_spill] sm:$0xff] %v7196_v29  ;;  %v1219_v59 = vsel %vm1179_vm2, %v1154_v58, %v1122_v3  ;;  %v1220_v29 = vsel %vm1179_vm2, %v1155_v24, %v1123_v16  ;;  %v1223_v50 = vsel %vm1179_vm2, %v1158_v57, %v1126_v54  ;;  %v7226_v24 = vsel %vm1113_vm3, %v1213_v1, 0.0  ;;  %v13042_v54 = vld [vmem:[#allocation64_spill] sm:$0xff]  ;;  %v13094_v34 = vld [vmem:[#allocation41_spill] sm:$0xff] }
 0x202   :  { %v1224_v47 = vsel %vm1179_vm2, %v1159_v63, %v1127_v18  ;;  %v1225_v28 = vsel %vm1179_vm2, %v1160_v5, %v1128_v11  ;;  %v1226_v3 = vsel %vm1179_vm2, %v1161_v20, %v1129_v36  ;;  %13029 = vst [vmem:[#allocation159_spill] sm:$0xff] %v7226_v24  ;;  %13030 = vst [vmem:[#allocation160_spill] sm:$0xff] %v7230_v51  ;;  %v7234_v53 = vsel %vm1113_vm3, %v1216_v55, 0.0  ;;  %v13044_v11 = vld [vmem:[#allocation66_spill] sm:$0xff]  ;;  %v13046_v36 = vld [vmem:[#allocation87_spill] sm:$0xff] }
 0x203   :  { %13031 = vst [vmem:[#allocation161_spill] sm:$0xff] %v7234_v53  ;;  %v7238_v63 = vsel %vm1113_vm3, %v1217_v61, 0.0  ;;  %v7242_v5 = vsel %vm1113_vm3, %v1218_v43, 0.0  ;;  %v7246_v1 = vsel %vm1113_vm3, %v1219_v59, 0.0  ;;  %v7250_v20 = vsel %vm1113_vm3, %v1220_v29, 0.0  ;;  %v13054_v59 = vld [vmem:[#allocation91_spill] sm:$0xff] }
 0x204   :  { %13032 = vst [vmem:[#allocation162_spill] sm:$0xff] %v7238_v63  ;;  %13033 = vst [vmem:[#allocation163_spill] sm:$0xff] %v7242_v5  ;;  %v7254_v57 = vsel %vm1113_vm3, %v1221_v30, 0.0  ;;  %v7258_v61 = vsel %vm1113_vm3, %v1222_v26, 0.0  ;;  %v7262_v43 = vsel %vm1113_vm3, %v1223_v50, 0.0  ;;  %v7266_v16 = vsel %vm1113_vm3, %v1224_v47, 0.0 }
 0x205   :  { %13034 = vst [vmem:[#allocation164_spill] sm:$0xff] %v7246_v1  ;;  %13035 = vst [vmem:[#allocation165_spill] sm:$0xff] %v7250_v20  ;;  %v7270_v39 = vsel %vm1113_vm3, %v1225_v28, 0.0  ;;  %v7274_v15 = vsel %vm1113_vm3, %v1226_v3, 0.0  ;;  %v7279_v18 = vsel %vm1113_vm3, %v13042_v54, 0.0  ;;  %v7284_v56 = vsel %vm1113_vm3, %v13044_v11, 0.0 }
 0x206   :  { %13036 = vst [vmem:[#allocation166_spill] sm:$0xff] %v7254_v57  ;;  %13037 = vst [vmem:[#allocation167_spill] sm:$0xff] %v7258_v61  ;;  %v7289_v25 = vsel %vm1113_vm3, %v13046_v36, 0.0  ;;  %v7294_v35 = vsel %vm1113_vm3, %v13048_v46, 0.0  ;;  %v7299_v58 = vsel %vm1113_vm3, %v13050_v38, 0.0  ;;  %v7304_v55 = vsel %vm1113_vm3, %v13052_v41, 0.0 }
 0x207   :  { %13038 = vst [vmem:[#allocation168_spill] sm:$0xff] %v7262_v43  ;;  %13039 = vst [vmem:[#allocation169_spill] sm:$0xff] %v7266_v16  ;;  %v7309_v29 = vsel %vm1113_vm3, %v13054_v59, 0.0  ;;  %v13056_v30 = vld [vmem:[#allocation92_spill] sm:$0xff]  ;;  %v13058_v50 = vld [vmem:[#allocation93_spill] sm:$0xff] }
 0x208   :  { %13040 = vst [vmem:[#allocation170_spill] sm:$0xff] %v7270_v39  ;;  %13041 = vst [vmem:[#allocation171_spill] sm:$0xff] %v7274_v15  ;;  %v7314_v26 = vsel %vm1113_vm3, %v13056_v30, 0.0  ;;  %v7319_v47 = vsel %vm1113_vm3, %v13058_v50, 0.0  ;;  %v13060_v28 = vld [vmem:[#allocation94_spill] sm:$0xff]  ;;  %v13062_v54 = vld [vmem:[#allocation95_spill] sm:$0xff] }
 0x209   :  { %13043 = vst [vmem:[#allocation64_spill] sm:$0xff] %v7279_v18  ;;  %13045 = vst [vmem:[#allocation66_spill] sm:$0xff] %v7284_v56  ;;  %v7324_v3 = vsel %vm1113_vm3, %v13060_v28, 0.0  ;;  %v7329_v11 = vsel %vm1113_vm3, %v13062_v54, 0.0  ;;  %v13064_v36 = vld [vmem:[#allocation96_spill] sm:$0xff]  ;;  %v13066_v38 = vld [vmem:[#allocation97_spill] sm:$0xff] }
 0x20a   :  { %13047 = vst [vmem:[#allocation87_spill] sm:$0xff] %v7289_v25  ;;  %13049 = vst [vmem:[#allocation88_spill] sm:$0xff] %v7294_v35  ;;  %v7334_v46 = vsel %vm1113_vm3, %v13064_v36, 0.0  ;;  %v7339_v41 = vsel %vm1113_vm3, %v13066_v38, 0.0  ;;  %v13068_v38 = vld [vmem:[#allocation48_spill] sm:$0xff]  ;;  %v13069_v59 = vld [vmem:[#allocation75_spill] sm:$0xff] }
 0x20b   :  { %13051 = vst [vmem:[#allocation89_spill] sm:$0xff] %v7299_v58  ;;  %13053 = vst [vmem:[#allocation90_spill] sm:$0xff] %v7304_v55  ;;  %v1545_v43 = vmul.f32 %v13068_v38, %v7279_v18  ;;  %v1546_v30 = vmul.f32 %v13068_v38, %v13069_v59  ;;  %v1549_v50 = vmul.f32 %v13068_v38, %v7284_v56  ;;  %v13070_v28 = vld [vmem:[#allocation76_spill] sm:$0xff]  ;;  %v13071_v36 = vld [vmem:[#allocation77_spill] sm:$0xff] }
 0x20c   :  { %13055 = vst [vmem:[#allocation91_spill] sm:$0xff] %v7309_v29  ;;  %13057 = vst [vmem:[#allocation92_spill] sm:$0xff] %v7314_v26  ;;  %v1550_v54 = vmul.f32 %v13068_v38, %v13070_v28  ;;  %v1551_v15 = vmul.f32 %v13068_v38, %v7289_v25  ;;  %v1552_v39 = vmul.f32 %v13068_v38, %v13071_v36  ;;  %v13072_v61 = vld [vmem:[#allocation78_spill] sm:$0xff]  ;;  %v13073_v57 = vld [vmem:[#allocation79_spill] sm:$0xff] }
 0x20d   :  { %13059 = vst [vmem:[#allocation93_spill] sm:$0xff] %v7319_v47  ;;  %13061 = vst [vmem:[#allocation94_spill] sm:$0xff] %v7324_v3  ;;  %v1553_v16 = vmul.f32 %v13068_v38, %v7294_v35  ;;  %v1554_v18 = vmul.f32 %v13068_v38, %v13072_v61  ;;  %v1555_v59 = vmul.f32 %v13068_v38, %v7299_v58  ;;  %v13074_v20 = vld [vmem:[#allocation80_spill] sm:$0xff]  ;;  %v13075_v1 = vld [vmem:[#allocation81_spill] sm:$0xff] }
 0x20e   :  { %13063 = vst [vmem:[#allocation95_spill] sm:$0xff] %v7329_v11  ;;  %13065 = vst [vmem:[#allocation96_spill] sm:$0xff] %v7334_v46  ;;  %v1556_v56 = vmul.f32 %v13068_v38, %v13073_v57  ;;  %v1557_v28 = vmul.f32 %v13068_v38, %v7304_v55  ;;  %v1558_v25 = vmul.f32 %v13068_v38, %v13074_v20  ;;  %v13076_v5 = vld [vmem:[#allocation82_spill] sm:$0xff]  ;;  %v13077_v63 = vld [vmem:[#allocation83_spill] sm:$0xff] }
 0x20f   :  { %13067 = vst [vmem:[#allocation97_spill] sm:$0xff] %v7339_v41  ;;  %v1559_v36 = vmul.f32 %v13068_v38, %v7309_v29  ;;  %v1560_v35 = vmul.f32 %v13068_v38, %v13075_v1  ;;  %v1561_v61 = vmul.f32 %v13068_v38, %v7314_v26  ;;  %v1562_v58 = vmul.f32 %v13068_v38, %v13076_v5  ;;  %v13078_v53 = vld [vmem:[#allocation84_spill] sm:$0xff]  ;;  %v13079_v51 = vld [vmem:[#allocation85_spill] sm:$0xff]  ;;  %v13080_v24 = vld [vmem:[#allocation86_spill] sm:$0xff] }
 0x210   :  { %v1563_v57 = vmul.f32 %v13068_v38, %v7319_v47  ;;  %v1564_v55 = vmul.f32 %v13068_v38, %v13077_v63  ;;  %v1565_v20 = vmul.f32 %v13068_v38, %v7324_v3  ;;  %v1566_v29 = vmul.f32 %v13068_v38, %v13078_v53  ;;  %v13083_v53 = vld [vmem:[#allocation47_spill] sm:$0xff]  ;;  %v13097_v4 = vld [vmem:[#allocation6_spill] sm:$0xff]  ;;  %v13099_v44 = vld [vmem:[#allocation5_spill] sm:$0xff] }
 0x211   :  { %v1567_v1 = vmul.f32 %v13068_v38, %v7329_v11  ;;  %v1568_v26 = vmul.f32 %v13068_v38, %v13079_v51  ;;  %v1569_v5 = vmul.f32 %v13068_v38, %v7334_v46  ;;  %v1570_v47 = vmul.f32 %v13068_v38, %v13080_v24  ;;  %v13098_v19 = vld [vmem:[#allocation3_spill] sm:$0xff]  ;;  %v13100_v49 = vld [vmem:[#allocation8_spill] sm:$0xff]  ;;  %v13101_v10 = vld [vmem:[#allocation10_spill] sm:$0xff] }
 0x212   :  { %v1571_v63 = vmul.f32 %v13068_v38, %v7339_v41  ;;  %v1572_v3 = vmul.f32 %v13068_v38, %v13081_v17  ;;  %v1613_v12 = vmul.f32 %v13083_v53, %v13082_v22  ;;  %v1614_v11 = vmul.f32 %v13083_v53, %v13084_v13  ;;  %v13090_v38 = vld [vmem:[#allocation40_spill] sm:$0xff]  ;;  %v13102_v62 = vld [vmem:[#allocation7_spill] sm:$0xff]  ;;  %v13103_v27 = vld [vmem:[#allocation9_spill] sm:$0xff] }
 0x213   :  { %v1617_v51 = vmul.f32 %v13083_v53, %v13085_v14  ;;  %v1618_v46 = vmul.f32 %v13083_v53, %v13086_v33  ;;  %v1619_v24 = vmul.f32 %v13083_v53, %v13087_v42  ;;  %v1620_v41 = vmul.f32 %v13083_v53, %v13088_v40  ;;  %v13104_v8 = vld [vmem:[#allocation14_spill] sm:$0xff]  ;;  %v13105_v9 = vld [vmem:[#allocation12_spill] sm:$0xff]  ;;  %v13106_v52 = vld [vmem:[#allocation11_spill] sm:$0xff] }
 0x214   :  { %v1621_v17 = vmul.f32 %v13083_v53, %v13089_v32  ;;  %v1622_v22 = vmul.f32 %v13083_v53, %v13090_v38  ;;  %v1623_v13 = vmul.f32 %v13083_v53, %v13091_v23  ;;  %v1624_v14 = vmul.f32 %v13083_v53, %v13092_v7  ;;  %v13107_v31 = vld [vmem:[#allocation13_spill] sm:$0xff]  ;;  %v13108_v45 = vld [vmem:[#allocation74_spill] sm:$0xff] }
 0x215   :  { %v1625_v33 = vmul.f32 %v13083_v53, %v13093_v60  ;;  %v1626_v42 = vmul.f32 %v13083_v53, %v13094_v34  ;;  %v1627_v40 = vmul.f32 %v13083_v53, %v13095_v48  ;;  %v1628_v32 = vmul.f32 %v13083_v53, %v13096_v2 }
 0x216   :  { %v1629_v38 = vmul.f32 %v13083_v53, %v13097_v4  ;;  %v1630_v23 = vmul.f32 %v13083_v53, %v13098_v19  ;;  %v1631_v7 = vmul.f32 %v13083_v53, %v13099_v44  ;;  %v1632_v60 = vmul.f32 %v13083_v53, %v13100_v49 }
 0x217   :  { %v1633_v34 = vmul.f32 %v13083_v53, %v13101_v10  ;;  %v1634_v48 = vmul.f32 %v13083_v53, %v13102_v62  ;;  %v1635_v2 = vmul.f32 %v13083_v53, %v13103_v27  ;;  %v1636_v4 = vmul.f32 %v13083_v53, %v13104_v8 }
 0x218   :  { %v1637_v19 = vmul.f32 %v13083_v53, %v13105_v9  ;;  %v1638_v44 = vmul.f32 %v13083_v53, %v13106_v52  ;;  %v1639_v49 = vmul.f32 %v13083_v53, %v13107_v31  ;;  %v1640_v10 = vmul.f32 %v13083_v53, %v13108_v45  ;;  %v13207_v53 = vld [vmem:[#allocation130_spill] sm:$0xff] }
 0x219   :  { %v7454_v0 = vadd.f32 %v1613_v12, %v1545_v43  ;;  %v7456_v62 = vadd.f32 %v1614_v11, %v1546_v30  ;;  %v7458_v27 = vadd.f32 %v1617_v51, %v1549_v50  ;;  %v7460_v37 = vadd.f32 %v1618_v46, %v1550_v54 }
 0x21a   :  { %v7462_v8 = vadd.f32 %v1619_v24, %v1551_v15  ;;  %v7464_v9 = vadd.f32 %v1620_v41, %v1552_v39  ;;  %v7466_v6 = vadd.f32 %v1621_v17, %v1553_v16  ;;  %v7468_v52 = vadd.f32 %v1622_v22, %v1554_v18  ;;  %v13123_v41 = vld [vmem:[#allocation18_spill] sm:$0xff]  ;;  %v13127_v15 = vld [vmem:[#allocation143_spill] sm:$0xff]  ;;  %v13128_v16 = vld [vmem:[#allocation105_spill] sm:$0xff] }
 0x21b   :  { %v7470_v31 = vadd.f32 %v1623_v13, %v1555_v59  ;;  %v7472_v21 = vadd.f32 %v1624_v14, %v1556_v56  ;;  %v7474_v12 = vadd.f32 %v1625_v33, %v1557_v28  ;;  %v7476_v43 = vadd.f32 %v1626_v42, %v1558_v25  ;;  %v13118_v25 = vld [vmem:[#allocation134_spill] sm:$0xff]  ;;  %v13125_v28 = vld [vmem:[#allocation15_spill] sm:$0xff]  ;;  %v13135_v59 = vld [vmem:[#allocation112_spill] sm:$0xff] }
 0x21c   :  { %v7478_v51 = vadd.f32 %v1627_v40, %v1559_v36  ;;  %v7480_v11 = vadd.f32 %v1628_v32, %v1560_v35  ;;  %v7482_v24 = vadd.f32 %v1629_v38, %v1561_v61  ;;  %v7484_v39 = vadd.f32 %v1630_v23, %v1562_v58  ;;  %v13109_v23 = vld [vmem:[#allocation139_spill] sm:$0xff]  ;;  %v13119_v58 = vld [vmem:[#allocation136_spill] sm:$0xff]  ;;  %v13138_v38 = vld [vmem:[#allocation114_spill] sm:$0xff] }
 0x21d   :  { %v7486_v17 = vadd.f32 %v1631_v7, %v1563_v57  ;;  %v7488_v22 = vadd.f32 %v1632_v60, %v1564_v55  ;;  %v7490_v13 = vadd.f32 %v1633_v34, %v1565_v20  ;;  %v7492_v14 = vadd.f32 %v1634_v48, %v1566_v29  ;;  %v13110_v7 = vld [vmem:[#allocation141_spill] sm:$0xff]  ;;  %v13111_v60 = vld [vmem:[#allocation16_spill] sm:$0xff]  ;;  %v13112_v48 = vld [vmem:[#allocation106_spill] sm:$0xff] }
 0x21e   :  { %v7494_v33 = vadd.f32 %v1635_v2, %v1567_v1  ;;  %v7496_v42 = vadd.f32 %v1636_v4, %v1568_v26  ;;  %v7498_v40 = vadd.f32 %v1637_v19, %v1569_v5  ;;  %v7500_v32 = vadd.f32 %v1638_v44, %v1570_v47  ;;  %v13113_v2 = vld [vmem:[#allocation111_spill] sm:$0xff]  ;;  %v13114_v4 = vld [vmem:[#allocation113_spill] sm:$0xff]  ;;  %v13120_v29 = vld [vmem:[#allocation138_spill] sm:$0xff] }
 0x21f   :  { %v7502_v61 = vadd.f32 %v1639_v49, %v1571_v63  ;;  %v7507_v34 = vadd.f32 %v1640_v10, %v1572_v3  ;;  %v1347_v20 = vrot.slane %v13112_v48, 1  ;;  %v1349_v1 = vrot.slane %v13113_v2, 1  ;;  %v13115_v19 = vld [vmem:[#allocation115_spill] sm:$0xff]  ;;  %v13116_v44 = vld [vmem:[#allocation117_spill] sm:$0xff]  ;;  %v13117_v49 = vld [vmem:[#allocation132_spill] sm:$0xff] }
 0x220   :  { %v1350_v18 = vrot.slane %v13114_v4, 1  ;;  %v1351_v5 = vrot.slane %v13115_v19, 1  ;;  %v1352_v56 = vrot.slane %v13116_v44, 1  ;;  %v1353_v63 = vrot.slane %v13117_v49, 1  ;;  %v13121_v10 = vld [vmem:[#allocation140_spill] sm:$0xff]  ;;  %v13122_v3 = vld [vmem:[#allocation142_spill] sm:$0xff] }
 0x221   :  { %v1354_v35 = vrot.slane %v13118_v25, 1  ;;  %v13129_v45 = vrot.slane %v13128_v16, 1  ;;  %v13132_v26 = vld [vmem:[#allocation110_spill] sm:$0xff]  ;;  %v13136_v50 = vrot.slane %v13135_v59, 1  ;;  %v13139_v57 = vrot.slane %v13138_v38, 1  ;;  %v13155_v36 = vld [vmem:[#allocation137_spill] sm:$0xff] }
 0x222   :  { %v13133_v47 = vrot.slane %v13132_v26, 1  ;;  %v13156_v30 = vrot.slane %v13155_v36, 1  ;;  %v13161_v48 = vrot.slane %v13122_v3, 1  ;;  %v13220_v3 = vld [vmem:[#allocation31_spill] sm:$0xff]  ;;  %v13392_v25 = vld [vmem:[#allocation50_spill] sm:$0xff] }
 0x223   :  { %v7529_v55 = vsel %vm1378_vm4, %v13129_v45, %v1347_v20  ;;  %v7541_v54 = vsel %vm1378_vm4, %v13136_v50, %v1350_v18  ;;  %v7547_v49 = vsel %vm1378_vm4, %v13139_v57, %v1351_v5  ;;  %v13141_v45 = vld [vmem:[#allocation116_spill] sm:$0xff]  ;;  %v13147_v50 = vld [vmem:[#allocation133_spill] sm:$0xff]  ;;  %v13150_v57 = vrot.slane %v13119_v58, 1 }
 0x224   :  { %13131 = vst [vmem:[#allocation172_spill] sm:$0xff] %v7529_v55  ;;  %v7535_v46 = vsel %vm1378_vm4, %v13133_v47, %v1349_v1  ;;  %13137 = vst [vmem:[#allocation174_spill] sm:$0xff] %v7541_v54  ;;  %v13142_v55 = vrot.slane %v13141_v45, 1  ;;  %v13144_v47 = vld [vmem:[#allocation128_spill] sm:$0xff]  ;;  %v13148_v54 = vrot.slane %v13147_v50, 1 }
 0x225   :  { %13134 = vst [vmem:[#allocation173_spill] sm:$0xff] %v7535_v46  ;;  %13140 = vst [vmem:[#allocation175_spill] sm:$0xff] %v7547_v49  ;;  %v13145_v46 = vrot.slane %v13144_v47, 1  ;;  %v13151_v49 = vld [vmem:[#allocation135_spill] sm:$0xff] }
 0x226   :  { %v7553_v44 = vsel %vm1378_vm4, %v13142_v55, %v1352_v56  ;;  %v7565_v4 = vsel %vm1378_vm4, %v13148_v54, %v1354_v35  ;;  %v13152_v2 = vrot.slane %v13151_v49, 1  ;;  %v13159_v54 = vrot.slane %v13109_v23, 1  ;;  %v13223_v23 = vld [vmem:[#allocation104_spill] sm:$0xff] }
 0x227   :  { %13143 = vst [vmem:[#allocation176_spill] sm:$0xff] %v7553_v44  ;;  %v7559_v19 = vsel %vm1378_vm4, %v13145_v46, %v1353_v63  ;;  %13149 = vst [vmem:[#allocation178_spill] sm:$0xff] %v7565_v4  ;;  %v13154_v44 = vrot.slane %v13120_v29, 1  ;;  %v13224_v29 = vld [vmem:[#allocation107_spill] sm:$0xff] }
 0x228   :  { %13146 = vst [vmem:[#allocation177_spill] sm:$0xff] %v7559_v19  ;;  %v7573_v55 = vsel %vm1378_vm4, %v13152_v2, %v13150_v57  ;;  %v13158_v19 = vrot.slane %v13121_v10, 1  ;;  %v13162_v2 = vrot.slane %v13110_v7, 1  ;;  %v13221_v7 = vld [vmem:[#allocation102_spill] sm:$0xff]  ;;  %v13222_v10 = vld [vmem:[#allocation103_spill] sm:$0xff] }
 0x229   :  { %13153 = vst [vmem:[#allocation179_spill] sm:$0xff] %v7573_v55  ;;  %v7581_v46 = vsel %vm1378_vm4, %v13156_v30, %v13154_v44  ;;  %v13164_v55 = vrot.slane %v13123_v41, 1  ;;  %v13165_v44 = vrot.slane %v13111_v60, 1  ;;  %v13218_v41 = vld [vmem:[#allocation26_spill] sm:$0xff]  ;;  %v13219_v60 = vld [vmem:[#allocation23_spill] sm:$0xff] }
 0x22a   :  { %13157 = vst [vmem:[#allocation180_spill] sm:$0xff] %v7581_v46  ;;  %v7589_v4 = vsel %vm1378_vm4, %v13159_v54, %v13158_v19  ;;  %v7597_v57 = vsel %vm1378_vm4, %v13162_v2, %v13161_v48  ;;  %v13167_v46 = vrot.slane %v13127_v15, 1  ;;  %v13168_v19 = vrot.slane %v13125_v28, 1  ;;  %v13216_v15 = vld [vmem:[#allocation21_spill] sm:$0xff]  ;;  %v13217_v28 = vld [vmem:[#allocation24_spill] sm:$0xff] }
 0x22b   :  { %13160 = vst [vmem:[#allocation181_spill] sm:$0xff] %v7589_v4  ;;  %13163 = vst [vmem:[#allocation182_spill] sm:$0xff] %v7597_v57  ;;  %v7605_v30 = vsel %vm1378_vm4, %v13165_v44, %v13164_v55  ;;  %v13170_v4 = vrot.slane %v13128_v16, 1  ;;  %v13172_v2 = vrot.slane %v13132_v26, 1  ;;  %v13174_v44 = vrot.slane %v13135_v59, 1  ;;  %v13187_v57 = vld [vmem:[#allocation119_spill] sm:$0xff] }
 0x22c   :  { %13166 = vst [vmem:[#allocation183_spill] sm:$0xff] %v7605_v30  ;;  %v7613_v54 = vsel %vm1378_vm4, %v13168_v19, %v13167_v46  ;;  %v13176_v46 = vrot.slane %v13138_v38, 1  ;;  %v13201_v38 = vld [vmem:[#allocation126_spill] sm:$0xff]  ;;  %v13203_v59 = vld [vmem:[#allocation127_spill] sm:$0xff]  ;;  %v13205_v26 = vld [vmem:[#allocation129_spill] sm:$0xff] }
 0x22d   :  { %13169 = vst [vmem:[#allocation184_spill] sm:$0xff] %v7613_v54  ;;  %v7619_v48 = vsel %vm1378_vm4, %v1347_v20, %v13170_v4  ;;  %v7625_v55 = vsel %vm1378_vm4, %v1349_v1, %v13172_v2  ;;  %v7631_v30 = vsel %vm1378_vm4, %v1350_v18, %v13174_v44  ;;  %v13178_v20 = vrot.slane %v13141_v45, 1  ;;  %v13199_v45 = vld [vmem:[#allocation125_spill] sm:$0xff]  ;;  %v13209_v16 = vld [vmem:[#allocation131_spill] sm:$0xff] }
 0x22e   :  { %13171 = vst [vmem:[#allocation185_spill] sm:$0xff] %v7619_v48  ;;  %13173 = vst [vmem:[#allocation186_spill] sm:$0xff] %v7625_v55  ;;  %v7637_v19 = vsel %vm1378_vm4, %v1351_v5, %v13176_v46  ;;  %v13180_v1 = vrot.slane %v13144_v47, 1  ;;  %v13182_v18 = vrot.slane %v13147_v50, 1  ;;  %v13184_v5 = vld [vmem:[#allocation118_spill] sm:$0xff]  ;;  %v13195_v50 = vld [vmem:[#allocation123_spill] sm:$0xff] }
 0x22f   :  { %13175 = vst [vmem:[#allocation187_spill] sm:$0xff] %v7631_v30  ;;  %13177 = vst [vmem:[#allocation188_spill] sm:$0xff] %v7637_v19  ;;  %v7643_v4 = vsel %vm1378_vm4, %v1352_v56, %v13178_v20  ;;  %v7660_v54 = vsel %vm1313_vm5, %v13184_v5, 0.0  ;;  %v7665_v56 = vsel %vm1313_vm5, %v13187_v57, 0.0  ;;  %v13189_v20 = vld [vmem:[#allocation120_spill] sm:$0xff]  ;;  %v7685_v57 = vsel %vm1313_vm5, %v13195_v50, 0.0 }
 0x230   :  { %13179 = vst [vmem:[#allocation189_spill] sm:$0xff] %v7643_v4  ;;  %v7649_v2 = vsel %vm1378_vm4, %v1353_v63, %v13180_v1  ;;  %v7655_v44 = vsel %vm1378_vm4, %v1354_v35, %v13182_v18  ;;  %13186 = vst [vmem:[#allocation118_spill] sm:$0xff] %v7660_v54  ;;  %v7670_v63 = vsel %vm1313_vm5, %v13189_v20, 0.0  ;;  %v13191_v1 = vld [vmem:[#allocation121_spill] sm:$0xff]  ;;  %v13193_v18 = vld [vmem:[#allocation122_spill] sm:$0xff]  ;;  %v7705_v50 = vsel %vm1313_vm5, %v13203_v59, 0.0 }
 0x231   :  { %13181 = vst [vmem:[#allocation190_spill] sm:$0xff] %v7649_v2  ;;  %13183 = vst [vmem:[#allocation191_spill] sm:$0xff] %v7655_v44  ;;  %v7675_v35 = vsel %vm1313_vm5, %v13191_v1, 0.0  ;;  %v7680_v5 = vsel %vm1313_vm5, %v13193_v18, 0.0  ;;  %v13197_v47 = vld [vmem:[#allocation124_spill] sm:$0xff]  ;;  %v7695_v1 = vsel %vm1313_vm5, %v13199_v45, 0.0 }
 0x232   :  { %13188 = vst [vmem:[#allocation119_spill] sm:$0xff] %v7665_v56  ;;  %13190 = vst [vmem:[#allocation120_spill] sm:$0xff] %v7670_v63  ;;  %v7690_v20 = vsel %vm1313_vm5, %v13197_v47, 0.0  ;;  %v7700_v18 = vsel %vm1313_vm5, %v13201_v38, 0.0  ;;  %v7710_v47 = vsel %vm1313_vm5, %v13205_v26, 0.0  ;;  %v7715_v45 = vsel %vm1313_vm5, %v13207_v53, 0.0 }
 0x233   :  { %13192 = vst [vmem:[#allocation121_spill] sm:$0xff] %v7675_v35  ;;  %13194 = vst [vmem:[#allocation122_spill] sm:$0xff] %v7680_v5  ;;  %v7720_v38 = vsel %vm1313_vm5, %v13209_v16, 0.0  ;;  %v13211_v44 = vld [vmem:[#allocation17_spill] sm:$0xff]  ;;  %v13213_v19 = vld [vmem:[#allocation20_spill] sm:$0xff] }
 0x234   :  { %13196 = vst [vmem:[#allocation123_spill] sm:$0xff] %v7685_v57  ;;  %13198 = vst [vmem:[#allocation124_spill] sm:$0xff] %v7690_v20  ;;  %v13212_v2 = vld [vmem:[#allocation49_spill] sm:$0xff]  ;;  %v13214_v55 = vld [vmem:[#allocation22_spill] sm:$0xff] }
 0x235   :  { %13200 = vst [vmem:[#allocation125_spill] sm:$0xff] %v7695_v1  ;;  %13202 = vst [vmem:[#allocation126_spill] sm:$0xff] %v7700_v18  ;;  %v1745_v4 = vmul.f32 %v13212_v2, %v13211_v44  ;;  %v1746_v59 = vmul.f32 %v13212_v2, %v7660_v54  ;;  %v1749_v26 = vmul.f32 %v13212_v2, %v13213_v19  ;;  %v13215_v16 = vld [vmem:[#allocation19_spill] sm:$0xff] }
 0x236   :  { %13204 = vst [vmem:[#allocation127_spill] sm:$0xff] %v7705_v50  ;;  %13206 = vst [vmem:[#allocation129_spill] sm:$0xff] %v7710_v47  ;;  %v1750_v30 = vmul.f32 %v13212_v2, %v7665_v56  ;;  %v1751_v53 = vmul.f32 %v13212_v2, %v13214_v55  ;;  %v1752_v46 = vmul.f32 %v13212_v2, %v7670_v63 }
 0x237   :  { %13208 = vst [vmem:[#allocation130_spill] sm:$0xff] %v7715_v45  ;;  %13210 = vst [vmem:[#allocation131_spill] sm:$0xff] %v7720_v38  ;;  %v1753_v48 = vmul.f32 %v13212_v2, %v13215_v16  ;;  %v1754_v44 = vmul.f32 %v13212_v2, %v7675_v35  ;;  %v1755_v54 = vmul.f32 %v13212_v2, %v13216_v15 }
 0x238   :  { %v1756_v19 = vmul.f32 %v13212_v2, %v7680_v5  ;;  %v1757_v56 = vmul.f32 %v13212_v2, %v13217_v28  ;;  %v1758_v55 = vmul.f32 %v13212_v2, %v7685_v57  ;;  %v1759_v63 = vmul.f32 %v13212_v2, %v13218_v41 }
 0x239   :  { %v1760_v16 = vmul.f32 %v13212_v2, %v7690_v20  ;;  %v1761_v35 = vmul.f32 %v13212_v2, %v13219_v60  ;;  %v1762_v15 = vmul.f32 %v13212_v2, %v7695_v1  ;;  %v1763_v5 = vmul.f32 %v13212_v2, %v13220_v3 }
 0x23a   :  { %v1764_v28 = vmul.f32 %v13212_v2, %v7700_v18  ;;  %v1765_v57 = vmul.f32 %v13212_v2, %v13221_v7  ;;  %v1766_v41 = vmul.f32 %v13212_v2, %v7705_v50  ;;  %v1767_v20 = vmul.f32 %v13212_v2, %v13222_v10 }
 0x23b   :  { %v1768_v60 = vmul.f32 %v13212_v2, %v7710_v47  ;;  %v1769_v1 = vmul.f32 %v13212_v2, %v13223_v23  ;;  %v1770_v3 = vmul.f32 %v13212_v2, %v7715_v45  ;;  %v1771_v18 = vmul.f32 %v13212_v2, %v13224_v29 }
 0x23c   :  { %v1772_v7 = vmul.f32 %v13212_v2, %v7720_v38  ;;  %v7775_v50 = vadd.f32 %v1745_v4, %v7454_v0  ;;  %v7778_v10 = vadd.f32 %v1746_v59, %v7456_v62  ;;  %v7781_v47 = vadd.f32 %v1749_v26, %v7458_v27  ;;  %v13262_v4 = vld [vmem:[#allocation141_spill] sm:$0xff]  ;;  %v13271_v26 = vld [vmem:[#allocation15_spill] sm:$0xff] }
 0x23d   :  { %v7784_v23 = vadd.f32 %v1750_v30, %v7460_v37  ;;  %v7787_v45 = vadd.f32 %v1751_v53, %v7462_v8  ;;  %v7790_v29 = vadd.f32 %v1752_v46, %v7464_v9  ;;  %v7793_v38 = vadd.f32 %v1753_v48, %v7466_v6  ;;  %v13264_v46 = vld [vmem:[#allocation142_spill] sm:$0xff] }
 0x23e   :  { %13225 = vst [vmem:[#allocation192_spill] sm:$0xff] %v7775_v50  ;;  %13226 = vst [vmem:[#allocation193_spill] sm:$0xff] %v7778_v10  ;;  %v7796_v0 = vadd.f32 %v1754_v44, %v7468_v52  ;;  %v7799_v62 = vadd.f32 %v1755_v54, %v7470_v31  ;;  %v7802_v27 = vadd.f32 %v1756_v19, %v7472_v21  ;;  %v13260_v54 = vld [vmem:[#allocation140_spill] sm:$0xff]  ;;  %v13263_v44 = vrot.slane %v13262_v4, 1  ;;  %v13337_v50 = vld [vmem:[#allocation170_spill] sm:$0xff] }
 0x23f   :  { %13227 = vst [vmem:[#allocation194_spill] sm:$0xff] %v7781_v47  ;;  %13228 = vst [vmem:[#allocation195_spill] sm:$0xff] %v7784_v23  ;;  %v7805_v37 = vadd.f32 %v1757_v56, %v7474_v12  ;;  %v7808_v8 = vadd.f32 %v1758_v55, %v7476_v43  ;;  %v7811_v9 = vadd.f32 %v1759_v63, %v7478_v51  ;;  %v13261_v48 = vrot.slane %v13260_v54, 1  ;;  %v13331_v23 = vld [vmem:[#allocation155_spill] sm:$0xff]  ;;  %v13333_v47 = vld [vmem:[#allocation169_spill] sm:$0xff] }
 0x240   :  { %13229 = vst [vmem:[#allocation196_spill] sm:$0xff] %v7787_v45  ;;  %13230 = vst [vmem:[#allocation197_spill] sm:$0xff] %v7790_v29  ;;  %v7814_v6 = vadd.f32 %v1760_v16, %v7480_v11  ;;  %v7817_v52 = vadd.f32 %v1761_v35, %v7482_v24  ;;  %v7820_v31 = vadd.f32 %v1762_v15, %v7484_v39  ;;  %v13265_v56 = vrot.slane %v13264_v46, 1  ;;  %v13266_v35 = vld [vmem:[#allocation16_spill] sm:$0xff]  ;;  %v13273_v16 = vld [vmem:[#allocation143_spill] sm:$0xff] }
 0x241   :  { %13231 = vst [vmem:[#allocation198_spill] sm:$0xff] %v7793_v38  ;;  %13232 = vst [vmem:[#allocation199_spill] sm:$0xff] %v7796_v0  ;;  %v7823_v21 = vadd.f32 %v1763_v5, %v7486_v17  ;;  %v7826_v12 = vadd.f32 %v1764_v28, %v7488_v22  ;;  %v7829_v43 = vadd.f32 %v1765_v57, %v7490_v13  ;;  %v13267_v5 = vrot.slane %v13266_v35, 1  ;;  %v13268_v57 = vld [vmem:[#allocation18_spill] sm:$0xff]  ;;  %v13323_v0 = vld [vmem:[#allocation153_spill] sm:$0xff] }
 0x242   :  { %13233 = vst [vmem:[#allocation200_spill] sm:$0xff] %v7799_v62  ;;  %13234 = vst [vmem:[#allocation201_spill] sm:$0xff] %v7802_v27  ;;  %v7832_v51 = vadd.f32 %v1766_v41, %v7492_v14  ;;  %v7835_v11 = vadd.f32 %v1767_v20, %v7494_v33  ;;  %v7838_v24 = vadd.f32 %v1768_v60, %v7496_v42  ;;  %v13251_v14 = vld [vmem:[#allocation144_spill] sm:$0xff]  ;;  %v13253_v42 = vrot.slane %v13151_v49, 1  ;;  %v13321_v62 = vld [vmem:[#allocation166_spill] sm:$0xff] }
 0x243   :  { %13235 = vst [vmem:[#allocation202_spill] sm:$0xff] %v7805_v37  ;;  %13236 = vst [vmem:[#allocation203_spill] sm:$0xff] %v7808_v8  ;;  %v7841_v39 = vadd.f32 %v1769_v1, %v7498_v40  ;;  %v7844_v17 = vadd.f32 %v1770_v3, %v7500_v32  ;;  %v7847_v22 = vadd.f32 %v1771_v18, %v7502_v61  ;;  %v1922_v15 = vrot.slane %v13251_v14, 7  ;;  %v13252_v41 = vld [vmem:[#allocation32_spill] sm:$0xff]  ;;  %v13256_v61 = vld [vmem:[#allocation138_spill] sm:$0xff] }
 0x244   :  { %13237 = vst [vmem:[#allocation204_spill] sm:$0xff] %v7811_v9  ;;  %13238 = vst [vmem:[#allocation205_spill] sm:$0xff] %v7814_v6  ;;  %v7850_v13 = vadd.f32 %v1772_v7, %v7507_v34  ;;  %v1954_v33 = vrot.slane %v13252_v41, 7  ;;  %v2114_v28 = vrot.slane %v13251_v14, 1  ;;  %v13254_v40 = vrot.slane %v13119_v58, 1  ;;  %v13258_v34 = vld [vmem:[#allocation139_spill] sm:$0xff] }
 0x245   :  { %13239 = vst [vmem:[#allocation206_spill] sm:$0xff] %v7817_v52  ;;  %13240 = vst [vmem:[#allocation207_spill] sm:$0xff] %v7820_v31  ;;  %v13255_v60 = vrot.slane %v13155_v36, 1  ;;  %v13257_v3 = vrot.slane %v13256_v61, 1  ;;  %v13259_v30 = vrot.slane %v13258_v34, 1  ;;  %v2146_v19 = vrot.slane %v13252_v41, 1 }
 0x246   :  { %13241 = vst [vmem:[#allocation208_spill] sm:$0xff] %v7823_v21  ;;  %13242 = vst [vmem:[#allocation209_spill] sm:$0xff] %v7826_v12  ;;  %v1420_v32 = vsel %vm1378_vm4, %v13254_v40, %v13253_v42  ;;  %v1423_v63 = vsel %vm1378_vm4, %v13265_v56, %v13263_v44  ;;  %v13269_v20 = vrot.slane %v13268_v57, 1  ;;  %v7888_v18 = vsel %vm1179_vm2, %v1922_v15, %v1954_v33  ;;  %v13282_v56 = vld [vmem:[#allocation187_spill] sm:$0xff]  ;;  %v13304_v12 = vld [vmem:[#allocation161_spill] sm:$0xff] }
 0x247   :  { %13243 = vst [vmem:[#allocation210_spill] sm:$0xff] %v7829_v43  ;;  %13244 = vst [vmem:[#allocation211_spill] sm:$0xff] %v7832_v51  ;;  %v1421_v7 = vsel %vm1378_vm4, %v13257_v3, %v13255_v60  ;;  %v1422_v55 = vsel %vm1378_vm4, %v13261_v48, %v13259_v30  ;;  %v7892_v59 = vsel %vm1179_vm2, %v1954_v33, %v1922_v15  ;;  %v13272_v53 = vrot.slane %v13271_v26, 1  ;;  %v13275_v60 = vld [vmem:[#allocation185_spill] sm:$0xff]  ;;  %v13280_v33 = vld [vmem:[#allocation186_spill] sm:$0xff] }
 0x248   :  { %13245 = vst [vmem:[#allocation212_spill] sm:$0xff] %v7835_v11  ;;  %13246 = vst [vmem:[#allocation213_spill] sm:$0xff] %v7838_v24  ;;  %v1424_v1 = vsel %vm1378_vm4, %v13269_v20, %v13267_v5  ;;  %v13274_v42 = vrot.slane %v13273_v16, 1  ;;  %v7903_v30 = vsel %vm1313_vm5, %v13275_v60, 0.0  ;;  %v7907_v48 = vsel %vm1378_vm4, %v2114_v28, %v2146_v19  ;;  %v13284_v20 = vld [vmem:[#allocation188_spill] sm:$0xff]  ;;  %v13303_v43 = vld [vmem:[#allocation147_spill] sm:$0xff] }
 0x249   :  { %13247 = vst [vmem:[#allocation214_spill] sm:$0xff] %v7841_v39  ;;  %13248 = vst [vmem:[#allocation215_spill] sm:$0xff] %v7844_v17  ;;  %v7911_v15 = vsel %vm1378_vm4, %v2146_v19, %v2114_v28  ;;  %v7916_v44 = vsel %vm1313_vm5, %v13280_v33, 0.0  ;;  %v7921_v5 = vsel %vm1313_vm5, %v13282_v56, 0.0  ;;  %v13288_v19 = vld [vmem:[#allocation190_spill] sm:$0xff]  ;;  %v13290_v33 = vld [vmem:[#allocation191_spill] sm:$0xff] }
 0x24a   :  { %13249 = vst [vmem:[#allocation216_spill] sm:$0xff] %v7847_v22  ;;  %13250 = vst [vmem:[#allocation217_spill] sm:$0xff] %v7850_v13  ;;  %v1425_v40 = vsel %vm1378_vm4, %v13274_v42, %v13272_v53  ;;  %v7926_v53 = vsel %vm1313_vm5, %v13284_v20, 0.0  ;;  %v13286_v42 = vld [vmem:[#allocation189_spill] sm:$0xff]  ;;  %v7936_v60 = vsel %vm1313_vm5, %v13288_v19, 0.0  ;;  %v7941_v56 = vsel %vm1313_vm5, %v13290_v33, 0.0 }
 0x24b   :  { %13270 = vst [vmem:[#allocation218_spill] sm:$0xff] %v7888_v18  ;;  %13277 = vst [vmem:[#allocation185_spill] sm:$0xff] %v7903_v30  ;;  %v7931_v28 = vsel %vm1313_vm5, %v13286_v42, 0.0  ;;  %v7945_v13 = vsel %vm1313_vm5, %v1420_v32, 0.0  ;;  %v7949_v20 = vsel %vm1313_vm5, %v1421_v7, 0.0  ;;  %v7953_v42 = vsel %vm1313_vm5, %v1422_v55, 0.0 }
 0x24c   :  { %13278 = vst [vmem:[#allocation219_spill] sm:$0xff] %v7907_v48  ;;  %13279 = vst [vmem:[#allocation220_spill] sm:$0xff] %v7911_v15  ;;  %v7957_v19 = vsel %vm1313_vm5, %v1423_v63, 0.0  ;;  %v7961_v33 = vsel %vm1313_vm5, %v1424_v1, 0.0  ;;  %v7965_v32 = vsel %vm1313_vm5, %v1425_v40, 0.0  ;;  %v13298_v22 = vld [vmem:[#allocation159_spill] sm:$0xff] }
 0x24d   :  { %13281 = vst [vmem:[#allocation186_spill] sm:$0xff] %v7916_v44  ;;  %13283 = vst [vmem:[#allocation187_spill] sm:$0xff] %v7921_v5  ;;  %v13299_v17 = vld [vmem:[#allocation48_spill] sm:$0xff]  ;;  %v13300_v39 = vld [vmem:[#allocation145_spill] sm:$0xff] }
 0x24e   :  { %13285 = vst [vmem:[#allocation188_spill] sm:$0xff] %v7926_v53  ;;  %13287 = vst [vmem:[#allocation189_spill] sm:$0xff] %v7931_v28  ;;  %v1517_v7 = vmul.f32 %v13299_v17, %v13298_v22  ;;  %v1518_v24 = vmul.f32 %v13299_v17, %v13300_v39  ;;  %v13301_v55 = vld [vmem:[#allocation146_spill] sm:$0xff]  ;;  %v13302_v51 = vld [vmem:[#allocation160_spill] sm:$0xff]  ;;  %v1522_v1 = vmul.f32 %v13299_v17, %v13303_v43 }
 0x24f   :  { %13289 = vst [vmem:[#allocation190_spill] sm:$0xff] %v7936_v60  ;;  %13291 = vst [vmem:[#allocation191_spill] sm:$0xff] %v7941_v56  ;;  %v1520_v11 = vmul.f32 %v13299_v17, %v13301_v55  ;;  %v1521_v63 = vmul.f32 %v13299_v17, %v13302_v51  ;;  %v1523_v21 = vmul.f32 %v13299_v17, %v13304_v12  ;;  %v13305_v40 = vld [vmem:[#allocation148_spill] sm:$0xff]  ;;  %v13306_v52 = vld [vmem:[#allocation162_spill] sm:$0xff] }
 0x250   :  { %13292 = vst [vmem:[#allocation221_spill] sm:$0xff] %v7945_v13  ;;  %13293 = vst [vmem:[#allocation222_spill] sm:$0xff] %v7949_v20  ;;  %v1524_v31 = vmul.f32 %v13299_v17, %v13305_v40  ;;  %v1525_v22 = vmul.f32 %v13299_v17, %v13306_v52  ;;  %v13307_v6 = vld [vmem:[#allocation149_spill] sm:$0xff]  ;;  %v13309_v55 = vld [vmem:[#allocation163_spill] sm:$0xff] }
 0x251   :  { %13294 = vst [vmem:[#allocation223_spill] sm:$0xff] %v7953_v42  ;;  %13295 = vst [vmem:[#allocation224_spill] sm:$0xff] %v7957_v19  ;;  %v7985_v39 = vmul.f32 %v13299_v17, %v13307_v6  ;;  %v7989_v9 = vmul.f32 %v13299_v17, %v13309_v55  ;;  %v13311_v51 = vld [vmem:[#allocation150_spill] sm:$0xff]  ;;  %v13313_v8 = vld [vmem:[#allocation164_spill] sm:$0xff] }
 0x252   :  { %13296 = vst [vmem:[#allocation225_spill] sm:$0xff] %v7961_v33  ;;  %13297 = vst [vmem:[#allocation226_spill] sm:$0xff] %v7965_v32  ;;  %v7993_v43 = vmul.f32 %v13299_v17, %v13311_v51  ;;  %v7997_v12 = vmul.f32 %v13299_v17, %v13313_v8  ;;  %v13315_v40 = vld [vmem:[#allocation151_spill] sm:$0xff]  ;;  %v13317_v52 = vld [vmem:[#allocation165_spill] sm:$0xff]  ;;  %v8013_v51 = vmul.f32 %v13299_v17, %v13321_v62 }
 0x253   :  { %13308 = vst [vmem:[#allocation227_spill] sm:$0xff] %v7985_v39  ;;  %13310 = vst [vmem:[#allocation228_spill] sm:$0xff] %v7989_v9  ;;  %v8001_v37 = vmul.f32 %v13299_v17, %v13315_v40  ;;  %v8005_v6 = vmul.f32 %v13299_v17, %v13317_v52  ;;  %v13319_v27 = vld [vmem:[#allocation152_spill] sm:$0xff]  ;;  %v8017_v8 = vmul.f32 %v13299_v17, %v13323_v0  ;;  %v13325_v38 = vld [vmem:[#allocation167_spill] sm:$0xff] }
 0x254   :  { %13312 = vst [vmem:[#allocation229_spill] sm:$0xff] %v7993_v43  ;;  %13314 = vst [vmem:[#allocation230_spill] sm:$0xff] %v7997_v12  ;;  %v8009_v55 = vmul.f32 %v13299_v17, %v13319_v27  ;;  %v8021_v40 = vmul.f32 %v13299_v17, %v13325_v38  ;;  %v13327_v29 = vld [vmem:[#allocation154_spill] sm:$0xff]  ;;  %v13329_v45 = vld [vmem:[#allocation168_spill] sm:$0xff]  ;;  %v8033_v62 = vmul.f32 %v13299_v17, %v13331_v23 }
 0x255   :  { %13316 = vst [vmem:[#allocation231_spill] sm:$0xff] %v8001_v37  ;;  %13318 = vst [vmem:[#allocation232_spill] sm:$0xff] %v8005_v6  ;;  %v8025_v52 = vmul.f32 %v13299_v17, %v13327_v29  ;;  %v8029_v27 = vmul.f32 %v13299_v17, %v13329_v45  ;;  %v8037_v0 = vmul.f32 %v13299_v17, %v13333_v47  ;;  %v13335_v10 = vld [vmem:[#allocation156_spill] sm:$0xff]  ;;  %v13339_v48 = vld [vmem:[#allocation157_spill] sm:$0xff] }
 0x256   :  { %13320 = vst [vmem:[#allocation233_spill] sm:$0xff] %v8009_v55  ;;  %13322 = vst [vmem:[#allocation234_spill] sm:$0xff] %v8013_v51  ;;  %v8041_v38 = vmul.f32 %v13299_v17, %v13335_v10  ;;  %v8045_v29 = vmul.f32 %v13299_v17, %v13337_v50  ;;  %v8049_v45 = vmul.f32 %v13299_v17, %v13339_v48  ;;  %v13341_v32 = vld [vmem:[#allocation171_spill] sm:$0xff]  ;;  %v13343_v33 = vld [vmem:[#allocation158_spill] sm:$0xff] }
 0x257   :  { %13324 = vst [vmem:[#allocation235_spill] sm:$0xff] %v8017_v8  ;;  %13326 = vst [vmem:[#allocation236_spill] sm:$0xff] %v8021_v40  ;;  %v8053_v23 = vmul.f32 %v13299_v17, %v13341_v32  ;;  %v8057_v47 = vmul.f32 %v13299_v17, %v13343_v33  ;;  %v13345_v3 = vld [vmem:[#allocation105_spill] sm:$0xff]  ;;  %v13346_v15 = vld [vmem:[#allocation47_spill] sm:$0xff] }
 0x258   :  { %13328 = vst [vmem:[#allocation237_spill] sm:$0xff] %v8025_v52  ;;  %13330 = vst [vmem:[#allocation238_spill] sm:$0xff] %v8029_v27  ;;  %v1585_v10 = vmul.f32 %v13346_v15, %v13345_v3  ;;  %v13347_v19 = vld [vmem:[#allocation106_spill] sm:$0xff]  ;;  %v13348_v50 = vld [vmem:[#allocation108_spill] sm:$0xff] }
 0x259   :  { %13332 = vst [vmem:[#allocation239_spill] sm:$0xff] %v8033_v62  ;;  %13334 = vst [vmem:[#allocation240_spill] sm:$0xff] %v8037_v0  ;;  %v1586_v42 = vmul.f32 %v13346_v15, %v13347_v19  ;;  %v8065_v20 = vmul.f32 %v13346_v15, %v13348_v50  ;;  %v13350_v48 = vld [vmem:[#allocation109_spill] sm:$0xff]  ;;  %v13351_v56 = vld [vmem:[#allocation110_spill] sm:$0xff] }
 0x25a   :  { %13336 = vst [vmem:[#allocation241_spill] sm:$0xff] %v8041_v38  ;;  %13338 = vst [vmem:[#allocation242_spill] sm:$0xff] %v8045_v29  ;;  %v1588_v13 = vmul.f32 %v13346_v15, %v13350_v48  ;;  %v1589_v32 = vmul.f32 %v13346_v15, %v13351_v56  ;;  %v13352_v60 = vld [vmem:[#allocation111_spill] sm:$0xff]  ;;  %v13353_v33 = vld [vmem:[#allocation112_spill] sm:$0xff] }
 0x25b   :  { %13340 = vst [vmem:[#allocation243_spill] sm:$0xff] %v8049_v45  ;;  %13342 = vst [vmem:[#allocation244_spill] sm:$0xff] %v8053_v23  ;;  %v1590_v17 = vmul.f32 %v13346_v15, %v13352_v60  ;;  %v1591_v28 = vmul.f32 %v13346_v15, %v13353_v33  ;;  %v13354_v3 = vld [vmem:[#allocation113_spill] sm:$0xff]  ;;  %v13355_v19 = vld [vmem:[#allocation114_spill] sm:$0xff]  ;;  %v8160_v23 = vadd.f32 %v1585_v10, %v1517_v7 }
 0x25c   :  { %13344 = vst [vmem:[#allocation245_spill] sm:$0xff] %v8057_v47  ;;  %13349 = vst [vmem:[#allocation246_spill] sm:$0xff] %v8065_v20  ;;  %v1592_v53 = vmul.f32 %v13346_v15, %v13354_v3  ;;  %v1593_v5 = vmul.f32 %v13346_v15, %v13355_v19  ;;  %v13356_v50 = vld [vmem:[#allocation115_spill] sm:$0xff]  ;;  %v13358_v48 = vld [vmem:[#allocation116_spill] sm:$0xff]  ;;  %v8164_v45 = vadd.f32 %v1588_v13, %v1520_v11 }
 0x25d   :  { %v8081_v20 = vmul.f32 %v13346_v15, %v13356_v50  ;;  %v8085_v44 = vmul.f32 %v13346_v15, %v13358_v48  ;;  %v13360_v56 = vld [vmem:[#allocation117_spill] sm:$0xff]  ;;  %v13362_v30 = vld [vmem:[#allocation128_spill] sm:$0xff]  ;;  %v13368_v47 = vld [vmem:[#allocation134_spill] sm:$0xff]  ;;  %13383 = vst [vmem:[#allocation267_spill] sm:$0xff] %v8160_v23 }
 0x25e   :  { %v8089_v60 = vmul.f32 %v13346_v15, %v13360_v56  ;;  %v8093_v33 = vmul.f32 %v13346_v15, %v13362_v30  ;;  %v13364_v3 = vld [vmem:[#allocation132_spill] sm:$0xff]  ;;  %v13366_v19 = vld [vmem:[#allocation133_spill] sm:$0xff]  ;;  %v8105_v48 = vmul.f32 %v13346_v15, %v13368_v47  ;;  %v8109_v56 = vmul.f32 %v13346_v15, %v13151_v49  ;;  %13385 = vst [vmem:[#allocation269_spill] sm:$0xff] %v8164_v45  ;;  %v13399_v7 = vld [vmem:[#allocation78_spill] sm:$0xff] }
 0x25f   :  { %13357 = vst [vmem:[#allocation247_spill] sm:$0xff] %v8081_v20  ;;  %13359 = vst [vmem:[#allocation248_spill] sm:$0xff] %v8085_v44  ;;  %v8097_v2 = vmul.f32 %v13346_v15, %v13364_v3  ;;  %v8101_v50 = vmul.f32 %v13346_v15, %v13366_v19  ;;  %v8113_v30 = vmul.f32 %v13346_v15, %v13119_v58  ;;  %v13395_v13 = vld [vmem:[#allocation76_spill] sm:$0xff]  ;;  %v13413_v29 = vld [vmem:[#allocation85_spill] sm:$0xff] }
 0x260   :  { %13361 = vst [vmem:[#allocation249_spill] sm:$0xff] %v8089_v60  ;;  %13363 = vst [vmem:[#allocation250_spill] sm:$0xff] %v8093_v33  ;;  %v8117_v3 = vmul.f32 %v13346_v15, %v13155_v36  ;;  %v8121_v19 = vmul.f32 %v13346_v15, %v13256_v61  ;;  %v8125_v47 = vmul.f32 %v13346_v15, %v13258_v34  ;;  %v13411_v23 = vld [vmem:[#allocation84_spill] sm:$0xff]  ;;  %v13415_v38 = vld [vmem:[#allocation86_spill] sm:$0xff] }
 0x261   :  { %13365 = vst [vmem:[#allocation251_spill] sm:$0xff] %v8097_v2  ;;  %13367 = vst [vmem:[#allocation252_spill] sm:$0xff] %v8101_v50  ;;  %v8129_v49 = vmul.f32 %v13346_v15, %v13260_v54  ;;  %v8133_v58 = vmul.f32 %v13346_v15, %v13262_v4  ;;  %v8137_v36 = vmul.f32 %v13346_v15, %v13264_v46  ;;  %v8158_v46 = vsel %vm1113_vm3, %v7892_v59, 0.0  ;;  %v13417_v0 = vld [vmem:[#allocation25_spill] sm:$0xff]  ;;  %v13426_v40 = vld [vmem:[#allocation40_spill] sm:$0xff] }
 0x262   :  { %13369 = vst [vmem:[#allocation253_spill] sm:$0xff] %v8105_v48  ;;  %13370 = vst [vmem:[#allocation254_spill] sm:$0xff] %v8109_v56  ;;  %v8141_v61 = vmul.f32 %v13346_v15, %v13266_v35  ;;  %v8145_v34 = vmul.f32 %v13346_v15, %v13268_v57  ;;  %v8149_v54 = vmul.f32 %v13346_v15, %v13271_v26  ;;  %v13421_v27 = vld [vmem:[#allocation33_spill] sm:$0xff]  ;;  %v13428_v8 = vld [vmem:[#allocation42_spill] sm:$0xff] }
 0x263   :  { %13371 = vst [vmem:[#allocation255_spill] sm:$0xff] %v8113_v30  ;;  %13372 = vst [vmem:[#allocation256_spill] sm:$0xff] %v8117_v3  ;;  %v8153_v4 = vmul.f32 %v13346_v15, %v13273_v16  ;;  %v8162_v35 = vadd.f32 %v1586_v42, %v1518_v24  ;;  %v8166_v57 = vadd.f32 %v1589_v32, %v1521_v63  ;;  %v13391_v16 = vld [vmem:[#allocation64_spill] sm:$0xff]  ;;  %v13423_v52 = vld [vmem:[#allocation37_spill] sm:$0xff] }
 0x264   :  { %13373 = vst [vmem:[#allocation257_spill] sm:$0xff] %v8121_v19  ;;  %13374 = vst [vmem:[#allocation258_spill] sm:$0xff] %v8125_v47  ;;  %v8170_v26 = vadd.f32 %v1591_v28, %v1523_v21  ;;  %v8174_v15 = vadd.f32 %v1593_v5, %v1525_v22  ;;  %v2323_v59 = vmul.f32 %v13392_v25, %v13391_v16  ;;  %v13396_v22 = vld [vmem:[#allocation87_spill] sm:$0xff]  ;;  %v13398_v42 = vld [vmem:[#allocation88_spill] sm:$0xff] }
 0x265   :  { %13375 = vst [vmem:[#allocation259_spill] sm:$0xff] %v8129_v49  ;;  %13376 = vst [vmem:[#allocation260_spill] sm:$0xff] %v8133_v58  ;;  %v2325_v11 = vmul.f32 %v13392_v25, %v8158_v46  ;;  %v2326_v24 = vmul.f32 %v13392_v25, %v7888_v18  ;;  %v2329_v5 = vmul.f32 %v13392_v25, %v13396_v22  ;;  %v13401_v18 = vld [vmem:[#allocation79_spill] sm:$0xff]  ;;  %v13416_v58 = vld [vmem:[#allocation97_spill] sm:$0xff] }
 0x266   :  { %13377 = vst [vmem:[#allocation261_spill] sm:$0xff] %v8137_v36  ;;  %13378 = vst [vmem:[#allocation262_spill] sm:$0xff] %v8141_v61  ;;  %v2331_v32 = vmul.f32 %v13392_v25, %v13398_v42  ;;  %v2332_v63 = vmul.f32 %v13392_v25, %v13399_v7  ;;  %v13404_v16 = vld [vmem:[#allocation91_spill] sm:$0xff]  ;;  %v13414_v36 = vld [vmem:[#allocation96_spill] sm:$0xff] }
 0x267   :  { %13379 = vst [vmem:[#allocation263_spill] sm:$0xff] %v8145_v34  ;;  %13380 = vst [vmem:[#allocation264_spill] sm:$0xff] %v8149_v54  ;;  %v8168_v34 = vadd.f32 %v1590_v17, %v1522_v1  ;;  %v8172_v54 = vadd.f32 %v1592_v53, %v1524_v31  ;;  %v13394_v17 = vld [vmem:[#allocation66_spill] sm:$0xff]  ;;  %v2328_v31 = vmul.f32 %v13392_v25, %v13395_v13  ;;  %v13397_v53 = vld [vmem:[#allocation77_spill] sm:$0xff] }
 0x268   :  { %13381 = vst [vmem:[#allocation265_spill] sm:$0xff] %v8153_v4  ;;  %13382 = vst [vmem:[#allocation266_spill] sm:$0xff] %v8158_v46  ;;  %v13393_v4 = vld [vmem:[#allocation75_spill] sm:$0xff]  ;;  %v2327_v21 = vmul.f32 %v13392_v25, %v13394_v17  ;;  %v2330_v28 = vmul.f32 %v13392_v25, %v13397_v53  ;;  %v13400_v1 = vld [vmem:[#allocation89_spill] sm:$0xff]  ;;  %v2334_v17 = vmul.f32 %v13392_v25, %v13401_v18 }
 0x269   :  { %13384 = vst [vmem:[#allocation268_spill] sm:$0xff] %v8162_v35  ;;  %13386 = vst [vmem:[#allocation270_spill] sm:$0xff] %v8166_v57  ;;  %v2324_v10 = vmul.f32 %v13392_v25, %v13393_v4  ;;  %v2333_v45 = vmul.f32 %v13392_v25, %v13400_v1  ;;  %v13402_v46 = vld [vmem:[#allocation90_spill] sm:$0xff]  ;;  %v13403_v4 = vld [vmem:[#allocation80_spill] sm:$0xff]  ;;  %v2337_v53 = vmul.f32 %v13392_v25, %v13404_v16 }
 0x26a   :  { %13387 = vst [vmem:[#allocation271_spill] sm:$0xff] %v8168_v34  ;;  %13388 = vst [vmem:[#allocation272_spill] sm:$0xff] %v8170_v26  ;;  %v2335_v13 = vmul.f32 %v13392_v25, %v13402_v46  ;;  %v2336_v22 = vmul.f32 %v13392_v25, %v13403_v4  ;;  %v13407_v26 = vld [vmem:[#allocation82_spill] sm:$0xff]  ;;  %v13408_v34 = vld [vmem:[#allocation93_spill] sm:$0xff]  ;;  %v2344_v16 = vmul.f32 %v13392_v25, %v13411_v23 }
 0x26b   :  { %13389 = vst [vmem:[#allocation273_spill] sm:$0xff] %v8172_v54  ;;  %13390 = vst [vmem:[#allocation274_spill] sm:$0xff] %v8174_v15  ;;  %v13405_v15 = vld [vmem:[#allocation81_spill] sm:$0xff]  ;;  %v13406_v54 = vld [vmem:[#allocation92_spill] sm:$0xff]  ;;  %v2340_v1 = vmul.f32 %v13392_v25, %v13407_v26  ;;  %v2341_v18 = vmul.f32 %v13392_v25, %v13408_v34  ;;  %v2347_v26 = vmul.f32 %v13392_v25, %v13414_v36 }
 0x26c   :  { %v2338_v42 = vmul.f32 %v13392_v25, %v13405_v15  ;;  %v2339_v7 = vmul.f32 %v13392_v25, %v13406_v54  ;;  %v13409_v57 = vld [vmem:[#allocation83_spill] sm:$0xff]  ;;  %v13410_v35 = vld [vmem:[#allocation94_spill] sm:$0xff]  ;;  %v2346_v54 = vmul.f32 %v13392_v25, %v13413_v29  ;;  %v2348_v34 = vmul.f32 %v13392_v25, %v13415_v38  ;;  %v13420_v47 = vld [vmem:[#allocation36_spill] sm:$0xff] }
 0x26d   :  { %v2342_v46 = vmul.f32 %v13392_v25, %v13409_v57  ;;  %v2343_v4 = vmul.f32 %v13392_v25, %v13410_v35  ;;  %v13412_v61 = vld [vmem:[#allocation95_spill] sm:$0xff]  ;;  %v2349_v57 = vmul.f32 %v13392_v25, %v13416_v58  ;;  %v2350_v35 = vmul.f32 %v13392_v25, %v13417_v0  ;;  %v13418_v49 = vld [vmem:[#allocation34_spill] sm:$0xff]  ;;  %v13429_v56 = vld [vmem:[#allocation44_spill] sm:$0xff] }
 0x26e   :  { %v2345_v15 = vmul.f32 %v13392_v25, %v13412_v61  ;;  %v13419_v23 = vld [vmem:[#allocation51_spill] sm:$0xff]  ;;  %v13424_v25 = vld [vmem:[#allocation52_spill] sm:$0xff]  ;;  %v13425_v3 = vld [vmem:[#allocation38_spill] sm:$0xff] }
 0x26f   :  { %v2391_v62 = vmul.f32 %v13419_v23, %v13418_v49  ;;  %v2392_v61 = vmul.f32 %v13419_v23, %v13420_v47  ;;  %v2393_v29 = vmul.f32 %v13419_v23, %v13251_v14  ;;  %v2394_v36 = vmul.f32 %v13419_v23, %v13252_v41  ;;  %v13422_v19 = vld [vmem:[#allocation35_spill] sm:$0xff]  ;;  %v13430_v51 = vld [vmem:[#allocation41_spill] sm:$0xff]  ;;  %v13432_v55 = vld [vmem:[#allocation4_spill] sm:$0xff] }
 0x270   :  { %v2395_v38 = vmul.f32 %v13419_v23, %v13421_v27  ;;  %v2396_v58 = vmul.f32 %v13419_v23, %v13422_v19  ;;  %v2397_v0 = vmul.f32 %v13419_v23, %v13423_v52  ;;  %v2398_v49 = vmul.f32 %v13419_v23, %v13424_v25  ;;  %v13427_v30 = vld [vmem:[#allocation39_spill] sm:$0xff]  ;;  %v13433_v50 = vld [vmem:[#allocation6_spill] sm:$0xff]  ;;  %v13435_v2 = vld [vmem:[#allocation5_spill] sm:$0xff] }
 0x271   :  { %v2399_v47 = vmul.f32 %v13419_v23, %v13425_v3  ;;  %v2400_v14 = vmul.f32 %v13419_v23, %v13426_v40  ;;  %v2401_v41 = vmul.f32 %v13419_v23, %v13427_v30  ;;  %v2402_v27 = vmul.f32 %v13419_v23, %v13428_v8  ;;  %v13431_v48 = vld [vmem:[#allocation43_spill] sm:$0xff]  ;;  %v13436_v37 = vld [vmem:[#allocation8_spill] sm:$0xff]  ;;  %v13437_v33 = vld [vmem:[#allocation10_spill] sm:$0xff] }
 0x272   :  { %v2403_v19 = vmul.f32 %v13419_v23, %v13429_v56  ;;  %v2404_v52 = vmul.f32 %v13419_v23, %v13430_v51  ;;  %v2405_v25 = vmul.f32 %v13419_v23, %v13431_v48  ;;  %v2406_v3 = vmul.f32 %v13419_v23, %v13432_v55  ;;  %v13434_v6 = vld [vmem:[#allocation3_spill] sm:$0xff]  ;;  %v13439_v60 = vld [vmem:[#allocation9_spill] sm:$0xff]  ;;  %v13440_v43 = vld [vmem:[#allocation14_spill] sm:$0xff] }
 0x273   :  { %v2407_v40 = vmul.f32 %v13419_v23, %v13433_v50  ;;  %v2408_v30 = vmul.f32 %v13419_v23, %v13434_v6  ;;  %v2409_v8 = vmul.f32 %v13419_v23, %v13435_v2  ;;  %v2410_v56 = vmul.f32 %v13419_v23, %v13436_v37  ;;  %v13438_v12 = vld [vmem:[#allocation7_spill] sm:$0xff]  ;;  %v13441_v44 = vld [vmem:[#allocation12_spill] sm:$0xff]  ;;  %v13443_v20 = vld [vmem:[#allocation13_spill] sm:$0xff] }
 0x274   :  { %v2411_v51 = vmul.f32 %v13419_v23, %v13437_v33  ;;  %v2412_v48 = vmul.f32 %v13419_v23, %v13438_v12  ;;  %v2413_v55 = vmul.f32 %v13419_v23, %v13439_v60  ;;  %v2414_v50 = vmul.f32 %v13419_v23, %v13440_v43  ;;  %v13442_v9 = vld [vmem:[#allocation11_spill] sm:$0xff]  ;;  %v13444_v39 = vld [vmem:[#allocation74_spill] sm:$0xff] }
 0x275   :  { %v2415_v6 = vmul.f32 %v13419_v23, %v13441_v44  ;;  %v2416_v2 = vmul.f32 %v13419_v23, %v13442_v9  ;;  %v2417_v37 = vmul.f32 %v13419_v23, %v13443_v20  ;;  %v2418_v33 = vmul.f32 %v13419_v23, %v13444_v39 }
 0x276   :  { %v8288_v12 = vadd.f32 %v2391_v62, %v2323_v59  ;;  %v8290_v60 = vadd.f32 %v2392_v61, %v2324_v10  ;;  %v8292_v43 = vadd.f32 %v2393_v29, %v2325_v11  ;;  %v8294_v44 = vadd.f32 %v2394_v36, %v2326_v24  ;;  %v13449_v10 = vld [vmem:[#allocation247_spill] sm:$0xff] }
 0x277   :  { %v8296_v9 = vadd.f32 %v2395_v38, %v2327_v21  ;;  %v8298_v20 = vadd.f32 %v2396_v58, %v2328_v31  ;;  %v8300_v23 = vadd.f32 %v2397_v0, %v2329_v5  ;;  %v8302_v39 = vadd.f32 %v2398_v49, %v2330_v28  ;;  %v13467_v24 = vld [vmem:[#allocation251_spill] sm:$0xff]  ;;  %v13469_v31 = vld [vmem:[#allocation232_spill] sm:$0xff]  ;;  %v13472_v28 = vld [vmem:[#allocation233_spill] sm:$0xff] }
 0x278   :  { %13445 = vst [vmem:[#allocation66_spill] sm:$0xff] %v8288_v12  ;;  %v8304_v59 = vadd.f32 %v2399_v47, %v2331_v32  ;;  %v8306_v62 = vadd.f32 %v2400_v14, %v2332_v63  ;;  %v8308_v12 = vadd.f32 %v2401_v41, %v2333_v45  ;;  %v8310_v61 = vadd.f32 %v2402_v27, %v2334_v17  ;;  %v5321_v45 = vld [vmem:[%s12146_s3 + $0x38] sm:$0xff]   ;;  %v13478_v17 = vld [vmem:[#allocation235_spill] sm:$0xff] }
 0x279   :  { %13446 = vst [vmem:[#allocation76_spill] sm:$0xff] %v8296_v9  ;;  %v8312_v29 = vadd.f32 %v2403_v19, %v2335_v13  ;;  %v8314_v36 = vadd.f32 %v2404_v52, %v2336_v22  ;;  %v8316_v38 = vadd.f32 %v2405_v25, %v2337_v53  ;;  %v8318_v58 = vadd.f32 %v2406_v3, %v2338_v42  ;;  %v5322_v52 = vld [vmem:[%s12146_s3 + $0x30] sm:$0xff]   ;;  %v13470_v22 = vld [vmem:[#allocation252_spill] sm:$0xff]  ;;  %v13476_v63 = vld [vmem:[#allocation254_spill] sm:$0xff] }
 0x27a   :  { %v8320_v0 = vadd.f32 %v2407_v40, %v2339_v7  ;;  %v8322_v49 = vadd.f32 %v2408_v30, %v2340_v1  ;;  %v8324_v47 = vadd.f32 %v2409_v8, %v2341_v18  ;;  %v8326_v14 = vadd.f32 %v2410_v56, %v2342_v46  ;;  %5223 = vmatprep.subr.bf16.mxu0 %v5321_v45  ;;  %v13448_v40 = vld [vmem:[#allocation227_spill] sm:$0xff]  ;;  %v5323_v53 = vld [vmem:[%s12146_s3 + $0x28] sm:$0xff]   ;;  %v13473_v42 = vld [vmem:[#allocation253_spill] sm:$0xff] }
 0x27b   :  { %v8334_v25 = vadd.f32 %v2411_v51, %v2343_v4  ;;  %v8336_v41 = vadd.f32 %v2412_v48, %v2344_v16  ;;  %v8338_v3 = vadd.f32 %v2413_v55, %v2345_v15  ;;  %v8340_v30 = vadd.f32 %v2414_v50, %v2346_v54  ;;  %v13451_v51 = vld [vmem:[#allocation228_spill] sm:$0xff]  ;;  %v13455_v50 = vld [vmem:[#allocation27_spill] sm:$0xff]  ;;  %5224 = vmatpush3.bf16.msra.mxu0 %v5321_v45  ;;  %v13464_v15 = vld [vmem:[#allocation250_spill] sm:$0xff] }
 0x27c   :  { %v8342_v8 = vadd.f32 %v2415_v6, %v2347_v26  ;;  %v8344_v46 = vadd.f32 %v2416_v2, %v2348_v34  ;;  %v8346_v18 = vadd.f32 %v2417_v37, %v2349_v57  ;;  %v8348_v56 = vadd.f32 %v2418_v33, %v2350_v35  ;;  %v13452_v4 = vld [vmem:[#allocation248_spill] sm:$0xff]  ;;  %v13457_v6 = vld [vmem:[#allocation30_spill] sm:$0xff]  ;;  %v13458_v2 = vld [vmem:[#allocation29_spill] sm:$0xff]  ;;  %5225 = vmatprep.subr.bf16.mxu0 %v5322_v52 }
 0x27d   :  { %v8352_v11 = vadd.f32 %v13449_v10, %v13448_v40  ;;  %v8356_v16 = vadd.f32 %v13452_v4, %v13451_v51  ;;  %v13454_v48 = vld [vmem:[#allocation28_spill] sm:$0xff]  ;;  %v8364_v34 = vadd.f32 %v13458_v2, %v13457_v6  ;;  %v13460_v37 = vld [vmem:[#allocation229_spill] sm:$0xff]  ;;  %v13463_v26 = vld [vmem:[#allocation230_spill] sm:$0xff]  ;;  %v8380_v5 = vadd.f32 %v13470_v22, %v13469_v31  ;;  %5303 = vmatprep.subr.bf16.mxu1 %v5321_v45 }
 0x27e   :  { %13447 = vst [vmem:[#allocation33_spill] sm:$0xff] %v8348_v56  ;;  %v8360_v54 = vadd.f32 %v13455_v50, %v13454_v48  ;;  %v13461_v35 = vld [vmem:[#allocation249_spill] sm:$0xff]  ;;  %v8372_v33 = vadd.f32 %v13464_v15, %v13463_v26  ;;  %v13466_v55 = vld [vmem:[#allocation231_spill] sm:$0xff]  ;;  %v8387_v32 = vadd.f32 %v13473_v42, %v13472_v28  ;;  %v13475_v7 = vld [vmem:[#allocation234_spill] sm:$0xff]  ;;  %5311 = vmatpush3.bf16.msra.mxu1 %v5321_v45 }
 0x27f   :  { %13450 = vst [vmem:[#allocation35_spill] sm:$0xff] %v8352_v11  ;;  %13453 = vst [vmem:[#allocation227_spill] sm:$0xff] %v8356_v16  ;;  %v8368_v57 = vadd.f32 %v13461_v35, %v13460_v37  ;;  %v8376_v21 = vadd.f32 %v13467_v24, %v13466_v55  ;;  %v8391_v1 = vadd.f32 %v13476_v63, %v13475_v7  ;;  %v13479_v13 = vld [vmem:[#allocation255_spill] sm:$0xff]  ;;  %v13481_v19 = vld [vmem:[#allocation236_spill] sm:$0xff]  ;;  %5226 = vmatpush3.bf16.msra.mxu0 %v5322_v52 }
 0x280   :  { %13456 = vst [vmem:[#allocation247_spill] sm:$0xff] %v8360_v54  ;;  %13459 = vst [vmem:[#allocation228_spill] sm:$0xff] %v8364_v34  ;;  %v8395_v27 = vadd.f32 %v13479_v13, %v13478_v17  ;;  %v13482_v40 = vld [vmem:[#allocation256_spill] sm:$0xff]  ;;  %v13484_v51 = vld [vmem:[#allocation237_spill] sm:$0xff]  ;;  %5227 = vmatprep.subr.bf16.mxu0 %v5323_v53  ;;  %5304 = vmatprep.subr.bf16.mxu1 %v5322_v52 }
 0x281   :  { %13462 = vst [vmem:[#allocation248_spill] sm:$0xff] %v8368_v57  ;;  %13465 = vst [vmem:[#allocation28_spill] sm:$0xff] %v8372_v33  ;;  %v8399_v10 = vadd.f32 %v13482_v40, %v13481_v19  ;;  %v13485_v4 = vld [vmem:[#allocation257_spill] sm:$0xff]  ;;  %v13487_v50 = vld [vmem:[#allocation238_spill] sm:$0xff] }
 0x282   :  { %13468 = vst [vmem:[#allocation27_spill] sm:$0xff] %v8376_v21  ;;  %13471 = vst [vmem:[#allocation30_spill] sm:$0xff] %v8380_v5  ;;  %v8403_v48 = vadd.f32 %v13485_v4, %v13484_v51  ;;  %v13488_v6 = vld [vmem:[#allocation258_spill] sm:$0xff]  ;;  %v13490_v37 = vld [vmem:[#allocation239_spill] sm:$0xff]  ;;  %5312 = vmatpush3.bf16.msra.mxu1 %v5322_v52 }
 0x283   :  { %13474 = vst [vmem:[#allocation29_spill] sm:$0xff] %v8387_v32  ;;  %13477 = vst [vmem:[#allocation229_spill] sm:$0xff] %v8391_v1  ;;  %v8407_v2 = vadd.f32 %v13488_v6, %v13487_v50  ;;  %v13491_v35 = vld [vmem:[#allocation259_spill] sm:$0xff]  ;;  %v13493_v15 = vld [vmem:[#allocation240_spill] sm:$0xff]  ;;  %5228 = vmatpush3.bf16.msra.mxu0 %v5323_v53  ;;  %5305 = vmatprep.subr.bf16.mxu1 %v5323_v53 }
 0x284   :  { %13480 = vst [vmem:[#allocation249_spill] sm:$0xff] %v8395_v27  ;;  %13483 = vst [vmem:[#allocation230_spill] sm:$0xff] %v8399_v10  ;;  %v8411_v26 = vadd.f32 %v13491_v35, %v13490_v37  ;;  %v13494_v55 = vld [vmem:[#allocation260_spill] sm:$0xff]  ;;  %v13496_v31 = vld [vmem:[#allocation241_spill] sm:$0xff] }
 0x285   :  { %13486 = vst [vmem:[#allocation250_spill] sm:$0xff] %v8403_v48  ;;  %13489 = vst [vmem:[#allocation231_spill] sm:$0xff] %v8407_v2  ;;  %v8415_v24 = vadd.f32 %v13494_v55, %v13493_v15  ;;  %v13497_v22 = vld [vmem:[#allocation261_spill] sm:$0xff]  ;;  %v13499_v42 = vld [vmem:[#allocation242_spill] sm:$0xff] }
 0x286   :  { %13492 = vst [vmem:[#allocation251_spill] sm:$0xff] %v8411_v26  ;;  %v8419_v28 = vadd.f32 %v13497_v22, %v13496_v31  ;;  %v13500_v7 = vld [vmem:[#allocation262_spill] sm:$0xff]  ;;  %v13502_v17 = vld [vmem:[#allocation243_spill] sm:$0xff]  ;;  %v13505_v40 = vld [vmem:[#allocation244_spill] sm:$0xff]  ;;  %5313 = vmatpush3.bf16.msra.mxu1 %v5323_v53 }
 0x287   :  { %13495 = vst [vmem:[#allocation232_spill] sm:$0xff] %v8415_v24  ;;  %v8423_v63 = vadd.f32 %v13500_v7, %v13499_v42  ;;  %v13503_v13 = vld [vmem:[#allocation263_spill] sm:$0xff]  ;;  %v13506_v51 = vld [vmem:[#allocation264_spill] sm:$0xff]  ;;  %v13508_v50 = vld [vmem:[#allocation245_spill] sm:$0xff] }
 0x288   :  { %13498 = vst [vmem:[#allocation252_spill] sm:$0xff] %v8419_v28  ;;  %v8427_v19 = vadd.f32 %v13503_v13, %v13502_v17  ;;  %v8431_v4 = vadd.f32 %v13506_v51, %v13505_v40  ;;  %v13509_v6 = vld [vmem:[#allocation265_spill] sm:$0xff]  ;;  %v13511_v37 = vld [vmem:[#allocation172_spill] sm:$0xff]  ;;  %v5324_v7 = vld [vmem:[%s12146_s3 + $0x20] sm:$0xff]  }
 0x289   :  { %13501 = vst [vmem:[#allocation233_spill] sm:$0xff] %v8423_v63  ;;  %v8435_v45 = vadd.f32 %v13509_v6, %v13508_v50  ;;  %v13512_v35 = vld [vmem:[#allocation49_spill] sm:$0xff]  ;;  %v13515_v17 = vld [vmem:[#allocation186_spill] sm:$0xff]  ;;  %v13519_v50 = vld [vmem:[#allocation187_spill] sm:$0xff]  ;;  %5229 = vmatprep.subr.bf16.mxu0 %v5324_v7  ;;  %5306 = vmatprep.subr.bf16.mxu1 %v5324_v7 }
 0x28a   :  { %13504 = vst [vmem:[#allocation253_spill] sm:$0xff] %v8427_v19  ;;  %13507 = vst [vmem:[#allocation234_spill] sm:$0xff] %v8431_v4  ;;  %v1717_v15 = vmul.f32 %v13512_v35, %v13511_v37  ;;  %v13513_v55 = vld [vmem:[#allocation185_spill] sm:$0xff]  ;;  %v8448_v13 = vmul.f32 %v13512_v35, %v13515_v17  ;;  %v13517_v40 = vld [vmem:[#allocation174_spill] sm:$0xff]  ;;  %v8456_v6 = vmul.f32 %v13512_v35, %v13519_v50  ;;  %5230 = vmatpush3.bf16.msra.mxu0 %v5324_v7 }
 0x28b   :  { %13510 = vst [vmem:[#allocation254_spill] sm:$0xff] %v8435_v45  ;;  %v1718_v31 = vmul.f32 %v13512_v35, %v13513_v55  ;;  %v13514_v22 = vld [vmem:[#allocation173_spill] sm:$0xff]  ;;  %v8452_v51 = vmul.f32 %v13512_v35, %v13517_v40  ;;  %v13521_v9 = vld [vmem:[#allocation175_spill] sm:$0xff]  ;;  %v13523_v37 = vld [vmem:[#allocation188_spill] sm:$0xff]  ;;  %5314 = vmatpush3.bf16.msra.mxu1 %v5324_v7 }
 0x28c   :  { %v1721_v42 = vmul.f32 %v13512_v35, %v13514_v22  ;;  %13516 = vst [vmem:[#allocation235_spill] sm:$0xff] %v8448_v13  ;;  %13520 = vst [vmem:[#allocation236_spill] sm:$0xff] %v8456_v6  ;;  %v8460_v55 = vmul.f32 %v13512_v35, %v13521_v9  ;;  %v8464_v22 = vmul.f32 %v13512_v35, %v13523_v37  ;;  %v13525_v19 = vld [vmem:[#allocation176_spill] sm:$0xff]  ;;  %v13527_v63 = vld [vmem:[#allocation189_spill] sm:$0xff] }
 0x28d   :  { %13518 = vst [vmem:[#allocation255_spill] sm:$0xff] %v8452_v51  ;;  %v8468_v17 = vmul.f32 %v13512_v35, %v13525_v19  ;;  %v8472_v40 = vmul.f32 %v13512_v35, %v13527_v63  ;;  %v13529_v28 = vld [vmem:[#allocation177_spill] sm:$0xff]  ;;  %v13531_v9 = vld [vmem:[#allocation190_spill] sm:$0xff]  ;;  %v13535_v2 = vld [vmem:[#allocation191_spill] sm:$0xff] }
 0x28e   :  { %13522 = vst [vmem:[#allocation256_spill] sm:$0xff] %v8460_v55  ;;  %13524 = vst [vmem:[#allocation237_spill] sm:$0xff] %v8464_v22  ;;  %v8476_v50 = vmul.f32 %v13512_v35, %v13529_v28  ;;  %v8480_v24 = vmul.f32 %v13512_v35, %v13531_v9  ;;  %v13533_v26 = vld [vmem:[#allocation178_spill] sm:$0xff]  ;;  %v8488_v19 = vmul.f32 %v13512_v35, %v13535_v2  ;;  %v13537_v48 = vld [vmem:[#allocation179_spill] sm:$0xff] }
 0x28f   :  { %13526 = vst [vmem:[#allocation257_spill] sm:$0xff] %v8468_v17  ;;  %13528 = vst [vmem:[#allocation238_spill] sm:$0xff] %v8472_v40  ;;  %v8484_v37 = vmul.f32 %v13512_v35, %v13533_v26  ;;  %v8492_v63 = vmul.f32 %v13512_v35, %v13537_v48  ;;  %v13539_v28 = vld [vmem:[#allocation221_spill] sm:$0xff]  ;;  %v13541_v10 = vld [vmem:[#allocation180_spill] sm:$0xff] }
 0x290   :  { %13530 = vst [vmem:[#allocation258_spill] sm:$0xff] %v8476_v50  ;;  %13532 = vst [vmem:[#allocation239_spill] sm:$0xff] %v8480_v24  ;;  %v8496_v52 = vmul.f32 %v13512_v35, %v13539_v28  ;;  %v8500_v9 = vmul.f32 %v13512_v35, %v13541_v10  ;;  %v13543_v27 = vld [vmem:[#allocation222_spill] sm:$0xff]  ;;  %v13545_v1 = vld [vmem:[#allocation181_spill] sm:$0xff] }
 0x291   :  { %13534 = vst [vmem:[#allocation259_spill] sm:$0xff] %v8484_v37  ;;  %13536 = vst [vmem:[#allocation240_spill] sm:$0xff] %v8488_v19  ;;  %v8504_v26 = vmul.f32 %v13512_v35, %v13543_v27  ;;  %v8508_v2 = vmul.f32 %v13512_v35, %v13545_v1  ;;  %v5325_v48 = vld [vmem:[%s12146_s3 + $0x18] sm:$0xff]   ;;  %v13556_v19 = vld [vmem:[#allocation183_spill] sm:$0xff] }
 0x292   :  { %13538 = vst [vmem:[#allocation260_spill] sm:$0xff] %v8492_v63  ;;  %13540 = vst [vmem:[#allocation241_spill] sm:$0xff] %v8496_v52  ;;  %v13547_v63 = vld [vmem:[#allocation223_spill] sm:$0xff]  ;;  %v13549_v52 = vld [vmem:[#allocation182_spill] sm:$0xff]  ;;  %v8532_v32 = vmul.f32 %v13512_v35, %v13556_v19  ;;  %5231 = vmatprep.subr.bf16.mxu0 %v5325_v48  ;;  %5307 = vmatprep.subr.bf16.mxu1 %v5325_v48 }
 0x293   :  { %13542 = vst [vmem:[#allocation261_spill] sm:$0xff] %v8500_v9  ;;  %13544 = vst [vmem:[#allocation242_spill] sm:$0xff] %v8504_v26  ;;  %v8515_v28 = vmul.f32 %v13512_v35, %v13547_v63  ;;  %v8519_v10 = vmul.f32 %v13512_v35, %v13549_v52  ;;  %v13551_v9 = vld [vmem:[#allocation224_spill] sm:$0xff]  ;;  %v13558_v63 = vld [vmem:[#allocation225_spill] sm:$0xff]  ;;  %5232 = vmatpush3.bf16.msra.mxu0 %v5325_v48  ;;  %5315 = vmatpush3.bf16.msra.mxu1 %v5325_v48 }
 0x294   :  { %13546 = vst [vmem:[#allocation262_spill] sm:$0xff] %v8508_v2  ;;  %v8523_v27 = vmul.f32 %v13512_v35, %v13551_v9  ;;  %v13553_v26 = vld [vmem:[#allocation220_spill] sm:$0xff]  ;;  %13557 = vst [vmem:[#allocation245_spill] sm:$0xff] %v8532_v32  ;;  %v13562_v9 = vld [vmem:[#allocation226_spill] sm:$0xff] }
 0x295   :  { %13548 = vst [vmem:[#allocation243_spill] sm:$0xff] %v8515_v28  ;;  %13550 = vst [vmem:[#allocation263_spill] sm:$0xff] %v8519_v10  ;;  %v8528_v2 = vsel %vm1313_vm5, %v13553_v26, 0.0  ;;  %v8536_v28 = vmul.f32 %v13512_v35, %v13558_v63  ;;  %v13560_v52 = vld [vmem:[#allocation184_spill] sm:$0xff]  ;;  %v13564_v26 = vld [vmem:[#allocation267_spill] sm:$0xff] }
 0x296   :  { %13552 = vst [vmem:[#allocation244_spill] sm:$0xff] %v8523_v27  ;;  %13555 = vst [vmem:[#allocation264_spill] sm:$0xff] %v8528_v2  ;;  %v8540_v10 = vmul.f32 %v13512_v35, %v13560_v52  ;;  %v8544_v27 = vmul.f32 %v13512_v35, %v13562_v9  ;;  %v8547_v1 = vadd.f32 %v1717_v15, %v13564_v26  ;;  %v13566_v37 = vld [vmem:[#allocation268_spill] sm:$0xff]  ;;  %v13568_v19 = vld [vmem:[#allocation270_spill] sm:$0xff] }
 0x297   :  { %13559 = vst [vmem:[#allocation265_spill] sm:$0xff] %v8536_v28  ;;  %v8550_v5 = vadd.f32 %v1718_v31, %v13566_v37  ;;  %v8553_v32 = vadd.f32 %v1721_v42, %v13568_v19  ;;  %v13570_v63 = vld [vmem:[#allocation17_spill] sm:$0xff]  ;;  %v13572_v52 = vld [vmem:[#allocation118_spill] sm:$0xff]  ;;  %v13573_v50 = vld [vmem:[#allocation219_spill] sm:$0xff] }
 0x298   :  { %13561 = vst [vmem:[#allocation220_spill] sm:$0xff] %v8540_v10  ;;  %13563 = vst [vmem:[#allocation275_spill] sm:$0xff] %v8544_v27  ;;  %v13571_v28 = vld [vmem:[#allocation53_spill] sm:$0xff]  ;;  %v13574_v15 = vld [vmem:[#allocation119_spill] sm:$0xff] }
 0x299   :  { %13565 = vst [vmem:[#allocation267_spill] sm:$0xff] %v8547_v1  ;;  %13567 = vst [vmem:[#allocation268_spill] sm:$0xff] %v8550_v5  ;;  %v2523_v24 = vmul.f32 %v13571_v28, %v13570_v63  ;;  %v2524_v21 = vmul.f32 %v13571_v28, %v13572_v52  ;;  %v2525_v35 = vmul.f32 %v13571_v28, %v13573_v50  ;;  %v5326_v19 = vld [vmem:[%s12146_s3 + $0x10] sm:$0xff]   ;;  %v13575_v31 = vld [vmem:[#allocation22_spill] sm:$0xff] }
 0x29a   :  { %13569 = vst [vmem:[#allocation270_spill] sm:$0xff] %v8553_v32  ;;  %v2526_v53 = vmul.f32 %v13571_v28, %v8528_v2  ;;  %v2528_v37 = vmul.f32 %v13571_v28, %v13574_v15  ;;  %v2529_v42 = vmul.f32 %v13571_v28, %v13575_v31  ;;  %v13576_v26 = vld [vmem:[#allocation120_spill] sm:$0xff]  ;;  %v13577_v1 = vld [vmem:[#allocation19_spill] sm:$0xff]  ;;  %v13578_v50 = vld [vmem:[#allocation121_spill] sm:$0xff]  ;;  %5233 = vmatprep.subr.bf16.mxu0 %v5326_v19 }
 0x29b   :  { %v2530_v5 = vmul.f32 %v13571_v28, %v13576_v26  ;;  %v2531_v32 = vmul.f32 %v13571_v28, %v13577_v1  ;;  %v2532_v2 = vmul.f32 %v13571_v28, %v13578_v50  ;;  %v13579_v52 = vld [vmem:[#allocation21_spill] sm:$0xff]  ;;  %v13580_v63 = vld [vmem:[#allocation122_spill] sm:$0xff]  ;;  %v13581_v33 = vld [vmem:[#allocation24_spill] sm:$0xff]  ;;  %5234 = vmatpush3.bf16.msra.mxu0 %v5326_v19  ;;  %5308 = vmatprep.subr.bf16.mxu1 %v5326_v19 }
 0x29c   :  { %v2533_v15 = vmul.f32 %v13571_v28, %v13579_v52  ;;  %v2534_v9 = vmul.f32 %v13571_v28, %v13580_v63  ;;  %v2535_v27 = vmul.f32 %v13571_v28, %v13581_v33  ;;  %v13582_v31 = vld [vmem:[#allocation123_spill] sm:$0xff]  ;;  %v13583_v26 = vld [vmem:[#allocation26_spill] sm:$0xff]  ;;  %v13584_v10 = vld [vmem:[#allocation124_spill] sm:$0xff]  ;;  %5316 = vmatpush3.bf16.msra.mxu1 %v5326_v19 }
 0x29d   :  { %v2536_v45 = vmul.f32 %v13571_v28, %v13582_v31  ;;  %v2537_v1 = vmul.f32 %v13571_v28, %v13583_v26  ;;  %v2538_v50 = vmul.f32 %v13571_v28, %v13584_v10  ;;  %v13585_v4 = vld [vmem:[#allocation23_spill] sm:$0xff]  ;;  %v13586_v52 = vld [vmem:[#allocation125_spill] sm:$0xff]  ;;  %v13588_v17 = vld [vmem:[#allocation126_spill] sm:$0xff] }
 0x29e   :  { %v2539_v40 = vmul.f32 %v13571_v28, %v13585_v4  ;;  %v2540_v57 = vmul.f32 %v13571_v28, %v13586_v52  ;;  %v13587_v63 = vld [vmem:[#allocation31_spill] sm:$0xff]  ;;  %v2542_v31 = vmul.f32 %v13571_v28, %v13588_v17  ;;  %v13589_v7 = vld [vmem:[#allocation102_spill] sm:$0xff]  ;;  %v5327_v4 = vld [vmem:[%s12146_s3 + $0x8] sm:$0xff]  }
 0x29f   :  { %v2541_v33 = vmul.f32 %v13571_v28, %v13587_v63  ;;  %v2543_v16 = vmul.f32 %v13571_v28, %v13589_v7  ;;  %v13590_v26 = vld [vmem:[#allocation127_spill] sm:$0xff]  ;;  %v13592_v11 = vld [vmem:[#allocation129_spill] sm:$0xff]  ;;  %v13593_v55 = vld [vmem:[#allocation104_spill] sm:$0xff]  ;;  %5235 = vmatprep.subr.bf16.mxu0 %v5327_v4  ;;  %v2601_v48 = vadd.f32 %v2537_v1, %v8316_v38  ;;  %5309 = vmatprep.subr.bf16.mxu1 %v5327_v4 }
 0x2a0   :  { %v2544_v22 = vmul.f32 %v13571_v28, %v13590_v26  ;;  %v13591_v10 = vld [vmem:[#allocation103_spill] sm:$0xff]  ;;  %v2546_v63 = vmul.f32 %v13571_v28, %v13592_v11  ;;  %v2547_v17 = vmul.f32 %v13571_v28, %v13593_v55  ;;  %v13594_v6 = vld [vmem:[#allocation130_spill] sm:$0xff]  ;;  %v8622_v11 = vadd.f32 %v2525_v35, %v8292_v43  ;;  %5236 = vmatpush3.bf16.msra.mxu0 %v5327_v4  ;;  %v13617_v35 = vld [vmem:[#allocation237_spill] sm:$0xff] }
 0x2a1   :  { %v2545_v52 = vmul.f32 %v13571_v28, %v13591_v10  ;;  %v2548_v7 = vmul.f32 %v13571_v28, %v13594_v6  ;;  %v13595_v51 = vld [vmem:[#allocation107_spill] sm:$0xff]  ;;  %v13597_v56 = vld [vmem:[#allocation66_spill] sm:$0xff]  ;;  %v8619_v10 = vadd.f32 %v2524_v21, %v8290_v60  ;;  %v8625_v55 = vadd.f32 %v2526_v53, %v8294_v44  ;;  %5317 = vmatpush3.bf16.msra.mxu1 %v5327_v4 }
 0x2a2   :  { %v2549_v26 = vmul.f32 %v13571_v28, %v13595_v51  ;;  %v13596_v34 = vld [vmem:[#allocation131_spill] sm:$0xff]  ;;  %v8616_v13 = vadd.f32 %v2523_v24, %v13597_v56  ;;  %v8628_v6 = vadd.f32 %v2528_v37, %v8298_v20  ;;  %v2593_v51 = vadd.f32 %v2529_v42, %v8300_v23  ;;  %v13613_v24 = vld [vmem:[#allocation274_spill] sm:$0xff] }
 0x2a3   :  { %v2550_v54 = vmul.f32 %v13571_v28, %v13596_v34  ;;  %v2594_v34 = vadd.f32 %v2530_v5, %v8302_v39  ;;  %v2595_v56 = vadd.f32 %v2531_v32, %v8304_v59  ;;  %v2596_v60 = vadd.f32 %v2532_v2, %v8306_v62  ;;  %v5328_v43 = vld [vmem:[%s12146_s3] sm:$0xff]   ;;  %v13606_v32 = vld [vmem:[#allocation60_spill] sm:$0xff]  ;;  %v13623_v53 = vld [vmem:[#allocation238_spill] sm:$0xff] }
 0x2a4   :  { %13598 = vst [vmem:[#allocation119_spill] sm:$0xff] %v8628_v6  ;;  %v2597_v21 = vadd.f32 %v2533_v15, %v8308_v12  ;;  %v2598_v44 = vadd.f32 %v2534_v9, %v8310_v61  ;;  %v2599_v20 = vadd.f32 %v2535_v27, %v8312_v29  ;;  %v2600_v23 = vadd.f32 %v2536_v45, %v8314_v36  ;;  %v13625_v19 = vld [vmem:[#allocation234_spill] sm:$0xff]  ;;  %v13628_v15 = vld [vmem:[#allocation275_spill] sm:$0xff]  ;;  %v13859_v28 = vld [vmem:[#allocation8_spill] sm:$0xff] }
 0x2a5   :  { %v2602_v39 = vadd.f32 %v2538_v50, %v8318_v58  ;;  %v2603_v59 = vadd.f32 %v2539_v40, %v8320_v0  ;;  %v2604_v12 = vadd.f32 %v2540_v57, %v8322_v49  ;;  %v2605_v62 = vadd.f32 %v2541_v33, %v8324_v47  ;;  %5237 = vmatprep.subr.bf16.mxu0 %v5328_v43  ;;  %v13599_v49 = vld [vmem:[#allocation271_spill] sm:$0xff]  ;;  %v13620_v40 = vld [vmem:[#allocation257_spill] sm:$0xff] }
 0x2a6   :  { %v2606_v5 = vadd.f32 %v2542_v31, %v8326_v14  ;;  %v2607_v9 = vadd.f32 %v2543_v16, %v8334_v25  ;;  %v2608_v61 = vadd.f32 %v2544_v22, %v8336_v41  ;;  %v2609_v29 = vadd.f32 %v2545_v52, %v8338_v3  ;;  %v13600_v47 = vld [vmem:[#allocation235_spill] sm:$0xff]  ;;  %v13602_v14 = vld [vmem:[#allocation33_spill] sm:$0xff]  ;;  %v13604_v41 = vld [vmem:[#allocation62_spill] sm:$0xff]  ;;  %5238 = vmatpush3.bf16.msra.mxu0 %v5328_v43 }
 0x2a7   :  { %v2610_v36 = vadd.f32 %v2546_v63, %v8340_v30  ;;  %v2611_v38 = vadd.f32 %v2547_v17, %v8342_v8  ;;  %v2612_v58 = vadd.f32 %v2548_v7, %v8344_v46  ;;  %v2613_v0 = vadd.f32 %v2549_v26, %v8346_v18  ;;  %v13603_v16 = vld [vmem:[#allocation247_spill] sm:$0xff]  ;;  %v13605_v3 = vld [vmem:[#allocation228_spill] sm:$0xff]  ;;  %v13610_v46 = vld [vmem:[#allocation273_spill] sm:$0xff]  ;;  %5310 = vmatprep.subr.bf16.mxu1 %v5328_v43 }
 0x2a8   :  { %v8656_v57 = vadd.f32 %v13600_v47, %v13599_v49  ;;  %v2614_v25 = vadd.f32 %v2550_v54, %v13602_v14  ;;  %v2615_v33 = vadd.f32 %v13604_v41, %v13603_v16  ;;  %v2616_v1 = vadd.f32 %v13606_v32, %v13605_v3  ;;  %v13607_v30 = vld [vmem:[#allocation272_spill] sm:$0xff]  ;;  %v13608_v8 = vld [vmem:[#allocation255_spill] sm:$0xff]  ;;  %v13627_v26 = vld [vmem:[#allocation254_spill] sm:$0xff]  ;;  %5318 = vmatpush3.bf16.msra.mxu1 %v5328_v43 }
 0x2a9   :  { %v8665_v27 = vadd.f32 %v13608_v8, %v13607_v30  ;;  %v13611_v18 = vld [vmem:[#allocation236_spill] sm:$0xff]  ;;  %v13616_v54 = vld [vmem:[#allocation35_spill] sm:$0xff]  ;;  %v1808_v7 = vadd.f32 %v13628_v15, %v13627_v26  ;;  %v13630_v47 = vld [vmem:[#allocation258_spill] sm:$0xff] }
 0x2aa   :  { %13601 = vst [vmem:[#allocation66_spill] sm:$0xff] %v8656_v57  ;;  %v8669_v2 = vadd.f32 %v13611_v18, %v13610_v46  ;;  %v13614_v63 = vld [vmem:[#allocation256_spill] sm:$0xff]  ;;  %v8677_v22 = vadd.f32 %v13617_v35, %v13616_v54  ;;  %v13619_v17 = vld [vmem:[#allocation227_spill] sm:$0xff]  ;;  %v13635_v3 = vld [vmem:[#allocation30_spill] sm:$0xff] }
 0x2ab   :  { %13609 = vst [vmem:[#allocation271_spill] sm:$0xff] %v8665_v27  ;;  %v8673_v45 = vadd.f32 %v13614_v63, %v13613_v24  ;;  %v8681_v50 = vadd.f32 %v13620_v40, %v13619_v17  ;;  %v13622_v52 = vld [vmem:[#allocation248_spill] sm:$0xff]  ;;  %v13632_v4 = vld [vmem:[#allocation27_spill] sm:$0xff]  ;;  %v13638_v8 = vld [vmem:[#allocation29_spill] sm:$0xff] }
 0x2ac   :  { %13612 = vst [vmem:[#allocation235_spill] sm:$0xff] %v8669_v2  ;;  %13618 = vst [vmem:[#allocation247_spill] sm:$0xff] %v8677_v22  ;;  %v8685_v37 = vadd.f32 %v13623_v53, %v13622_v52  ;;  %v13626_v31 = vld [vmem:[#allocation220_spill] sm:$0xff]  ;;  %v13633_v16 = vld [vmem:[#allocation239_spill] sm:$0xff] }
 0x2ad   :  { %13615 = vst [vmem:[#allocation33_spill] sm:$0xff] %v8673_v45  ;;  %13621 = vst [vmem:[#allocation62_spill] sm:$0xff] %v8681_v50  ;;  %v1807_v42 = vadd.f32 %v13626_v31, %v13625_v19  ;;  %v13629_v49 = vld [vmem:[#allocation28_spill] sm:$0xff]  ;;  %v8697_v41 = vadd.f32 %v13633_v16, %v13632_v4  ;;  %v13636_v32 = vld [vmem:[#allocation259_spill] sm:$0xff] }
 0x2ae   :  { %13624 = vst [vmem:[#allocation228_spill] sm:$0xff] %v8685_v37  ;;  %v8693_v14 = vadd.f32 %v13630_v47, %v13629_v49  ;;  %v8701_v30 = vadd.f32 %v13636_v32, %v13635_v3  ;;  %v13639_v46 = vld [vmem:[#allocation240_spill] sm:$0xff]  ;;  %v13641_v24 = vld [vmem:[#allocation229_spill] sm:$0xff]  ;;  %v13647_v52 = vld [vmem:[#allocation230_spill] sm:$0xff] }
 0x2af   :  { %13634 = vst [vmem:[#allocation272_spill] sm:$0xff] %v8697_v41  ;;  %v8705_v18 = vadd.f32 %v13639_v46, %v13638_v8  ;;  %v13642_v63 = vld [vmem:[#allocation260_spill] sm:$0xff]  ;;  %v13644_v35 = vld [vmem:[#allocation249_spill] sm:$0xff]  ;;  %v13650_v31 = vld [vmem:[#allocation250_spill] sm:$0xff] }
 0x2b0   :  { %13631 = vst [vmem:[#allocation60_spill] sm:$0xff] %v8693_v14  ;;  %13637 = vst [vmem:[#allocation255_spill] sm:$0xff] %v8701_v30  ;;  %v8709_v54 = vadd.f32 %v13642_v63, %v13641_v24  ;;  %v13645_v17 = vld [vmem:[#allocation241_spill] sm:$0xff]  ;;  %v13651_v26 = vld [vmem:[#allocation242_spill] sm:$0xff] }
 0x2b1   :  { %13640 = vst [vmem:[#allocation273_spill] sm:$0xff] %v8705_v18  ;;  %v8713_v40 = vadd.f32 %v13645_v17, %v13644_v35  ;;  %v13648_v53 = vld [vmem:[#allocation261_spill] sm:$0xff]  ;;  %v8721_v15 = vadd.f32 %v13651_v26, %v13650_v31  ;;  %v13653_v49 = vld [vmem:[#allocation231_spill] sm:$0xff]  ;;  %v13654_v47 = vld [vmem:[#allocation262_spill] sm:$0xff]  ;;  %v8744_v26 = vadd.f32 %v8616_v13, %v1807_v42 }
 0x2b2   :  { %13643 = vst [vmem:[#allocation236_spill] sm:$0xff] %v8709_v54  ;;  %v8717_v19 = vadd.f32 %v13648_v53, %v13647_v52  ;;  %v8725_v4 = vadd.f32 %v13654_v47, %v13653_v49  ;;  %v13656_v16 = vld [vmem:[#allocation251_spill] sm:$0xff]  ;;  %v13659_v8 = vld [vmem:[#allocation232_spill] sm:$0xff]  ;;  %v13665_v52 = vld [vmem:[#allocation233_spill] sm:$0xff]  ;;  %v8747_v49 = vadd.f32 %v8619_v10, %v1808_v7 }
 0x2b3   :  { %13646 = vst [vmem:[#allocation274_spill] sm:$0xff] %v8713_v40  ;;  %13652 = vst [vmem:[#allocation35_spill] sm:$0xff] %v8721_v15  ;;  %v13657_v3 = vld [vmem:[#allocation243_spill] sm:$0xff]  ;;  %v13662_v63 = vld [vmem:[#allocation252_spill] sm:$0xff] }
 0x2b4   :  { %13649 = vst [vmem:[#allocation256_spill] sm:$0xff] %v8717_v19  ;;  %13655 = vst [vmem:[#allocation237_spill] sm:$0xff] %v8725_v4  ;;  %v8729_v32 = vadd.f32 %v13657_v3, %v13656_v16  ;;  %v13660_v46 = vld [vmem:[#allocation263_spill] sm:$0xff]  ;;  %v13663_v35 = vld [vmem:[#allocation244_spill] sm:$0xff] }
 0x2b5   :  { %v8733_v24 = vadd.f32 %v13660_v46, %v13659_v8  ;;  %v8737_v17 = vadd.f32 %v13663_v35, %v13662_v63  ;;  %v13666_v53 = vld [vmem:[#allocation245_spill] sm:$0xff]  ;;  %13668 = vst [vmem:[#allocation234_spill] sm:$0xff] %v8744_v26  ;;  %13669 = vst [vmem:[#allocation220_spill] sm:$0xff] %v8747_v49  ;;  %v13670_v47 = vld [vmem:[#allocation192_spill] sm:$0xff] }
 0x2b6   :  { %13658 = vst [vmem:[#allocation227_spill] sm:$0xff] %v8729_v32  ;;  %v8741_v31 = vadd.f32 %v13666_v53, %v13665_v52  ;;  %v8751_v16 = vadd.f32 %v8622_v11, %v13670_v47  ;;  %v13672_v3 = vld [vmem:[#allocation193_spill] sm:$0xff]  ;;  %v13674_v46 = vld [vmem:[#allocation194_spill] sm:$0xff]  ;;  %v13676_v63 = vld [vmem:[#allocation195_spill] sm:$0xff] }
 0x2b7   :  { %13661 = vst [vmem:[#allocation257_spill] sm:$0xff] %v8733_v24  ;;  %13664 = vst [vmem:[#allocation248_spill] sm:$0xff] %v8737_v17  ;;  %v8755_v8 = vadd.f32 %v8625_v55, %v13672_v3  ;;  %v8758_v43 = vadd.f32 %v2593_v51, %v13674_v46  ;;  %v8761_v35 = vadd.f32 %v2594_v34, %v13676_v63  ;;  %v13678_v52 = vld [vmem:[#allocation196_spill] sm:$0xff]  ;;  %v13680_v42 = vld [vmem:[#allocation197_spill] sm:$0xff] }
 0x2b8   :  { %13667 = vst [vmem:[#allocation238_spill] sm:$0xff] %v8741_v31  ;;  %13671 = vst [vmem:[#allocation254_spill] sm:$0xff] %v8751_v16  ;;  %v8764_v13 = vadd.f32 %v2595_v56, %v13678_v52  ;;  %v8767_v10 = vadd.f32 %v2596_v60, %v13680_v42  ;;  %v13682_v7 = vld [vmem:[#allocation198_spill] sm:$0xff]  ;;  %v13684_v11 = vld [vmem:[#allocation199_spill] sm:$0xff] }
 0x2b9   :  { %13673 = vst [vmem:[#allocation275_spill] sm:$0xff] %v8755_v8  ;;  %13675 = vst [vmem:[#allocation28_spill] sm:$0xff] %v8758_v43  ;;  %v8770_v53 = vadd.f32 %v2597_v21, %v13682_v7  ;;  %v8773_v47 = vadd.f32 %v2598_v44, %v13684_v11  ;;  %v13686_v55 = vld [vmem:[#allocation200_spill] sm:$0xff]  ;;  %v13688_v51 = vld [vmem:[#allocation201_spill] sm:$0xff] }
 0x2ba   :  { %13677 = vst [vmem:[#allocation258_spill] sm:$0xff] %v8761_v35  ;;  %13679 = vst [vmem:[#allocation27_spill] sm:$0xff] %v8764_v13  ;;  %v8776_v3 = vadd.f32 %v2599_v20, %v13686_v55  ;;  %v8779_v46 = vadd.f32 %v2600_v23, %v13688_v51  ;;  %v13690_v34 = vld [vmem:[#allocation202_spill] sm:$0xff]  ;;  %v13692_v56 = vld [vmem:[#allocation203_spill] sm:$0xff] }
 0x2bb   :  { %13681 = vst [vmem:[#allocation239_spill] sm:$0xff] %v8767_v10  ;;  %13683 = vst [vmem:[#allocation30_spill] sm:$0xff] %v8770_v53  ;;  %v8782_v63 = vadd.f32 %v2601_v48, %v13690_v34  ;;  %v8785_v52 = vadd.f32 %v2602_v39, %v13692_v56  ;;  %v13694_v60 = vld [vmem:[#allocation204_spill] sm:$0xff]  ;;  %v13696_v21 = vld [vmem:[#allocation205_spill] sm:$0xff] }
 0x2bc   :  { %13685 = vst [vmem:[#allocation259_spill] sm:$0xff] %v8773_v47  ;;  %13687 = vst [vmem:[#allocation29_spill] sm:$0xff] %v8776_v3  ;;  %v8788_v42 = vadd.f32 %v2603_v59, %v13694_v60  ;;  %v8791_v7 = vadd.f32 %v2604_v12, %v13696_v21  ;;  %v13698_v44 = vld [vmem:[#allocation206_spill] sm:$0xff]  ;;  %v13700_v20 = vld [vmem:[#allocation207_spill] sm:$0xff] }
 0x2bd   :  { %13689 = vst [vmem:[#allocation240_spill] sm:$0xff] %v8779_v46  ;;  %13691 = vst [vmem:[#allocation229_spill] sm:$0xff] %v8782_v63  ;;  %v8794_v11 = vadd.f32 %v2605_v62, %v13698_v44  ;;  %v8797_v55 = vadd.f32 %v2606_v5, %v13700_v20  ;;  %v13702_v23 = vld [vmem:[#allocation208_spill] sm:$0xff]  ;;  %v13704_v48 = vld [vmem:[#allocation209_spill] sm:$0xff] }
 0x2be   :  { %13693 = vst [vmem:[#allocation260_spill] sm:$0xff] %v8785_v52  ;;  %13695 = vst [vmem:[#allocation249_spill] sm:$0xff] %v8788_v42  ;;  %v8800_v51 = vadd.f32 %v2607_v9, %v13702_v23  ;;  %v8803_v34 = vadd.f32 %v2608_v61, %v13704_v48  ;;  %v13706_v39 = vld [vmem:[#allocation210_spill] sm:$0xff]  ;;  %v13708_v59 = vld [vmem:[#allocation211_spill] sm:$0xff] }
 0x2bf   :  { %13697 = vst [vmem:[#allocation241_spill] sm:$0xff] %v8791_v7  ;;  %13699 = vst [vmem:[#allocation230_spill] sm:$0xff] %v8794_v11  ;;  %v8806_v56 = vadd.f32 %v2609_v29, %v13706_v39  ;;  %v8809_v60 = vadd.f32 %v2610_v36, %v13708_v59  ;;  %v13710_v12 = vld [vmem:[#allocation212_spill] sm:$0xff]  ;;  %v13712_v62 = vld [vmem:[#allocation213_spill] sm:$0xff] }
 0x2c0   :  { %13701 = vst [vmem:[#allocation261_spill] sm:$0xff] %v8797_v55  ;;  %13703 = vst [vmem:[#allocation250_spill] sm:$0xff] %v8800_v51  ;;  %v8812_v21 = vadd.f32 %v2611_v38, %v13710_v12  ;;  %v8815_v44 = vadd.f32 %v2612_v58, %v13712_v62  ;;  %v13714_v5 = vld [vmem:[#allocation214_spill] sm:$0xff]  ;;  %v13716_v9 = vld [vmem:[#allocation215_spill] sm:$0xff] }
 0x2c1   :  { %13705 = vst [vmem:[#allocation242_spill] sm:$0xff] %v8803_v34  ;;  %13707 = vst [vmem:[#allocation231_spill] sm:$0xff] %v8806_v56  ;;  %v8818_v20 = vadd.f32 %v2613_v0, %v13714_v5  ;;  %v8821_v23 = vadd.f32 %v2614_v25, %v13716_v9  ;;  %v13718_v61 = vld [vmem:[#allocation216_spill] sm:$0xff]  ;;  %v13720_v29 = vld [vmem:[#allocation253_spill] sm:$0xff] }
 0x2c2   :  { %13709 = vst [vmem:[#allocation262_spill] sm:$0xff] %v8809_v60  ;;  %13711 = vst [vmem:[#allocation251_spill] sm:$0xff] %v8812_v21  ;;  %v8824_v48 = vadd.f32 %v2615_v33, %v13718_v61  ;;  %v13721_v39 = vld [vmem:[#allocation265_spill] sm:$0xff]  ;;  %v13723_v36 = vld [vmem:[#allocation159_spill] sm:$0xff] }
 0x2c3   :  { %13713 = vst [vmem:[#allocation243_spill] sm:$0xff] %v8815_v44  ;;  %13715 = vst [vmem:[#allocation232_spill] sm:$0xff] %v8818_v20  ;;  %v8828_v16 = vadd.f32 %v13721_v39, %v13720_v29  ;;  %v13724_v59 = vld [vmem:[#allocation50_spill] sm:$0xff]  ;;  %v13726_v12 = vld [vmem:[#allocation145_spill] sm:$0xff] }
 0x2c4   :  { %13717 = vst [vmem:[#allocation263_spill] sm:$0xff] %v8821_v23  ;;  %13719 = vst [vmem:[#allocation252_spill] sm:$0xff] %v8824_v48  ;;  %v8832_v38 = vmul.f32 %v13724_v59, %v13723_v36  ;;  %v2296_v58 = vmul.f32 %v13724_v59, %v13726_v12  ;;  %v13727_v62 = vld [vmem:[#allocation217_spill] sm:$0xff]  ;;  %v13729_v5 = vld [vmem:[#allocation146_spill] sm:$0xff] }
 0x2c5   :  { %13722 = vst [vmem:[#allocation244_spill] sm:$0xff] %v8828_v16  ;;  %v8837_v0 = vadd.f32 %v2616_v1, %v13727_v62  ;;  %v2298_v25 = vmul.f32 %v13724_v59, %v13729_v5  ;;  %v13730_v9 = vld [vmem:[#allocation160_spill] sm:$0xff]  ;;  %v13731_v61 = vld [vmem:[#allocation147_spill] sm:$0xff]  ;;  %v13732_v39 = vld [vmem:[#allocation161_spill] sm:$0xff] }
 0x2c6   :  { %13725 = vst [vmem:[#allocation233_spill] sm:$0xff] %v8832_v38  ;;  %v2299_v33 = vmul.f32 %v13724_v59, %v13730_v9  ;;  %v2300_v29 = vmul.f32 %v13724_v59, %v13731_v61  ;;  %v2301_v17 = vmul.f32 %v13724_v59, %v13732_v39  ;;  %v13733_v36 = vld [vmem:[#allocation148_spill] sm:$0xff]  ;;  %v13734_v8 = vld [vmem:[#allocation162_spill] sm:$0xff]  ;;  %v13735_v1 = vld [vmem:[#allocation149_spill] sm:$0xff] }
 0x2c7   :  { %13728 = vst [vmem:[#allocation245_spill] sm:$0xff] %v8837_v0  ;;  %v2302_v24 = vmul.f32 %v13724_v59, %v13733_v36  ;;  %v2303_v12 = vmul.f32 %v13724_v59, %v13734_v8  ;;  %v2304_v62 = vmul.f32 %v13724_v59, %v13735_v1  ;;  %v13736_v6 = vld [vmem:[#allocation163_spill] sm:$0xff]  ;;  %v13737_v38 = vld [vmem:[#allocation150_spill] sm:$0xff]  ;;  %v13738_v32 = vld [vmem:[#allocation164_spill] sm:$0xff] }
 0x2c8   :  { %v2305_v5 = vmul.f32 %v13724_v59, %v13736_v6  ;;  %v2306_v9 = vmul.f32 %v13724_v59, %v13737_v38  ;;  %v2307_v61 = vmul.f32 %v13724_v59, %v13738_v32  ;;  %v13739_v4 = vld [vmem:[#allocation151_spill] sm:$0xff]  ;;  %v13740_v15 = vld [vmem:[#allocation165_spill] sm:$0xff]  ;;  %v13741_v19 = vld [vmem:[#allocation152_spill] sm:$0xff] }
 0x2c9   :  { %v2308_v39 = vmul.f32 %v13724_v59, %v13739_v4  ;;  %v2309_v36 = vmul.f32 %v13724_v59, %v13740_v15  ;;  %v2310_v8 = vmul.f32 %v13724_v59, %v13741_v19  ;;  %v13742_v40 = vld [vmem:[#allocation166_spill] sm:$0xff]  ;;  %v13743_v54 = vld [vmem:[#allocation153_spill] sm:$0xff]  ;;  %v13744_v18 = vld [vmem:[#allocation167_spill] sm:$0xff] }
 0x2ca   :  { %v2311_v1 = vmul.f32 %v13724_v59, %v13742_v40  ;;  %v2312_v6 = vmul.f32 %v13724_v59, %v13743_v54  ;;  %v2313_v38 = vmul.f32 %v13724_v59, %v13744_v18  ;;  %v13745_v30 = vld [vmem:[#allocation154_spill] sm:$0xff]  ;;  %v13746_v41 = vld [vmem:[#allocation168_spill] sm:$0xff]  ;;  %v13747_v0 = vld [vmem:[#allocation155_spill] sm:$0xff] }
 0x2cb   :  { %v2314_v32 = vmul.f32 %v13724_v59, %v13745_v30  ;;  %v2315_v4 = vmul.f32 %v13724_v59, %v13746_v41  ;;  %v8877_v15 = vmul.f32 %v13724_v59, %v13747_v0  ;;  %v13748_v19 = vld [vmem:[#allocation169_spill] sm:$0xff]  ;;  %v13750_v40 = vld [vmem:[#allocation156_spill] sm:$0xff]  ;;  %v13752_v23 = vld [vmem:[#allocation170_spill] sm:$0xff] }
 0x2cc   :  { %v8881_v48 = vmul.f32 %v13724_v59, %v13748_v19  ;;  %v8885_v54 = vmul.f32 %v13724_v59, %v13750_v40  ;;  %v8889_v18 = vmul.f32 %v13724_v59, %v13752_v23  ;;  %v13754_v30 = vld [vmem:[#allocation157_spill] sm:$0xff]  ;;  %v13756_v41 = vld [vmem:[#allocation171_spill] sm:$0xff]  ;;  %v13758_v44 = vld [vmem:[#allocation158_spill] sm:$0xff] }
 0x2cd   :  { %v8893_v20 = vmul.f32 %v13724_v59, %v13754_v30  ;;  %v8897_v0 = vmul.f32 %v13724_v59, %v13756_v41  ;;  %v8901_v19 = vmul.f32 %v13724_v59, %v13758_v44  ;;  %v13760_v21 = vld [vmem:[#allocation105_spill] sm:$0xff]  ;;  %v13761_v60 = vld [vmem:[#allocation51_spill] sm:$0xff]  ;;  %v13763_v56 = vld [vmem:[#allocation106_spill] sm:$0xff] }
 0x2ce   :  { %13749 = vst [vmem:[#allocation192_spill] sm:$0xff] %v8881_v48  ;;  %13751 = vst [vmem:[#allocation193_spill] sm:$0xff] %v8885_v54  ;;  %v8905_v40 = vmul.f32 %v13761_v60, %v13760_v21  ;;  %v2364_v23 = vmul.f32 %v13761_v60, %v13763_v56  ;;  %v13764_v34 = vld [vmem:[#allocation108_spill] sm:$0xff]  ;;  %v13766_v30 = vld [vmem:[#allocation109_spill] sm:$0xff] }
 0x2cf   :  { %13753 = vst [vmem:[#allocation194_spill] sm:$0xff] %v8889_v18  ;;  %13755 = vst [vmem:[#allocation195_spill] sm:$0xff] %v8893_v20  ;;  %v8911_v51 = vmul.f32 %v13761_v60, %v13764_v34  ;;  %v2366_v55 = vmul.f32 %v13761_v60, %v13766_v30  ;;  %v13767_v41 = vld [vmem:[#allocation110_spill] sm:$0xff]  ;;  %v13768_v7 = vld [vmem:[#allocation111_spill] sm:$0xff] }
 0x2d0   :  { %13757 = vst [vmem:[#allocation196_spill] sm:$0xff] %v8897_v0  ;;  %13759 = vst [vmem:[#allocation197_spill] sm:$0xff] %v8901_v19  ;;  %v2367_v11 = vmul.f32 %v13761_v60, %v13767_v41  ;;  %v2368_v44 = vmul.f32 %v13761_v60, %v13768_v7  ;;  %v13769_v59 = vld [vmem:[#allocation112_spill] sm:$0xff]  ;;  %v13771_v56 = vld [vmem:[#allocation114_spill] sm:$0xff]  ;;  %v8977_v2 = vadd.f32 %v2364_v23, %v2296_v58 }
 0x2d1   :  { %13762 = vst [vmem:[#allocation198_spill] sm:$0xff] %v8905_v40  ;;  %13765 = vst [vmem:[#allocation199_spill] sm:$0xff] %v8911_v51  ;;  %v2369_v21 = vmul.f32 %v13761_v60, %v13769_v59  ;;  %v13770_v40 = vld [vmem:[#allocation113_spill] sm:$0xff]  ;;  %v2371_v52 = vmul.f32 %v13761_v60, %v13771_v56  ;;  %v13772_v34 = vld [vmem:[#allocation115_spill] sm:$0xff] }
 0x2d2   :  { %v2370_v42 = vmul.f32 %v13761_v60, %v13770_v40  ;;  %v2372_v51 = vmul.f32 %v13761_v60, %v13772_v34  ;;  %v13773_v63 = vld [vmem:[#allocation116_spill] sm:$0xff]  ;;  %v13774_v46 = vld [vmem:[#allocation117_spill] sm:$0xff]  ;;  %v13778_v10 = vld [vmem:[#allocation134_spill] sm:$0xff]  ;;  %13797 = vst [vmem:[#allocation206_spill] sm:$0xff] %v8977_v2  ;;  %v8981_v27 = vadd.f32 %v2367_v11, %v2299_v33 }
 0x2d3   :  { %v2373_v30 = vmul.f32 %v13761_v60, %v13773_v63  ;;  %v2374_v41 = vmul.f32 %v13761_v60, %v13774_v46  ;;  %v13775_v3 = vld [vmem:[#allocation128_spill] sm:$0xff]  ;;  %v13777_v53 = vld [vmem:[#allocation133_spill] sm:$0xff]  ;;  %v2378_v56 = vmul.f32 %v13761_v60, %v13778_v10  ;;  %v13779_v13 = vld [vmem:[#allocation135_spill] sm:$0xff]  ;;  %v8985_v57 = vadd.f32 %v2369_v21, %v2301_v17 }
 0x2d4   :  { %v2375_v7 = vmul.f32 %v13761_v60, %v13775_v3  ;;  %v13776_v47 = vld [vmem:[#allocation132_spill] sm:$0xff]  ;;  %v2377_v40 = vmul.f32 %v13761_v60, %v13777_v53  ;;  %v2379_v34 = vmul.f32 %v13761_v60, %v13779_v13  ;;  %v13781_v43 = vld [vmem:[#allocation137_spill] sm:$0xff]  ;;  %v13782_v49 = vld [vmem:[#allocation138_spill] sm:$0xff]  ;;  %13799 = vst [vmem:[#allocation208_spill] sm:$0xff] %v8981_v27  ;;  %v8989_v16 = vadd.f32 %v2371_v52, %v2303_v12 }
 0x2d5   :  { %v2376_v59 = vmul.f32 %v13761_v60, %v13776_v47  ;;  %v13780_v35 = vld [vmem:[#allocation136_spill] sm:$0xff]  ;;  %v2381_v46 = vmul.f32 %v13761_v60, %v13781_v43  ;;  %v2382_v3 = vmul.f32 %v13761_v60, %v13782_v49  ;;  %v13783_v26 = vld [vmem:[#allocation139_spill] sm:$0xff]  ;;  %v13785_v10 = vld [vmem:[#allocation141_spill] sm:$0xff]  ;;  %13801 = vst [vmem:[#allocation210_spill] sm:$0xff] %v8985_v57  ;;  %v8993_v31 = vadd.f32 %v2373_v30, %v2305_v5 }
 0x2d6   :  { %v2380_v63 = vmul.f32 %v13761_v60, %v13780_v35  ;;  %v2383_v47 = vmul.f32 %v13761_v60, %v13783_v26  ;;  %v13784_v14 = vld [vmem:[#allocation140_spill] sm:$0xff]  ;;  %v8955_v37 = vmul.f32 %v13761_v60, %v13785_v10  ;;  %v13787_v13 = vld [vmem:[#allocation142_spill] sm:$0xff]  ;;  %v13793_v26 = vld [vmem:[#allocation15_spill] sm:$0xff]  ;;  %13803 = vst [vmem:[#allocation212_spill] sm:$0xff] %v8989_v16  ;;  %v8997_v23 = vadd.f32 %v2375_v7, %v2307_v61 }
 0x2d7   :  { %v8951_v53 = vmul.f32 %v13761_v60, %v13784_v14  ;;  %v8959_v35 = vmul.f32 %v13761_v60, %v13787_v13  ;;  %v13789_v50 = vld [vmem:[#allocation16_spill] sm:$0xff]  ;;  %v13791_v49 = vld [vmem:[#allocation18_spill] sm:$0xff]  ;;  %v8971_v14 = vmul.f32 %v13761_v60, %v13793_v26  ;;  %v13795_v45 = vld [vmem:[#allocation143_spill] sm:$0xff]  ;;  %v8979_v13 = vadd.f32 %v2366_v55, %v2298_v25  ;;  %13805 = vst [vmem:[#allocation214_spill] sm:$0xff] %v8993_v31 }
 0x2d8   :  { %13786 = vst [vmem:[#allocation200_spill] sm:$0xff] %v8955_v37  ;;  %v8963_v43 = vmul.f32 %v13761_v60, %v13789_v50  ;;  %v8967_v22 = vmul.f32 %v13761_v60, %v13791_v49  ;;  %v8975_v10 = vmul.f32 %v13761_v60, %v13795_v45  ;;  %v8983_v50 = vadd.f32 %v2368_v44, %v2300_v29  ;;  %v13818_v58 = vld [vmem:[#allocation75_spill] sm:$0xff]  ;;  %v13820_v5 = vld [vmem:[#allocation218_spill] sm:$0xff]  ;;  %v13827_v29 = vld [vmem:[#allocation80_spill] sm:$0xff] }
 0x2d9   :  { %13788 = vst [vmem:[#allocation201_spill] sm:$0xff] %v8959_v35  ;;  %13794 = vst [vmem:[#allocation204_spill] sm:$0xff] %v8971_v14  ;;  %v8987_v49 = vadd.f32 %v2370_v42, %v2302_v24  ;;  %v8991_v26 = vadd.f32 %v2372_v51, %v2304_v62  ;;  %v8995_v60 = vadd.f32 %v2374_v41, %v2306_v9  ;;  %v13816_v41 = vld [vmem:[#allocation64_spill] sm:$0xff]  ;;  %v13817_v51 = vld [vmem:[#allocation54_spill] sm:$0xff] }
 0x2da   :  { %13790 = vst [vmem:[#allocation202_spill] sm:$0xff] %v8963_v43  ;;  %13792 = vst [vmem:[#allocation203_spill] sm:$0xff] %v8967_v22  ;;  %v8999_v55 = vadd.f32 %v2376_v59, %v2308_v39  ;;  %v9001_v11 = vadd.f32 %v2377_v40, %v2309_v36  ;;  %v9003_v44 = vadd.f32 %v2378_v56, %v2310_v8  ;;  %v13819_v40 = vld [vmem:[#allocation266_spill] sm:$0xff]  ;;  %v13825_v25 = vld [vmem:[#allocation79_spill] sm:$0xff] }
 0x2db   :  { %13796 = vst [vmem:[#allocation205_spill] sm:$0xff] %v8975_v10  ;;  %13798 = vst [vmem:[#allocation207_spill] sm:$0xff] %v8979_v13  ;;  %v9005_v17 = vadd.f32 %v2379_v34, %v2311_v1  ;;  %v9007_v24 = vadd.f32 %v2380_v63, %v2312_v6  ;;  %v9009_v52 = vadd.f32 %v2381_v46, %v2313_v38  ;;  %v13821_v6 = vld [vmem:[#allocation77_spill] sm:$0xff]  ;;  %v13822_v63 = vld [vmem:[#allocation88_spill] sm:$0xff] }
 0x2dc   :  { %13800 = vst [vmem:[#allocation209_spill] sm:$0xff] %v8983_v50  ;;  %13802 = vst [vmem:[#allocation211_spill] sm:$0xff] %v8987_v49  ;;  %v9011_v42 = vadd.f32 %v2382_v3, %v2314_v32  ;;  %v9013_v30 = vadd.f32 %v2383_v47, %v2315_v4  ;;  %v3166_v7 = vmul.f32 %v13817_v51, %v13816_v41  ;;  %v13823_v4 = vld [vmem:[#allocation78_spill] sm:$0xff]  ;;  %v13824_v3 = vld [vmem:[#allocation89_spill] sm:$0xff] }
 0x2dd   :  { %13804 = vst [vmem:[#allocation213_spill] sm:$0xff] %v8991_v26  ;;  %13806 = vst [vmem:[#allocation215_spill] sm:$0xff] %v8995_v60  ;;  %v3167_v59 = vmul.f32 %v13817_v51, %v13818_v58  ;;  %v3168_v8 = vmul.f32 %v13817_v51, %v13819_v40  ;;  %v3169_v34 = vmul.f32 %v13817_v51, %v13820_v5  ;;  %v13826_v33 = vld [vmem:[#allocation90_spill] sm:$0xff]  ;;  %v13828_v36 = vld [vmem:[#allocation91_spill] sm:$0xff] }
 0x2de   :  { %13807 = vst [vmem:[#allocation216_spill] sm:$0xff] %v8997_v23  ;;  %13808 = vst [vmem:[#allocation253_spill] sm:$0xff] %v8999_v55  ;;  %v3173_v46 = vmul.f32 %v13817_v51, %v13821_v6  ;;  %v3174_v32 = vmul.f32 %v13817_v51, %v13822_v63  ;;  %v3175_v47 = vmul.f32 %v13817_v51, %v13823_v4  ;;  %v13829_v1 = vld [vmem:[#allocation81_spill] sm:$0xff]  ;;  %v13830_v21 = vld [vmem:[#allocation92_spill] sm:$0xff] }
 0x2df   :  { %13809 = vst [vmem:[#allocation265_spill] sm:$0xff] %v9001_v11  ;;  %13810 = vst [vmem:[#allocation159_spill] sm:$0xff] %v9003_v44  ;;  %v3176_v38 = vmul.f32 %v13817_v51, %v13824_v3  ;;  %v3177_v9 = vmul.f32 %v13817_v51, %v13825_v25  ;;  %v3178_v61 = vmul.f32 %v13817_v51, %v13826_v33  ;;  %v13831_v41 = vld [vmem:[#allocation82_spill] sm:$0xff]  ;;  %v13832_v40 = vld [vmem:[#allocation93_spill] sm:$0xff] }
 0x2e0   :  { %13811 = vst [vmem:[#allocation145_spill] sm:$0xff] %v9005_v17  ;;  %13812 = vst [vmem:[#allocation217_spill] sm:$0xff] %v9007_v24  ;;  %v3179_v39 = vmul.f32 %v13817_v51, %v13827_v29  ;;  %v3180_v12 = vmul.f32 %v13817_v51, %v13828_v36  ;;  %v3181_v62 = vmul.f32 %v13817_v51, %v13829_v1  ;;  %v13833_v6 = vld [vmem:[#allocation83_spill] sm:$0xff]  ;;  %v13834_v4 = vld [vmem:[#allocation94_spill] sm:$0xff] }
 0x2e1   :  { %13813 = vst [vmem:[#allocation105_spill] sm:$0xff] %v9009_v52  ;;  %13814 = vst [vmem:[#allocation51_spill] sm:$0xff] %v9011_v42  ;;  %v3182_v56 = vmul.f32 %v13817_v51, %v13830_v21  ;;  %v3183_v58 = vmul.f32 %v13817_v51, %v13831_v41  ;;  %v3184_v5 = vmul.f32 %v13817_v51, %v13832_v40  ;;  %v13835_v25 = vld [vmem:[#allocation84_spill] sm:$0xff]  ;;  %v13836_v29 = vld [vmem:[#allocation95_spill] sm:$0xff] }
 0x2e2   :  { %13815 = vst [vmem:[#allocation106_spill] sm:$0xff] %v9013_v30  ;;  %v3185_v63 = vmul.f32 %v13817_v51, %v13833_v6  ;;  %v3186_v3 = vmul.f32 %v13817_v51, %v13834_v4  ;;  %v3187_v33 = vmul.f32 %v13817_v51, %v13835_v25  ;;  %v3188_v36 = vmul.f32 %v13817_v51, %v13836_v29  ;;  %v13837_v1 = vld [vmem:[#allocation85_spill] sm:$0xff]  ;;  %v13838_v45 = vld [vmem:[#allocation96_spill] sm:$0xff]  ;;  %v13839_v13 = vld [vmem:[#allocation86_spill] sm:$0xff] }
 0x2e3   :  { %v3189_v21 = vmul.f32 %v13817_v51, %v13837_v1  ;;  %v3190_v41 = vmul.f32 %v13817_v51, %v13838_v45  ;;  %v3191_v40 = vmul.f32 %v13817_v51, %v13839_v13  ;;  %v13840_v2 = vld [vmem:[#allocation97_spill] sm:$0xff]  ;;  %v13842_v42 = vld [vmem:[#allocation34_spill] sm:$0xff]  ;;  %v13843_v25 = vld [vmem:[#allocation55_spill] sm:$0xff] }
 0x2e4   :  { %v3192_v6 = vmul.f32 %v13817_v51, %v13840_v2  ;;  %v13841_v30 = vld [vmem:[#allocation25_spill] sm:$0xff]  ;;  %v3234_v52 = vmul.f32 %v13843_v25, %v13842_v42  ;;  %v13844_v24 = vld [vmem:[#allocation36_spill] sm:$0xff]  ;;  %v13848_v55 = vld [vmem:[#allocation38_spill] sm:$0xff] }
 0x2e5   :  { %v3193_v4 = vmul.f32 %v13817_v51, %v13841_v30  ;;  %v3235_v29 = vmul.f32 %v13843_v25, %v13844_v24  ;;  %v13845_v17 = vld [vmem:[#allocation144_spill] sm:$0xff]  ;;  %v3242_v2 = vmul.f32 %v13843_v25, %v13848_v55  ;;  %v13850_v51 = vld [vmem:[#allocation39_spill] sm:$0xff]  ;;  %v13851_v60 = vld [vmem:[#allocation42_spill] sm:$0xff] }
 0x2e6   :  { %v3236_v1 = vmul.f32 %v13843_v25, %v13845_v17  ;;  %v13846_v44 = vld [vmem:[#allocation32_spill] sm:$0xff]  ;;  %v3244_v42 = vmul.f32 %v13843_v25, %v13850_v51  ;;  %v3245_v24 = vmul.f32 %v13843_v25, %v13851_v60  ;;  %v13853_v26 = vld [vmem:[#allocation41_spill] sm:$0xff]  ;;  %v13854_v16 = vld [vmem:[#allocation43_spill] sm:$0xff]  ;;  %v9115_v35 = vadd.f32 %v3234_v52, %v3166_v7 }
 0x2e7   :  { %v3237_v45 = vmul.f32 %v13843_v25, %v13846_v44  ;;  %v13847_v11 = vld [vmem:[#allocation52_spill] sm:$0xff]  ;;  %v3247_v44 = vmul.f32 %v13843_v25, %v13853_v26  ;;  %v13856_v57 = vld [vmem:[#allocation6_spill] sm:$0xff]  ;;  %v13857_v50 = vld [vmem:[#allocation3_spill] sm:$0xff] }
 0x2e8   :  { %v3241_v13 = vmul.f32 %v13843_v25, %v13847_v11  ;;  %v13849_v23 = vld [vmem:[#allocation40_spill] sm:$0xff]  ;;  %v3248_v11 = vmul.f32 %v13843_v25, %v13854_v16  ;;  %v3251_v51 = vmul.f32 %v13843_v25, %v13857_v50  ;;  %v13858_v27 = vld [vmem:[#allocation5_spill] sm:$0xff]  ;;  %v13860_v10 = vld [vmem:[#allocation10_spill] sm:$0xff] }
 0x2e9   :  { %v3243_v30 = vmul.f32 %v13843_v25, %v13849_v23  ;;  %v13852_v31 = vld [vmem:[#allocation44_spill] sm:$0xff]  ;;  %v3250_v23 = vmul.f32 %v13843_v25, %v13856_v57  ;;  %v3252_v60 = vmul.f32 %v13843_v25, %v13858_v27  ;;  %v3254_v26 = vmul.f32 %v13843_v25, %v13860_v10  ;;  %v13861_v19 = vld [vmem:[#allocation7_spill] sm:$0xff]  ;;  %v13862_v14 = vld [vmem:[#allocation9_spill] sm:$0xff] }
 0x2ea   :  { %v3246_v17 = vmul.f32 %v13843_v25, %v13852_v31  ;;  %v13855_v49 = vld [vmem:[#allocation4_spill] sm:$0xff]  ;;  %v3253_v31 = vmul.f32 %v13843_v25, %v13859_v28  ;;  %v3255_v16 = vmul.f32 %v13843_v25, %v13861_v19  ;;  %v13863_v0 = vld [vmem:[#allocation14_spill] sm:$0xff]  ;;  %v13865_v20 = vld [vmem:[#allocation11_spill] sm:$0xff]  ;;  %v9117_v19 = vadd.f32 %v3235_v29, %v3167_v59 }
 0x2eb   :  { %v3249_v55 = vmul.f32 %v13843_v25, %v13855_v49  ;;  %v3256_v49 = vmul.f32 %v13843_v25, %v13862_v14  ;;  %v3257_v57 = vmul.f32 %v13843_v25, %v13863_v0  ;;  %v13864_v22 = vld [vmem:[#allocation12_spill] sm:$0xff]  ;;  %v3259_v27 = vmul.f32 %v13843_v25, %v13865_v20  ;;  %v13866_v43 = vld [vmem:[#allocation13_spill] sm:$0xff]  ;;  %v13867_v18 = vld [vmem:[#allocation74_spill] sm:$0xff] }
 0x2ec   :  { %v3258_v50 = vmul.f32 %v13843_v25, %v13864_v22  ;;  %v3260_v28 = vmul.f32 %v13843_v25, %v13866_v43  ;;  %v3261_v10 = vmul.f32 %v13843_v25, %v13867_v18  ;;  %v9119_v14 = vadd.f32 %v3236_v1, %v3168_v8  ;;  %v13876_v29 = vld [vmem:[#allocation59_spill] sm:$0xff]  ;;  %v13878_v1 = vld [vmem:[#allocation192_spill] sm:$0xff]  ;;  %v13924_v25 = vld [vmem:[#allocation225_spill] sm:$0xff] }
 0x2ed   :  { %v9121_v54 = vadd.f32 %v3237_v45, %v3169_v34  ;;  %v9123_v0 = vadd.f32 %v3241_v13, %v3173_v46  ;;  %v9125_v22 = vadd.f32 %v3242_v2, %v3174_v32  ;;  %v9127_v37 = vadd.f32 %v3243_v30, %v3175_v47  ;;  %v13879_v45 = vld [vmem:[#allocation200_spill] sm:$0xff]  ;;  %v13881_v2 = vld [vmem:[#allocation193_spill] sm:$0xff] }
 0x2ee   :  { %v9129_v20 = vadd.f32 %v3244_v42, %v3176_v38  ;;  %v9131_v43 = vadd.f32 %v3245_v24, %v3177_v9  ;;  %v9133_v48 = vadd.f32 %v3246_v17, %v3178_v61  ;;  %v9135_v18 = vadd.f32 %v3247_v44, %v3179_v39  ;;  %v13882_v30 = vld [vmem:[#allocation201_spill] sm:$0xff]  ;;  %v13885_v42 = vld [vmem:[#allocation202_spill] sm:$0xff]  ;;  %v13887_v17 = vld [vmem:[#allocation195_spill] sm:$0xff] }
 0x2ef   :  { %v9137_v52 = vadd.f32 %v3248_v11, %v3180_v12  ;;  %v9139_v7 = vadd.f32 %v3249_v55, %v3181_v62  ;;  %v9141_v59 = vadd.f32 %v3250_v23, %v3182_v56  ;;  %v9143_v8 = vadd.f32 %v3251_v51, %v3183_v58  ;;  %v13868_v56 = vld [vmem:[#allocation56_spill] sm:$0xff]  ;;  %v13869_v58 = vld [vmem:[#allocation98_spill] sm:$0xff]  ;;  %v13888_v44 = vld [vmem:[#allocation203_spill] sm:$0xff] }
 0x2f0   :  { %v9145_v34 = vadd.f32 %v3252_v60, %v3184_v5  ;;  %v9147_v46 = vadd.f32 %v3253_v31, %v3185_v63  ;;  %v9149_v32 = vadd.f32 %v3254_v26, %v3186_v3  ;;  %v9151_v47 = vadd.f32 %v3255_v16, %v3187_v33  ;;  %v13871_v3 = vld [vmem:[#allocation57_spill] sm:$0xff]  ;;  %v13872_v33 = vld [vmem:[#allocation99_spill] sm:$0xff]  ;;  %v13890_v55 = vld [vmem:[#allocation196_spill] sm:$0xff] }
 0x2f1   :  { %v9153_v38 = vadd.f32 %v3256_v49, %v3188_v36  ;;  %v9155_v9 = vadd.f32 %v3257_v57, %v3189_v21  ;;  %v9157_v61 = vadd.f32 %v3258_v50, %v3190_v41  ;;  %v9159_v39 = vadd.f32 %v3259_v27, %v3191_v40  ;;  %v13873_v21 = vld [vmem:[#allocation63_spill] sm:$0xff]  ;;  %v13874_v41 = vld [vmem:[#allocation58_spill] sm:$0xff]  ;;  %v13891_v23 = vld [vmem:[#allocation204_spill] sm:$0xff] }
 0x2f2   :  { %v9161_v12 = vadd.f32 %v3260_v28, %v3192_v6  ;;  %v9163_v62 = vadd.f32 %v3261_v10, %v3193_v4  ;;  %v9167_v5 = vadd.f32 %v13869_v58, %v13868_v56  ;;  %v9171_v63 = vadd.f32 %v8951_v53, %v8877_v15  ;;  %v13875_v6 = vld [vmem:[#allocation61_spill] sm:$0xff]  ;;  %v13884_v53 = vld [vmem:[#allocation194_spill] sm:$0xff]  ;;  %v13898_v56 = vld [vmem:[#allocation187_spill] sm:$0xff] }
 0x2f3   :  { %v9175_v36 = vadd.f32 %v13872_v33, %v13871_v3  ;;  %v9179_v40 = vadd.f32 %v13874_v41, %v13873_v21  ;;  %v9183_v4 = vadd.f32 %v13876_v29, %v13875_v6  ;;  %v9187_v13 = vadd.f32 %v13879_v45, %v13878_v1  ;;  %v13892_v60 = vld [vmem:[#allocation197_spill] sm:$0xff]  ;;  %v13896_v50 = vld [vmem:[#allocation186_spill] sm:$0xff]  ;;  %v13899_v3 = vld [vmem:[#allocation175_spill] sm:$0xff] }
 0x2f4   :  { %13870 = vst [vmem:[#allocation64_spill] sm:$0xff] %v9171_v63  ;;  %v9191_v15 = vadd.f32 %v13882_v30, %v13881_v2  ;;  %v9195_v24 = vadd.f32 %v13885_v42, %v13884_v53  ;;  %v9199_v11 = vadd.f32 %v13888_v44, %v13887_v17  ;;  %v2453_v51 = vadd.f32 %v13891_v23, %v13890_v55  ;;  %v13893_v31 = vld [vmem:[#allocation205_spill] sm:$0xff]  ;;  %v13897_v28 = vld [vmem:[#allocation174_spill] sm:$0xff]  ;;  %v13900_v21 = vld [vmem:[#allocation188_spill] sm:$0xff] }
 0x2f5   :  { %13877 = vst [vmem:[#allocation75_spill] sm:$0xff] %v9183_v4  ;;  %13880 = vst [vmem:[#allocation266_spill] sm:$0xff] %v9187_v13  ;;  %v2454_v26 = vadd.f32 %v13893_v31, %v13892_v60  ;;  %v13894_v16 = vld [vmem:[#allocation173_spill] sm:$0xff]  ;;  %v13901_v6 = vld [vmem:[#allocation176_spill] sm:$0xff] }
 0x2f6   :  { %13883 = vst [vmem:[#allocation218_spill] sm:$0xff] %v9191_v15  ;;  %13886 = vst [vmem:[#allocation77_spill] sm:$0xff] %v9195_v24  ;;  %v13895_v49 = vld [vmem:[#allocation53_spill] sm:$0xff]  ;;  %v13904_v53 = vld [vmem:[#allocation190_spill] sm:$0xff] }
 0x2f7   :  { %13889 = vst [vmem:[#allocation88_spill] sm:$0xff] %v9199_v11  ;;  %v2499_v57 = vmul.f32 %v13895_v49, %v13894_v16  ;;  %v2500_v27 = vmul.f32 %v13895_v49, %v13896_v50  ;;  %v2501_v10 = vmul.f32 %v13895_v49, %v13897_v28  ;;  %v2502_v58 = vmul.f32 %v13895_v49, %v13898_v56  ;;  %v13902_v1 = vld [vmem:[#allocation189_spill] sm:$0xff]  ;;  %v13905_v17 = vld [vmem:[#allocation178_spill] sm:$0xff]  ;;  %v13906_v55 = vld [vmem:[#allocation191_spill] sm:$0xff] }
 0x2f8   :  { %v2503_v33 = vmul.f32 %v13895_v49, %v13899_v3  ;;  %v2504_v41 = vmul.f32 %v13895_v49, %v13900_v21  ;;  %v2505_v29 = vmul.f32 %v13895_v49, %v13901_v6  ;;  %v2506_v45 = vmul.f32 %v13895_v49, %v13902_v1  ;;  %v13903_v2 = vld [vmem:[#allocation177_spill] sm:$0xff]  ;;  %v13907_v60 = vld [vmem:[#allocation179_spill] sm:$0xff]  ;;  %v13910_v1 = vld [vmem:[#allocation180_spill] sm:$0xff] }
 0x2f9   :  { %v2507_v30 = vmul.f32 %v13895_v49, %v13903_v2  ;;  %v2508_v42 = vmul.f32 %v13895_v49, %v13904_v53  ;;  %v2509_v44 = vmul.f32 %v13895_v49, %v13905_v17  ;;  %v2510_v23 = vmul.f32 %v13895_v49, %v13906_v55  ;;  %v13908_v21 = vld [vmem:[#allocation221_spill] sm:$0xff]  ;;  %v13912_v2 = vld [vmem:[#allocation222_spill] sm:$0xff]  ;;  %v13916_v55 = vld [vmem:[#allocation223_spill] sm:$0xff] }
 0x2fa   :  { %v2511_v31 = vmul.f32 %v13895_v49, %v13907_v60  ;;  %v9233_v6 = vmul.f32 %v13895_v49, %v13908_v21  ;;  %v9237_v3 = vmul.f32 %v13895_v49, %v13910_v1  ;;  %v9241_v53 = vmul.f32 %v13895_v49, %v13912_v2  ;;  %v13914_v56 = vld [vmem:[#allocation181_spill] sm:$0xff]  ;;  %v13918_v60 = vld [vmem:[#allocation182_spill] sm:$0xff]  ;;  %v13920_v50 = vld [vmem:[#allocation224_spill] sm:$0xff] }
 0x2fb   :  { %v9245_v17 = vmul.f32 %v13895_v49, %v13914_v56  ;;  %v9249_v28 = vmul.f32 %v13895_v49, %v13916_v55  ;;  %v9253_v21 = vmul.f32 %v13895_v49, %v13918_v60  ;;  %v9257_v1 = vmul.f32 %v13895_v49, %v13920_v50  ;;  %v13922_v16 = vld [vmem:[#allocation183_spill] sm:$0xff]  ;;  %v13926_v11 = vld [vmem:[#allocation184_spill] sm:$0xff]  ;;  %v13927_v24 = vld [vmem:[#allocation226_spill] sm:$0xff] }
 0x2fc   :  { %13909 = vst [vmem:[#allocation78_spill] sm:$0xff] %v9233_v6  ;;  %13911 = vst [vmem:[#allocation89_spill] sm:$0xff] %v9237_v3  ;;  %v9261_v2 = vmul.f32 %v13895_v49, %v13922_v16  ;;  %v9265_v56 = vmul.f32 %v13895_v49, %v13924_v25  ;;  %v2521_v55 = vmul.f32 %v13895_v49, %v13926_v11  ;;  %v13928_v60 = vld [vmem:[#allocation20_spill] sm:$0xff]  ;;  %v13932_v13 = vld [vmem:[#allocation209_spill] sm:$0xff] }
 0x2fd   :  { %13913 = vst [vmem:[#allocation79_spill] sm:$0xff] %v9241_v53  ;;  %13915 = vst [vmem:[#allocation90_spill] sm:$0xff] %v9245_v17  ;;  %v2522_v15 = vmul.f32 %v13895_v49, %v13927_v24  ;;  %v13930_v50 = vld [vmem:[#allocation208_spill] sm:$0xff]  ;;  %v9279_v16 = vadd.f32 %v2500_v27, %v13932_v13  ;;  %v13936_v25 = vld [vmem:[#allocation211_spill] sm:$0xff] }
 0x2fe   :  { %13917 = vst [vmem:[#allocation80_spill] sm:$0xff] %v9249_v28  ;;  %13919 = vst [vmem:[#allocation91_spill] sm:$0xff] %v9253_v21  ;;  %v9273_v21 = vmul.f32 %v13895_v49, %v13928_v60  ;;  %v13938_v11 = vld [vmem:[#allocation212_spill] sm:$0xff]  ;;  %v13940_v24 = vld [vmem:[#allocation213_spill] sm:$0xff] }
 0x2ff   :  { %13921 = vst [vmem:[#allocation81_spill] sm:$0xff] %v9257_v1  ;;  %13923 = vst [vmem:[#allocation92_spill] sm:$0xff] %v9261_v2  ;;  %v9276_v1 = vadd.f32 %v2499_v57, %v13930_v50  ;;  %v13934_v2 = vld [vmem:[#allocation210_spill] sm:$0xff]  ;;  %v9288_v63 = vadd.f32 %v2503_v33, %v13938_v11  ;;  %v9291_v17 = vadd.f32 %v2504_v41, %v13940_v24  ;;  %v13944_v57 = vld [vmem:[#allocation215_spill] sm:$0xff] }
 0x300   :  { %13925 = vst [vmem:[#allocation82_spill] sm:$0xff] %v9265_v56  ;;  %13929 = vst [vmem:[#allocation93_spill] sm:$0xff] %v9273_v21  ;;  %v9282_v28 = vadd.f32 %v2501_v10, %v13934_v2  ;;  %v9285_v56 = vadd.f32 %v2502_v58, %v13936_v25  ;;  %v13942_v60 = vld [vmem:[#allocation214_spill] sm:$0xff]  ;;  %v9297_v50 = vadd.f32 %v2506_v45, %v13944_v57  ;;  %v13946_v13 = vld [vmem:[#allocation216_spill] sm:$0xff] }
 0x301   :  { %13931 = vst [vmem:[#allocation83_spill] sm:$0xff] %v9276_v1  ;;  %13933 = vst [vmem:[#allocation94_spill] sm:$0xff] %v9279_v16  ;;  %v9294_v21 = vadd.f32 %v2505_v29, %v13942_v60  ;;  %v9300_v27 = vadd.f32 %v2507_v30, %v13946_v13  ;;  %v13948_v10 = vld [vmem:[#allocation253_spill] sm:$0xff]  ;;  %v13952_v11 = vld [vmem:[#allocation159_spill] sm:$0xff]  ;;  %v9314_v29 = vadd.f32 %v2521_v55, %v2453_v51 }
 0x302   :  { %13935 = vst [vmem:[#allocation84_spill] sm:$0xff] %v9282_v28  ;;  %13937 = vst [vmem:[#allocation95_spill] sm:$0xff] %v9285_v56  ;;  %v9303_v2 = vadd.f32 %v2508_v42, %v13948_v10  ;;  %v13950_v25 = vld [vmem:[#allocation265_spill] sm:$0xff]  ;;  %v9309_v33 = vadd.f32 %v2510_v23, %v13952_v11  ;;  %v9316_v60 = vadd.f32 %v2522_v15, %v2454_v26  ;;  %v9321_v45 = vld [vmem:[%s12147_s2 + $0x8] ss:$0 sm:$0xff] }
 0x303   :  { %13939 = vst [vmem:[#allocation85_spill] sm:$0xff] %v9288_v63  ;;  %13941 = vst [vmem:[#allocation96_spill] sm:$0xff] %v9291_v17  ;;  %v9306_v58 = vadd.f32 %v2509_v44, %v13950_v25  ;;  %v13954_v24 = vld [vmem:[#allocation145_spill] sm:$0xff]  ;;  %v13959_v44 = vld [vmem:[#allocation118_spill] sm:$0xff] }
 0x304   :  { %13943 = vst [vmem:[#allocation86_spill] sm:$0xff] %v9294_v21  ;;  %13945 = vst [vmem:[#allocation97_spill] sm:$0xff] %v9297_v50  ;;  %v9312_v41 = vadd.f32 %v2511_v31, %v13954_v24  ;;  %v13958_v30 = vld [vmem:[#allocation17_spill] sm:$0xff]  ;;  %v3367_v57 = vmul.f32 %v9321_v45, %v13959_v44  ;;  %v13960_v23 = vld [vmem:[#allocation219_spill] sm:$0xff] }
 0x305   :  { %13947 = vst [vmem:[#allocation25_spill] sm:$0xff] %v9300_v27  ;;  %13949 = vst [vmem:[#allocation34_spill] sm:$0xff] %v9303_v2  ;;  %v3366_v42 = vmul.f32 %v9321_v45, %v13958_v30  ;;  %v3368_v13 = vmul.f32 %v9321_v45, %v13960_v23  ;;  %v13961_v31 = vld [vmem:[#allocation264_spill] sm:$0xff]  ;;  %v13963_v26 = vld [vmem:[#allocation19_spill] sm:$0xff] }
 0x306   :  { %13951 = vst [vmem:[#allocation36_spill] sm:$0xff] %v9306_v58  ;;  %13953 = vst [vmem:[#allocation144_spill] sm:$0xff] %v9309_v33  ;;  %v3369_v51 = vmul.f32 %v9321_v45, %v13961_v31  ;;  %v13962_v55 = vld [vmem:[#allocation120_spill] sm:$0xff]  ;;  %v3374_v10 = vmul.f32 %v9321_v45, %v13963_v26  ;;  %v13964_v25 = vld [vmem:[#allocation121_spill] sm:$0xff]  ;;  %v3431_v3 = vadd.f32 %v3367_v57, %v9117_v19 }
 0x307   :  { %13955 = vst [vmem:[#allocation32_spill] sm:$0xff] %v9312_v41  ;;  %13956 = vst [vmem:[#allocation52_spill] sm:$0xff] %v9314_v29  ;;  %v3373_v15 = vmul.f32 %v9321_v45, %v13962_v55  ;;  %v3375_v11 = vmul.f32 %v9321_v45, %v13964_v25  ;;  %v13965_v24 = vld [vmem:[#allocation21_spill] sm:$0xff]  ;;  %v13966_v16 = vld [vmem:[#allocation122_spill] sm:$0xff] }
 0x308   :  { %13957 = vst [vmem:[#allocation38_spill] sm:$0xff] %v9316_v60  ;;  %v3376_v30 = vmul.f32 %v9321_v45, %v13965_v24  ;;  %v3377_v44 = vmul.f32 %v9321_v45, %v13966_v16  ;;  %v13967_v1 = vld [vmem:[#allocation24_spill] sm:$0xff]  ;;  %v13968_v49 = vld [vmem:[#allocation123_spill] sm:$0xff]  ;;  %v13969_v41 = vld [vmem:[#allocation26_spill] sm:$0xff] }
 0x309   :  { %v3378_v23 = vmul.f32 %v9321_v45, %v13967_v1  ;;  %v3379_v31 = vmul.f32 %v9321_v45, %v13968_v49  ;;  %v3380_v55 = vmul.f32 %v9321_v45, %v13969_v41  ;;  %v13970_v33 = vld [vmem:[#allocation124_spill] sm:$0xff]  ;;  %v13971_v58 = vld [vmem:[#allocation23_spill] sm:$0xff]  ;;  %v13972_v2 = vld [vmem:[#allocation125_spill] sm:$0xff]  ;;  %v9378_v6 = vadd.f32 %v3373_v15, %v9123_v0 }
 0x30a   :  { %v3381_v26 = vmul.f32 %v9321_v45, %v13970_v33  ;;  %v3382_v25 = vmul.f32 %v9321_v45, %v13971_v58  ;;  %v3383_v24 = vmul.f32 %v9321_v45, %v13972_v2  ;;  %v13973_v27 = vld [vmem:[#allocation31_spill] sm:$0xff]  ;;  %v13974_v50 = vld [vmem:[#allocation126_spill] sm:$0xff]  ;;  %v13978_v56 = vld [vmem:[#allocation129_spill] sm:$0xff]  ;;  %v3441_v4 = vadd.f32 %v3377_v44, %v9131_v43 }
 0x30b   :  { %v3384_v16 = vmul.f32 %v9321_v45, %v13973_v27  ;;  %v3385_v1 = vmul.f32 %v9321_v45, %v13974_v50  ;;  %v13975_v21 = vld [vmem:[#allocation102_spill] sm:$0xff]  ;;  %v13976_v17 = vld [vmem:[#allocation127_spill] sm:$0xff]  ;;  %v3389_v58 = vmul.f32 %v9321_v45, %v13978_v56  ;;  %v13979_v28 = vld [vmem:[#allocation104_spill] sm:$0xff]  ;;  %v3433_v56 = vadd.f32 %v3369_v51, %v9121_v54 }
 0x30c   :  { %v3386_v49 = vmul.f32 %v9321_v45, %v13975_v21  ;;  %v3387_v41 = vmul.f32 %v9321_v45, %v13976_v17  ;;  %v13977_v63 = vld [vmem:[#allocation103_spill] sm:$0xff]  ;;  %v3390_v2 = vmul.f32 %v9321_v45, %v13979_v28  ;;  %v13980_v60 = vld [vmem:[#allocation130_spill] sm:$0xff]  ;;  %v3430_v17 = vadd.f32 %v3366_v42, %v9115_v35  ;;  %v13988_v51 = vld [vmem:[#allocation217_spill] sm:$0xff] }
 0x30d   :  { %v3388_v33 = vmul.f32 %v9321_v45, %v13977_v63  ;;  %v3391_v27 = vmul.f32 %v9321_v45, %v13980_v60  ;;  %v13981_v29 = vld [vmem:[#allocation107_spill] sm:$0xff]  ;;  %v3432_v63 = vadd.f32 %v3368_v13, %v9119_v14  ;;  %v3438_v28 = vadd.f32 %v3374_v10, %v9125_v22  ;;  %v13991_v10 = vld [vmem:[#allocation89_spill] sm:$0xff]  ;;  %v13994_v44 = vld [vmem:[#allocation106_spill] sm:$0xff] }
 0x30e   :  { %v3392_v50 = vmul.f32 %v9321_v45, %v13981_v29  ;;  %v13982_v53 = vld [vmem:[#allocation131_spill] sm:$0xff]  ;;  %v3439_v60 = vadd.f32 %v3375_v11, %v9127_v37  ;;  %v3440_v29 = vadd.f32 %v3376_v30, %v9129_v20  ;;  %v3443_v35 = vadd.f32 %v3379_v31, %v9135_v18  ;;  %v13996_v31 = vld [vmem:[#allocation64_spill] sm:$0xff] }
 0x30f   :  { %v3393_v21 = vmul.f32 %v9321_v45, %v13982_v53  ;;  %v3442_v53 = vadd.f32 %v3378_v23, %v9133_v48  ;;  %v3444_v19 = vadd.f32 %v3380_v55, %v9137_v52  ;;  %v3445_v14 = vadd.f32 %v3381_v26, %v9139_v7  ;;  %v13987_v13 = vld [vmem:[#allocation67_spill] sm:$0xff]  ;;  %v13998_v26 = vld [vmem:[#allocation266_spill] sm:$0xff] }
 0x310   :  { %v3446_v54 = vadd.f32 %v3382_v25, %v9141_v59  ;;  %v3447_v0 = vadd.f32 %v3383_v24, %v9143_v8  ;;  %v3448_v22 = vadd.f32 %v3384_v16, %v9145_v34  ;;  %v3449_v37 = vadd.f32 %v3385_v1, %v9147_v46  ;;  %v13983_v34 = vld [vmem:[#allocation100_spill] sm:$0xff]  ;;  %v13984_v46 = vld [vmem:[#allocation101_spill] sm:$0xff]  ;;  %v13992_v11 = vld [vmem:[#allocation51_spill] sm:$0xff] }
 0x311   :  { %v3450_v20 = vadd.f32 %v3386_v49, %v9149_v32  ;;  %v3451_v43 = vadd.f32 %v3387_v41, %v9151_v47  ;;  %v3452_v48 = vadd.f32 %v3388_v33, %v9153_v38  ;;  %v3453_v18 = vadd.f32 %v3389_v58, %v9155_v9  ;;  %v13985_v47 = vld [vmem:[#allocation65_spill] sm:$0xff]  ;;  %v13986_v38 = vld [vmem:[#allocation75_spill] sm:$0xff]  ;;  %v14000_v24 = vld [vmem:[#allocation238_spill] sm:$0xff] }
 0x312   :  { %v3454_v52 = vadd.f32 %v3390_v2, %v9157_v61  ;;  %v3455_v7 = vadd.f32 %v3391_v27, %v9159_v39  ;;  %v3456_v59 = vadd.f32 %v3392_v50, %v9161_v12  ;;  %v3457_v8 = vadd.f32 %v3393_v21, %v9163_v62  ;;  %v13989_v61 = vld [vmem:[#allocation78_spill] sm:$0xff]  ;;  %v13990_v39 = vld [vmem:[#allocation105_spill] sm:$0xff]  ;;  %v13993_v62 = vld [vmem:[#allocation79_spill] sm:$0xff] }
 0x313   :  { %v3458_v42 = vadd.f32 %v13983_v34, %v9167_v5  ;;  %v3459_v32 = vadd.f32 %v13984_v46, %v9175_v36  ;;  %v3460_v57 = vadd.f32 %v13985_v47, %v9179_v40  ;;  %v3461_v9 = vadd.f32 %v13987_v13, %v13986_v38  ;;  %v13995_v5 = vld [vmem:[#allocation90_spill] sm:$0xff]  ;;  %v13997_v36 = vld [vmem:[#allocation80_spill] sm:$0xff]  ;;  %v13999_v40 = vld [vmem:[#allocation91_spill] sm:$0xff] }
 0x314   :  { %v2576_v15 = vadd.f32 %v13989_v61, %v13988_v51  ;;  %v2577_v12 = vadd.f32 %v13991_v10, %v13990_v39  ;;  %v2578_v30 = vadd.f32 %v13993_v62, %v13992_v11  ;;  %v2579_v23 = vadd.f32 %v13995_v5, %v13994_v44  ;;  %v14001_v16 = vld [vmem:[#allocation52_spill] sm:$0xff]  ;;  %v14003_v41 = vld [vmem:[#allocation38_spill] sm:$0xff]  ;;  %v14005_v2 = vld [vmem:[#allocation81_spill] sm:$0xff] }
 0x315   :  { %v2580_v55 = vadd.f32 %v13997_v36, %v13996_v31  ;;  %v2581_v25 = vadd.f32 %v13999_v40, %v13998_v26  ;;  %v2649_v1 = vadd.f32 %v14001_v16, %v14000_v24  ;;  %v14002_v49 = vld [vmem:[#allocation244_spill] sm:$0xff]  ;;  %v14004_v58 = vld [vmem:[#allocation218_spill] sm:$0xff]  ;;  %v14006_v50 = vld [vmem:[#allocation77_spill] sm:$0xff] }
 0x316   :  { %v2650_v33 = vadd.f32 %v14003_v41, %v14002_v49  ;;  %v2582_v27 = vadd.f32 %v14005_v2, %v14004_v58  ;;  %v14007_v21 = vld [vmem:[#allocation92_spill] sm:$0xff]  ;;  %v14010_v47 = vld [vmem:[#allocation82_spill] sm:$0xff]  ;;  %v14015_v10 = vld [vmem:[#allocation95_spill] sm:$0xff] }
 0x317   :  { %v9428_v34 = vadd.f32 %v14007_v21, %v14006_v50  ;;  %v14009_v46 = vld [vmem:[#allocation88_spill] sm:$0xff]  ;;  %v14012_v13 = vld [vmem:[#allocation270_spill] sm:$0xff]  ;;  %v14016_v62 = vld [vmem:[#allocation271_spill] sm:$0xff] }
 0x318   :  { %v9432_v38 = vadd.f32 %v14010_v47, %v14009_v46  ;;  %v14013_v51 = vld [vmem:[#allocation84_spill] sm:$0xff]  ;;  %v14014_v39 = vld [vmem:[#allocation66_spill] sm:$0xff]  ;;  %v14017_v44 = vld [vmem:[#allocation85_spill] sm:$0xff] }
 0x319   :  { %14008 = vst [vmem:[#allocation40_spill] sm:$0xff] %v9428_v34  ;;  %v9436_v61 = vadd.f32 %v14013_v51, %v14012_v13  ;;  %v9440_v11 = vadd.f32 %v14015_v10, %v14014_v39  ;;  %v9444_v5 = vadd.f32 %v14017_v44, %v14016_v62  ;;  %v14018_v31 = vld [vmem:[#allocation235_spill] sm:$0xff]  ;;  %v14019_v36 = vld [vmem:[#allocation96_spill] sm:$0xff]  ;;  %v14021_v40 = vld [vmem:[#allocation33_spill] sm:$0xff]  ;;  %v9470_v62 = vadd.f32 %v3430_v17, %v2649_v1 }
 0x31a   :  { %14011 = vst [vmem:[#allocation39_spill] sm:$0xff] %v9432_v38  ;;  %v9448_v26 = vadd.f32 %v14019_v36, %v14018_v31  ;;  %v14022_v24 = vld [vmem:[#allocation86_spill] sm:$0xff]  ;;  %v14024_v49 = vld [vmem:[#allocation247_spill] sm:$0xff]  ;;  %v14025_v41 = vld [vmem:[#allocation97_spill] sm:$0xff]  ;;  %v9472_v44 = vadd.f32 %v3431_v3, %v2650_v33 }
 0x31b   :  { %v9452_v16 = vadd.f32 %v14022_v24, %v14021_v40  ;;  %v9456_v58 = vadd.f32 %v14025_v41, %v14024_v49  ;;  %v14027_v2 = vld [vmem:[#allocation62_spill] sm:$0xff]  ;;  %v14028_v50 = vld [vmem:[#allocation25_spill] sm:$0xff]  ;;  %v14030_v46 = vld [vmem:[#allocation228_spill] sm:$0xff]  ;;  %14036 = vst [vmem:[#allocation3_spill] sm:$0xff] %v9470_v62 }
 0x31c   :  { %14020 = vst [vmem:[#allocation42_spill] sm:$0xff] %v9448_v26  ;;  %v9460_v21 = vadd.f32 %v14028_v50, %v14027_v2  ;;  %v14031_v47 = vld [vmem:[#allocation34_spill] sm:$0xff]  ;;  %v14033_v51 = vld [vmem:[#allocation60_spill] sm:$0xff]  ;;  %14037 = vst [vmem:[#allocation5_spill] sm:$0xff] %v9472_v44 }
 0x31d   :  { %14023 = vst [vmem:[#allocation44_spill] sm:$0xff] %v9452_v16  ;;  %14026 = vst [vmem:[#allocation41_spill] sm:$0xff] %v9456_v58  ;;  %v9464_v13 = vadd.f32 %v14031_v47, %v14030_v46  ;;  %v14034_v39 = vld [vmem:[#allocation36_spill] sm:$0xff]  ;;  %v14038_v31 = vld [vmem:[#allocation234_spill] sm:$0xff] }
 0x31e   :  { %14029 = vst [vmem:[#allocation43_spill] sm:$0xff] %v9460_v21  ;;  %v9468_v10 = vadd.f32 %v14034_v39, %v14033_v51  ;;  %v9475_v36 = vadd.f32 %v3432_v63, %v14038_v31  ;;  %v14040_v40 = vld [vmem:[#allocation220_spill] sm:$0xff]  ;;  %v14044_v2 = vld [vmem:[#allocation258_spill] sm:$0xff]  ;;  %v14046_v46 = vld [vmem:[#allocation27_spill] sm:$0xff] }
 0x31f   :  { %14032 = vst [vmem:[#allocation4_spill] sm:$0xff] %v9464_v13  ;;  %v9478_v24 = vadd.f32 %v3433_v56, %v14040_v40  ;;  %v14042_v49 = vld [vmem:[#allocation28_spill] sm:$0xff]  ;;  %v9484_v50 = vadd.f32 %v3439_v60, %v14044_v2  ;;  %v9487_v47 = vadd.f32 %v3440_v29, %v14046_v46  ;;  %v14048_v51 = vld [vmem:[#allocation239_spill] sm:$0xff]  ;;  %v14050_v3 = vld [vmem:[#allocation30_spill] sm:$0xff] }
 0x320   :  { %14035 = vst [vmem:[#allocation6_spill] sm:$0xff] %v9468_v10  ;;  %14039 = vst [vmem:[#allocation8_spill] sm:$0xff] %v9475_v36  ;;  %v9481_v41 = vadd.f32 %v3438_v28, %v14042_v49  ;;  %v9490_v17 = vadd.f32 %v3441_v4, %v14048_v51  ;;  %v9493_v1 = vadd.f32 %v3442_v53, %v14050_v3  ;;  %v14052_v63 = vld [vmem:[#allocation259_spill] sm:$0xff]  ;;  %v14054_v56 = vld [vmem:[#allocation29_spill] sm:$0xff] }
 0x321   :  { %14041 = vst [vmem:[#allocation10_spill] sm:$0xff] %v9478_v24  ;;  %14045 = vst [vmem:[#allocation9_spill] sm:$0xff] %v9484_v50  ;;  %v9496_v33 = vadd.f32 %v3443_v35, %v14052_v63  ;;  %v9499_v39 = vadd.f32 %v3444_v19, %v14054_v56  ;;  %v14056_v28 = vld [vmem:[#allocation240_spill] sm:$0xff]  ;;  %v14058_v60 = vld [vmem:[#allocation229_spill] sm:$0xff] }
 0x322   :  { %14043 = vst [vmem:[#allocation7_spill] sm:$0xff] %v9481_v41  ;;  %14047 = vst [vmem:[#allocation14_spill] sm:$0xff] %v9487_v47  ;;  %v9502_v31 = vadd.f32 %v3445_v14, %v14056_v28  ;;  %v9505_v40 = vadd.f32 %v3446_v54, %v14058_v60  ;;  %v14060_v29 = vld [vmem:[#allocation260_spill] sm:$0xff]  ;;  %v14062_v4 = vld [vmem:[#allocation249_spill] sm:$0xff] }
 0x323   :  { %14049 = vst [vmem:[#allocation12_spill] sm:$0xff] %v9490_v17  ;;  %14051 = vst [vmem:[#allocation11_spill] sm:$0xff] %v9493_v1  ;;  %v9508_v49 = vadd.f32 %v3447_v0, %v14060_v29  ;;  %v9511_v2 = vadd.f32 %v3448_v22, %v14062_v4  ;;  %v14064_v53 = vld [vmem:[#allocation241_spill] sm:$0xff]  ;;  %v14066_v35 = vld [vmem:[#allocation230_spill] sm:$0xff] }
 0x324   :  { %14053 = vst [vmem:[#allocation13_spill] sm:$0xff] %v9496_v33  ;;  %14055 = vst [vmem:[#allocation74_spill] sm:$0xff] %v9499_v39  ;;  %v9514_v46 = vadd.f32 %v3449_v37, %v14064_v53  ;;  %v9517_v51 = vadd.f32 %v3450_v20, %v14066_v35  ;;  %v14068_v19 = vld [vmem:[#allocation261_spill] sm:$0xff]  ;;  %v14070_v14 = vld [vmem:[#allocation250_spill] sm:$0xff] }
 0x325   :  { %14057 = vst [vmem:[#allocation56_spill] sm:$0xff] %v9502_v31  ;;  %14059 = vst [vmem:[#allocation98_spill] sm:$0xff] %v9505_v40  ;;  %v9520_v3 = vadd.f32 %v3451_v43, %v14068_v19  ;;  %v9523_v63 = vadd.f32 %v3452_v48, %v14070_v14  ;;  %v14072_v54 = vld [vmem:[#allocation242_spill] sm:$0xff]  ;;  %v14074_v0 = vld [vmem:[#allocation231_spill] sm:$0xff] }
 0x326   :  { %14061 = vst [vmem:[#allocation57_spill] sm:$0xff] %v9508_v49  ;;  %14063 = vst [vmem:[#allocation99_spill] sm:$0xff] %v9511_v2  ;;  %v9526_v56 = vadd.f32 %v3453_v18, %v14072_v54  ;;  %v9529_v28 = vadd.f32 %v3454_v52, %v14074_v0  ;;  %v14076_v22 = vld [vmem:[#allocation262_spill] sm:$0xff]  ;;  %v14078_v37 = vld [vmem:[#allocation251_spill] sm:$0xff] }
 0x327   :  { %14065 = vst [vmem:[#allocation63_spill] sm:$0xff] %v9514_v46  ;;  %14067 = vst [vmem:[#allocation58_spill] sm:$0xff] %v9517_v51  ;;  %v9532_v60 = vadd.f32 %v3455_v7, %v14076_v22  ;;  %v9535_v29 = vadd.f32 %v3456_v59, %v14078_v37  ;;  %v14080_v20 = vld [vmem:[#allocation243_spill] sm:$0xff]  ;;  %v14082_v43 = vld [vmem:[#allocation232_spill] sm:$0xff] }
 0x328   :  { %14069 = vst [vmem:[#allocation61_spill] sm:$0xff] %v9520_v3  ;;  %14071 = vst [vmem:[#allocation59_spill] sm:$0xff] %v9523_v63  ;;  %v9538_v4 = vadd.f32 %v3457_v8, %v14080_v20  ;;  %v9541_v53 = vadd.f32 %v3458_v42, %v14082_v43  ;;  %v14084_v48 = vld [vmem:[#allocation263_spill] sm:$0xff]  ;;  %v14086_v18 = vld [vmem:[#allocation252_spill] sm:$0xff] }
 0x329   :  { %14073 = vst [vmem:[#allocation192_spill] sm:$0xff] %v9526_v56  ;;  %14075 = vst [vmem:[#allocation200_spill] sm:$0xff] %v9529_v28  ;;  %v9544_v35 = vadd.f32 %v3459_v32, %v14084_v48  ;;  %v9547_v19 = vadd.f32 %v3460_v57, %v14086_v18  ;;  %v14088_v52 = vld [vmem:[#allocation245_spill] sm:$0xff]  ;;  %v14090_v7 = vld [vmem:[#allocation272_spill] sm:$0xff] }
 0x32a   :  { %14077 = vst [vmem:[#allocation193_spill] sm:$0xff] %v9532_v60  ;;  %14079 = vst [vmem:[#allocation201_spill] sm:$0xff] %v9535_v29  ;;  %v9550_v14 = vadd.f32 %v3461_v9, %v14088_v52  ;;  %v14091_v54 = vld [vmem:[#allocation144_spill] sm:$0xff]  ;;  %v14093_v59 = vld [vmem:[#allocation255_spill] sm:$0xff] }
 0x32b   :  { %14081 = vst [vmem:[#allocation194_spill] sm:$0xff] %v9538_v4  ;;  %14083 = vst [vmem:[#allocation202_spill] sm:$0xff] %v9541_v53  ;;  %v9554_v0 = vadd.f32 %v14091_v54, %v14090_v7  ;;  %v14094_v22 = vld [vmem:[#allocation32_spill] sm:$0xff]  ;;  %v14096_v37 = vld [vmem:[#allocation273_spill] sm:$0xff] }
 0x32c   :  { %14085 = vst [vmem:[#allocation195_spill] sm:$0xff] %v9544_v35  ;;  %14087 = vst [vmem:[#allocation203_spill] sm:$0xff] %v9547_v19  ;;  %v9558_v8 = vadd.f32 %v14094_v22, %v14093_v59  ;;  %v9561_v42 = vadd.f32 %v2576_v15, %v14096_v37  ;;  %v14098_v20 = vld [vmem:[#allocation236_spill] sm:$0xff]  ;;  %v14100_v43 = vld [vmem:[#allocation274_spill] sm:$0xff] }
 0x32d   :  { %14089 = vst [vmem:[#allocation196_spill] sm:$0xff] %v9550_v14  ;;  %14092 = vst [vmem:[#allocation204_spill] sm:$0xff] %v9554_v0  ;;  %v9564_v32 = vadd.f32 %v2577_v12, %v14098_v20  ;;  %v9567_v57 = vadd.f32 %v2578_v30, %v14100_v43  ;;  %v14102_v48 = vld [vmem:[#allocation256_spill] sm:$0xff]  ;;  %v14104_v18 = vld [vmem:[#allocation35_spill] sm:$0xff] }
 0x32e   :  { %14095 = vst [vmem:[#allocation197_spill] sm:$0xff] %v9558_v8  ;;  %14097 = vst [vmem:[#allocation205_spill] sm:$0xff] %v9561_v42  ;;  %v9570_v9 = vadd.f32 %v2579_v23, %v14102_v48  ;;  %v9573_v52 = vadd.f32 %v2580_v55, %v14104_v18  ;;  %v14106_v7 = vld [vmem:[#allocation237_spill] sm:$0xff]  ;;  %v14108_v59 = vld [vmem:[#allocation227_spill] sm:$0xff] }
 0x32f   :  { %14099 = vst [vmem:[#allocation20_spill] sm:$0xff] %v9564_v32  ;;  %14101 = vst [vmem:[#allocation208_spill] sm:$0xff] %v9567_v57  ;;  %v9576_v54 = vadd.f32 %v2581_v25, %v14106_v7  ;;  %v9579_v22 = vadd.f32 %v2582_v27, %v14108_v59  ;;  %v14110_v15 = vld [vmem:[#allocation160_spill] sm:$0xff]  ;;  %v14111_v37 = vld [vmem:[#allocation54_spill] sm:$0xff] }
 0x330   :  { %14103 = vst [vmem:[#allocation209_spill] sm:$0xff] %v9570_v9  ;;  %14105 = vst [vmem:[#allocation210_spill] sm:$0xff] %v9573_v52  ;;  %v9583_v14 = vmul.f32 %v14111_v37, %v14110_v15  ;;  %v14112_v12 = vld [vmem:[#allocation147_spill] sm:$0xff]  ;;  %v14113_v20 = vld [vmem:[#allocation161_spill] sm:$0xff] }
 0x331   :  { %14107 = vst [vmem:[#allocation211_spill] sm:$0xff] %v9576_v54  ;;  %14109 = vst [vmem:[#allocation212_spill] sm:$0xff] %v9579_v22  ;;  %v3143_v30 = vmul.f32 %v14111_v37, %v14112_v12  ;;  %v3144_v23 = vmul.f32 %v14111_v37, %v14113_v20  ;;  %v14114_v43 = vld [vmem:[#allocation148_spill] sm:$0xff]  ;;  %v14115_v48 = vld [vmem:[#allocation162_spill] sm:$0xff] }
 0x332   :  { %v3145_v55 = vmul.f32 %v14111_v37, %v14114_v43  ;;  %v9593_v25 = vmul.f32 %v14111_v37, %v14115_v48  ;;  %v14116_v18 = vld [vmem:[#allocation149_spill] sm:$0xff]  ;;  %v14117_v7 = vld [vmem:[#allocation163_spill] sm:$0xff]  ;;  %v14118_v15 = vld [vmem:[#allocation150_spill] sm:$0xff] }
 0x333   :  { %v9597_v27 = vmul.f32 %v14111_v37, %v14116_v18  ;;  %v9601_v59 = vmul.f32 %v14111_v37, %v14117_v7  ;;  %v9605_v12 = vmul.f32 %v14111_v37, %v14118_v15  ;;  %v14119_v20 = vld [vmem:[#allocation164_spill] sm:$0xff]  ;;  %v14120_v43 = vld [vmem:[#allocation151_spill] sm:$0xff]  ;;  %v14121_v35 = vld [vmem:[#allocation165_spill] sm:$0xff] }
 0x334   :  { %v9609_v19 = vmul.f32 %v14111_v37, %v14119_v20  ;;  %v9613_v48 = vmul.f32 %v14111_v37, %v14120_v43  ;;  %v9617_v18 = vmul.f32 %v14111_v37, %v14121_v35  ;;  %v14122_v53 = vld [vmem:[#allocation152_spill] sm:$0xff]  ;;  %v14124_v4 = vld [vmem:[#allocation166_spill] sm:$0xff]  ;;  %v14126_v29 = vld [vmem:[#allocation153_spill] sm:$0xff] }
 0x335   :  { %v9621_v7 = vmul.f32 %v14111_v37, %v14122_v53  ;;  %v9625_v15 = vmul.f32 %v14111_v37, %v14124_v4  ;;  %v9629_v20 = vmul.f32 %v14111_v37, %v14126_v29  ;;  %v14128_v60 = vld [vmem:[#allocation167_spill] sm:$0xff]  ;;  %v14130_v28 = vld [vmem:[#allocation154_spill] sm:$0xff]  ;;  %v14132_v56 = vld [vmem:[#allocation168_spill] sm:$0xff] }
 0x336   :  { %v9633_v43 = vmul.f32 %v14111_v37, %v14128_v60  ;;  %v9637_v35 = vmul.f32 %v14111_v37, %v14130_v28  ;;  %v9641_v53 = vmul.f32 %v14111_v37, %v14132_v56  ;;  %v14134_v63 = vld [vmem:[#allocation155_spill] sm:$0xff]  ;;  %v14136_v3 = vld [vmem:[#allocation169_spill] sm:$0xff]  ;;  %v14138_v51 = vld [vmem:[#allocation156_spill] sm:$0xff] }
 0x337   :  { %14123 = vst [vmem:[#allocation213_spill] sm:$0xff] %v9621_v7  ;;  %14125 = vst [vmem:[#allocation214_spill] sm:$0xff] %v9625_v15  ;;  %v9645_v4 = vmul.f32 %v14111_v37, %v14134_v63  ;;  %v9649_v29 = vmul.f32 %v14111_v37, %v14136_v3  ;;  %v9653_v60 = vmul.f32 %v14111_v37, %v14138_v51  ;;  %v14140_v46 = vld [vmem:[#allocation170_spill] sm:$0xff]  ;;  %v14142_v2 = vld [vmem:[#allocation157_spill] sm:$0xff] }
 0x338   :  { %14127 = vst [vmem:[#allocation215_spill] sm:$0xff] %v9629_v20  ;;  %14129 = vst [vmem:[#allocation216_spill] sm:$0xff] %v9633_v43  ;;  %v9657_v28 = vmul.f32 %v14111_v37, %v14140_v46  ;;  %v9661_v56 = vmul.f32 %v14111_v37, %v14142_v2  ;;  %v14144_v49 = vld [vmem:[#allocation171_spill] sm:$0xff]  ;;  %v14149_v33 = vld [vmem:[#allocation112_spill] sm:$0xff] }
 0x339   :  { %14131 = vst [vmem:[#allocation253_spill] sm:$0xff] %v9637_v35  ;;  %14133 = vst [vmem:[#allocation265_spill] sm:$0xff] %v9641_v53  ;;  %v9665_v63 = vmul.f32 %v14111_v37, %v14144_v49  ;;  %v14146_v40 = vld [vmem:[#allocation87_spill] sm:$0xff]  ;;  %v14150_v46 = vld [vmem:[#allocation113_spill] sm:$0xff] }
 0x33a   :  { %14135 = vst [vmem:[#allocation159_spill] sm:$0xff] %v9645_v4  ;;  %14137 = vst [vmem:[#allocation145_spill] sm:$0xff] %v9649_v29  ;;  %v9669_v3 = vmul.f32 %v14111_v37, %v14146_v40  ;;  %v14147_v31 = vld [vmem:[#allocation111_spill] sm:$0xff]  ;;  %v14151_v47 = vld [vmem:[#allocation108_spill] sm:$0xff] }
 0x33b   :  { %14139 = vst [vmem:[#allocation17_spill] sm:$0xff] %v9653_v60  ;;  %14141 = vst [vmem:[#allocation118_spill] sm:$0xff] %v9657_v28  ;;  %v14148_v39 = vld [vmem:[#allocation55_spill] sm:$0xff]  ;;  %v14152_v50 = vld [vmem:[#allocation109_spill] sm:$0xff] }
 0x33c   :  { %14143 = vst [vmem:[#allocation219_spill] sm:$0xff] %v9661_v56  ;;  %14145 = vst [vmem:[#allocation264_spill] sm:$0xff] %v9665_v63  ;;  %v3211_v51 = vmul.f32 %v14148_v39, %v14147_v31  ;;  %v3212_v1 = vmul.f32 %v14148_v39, %v14149_v33  ;;  %v3213_v17 = vmul.f32 %v14148_v39, %v14150_v46  ;;  %v14153_v41 = vld [vmem:[#allocation110_spill] sm:$0xff]  ;;  %v14155_v31 = vld [vmem:[#allocation37_spill] sm:$0xff] }
 0x33d   :  { %v3208_v2 = vmul.f32 %v14148_v39, %v14151_v47  ;;  %v3209_v49 = vmul.f32 %v14148_v39, %v14152_v50  ;;  %v3210_v24 = vmul.f32 %v14148_v39, %v14153_v41  ;;  %v14154_v40 = vld [vmem:[#allocation114_spill] sm:$0xff]  ;;  %v3240_v44 = vmul.f32 %v14148_v39, %v14155_v31  ;;  %v14156_v22 = vld [vmem:[#allocation173_spill] sm:$0xff]  ;;  %v14164_v9 = vld [vmem:[#allocation187_spill] sm:$0xff] }
 0x33e   :  { %v9685_v36 = vmul.f32 %v14148_v39, %v14154_v40  ;;  %v3275_v33 = vadd.f32 %v3211_v51, %v3143_v30  ;;  %v9689_v62 = vadd.f32 %v3212_v1, %v3144_v23  ;;  %v9691_v46 = vadd.f32 %v3213_v17, %v3145_v55  ;;  %v14157_v54 = vld [vmem:[#allocation186_spill] sm:$0xff]  ;;  %v14166_v57 = vld [vmem:[#allocation47_spill] sm:$0xff]  ;;  %v14170_v42 = vld [vmem:[#allocation49_spill] sm:$0xff] }
 0x33f   :  { %v9695_v38 = vmul.f32 %v9321_v45, %v14156_v22  ;;  %v3343_v52 = vmul.f32 %v9321_v45, %v14157_v54  ;;  %v14158_v41 = vrot.slane %v14151_v47, 7  ;;  %v14159_v40 = vrot.slane %v14152_v50, 7  ;;  %v14163_v55 = vld [vmem:[#allocation174_spill] sm:$0xff]  ;;  %v14172_v0 = vld [vmem:[#allocation233_spill] sm:$0xff]  ;;  %v14178_v20 = vld [vmem:[#allocation199_spill] sm:$0xff] }
 0x340   :  { %v5336_v31 = vmov 0.0   ;;  %v14161_v23 = vrot.slane %v14151_v47, 1  ;;  %v14162_v22 = vrot.slane %v14152_v50, 1  ;;  %v9715_v51 = vmul.f32 %v9321_v45, %v14163_v55  ;;  %v14171_v4 = vld [vmem:[#allocation50_spill] sm:$0xff]  ;;  %v14175_v53 = vld [vmem:[#allocation53_spill] sm:$0xff]  ;;  %v14182_v7 = vld [vmem:[#allocation119_spill] sm:$0xff] }
 0x341   :  { %v1214_v34 = vsel %vm1179_vm2, %v14159_v40, %v14158_v41  ;;  %v1115_v30 = vrot.slane %v5336_v31, 7  ;;  %v1314_v1 = vrot.slane %v5336_v31, 1  ;;  %v9719_v41 = vmul.f32 %v9321_v45, %v14164_v9  ;;  %v14165_v40 = vld [vmem:[#allocation48_spill] sm:$0xff]  ;;  %v14173_v63 = vld [vmem:[#allocation198_spill] sm:$0xff] }
 0x342   :  { %v1252_v17 = vsel %vm1113_vm3, %v1214_v34, 0.0  ;;  %v1413_v54 = vsel %vm1378_vm4, %v14162_v22, %v14161_v23  ;;  %v1583_v34 = vmul.f32 0.0, %v14166_v57  ;;  %v14167_v28 = vmov %v14162_v22  ;;  %v14176_v13 = vld [vmem:[#allocation246_spill] sm:$0xff]  ;;  %v14177_v22 = vld [vmem:[#allocation185_spill] sm:$0xff] }
 0x343   :  { %v1519_v56 = vmul.f32 %v14165_v40, %v1252_v17  ;;  %v1248_v31 = vsel %vm1113_vm3, %v1115_v30, 0.0  ;;  %v14168_v32 = vmov %v14161_v23  ;;  %v1448_v55 = vsel %vm1313_vm5, %v1314_v1, 0.0 }
 0x344   :  { %v1381_v23 = vsel %vm1378_vm4, %v14168_v32, %v14167_v28  ;;  %v1516_v9 = vmul.f32 %v14165_v40, %v1115_v30  ;;  %v1452_v60 = vsel %vm1313_vm5, %v1413_v54, 0.0  ;;  %v1515_v57 = vmul.f32 %v14165_v40, %v1248_v31  ;;  %v14174_v28 = vld [vmem:[#allocation172_spill] sm:$0xff] }
 0x345   :  { %v1715_v29 = vmul.f32 %v14170_v42, %v1314_v1  ;;  %v1716_v8 = vmul.f32 %v14170_v42, %v1448_v55  ;;  %v2297_v47 = vmul.f32 %v14171_v4, %v1252_v17  ;;  %v2427_v32 = vadd.f32 %v14173_v63, %v14172_v0  ;;  %v14179_v63 = vld [vmem:[#allocation206_spill] sm:$0xff] }
 0x346   :  { %v1648_v50 = vadd.f32 %v1583_v34, %v1516_v9  ;;  %v2495_v10 = vmul.f32 %v14175_v53, %v14174_v28  ;;  %v1647_v35 = vadd.f32 %v1583_v34, %v1515_v57  ;;  %v1651_v43 = vadd.f32 %v14176_v13, %v1519_v56  ;;  %v14180_v28 = vld [vmem:[#allocation76_spill] sm:$0xff]  ;;  %v14181_v34 = vld [vmem:[#allocation93_spill] sm:$0xff] }
 0x347   :  { %v2496_v54 = vmul.f32 %v14175_v53, %v14177_v22  ;;  %v2497_v40 = vmul.f32 %v14175_v53, %v1381_v23  ;;  %v2429_v58 = vadd.f32 %v14178_v20, %v2297_v47  ;;  %v2498_v9 = vmul.f32 %v14175_v53, %v1452_v60 }
 0x348   :  { %v1780_v21 = vadd.f32 %v1716_v8, %v1648_v50  ;;  %v2559_v4 = vadd.f32 %v2495_v10, %v2427_v32  ;;  %v1719_v15 = vmul.f32 %v14170_v42, %v1381_v23  ;;  %v1779_v0 = vadd.f32 %v1715_v29, %v1647_v35  ;;  %v14183_v50 = vld [vmem:[#allocation207_spill] sm:$0xff]  ;;  %v14185_v29 = vld [vmem:[#allocation146_spill] sm:$0xff] }
 0x349   :  { %v2560_v16 = vadd.f32 %v2496_v54, %v14179_v63  ;;  %v2591_v57 = vadd.f32 %v14181_v34, %v14180_v28  ;;  %v3407_v13 = vadd.f32 %v3343_v52, %v3275_v33  ;;  %v1720_v56 = vmul.f32 %v14170_v42, %v1452_v60  ;;  %v14184_v32 = vld [vmem:[#allocation267_spill] sm:$0xff] }
 0x34a   :  { %v2561_v22 = vadd.f32 %v2497_v40, %v2429_v58  ;;  %v2656_v26 = vadd.f32 %v14182_v7, %v1780_v21  ;;  %v1783_v8 = vadd.f32 %v1719_v15, %v1651_v43  ;;  %v2562_v20 = vadd.f32 %v2498_v9, %v14183_v50  ;;  %v14190_v50 = vld [vmem:[#allocation275_spill] sm:$0xff] }
 0x34b   :  { %v2623_v47 = vadd.f32 %v2559_v4, %v1779_v0  ;;  %v3140_v10 = vmul.f32 %v14111_v37, %v1252_v17  ;;  %v2624_v53 = vadd.f32 %v2560_v16, %v1780_v21  ;;  %v3141_v54 = vmul.f32 %v14111_v37, %v14185_v29 }
 0x34c   :  { %v2625_v35 = vadd.f32 %v2561_v22, %v14184_v32  ;;  %v3170_v63 = vmul.f32 %v14111_v37, %v1248_v31  ;;  %v3171_v52 = vmul.f32 %v14111_v37, %v1115_v30  ;;  %v3238_v58 = vmul.f32 0.0, %v14148_v39  ;;  %v14186_v30 = vld [vmem:[#allocation22_spill] sm:$0xff]  ;;  %v14191_v32 = vld [vmem:[#allocation68_spill] sm:$0xff] }
 0x34d   :  { %v3272_v42 = vadd.f32 %v3208_v2, %v3140_v10  ;;  %v3274_v7 = vadd.f32 %v3210_v24, %v9583_v14  ;;  %v3273_v15 = vadd.f32 %v3209_v49, %v3141_v54  ;;  %v3304_v43 = vadd.f32 %v3240_v44, %v9669_v3  ;;  %v14187_v24 = vld [vmem:[#allocation269_spill] sm:$0xff] }
 0x34e   :  { %v3340_v33 = vmul.f32 %v9321_v45, %v1381_v23  ;;  %v3341_v16 = vmul.f32 %v9321_v45, %v1452_v60  ;;  %v3302_v21 = vadd.f32 %v3238_v58, %v3170_v63  ;;  %v3303_v17 = vadd.f32 %v3238_v58, %v3171_v52  ;;  %v14188_v60 = vld [vmem:[#allocation268_spill] sm:$0xff]  ;;  %v14196_v52 = vld [vmem:[#allocation94_spill] sm:$0xff] }
 0x34f   :  { %v3370_v40 = vmul.f32 %v9321_v45, %v1314_v1  ;;  %v3371_v31 = vmul.f32 %v9321_v45, %v1448_v55  ;;  %v2655_v9 = vadd.f32 %v2591_v57, %v1779_v0  ;;  %v3372_v4 = vmul.f32 %v9321_v45, %v14186_v30  ;;  %v14189_v55 = vld [vmem:[#allocation83_spill] sm:$0xff] }
 0x350   :  { %v3404_v2 = vadd.f32 %v3340_v33, %v3272_v42  ;;  %v3405_v28 = vadd.f32 %v3341_v16, %v3273_v15  ;;  %v1784_v14 = vadd.f32 %v1720_v56, %v14187_v24  ;;  %v3406_v44 = vadd.f32 %v9695_v38, %v3274_v7  ;;  %v14197_v15 = vld [vmem:[#allocation158_spill] sm:$0xff]  ;;  %v14199_v16 = vld [vmem:[#allocation175_spill] sm:$0xff] }
 0x351   :  { %v9774_v3 = vadd.f32 %v3370_v40, %v3302_v21  ;;  %v3435_v49 = vadd.f32 %v3371_v31, %v3303_v17  ;;  %v2626_v23 = vadd.f32 %v2562_v20, %v14188_v60  ;;  %v3436_v34 = vadd.f32 %v3372_v4, %v3304_v43  ;;  %v14200_v17 = vld [vmem:[#allocation188_spill] sm:$0xff] }
 0x352   :  { %v9777_v22 = vadd.f32 %v3404_v2, %v2623_v47  ;;  %v9779_v1 = vadd.f32 %v3405_v28, %v2624_v53  ;;  %v2627_v0 = vadd.f32 %v14189_v55, %v1783_v8  ;;  %v9782_v57 = vadd.f32 %v3406_v44, %v2625_v35  ;;  %v14193_v47 = vld [vmem:[#allocation69_spill] sm:$0xff]  ;;  %v14195_v53 = vld [vmem:[#allocation115_spill] sm:$0xff] }
 0x353   :  { %v9785_v10 = vadd.f32 %v3435_v49, %v14190_v50  ;;  %v9788_v56 = vadd.f32 %v9378_v6, %v2656_v26  ;;  %v9790_v38 = vadd.f32 %v3436_v34, %v2655_v9  ;;  %v9794_v20 = vadd.f32 %v9774_v3, %v14191_v32  ;;  %v14202_v9 = vld [vmem:[#allocation128_spill] sm:$0xff] }
 0x354   :  { %v9797_v29 = vadd.f32 %v3435_v49, %v14193_v47  ;;  %v3532_v8 = vadd.f32 %v9779_v1, %v9777_v22  ;;  %v3215_v35 = vmul.f32 %v14148_v39, %v14195_v53  ;;  %v3278_v54 = vadd.f32 %v9685_v36, %v9593_v25  ;;  %v14198_v36 = vld [vmem:[#allocation116_spill] sm:$0xff] }
 0x355   :  { %14192 = vst [vmem:[#allocation120_spill] sm:$0xff] %v9794_v20  ;;  %v3601_v6 = vmul.f32 %v9777_v22, %v9777_v22  ;;  %v3602_v26 = vmul.f32 %v9779_v1, %v9779_v1  ;;  %v3408_v63 = vadd.f32 %v9715_v51, %v9689_v62  ;;  %v2628_v58 = vadd.f32 %v14196_v52, %v1784_v14  ;;  %v14203_v14 = vld [vmem:[#allocation176_spill] sm:$0xff] }
 0x356   :  { %14194 = vst [vmem:[#allocation19_spill] sm:$0xff] %v9797_v29  ;;  %v9812_v42 = vadd.f32 %v3407_v13, %v2626_v23  ;;  %v3533_v7 = vadd.f32 %v3532_v8, %v9782_v57  ;;  %v9817_v43 = vmul.f32 %v14111_v37, %v14197_v15  ;;  %v3216_v25 = vmul.f32 %v14148_v39, %v14198_v36  ;;  %v14201_v37 = vld [vmem:[#allocation117_spill] sm:$0xff]  ;;  %v14205_v50 = vld [vmem:[#allocation132_spill] sm:$0xff]  ;;  %v14208_v15 = vld [vmem:[#allocation190_spill] sm:$0xff] }
 0x357   :  { %v3279_v33 = vadd.f32 %v3215_v35, %v9597_v27  ;;  %v3346_v21 = vmul.f32 %v9321_v45, %v14199_v16  ;;  %v3347_v62 = vmul.f32 %v9321_v45, %v14200_v17  ;;  %v3409_v51 = vadd.f32 %v9719_v41, %v9691_v46  ;;  %v14204_v23 = vld [vmem:[#allocation189_spill] sm:$0xff] }
 0x358   :  { %v9828_v13 = vadd.f32 %v3408_v63, %v2627_v0  ;;  %v3534_v40 = vadd.f32 %v3533_v7, %v9812_v42  ;;  %v3217_v31 = vmul.f32 %v14148_v39, %v14201_v37  ;;  %v3218_v30 = vmul.f32 %v14148_v39, %v14202_v9  ;;  %v14207_v63 = vld [vmem:[#allocation177_spill] sm:$0xff]  ;;  %v14211_v37 = vld [vmem:[#allocation42_spill] sm:$0xff] }
 0x359   :  { %v3603_v27 = vmul.f32 %v9782_v57, %v9782_v57  ;;  %v3665_v4 = vadd.f32 %v3602_v26, %v3601_v6  ;;  %v3280_v2 = vadd.f32 %v3216_v25, %v9601_v59  ;;  %v3410_v28 = vadd.f32 %v3346_v21, %v3278_v54  ;;  %v14212_v9 = vld [vmem:[#allocation213_spill] sm:$0xff] }
 0x35a   :  { %v9838_v24 = vadd.f32 %v3409_v51, %v2628_v58  ;;  %v3535_v46 = vadd.f32 %v3534_v40, %v9828_v13  ;;  %v3281_v41 = vadd.f32 %v3217_v31, %v9605_v12  ;;  %v3348_v44 = vmul.f32 %v9321_v45, %v14203_v14  ;;  %v14206_v12 = vld [vmem:[#allocation133_spill] sm:$0xff] }
 0x35b   :  { %v3604_v49 = vmul.f32 %v9812_v42, %v9812_v42  ;;  %v3666_v60 = vadd.f32 %v3665_v4, %v3603_v27  ;;  %v3349_v34 = vmul.f32 %v9321_v45, %v14204_v23  ;;  %v3411_v55 = vadd.f32 %v3347_v62, %v3279_v33  ;;  %v14209_v33 = vld [vmem:[#allocation134_spill] sm:$0xff] }
 0x35c   :  { %v9849_v59 = vadd.f32 %v3410_v28, %v9436_v61  ;;  %v3536_v0 = vadd.f32 %v3535_v46, %v9838_v24  ;;  %v3219_v32 = vmul.f32 %v14148_v39, %v14205_v50  ;;  %v3220_v47 = vmul.f32 %v14148_v39, %v14206_v12  ;;  %v14213_v27 = vld [vmem:[#allocation178_spill] sm:$0xff]  ;;  %v14214_v46 = vld [vmem:[#allocation191_spill] sm:$0xff] }
 0x35d   :  { %v3605_v8 = vmul.f32 %v9828_v13, %v9828_v13  ;;  %v3667_v53 = vadd.f32 %v3666_v60, %v3604_v49  ;;  %v3282_v35 = vadd.f32 %v3218_v30, %v9609_v19  ;;  %v3412_v54 = vadd.f32 %v3348_v44, %v3280_v2  ;;  %v14216_v60 = vld [vmem:[#allocation136_spill] sm:$0xff] }
 0x35e   :  { %v9860_v6 = vadd.f32 %v3411_v55, %v9440_v11  ;;  %v3537_v61 = vadd.f32 %v3536_v0, %v9849_v59  ;;  %v3283_v26 = vadd.f32 %v3219_v32, %v9613_v48  ;;  %v3350_v52 = vmul.f32 %v9321_v45, %v14207_v63  ;;  %v14210_v48 = vld [vmem:[#allocation135_spill] sm:$0xff]  ;;  %v14218_v32 = vld [vmem:[#allocation214_spill] sm:$0xff] }
 0x35f   :  { %v3606_v58 = vmul.f32 %v9838_v24, %v9838_v24  ;;  %v3668_v7 = vadd.f32 %v3667_v53, %v3605_v8  ;;  %v3351_v36 = vmul.f32 %v9321_v45, %v14208_v15  ;;  %v3413_v25 = vadd.f32 %v3349_v34, %v3281_v41  ;;  %v14217_v34 = vld [vmem:[#allocation137_spill] sm:$0xff] }
 0x360   :  { %v9871_v19 = vadd.f32 %v3412_v54, %v9444_v5  ;;  %v3538_v11 = vadd.f32 %v3537_v61, %v9860_v6  ;;  %v3221_v16 = vmul.f32 %v14148_v39, %v14209_v33  ;;  %v3222_v21 = vmul.f32 %v14148_v39, %v14210_v48  ;;  %v14219_v8 = vld [vmem:[#allocation41_spill] sm:$0xff]  ;;  %v14220_v54 = vld [vmem:[#allocation215_spill] sm:$0xff] }
 0x361   :  { %v3607_v17 = vmul.f32 %v9849_v59, %v9849_v59  ;;  %v3669_v62 = vadd.f32 %v3668_v7, %v3606_v58  ;;  %v3284_v51 = vadd.f32 %v3220_v47, %v9617_v18  ;;  %v3414_v40 = vadd.f32 %v3350_v52, %v3282_v35  ;;  %v14215_v18 = vld [vmem:[#allocation44_spill] sm:$0xff]  ;;  %v14222_v7 = vld [vmem:[#allocation221_spill] sm:$0xff] }
 0x362   :  { %v9882_v31 = vadd.f32 %v3413_v25, %v14211_v37  ;;  %v3539_v5 = vadd.f32 %v3538_v11, %v9871_v19  ;;  %v3285_v30 = vadd.f32 %v3221_v16, %v14212_v9  ;;  %v3352_v4 = vmul.f32 %v9321_v45, %v14213_v27  ;;  %v14223_v25 = vld [vmem:[#allocation43_spill] sm:$0xff]  ;;  %v14224_v16 = vld [vmem:[#allocation138_spill] sm:$0xff]  ;;  %v14227_v9 = vld [vmem:[#allocation4_spill] sm:$0xff] }
 0x363   :  { %v3608_v2 = vmul.f32 %v9860_v6, %v9860_v6  ;;  %v3670_v28 = vadd.f32 %v3669_v62, %v3607_v17  ;;  %v3353_v41 = vmul.f32 %v9321_v45, %v14214_v46  ;;  %v3415_v14 = vadd.f32 %v3351_v36, %v3283_v26  ;;  %v14221_v26 = vld [vmem:[#allocation179_spill] sm:$0xff] }
 0x364   :  { %v9893_v44 = vadd.f32 %v3414_v40, %v14215_v18  ;;  %v3540_v49 = vadd.f32 %v3539_v5, %v9882_v31  ;;  %v3223_v23 = vmul.f32 %v14148_v39, %v14216_v60  ;;  %v3224_v55 = vmul.f32 %v14148_v39, %v14217_v34  ;;  %v14226_v40 = vld [vmem:[#allocation216_spill] sm:$0xff]  ;;  %v14230_v18 = vld [vmem:[#allocation222_spill] sm:$0xff] }
 0x365   :  { %v3609_v0 = vmul.f32 %v9871_v19, %v9871_v19  ;;  %v3671_v50 = vadd.f32 %v3670_v28, %v3608_v2  ;;  %v3286_v12 = vadd.f32 %v3222_v21, %v14218_v32  ;;  %v3416_v47 = vadd.f32 %v3352_v4, %v3284_v51  ;;  %v14225_v21 = vld [vmem:[#allocation139_spill] sm:$0xff]  ;;  %v14228_v4 = vld [vmem:[#allocation253_spill] sm:$0xff]  ;;  %v14229_v28 = vld [vmem:[#allocation180_spill] sm:$0xff] }
 0x366   :  { %v9904_v53 = vadd.f32 %v3415_v14, %v14219_v8  ;;  %v3541_v35 = vadd.f32 %v3540_v49, %v9893_v44  ;;  %v3287_v61 = vadd.f32 %v3223_v23, %v14220_v54  ;;  %v3354_v63 = vmul.f32 %v9321_v45, %v14221_v26  ;;  %v14231_v23 = vld [vmem:[#allocation6_spill] sm:$0xff]  ;;  %v14233_v32 = vld [vmem:[#allocation141_spill] sm:$0xff] }
 0x367   :  { %v3610_v52 = vmul.f32 %v9882_v31, %v9882_v31  ;;  %v3672_v58 = vadd.f32 %v3671_v50, %v3609_v0  ;;  %v3355_v15 = vmul.f32 %v9321_v45, %v14222_v7  ;;  %v3417_v36 = vadd.f32 %v3353_v41, %v3285_v30  ;;  %v14232_v0 = vld [vmem:[#allocation140_spill] sm:$0xff] }
 0x368   :  { %v9915_v11 = vadd.f32 %v3416_v47, %v14223_v25  ;;  %v3542_v33 = vadd.f32 %v3541_v35, %v9904_v53  ;;  %v3225_v48 = vmul.f32 %v14148_v39, %v14224_v16  ;;  %v3226_v17 = vmul.f32 %v14148_v39, %v14225_v21  ;;  %v14234_v35 = vld [vmem:[#allocation265_spill] sm:$0xff]  ;;  %v14238_v16 = vld [vmem:[#allocation223_spill] sm:$0xff] }
 0x369   :  { %v3611_v62 = vmul.f32 %v9893_v44, %v9893_v44  ;;  %v3673_v51 = vadd.f32 %v3672_v58, %v3610_v52  ;;  %v3288_v37 = vadd.f32 %v3224_v55, %v14226_v40  ;;  %v3418_v5 = vadd.f32 %v3354_v63, %v3286_v12  ;;  %v14235_v63 = vld [vmem:[#allocation204_spill] sm:$0xff]  ;;  %v14236_v58 = vld [vmem:[#allocation159_spill] sm:$0xff]  ;;  %v14240_v40 = vld [vmem:[#allocation142_spill] sm:$0xff] }
 0x36a   :  { %v9926_v30 = vadd.f32 %v3417_v36, %v14227_v9  ;;  %v3543_v27 = vadd.f32 %v3542_v33, %v9915_v11  ;;  %v3289_v2 = vadd.f32 %v3225_v48, %v14228_v4  ;;  %v3356_v46 = vmul.f32 %v9321_v45, %v14229_v28  ;;  %v14242_v28 = vld [vmem:[#allocation145_spill] sm:$0xff] }
 0x36b   :  { %v3612_v41 = vmul.f32 %v9904_v53, %v9904_v53  ;;  %v3674_v14 = vadd.f32 %v3673_v51, %v3611_v62  ;;  %v3357_v49 = vmul.f32 %v9321_v45, %v14230_v18  ;;  %v3419_v60 = vadd.f32 %v3355_v15, %v3287_v61  ;;  %v14237_v15 = vld [vmem:[#allocation181_spill] sm:$0xff] }
 0x36c   :  { %v9937_v34 = vadd.f32 %v3418_v5, %v14231_v23  ;;  %v3544_v55 = vadd.f32 %v3543_v27, %v9926_v30  ;;  %v3227_v50 = vmul.f32 %v14148_v39, %v14232_v0  ;;  %v3228_v12 = vmul.f32 %v14148_v39, %v14233_v32  ;;  %v14241_v5 = vld [vmem:[#allocation16_spill] sm:$0xff]  ;;  %v14245_v23 = vld [vmem:[#allocation182_spill] sm:$0xff] }
 0x36d   :  { %v3613_v47 = vmul.f32 %v9915_v11, %v9915_v11  ;;  %v3675_v8 = vadd.f32 %v3674_v14, %v3612_v41  ;;  %v3290_v54 = vadd.f32 %v3226_v17, %v14234_v35  ;;  %v3420_v26 = vadd.f32 %v3356_v46, %v3288_v37  ;;  %v14239_v17 = vld [vmem:[#allocation197_spill] sm:$0xff]  ;;  %v14246_v32 = vld [vmem:[#allocation224_spill] sm:$0xff] }
 0x36e   :  { %v9948_v61 = vadd.f32 %v3419_v60, %v14235_v63  ;;  %v3545_v52 = vadd.f32 %v3544_v55, %v9937_v34  ;;  %v3291_v7 = vadd.f32 %v3227_v50, %v14236_v58  ;;  %v3358_v36 = vmul.f32 %v9321_v45, %v14237_v15  ;;  %v14243_v14 = vld [vmem:[#allocation205_spill] sm:$0xff] }
 0x36f   :  { %v3614_v25 = vmul.f32 %v9926_v30, %v9926_v30  ;;  %v3676_v33 = vadd.f32 %v3675_v8, %v3613_v47  ;;  %v3359_v48 = vmul.f32 %v9321_v45, %v14238_v16  ;;  %v3421_v21 = vadd.f32 %v3357_v49, %v3289_v2  ;;  %v14244_v49 = vld [vmem:[#allocation17_spill] sm:$0xff] }
 0x370   :  { %v9959_v62 = vadd.f32 %v3420_v26, %v14239_v17  ;;  %v3546_v51 = vadd.f32 %v3545_v52, %v9948_v61  ;;  %v3229_v37 = vmul.f32 %v14148_v39, %v14240_v40  ;;  %v3230_v9 = vmul.f32 %v14148_v39, %v14241_v5  ;;  %v14248_v26 = vld [vmem:[#allocation18_spill] sm:$0xff]  ;;  %v14249_v52 = vld [vmem:[#allocation15_spill] sm:$0xff] }
 0x371   :  { %v3615_v27 = vmul.f32 %v9937_v34, %v9937_v34  ;;  %v3677_v4 = vadd.f32 %v3676_v33, %v3614_v25  ;;  %v3292_v46 = vadd.f32 %v3228_v12, %v14242_v28  ;;  %v3422_v41 = vadd.f32 %v3358_v36, %v3290_v54  ;;  %v14247_v12 = vld [vmem:[#allocation20_spill] sm:$0xff]  ;;  %v14250_v25 = vld [vmem:[#allocation118_spill] sm:$0xff]  ;;  %v14252_v17 = vld [vmem:[#allocation219_spill] sm:$0xff] }
 0x372   :  { %v9970_v2 = vadd.f32 %v3421_v21, %v14243_v14  ;;  %v3547_v18 = vadd.f32 %v3546_v51, %v9959_v62  ;;  %v3293_v60 = vadd.f32 %v3229_v37, %v14244_v49  ;;  %v3360_v55 = vmul.f32 %v9321_v45, %v14245_v23  ;;  %v14251_v21 = vld [vmem:[#allocation208_spill] sm:$0xff]  ;;  %v14253_v40 = vld [vmem:[#allocation183_spill] sm:$0xff] }
 0x373   :  { %v3616_v0 = vmul.f32 %v9948_v61, %v9948_v61  ;;  %v3678_v50 = vadd.f32 %v3677_v4, %v3615_v27  ;;  %v3361_v47 = vmul.f32 %v9321_v45, %v14246_v32  ;;  %v3423_v8 = vadd.f32 %v3359_v48, %v3291_v7  ;;  %v14254_v4 = vld [vmem:[#allocation225_spill] sm:$0xff]  ;;  %v14257_v49 = vld [vmem:[#allocation40_spill] sm:$0xff] }
 0x374   :  { %v9981_v35 = vadd.f32 %v3422_v41, %v14247_v12  ;;  %v3548_v54 = vadd.f32 %v3547_v18, %v9970_v2  ;;  %v3231_v63 = vmul.f32 %v14148_v39, %v14248_v26  ;;  %v3232_v58 = vmul.f32 %v14148_v39, %v14249_v52  ;;  %v14256_v18 = vld [vmem:[#allocation257_spill] sm:$0xff]  ;;  %v14260_v26 = vld [vmem:[#allocation210_spill] sm:$0xff]  ;;  %v14261_v52 = vld [vmem:[#allocation184_spill] sm:$0xff] }
 0x375   :  { %v3617_v15 = vmul.f32 %v9959_v62, %v9959_v62  ;;  %v3679_v36 = vadd.f32 %v3678_v50, %v3616_v0  ;;  %v3294_v33 = vadd.f32 %v3230_v9, %v14250_v25  ;;  %v3424_v16 = vadd.f32 %v3360_v55, %v3292_v46  ;;  %v14255_v9 = vld [vmem:[#allocation209_spill] sm:$0xff]  ;;  %v14258_v55 = vld [vmem:[#allocation143_spill] sm:$0xff]  ;;  %v14262_v25 = vld [vmem:[#allocation226_spill] sm:$0xff] }
 0x376   :  { %v9992_v7 = vadd.f32 %v3423_v8, %v14251_v21  ;;  %v3549_v48 = vadd.f32 %v3548_v54, %v9981_v35  ;;  %v3295_v51 = vadd.f32 %v3231_v63, %v14252_v17  ;;  %v3362_v37 = vmul.f32 %v9321_v45, %v14253_v40  ;;  %v14259_v8 = vld [vmem:[#allocation264_spill] sm:$0xff] }
 0x377   :  { %v3618_v5 = vmul.f32 %v9970_v2, %v9970_v2  ;;  %v3680_v27 = vadd.f32 %v3679_v36, %v3617_v15  ;;  %v3363_v28 = vmul.f32 %v9321_v45, %v14254_v4  ;;  %v3425_v41 = vadd.f32 %v3361_v47, %v3293_v60  ;;  %v14264_v40 = vld [vmem:[#allocation248_spill] sm:$0xff] }
 0x378   :  { %v10003_v46 = vadd.f32 %v3424_v16, %v14255_v9  ;;  %v3550_v14 = vadd.f32 %v3549_v48, %v9992_v7  ;;  %v2647_v23 = vadd.f32 %v14257_v49, %v14256_v18  ;;  %v3233_v0 = vmul.f32 %v14148_v39, %v14258_v55  ;;  %v14266_v4 = vld [vmem:[#allocation212_spill] sm:$0xff] }
 0x379   :  { %v3619_v50 = vmul.f32 %v9981_v35, %v9981_v35  ;;  %v3681_v32 = vadd.f32 %v3680_v27, %v3618_v5  ;;  %v3296_v12 = vadd.f32 %v3232_v58, %v14259_v8  ;;  %v3426_v54 = vadd.f32 %v3362_v37, %v3294_v33  ;;  %v14263_v58 = vld [vmem:[#allocation211_spill] sm:$0xff] }
 0x37a   :  { %v10014_v60 = vadd.f32 %v3425_v41, %v14260_v26  ;;  %v3551_v47 = vadd.f32 %v3550_v14, %v10003_v46  ;;  %v3297_v63 = vadd.f32 %v3233_v0, %v9817_v43  ;;  %v3364_v15 = vmul.f32 %v9321_v45, %v14261_v52  ;;  %v14265_v37 = vld [vmem:[#allocation39_spill] sm:$0xff] }
 0x37b   :  { %v3620_v39 = vmul.f32 %v9992_v7, %v9992_v7  ;;  %v3682_v36 = vadd.f32 %v3681_v32, %v3619_v50  ;;  %v3365_v16 = vmul.f32 %v9321_v45, %v14262_v25  ;;  %v3427_v21 = vadd.f32 %v3363_v28, %v3295_v51  ;;  %v14267_v26 = vld [vmem:[#allocation3_spill] sm:$0xff] }
 0x37c   :  { %v10025_v33 = vadd.f32 %v3426_v54, %v14263_v58  ;;  %v3552_v48 = vadd.f32 %v3551_v47, %v10014_v60  ;;  %v3621_v17 = vmul.f32 %v10003_v46, %v10003_v46  ;;  %v2648_v5 = vadd.f32 %v14265_v37, %v14264_v40  ;;  %v14271_v40 = vld [vmem:[#allocation10_spill] sm:$0xff] }
 0x37d   :  { %v3683_v43 = vadd.f32 %v3682_v36, %v3620_v39  ;;  %v3428_v27 = vadd.f32 %v3364_v15, %v3296_v12  ;;  %v10033_v41 = vadd.f32 %v3427_v21, %v14266_v4  ;;  %v3622_v45 = vmul.f32 %v10014_v60, %v10014_v60  ;;  %v14268_v15 = vld [vmem:[#allocation5_spill] sm:$0xff] }
 0x37e   :  { %v3553_v9 = vadd.f32 %v3552_v48, %v10025_v33  ;;  %v3429_v28 = vadd.f32 %v3365_v16, %v3297_v63  ;;  %v3623_v49 = vmul.f32 %v10025_v33, %v10025_v33  ;;  %v3627_v36 = vmul.f32 %v14267_v26, %v14267_v26  ;;  %v14269_v16 = vld [vmem:[#allocation8_spill] sm:$0xff] }
 0x37f   :  { %v3684_v51 = vadd.f32 %v3683_v43, %v3621_v17  ;;  %v10038_v14 = vadd.f32 %v3428_v27, %v2647_v23  ;;  %v3624_v32 = vmul.f32 %v10033_v41, %v10033_v41  ;;  %v3628_v58 = vmul.f32 %v14268_v15, %v14268_v15  ;;  %v14270_v17 = vld [vmem:[#allocation254_spill] sm:$0xff] }
 0x380   :  { %v3554_v18 = vadd.f32 %v3553_v9, %v10033_v41  ;;  %v10043_v0 = vadd.f32 %v3429_v28, %v2648_v5  ;;  %v10062_v43 = vadd.f32 %v9774_v3, %v14270_v17  ;;  %v3629_v5 = vmul.f32 %v14269_v16, %v14269_v16  ;;  %v14275_v17 = vld [vmem:[#allocation12_spill] sm:$0xff] }
 0x381   :  { %v3685_v55 = vadd.f32 %v3684_v51, %v3622_v45  ;;  %v3625_v23 = vmul.f32 %v10038_v14, %v10038_v14  ;;  %v3630_v9 = vmul.f32 %v14271_v40, %v14271_v40 }
 0x382   :  { %v3555_v50 = vadd.f32 %v3554_v18, %v10038_v14  ;;  %v3626_v63 = vmul.f32 %v10043_v0, %v10043_v0  ;;  %v3631_v28 = vmul.f32 %v10062_v43, %v10062_v43 }
 0x383   :  { %v3686_v8 = vadd.f32 %v3685_v55, %v3623_v49  ;;  %v3632_v49 = vmul.f32 %v9785_v10, %v9785_v10 }
 0x384   :  { %v3556_v12 = vadd.f32 %v3555_v50, %v10043_v0 }
 0x385   :  { %v3687_v54 = vadd.f32 %v3686_v8, %v3624_v32  ;;  %v3633_v32 = vmul.f32 %v9790_v38, %v9790_v38 }
 0x386   :  { %v3557_v47 = vadd.f32 %v3556_v12, %v14267_v26  ;;  %v14272_v12 = vld [vmem:[#allocation7_spill] sm:$0xff] }
 0x387   :  { %v3688_v52 = vadd.f32 %v3687_v54, %v3625_v23  ;;  %v3634_v54 = vmul.f32 %v9788_v56, %v9788_v56 }
 0x388   :  { %v3558_v39 = vadd.f32 %v3557_v47, %v14268_v15 }
 0x389   :  { %v3689_v25 = vadd.f32 %v3688_v52, %v3626_v63  ;;  %v14273_v63 = vld [vmem:[#allocation9_spill] sm:$0xff] }
 0x38a   :  { %v3559_v21 = vadd.f32 %v3558_v39, %v14269_v16  ;;  %v3635_v39 = vmul.f32 %v14272_v12, %v14272_v12 }
 0x38b   :  { %v3690_v48 = vadd.f32 %v3689_v25, %v3627_v36  ;;  %v14274_v25 = vld [vmem:[#allocation14_spill] sm:$0xff] }
 0x38c   :  { %v3560_v37 = vadd.f32 %v3559_v21, %v14271_v40 }
 0x38d   :  { %v3691_v27 = vadd.f32 %v3690_v48, %v3628_v58  ;;  %v3636_v58 = vmul.f32 %v14273_v63, %v14273_v63 }
 0x38e   :  { %v3561_v4 = vadd.f32 %v3560_v37, %v10062_v43 }
 0x38f   :  { %v3692_v45 = vadd.f32 %v3691_v27, %v3629_v5  ;;  %v3637_v5 = vmul.f32 %v14274_v25, %v14274_v25 }
 0x390   :  { %v3562_v51 = vadd.f32 %v3561_v4, %v9785_v10  ;;  %v14276_v4 = vld [vmem:[#allocation11_spill] sm:$0xff] }
 0x391   :  { %v3693_v18 = vadd.f32 %v3692_v45, %v3630_v9  ;;  %v3638_v45 = vmul.f32 %v14275_v17, %v14275_v17 }
 0x392   :  { %v3563_v3 = vadd.f32 %v3562_v51, %v9790_v38 }
 0x393   :  { %v3694_v55 = vadd.f32 %v3693_v18, %v3631_v28  ;;  %v14277_v28 = vld [vmem:[#allocation13_spill] sm:$0xff] }
 0x394   :  { %v3564_v50 = vadd.f32 %v3563_v3, %v9788_v56  ;;  %v3639_v3 = vmul.f32 %v14276_v4, %v14276_v4 }
 0x395   :  { %v3695_v8 = vadd.f32 %v3694_v55, %v3632_v49  ;;  %v14278_v55 = vld [vmem:[#allocation74_spill] sm:$0xff] }
 0x396   :  { %v3565_v23 = vadd.f32 %v3564_v50, %v14272_v12 }
 0x397   :  { %v3696_v47 = vadd.f32 %v3695_v8, %v3633_v32  ;;  %v3640_v32 = vmul.f32 %v14277_v28, %v14277_v28 }
 0x398   :  { %v3566_v52 = vadd.f32 %v3565_v23, %v14273_v63  ;;  %v14279_v23 = vld [vmem:[#allocation56_spill] sm:$0xff] }
 0x399   :  { %v3697_v36 = vadd.f32 %v3696_v47, %v3634_v54  ;;  %v3641_v47 = vmul.f32 %v14278_v55, %v14278_v55 }
 0x39a   :  { %v3567_v21 = vadd.f32 %v3566_v52, %v14274_v25 }
 0x39b   :  { %v3698_v48 = vadd.f32 %v3697_v36, %v3635_v39  ;;  %v14280_v39 = vld [vmem:[#allocation98_spill] sm:$0xff] }
 0x39c   :  { %v3568_v37 = vadd.f32 %v3567_v21, %v14275_v17  ;;  %v3642_v21 = vmul.f32 %v14279_v23, %v14279_v23 }
 0x39d   :  { %v3699_v27 = vadd.f32 %v3698_v48, %v3636_v58  ;;  %v14281_v48 = vld [vmem:[#allocation57_spill] sm:$0xff] }
 0x39e   :  { %v3569_v9 = vadd.f32 %v3568_v37, %v14276_v4 }
 0x39f   :  { %v3700_v51 = vadd.f32 %v3699_v27, %v3637_v5  ;;  %v3643_v5 = vmul.f32 %v14280_v39, %v14280_v39 }
 0x3a0   :  { %v3570_v18 = vadd.f32 %v3569_v9, %v14277_v28  ;;  %v14282_v9 = vld [vmem:[#allocation99_spill] sm:$0xff] }
 0x3a1   :  { %v3701_v49 = vadd.f32 %v3700_v51, %v3638_v45  ;;  %v3644_v51 = vmul.f32 %v14281_v48, %v14281_v48 }
 0x3a2   :  { %v3571_v50 = vadd.f32 %v3570_v18, %v14278_v55 }
 0x3a3   :  { %v3702_v8 = vadd.f32 %v3701_v49, %v3639_v3  ;;  %v14283_v3 = vld [vmem:[#allocation63_spill] sm:$0xff] }
 0x3a4   :  { %v3572_v54 = vadd.f32 %v3571_v50, %v14279_v23  ;;  %v3645_v50 = vmul.f32 %v14282_v9, %v14282_v9 }
 0x3a5   :  { %v3703_v52 = vadd.f32 %v3702_v8, %v3640_v32  ;;  %v14284_v8 = vld [vmem:[#allocation58_spill] sm:$0xff] }
 0x3a6   :  { %v3573_v36 = vadd.f32 %v3572_v54, %v14280_v39 }
 0x3a7   :  { %v3704_v58 = vadd.f32 %v3703_v52, %v3641_v47  ;;  %v3646_v47 = vmul.f32 %v14283_v3, %v14283_v3 }
 0x3a8   :  { %v3574_v37 = vadd.f32 %v3573_v36, %v14281_v48  ;;  %v14285_v36 = vld [vmem:[#allocation61_spill] sm:$0xff]  ;;  %v14286_v48 = vld [vmem:[#allocation59_spill] sm:$0xff] }
 0x3a9   :  { %v3705_v27 = vadd.f32 %v3704_v58, %v3642_v21  ;;  %v3647_v58 = vmul.f32 %v14284_v8, %v14284_v8 }
 0x3aa   :  { %v3575_v45 = vadd.f32 %v3574_v37, %v14282_v9  ;;  %v14287_v9 = vld [vmem:[#allocation192_spill] sm:$0xff] }
 0x3ab   :  { %v3706_v18 = vadd.f32 %v3705_v27, %v3643_v5  ;;  %v3648_v27 = vmul.f32 %v14285_v36, %v14285_v36 }
 0x3ac   :  { %v3576_v49 = vadd.f32 %v3575_v45, %v14283_v3  ;;  %v14288_v3 = vld [vmem:[#allocation200_spill] sm:$0xff] }
 0x3ad   :  { %v3707_v32 = vadd.f32 %v3706_v18, %v3644_v51  ;;  %v3649_v18 = vmul.f32 %v14286_v48, %v14286_v48 }
 0x3ae   :  { %v3577_v54 = vadd.f32 %v3576_v49, %v14284_v8  ;;  %v14289_v8 = vld [vmem:[#allocation193_spill] sm:$0xff] }
 0x3af   :  { %v3708_v52 = vadd.f32 %v3707_v32, %v3645_v50  ;;  %v3650_v32 = vmul.f32 %v14287_v9, %v14287_v9 }
 0x3b0   :  { %v3578_v21 = vadd.f32 %v3577_v54, %v14285_v36  ;;  %v14290_v36 = vld [vmem:[#allocation201_spill] sm:$0xff] }
 0x3b1   :  { %v3709_v37 = vadd.f32 %v3708_v52, %v3646_v47  ;;  %v3651_v52 = vmul.f32 %v14288_v3, %v14288_v3 }
 0x3b2   :  { %v3579_v5 = vadd.f32 %v3578_v21, %v14286_v48  ;;  %v14291_v48 = vld [vmem:[#allocation194_spill] sm:$0xff] }
 0x3b3   :  { %v3710_v45 = vadd.f32 %v3709_v37, %v3647_v58  ;;  %v3652_v37 = vmul.f32 %v14289_v8, %v14289_v8 }
 0x3b4   :  { %v3580_v51 = vadd.f32 %v3579_v5, %v14287_v9  ;;  %v14292_v9 = vld [vmem:[#allocation202_spill] sm:$0xff] }
 0x3b5   :  { %v3711_v49 = vadd.f32 %v3710_v45, %v3648_v27  ;;  %v3653_v45 = vmul.f32 %v14290_v36, %v14290_v36 }
 0x3b6   :  { %v3581_v50 = vadd.f32 %v3580_v51, %v14288_v3  ;;  %v14293_v3 = vld [vmem:[#allocation195_spill] sm:$0xff] }
 0x3b7   :  { %v3712_v54 = vadd.f32 %v3711_v49, %v3649_v18  ;;  %v3654_v49 = vmul.f32 %v14291_v48, %v14291_v48 }
 0x3b8   :  { %v3582_v47 = vadd.f32 %v3581_v50, %v14289_v8  ;;  %v14294_v8 = vld [vmem:[#allocation203_spill] sm:$0xff] }
 0x3b9   :  { %v3713_v21 = vadd.f32 %v3712_v54, %v3650_v32  ;;  %v3655_v54 = vmul.f32 %v14292_v9, %v14292_v9 }
 0x3ba   :  { %v3583_v58 = vadd.f32 %v3582_v47, %v14290_v36  ;;  %v14295_v36 = vld [vmem:[#allocation196_spill] sm:$0xff] }
 0x3bb   :  { %v3714_v5 = vadd.f32 %v3713_v21, %v3651_v52  ;;  %v3656_v21 = vmul.f32 %v14293_v3, %v14293_v3 }
 0x3bc   :  { %v3584_v27 = vadd.f32 %v3583_v58, %v14291_v48  ;;  %v14296_v48 = vld [vmem:[#allocation70_spill] sm:$0xff] }
 0x3bd   :  { %v3715_v51 = vadd.f32 %v3714_v5, %v3652_v37  ;;  %v3657_v5 = vmul.f32 %v14294_v8, %v14294_v8 }
 0x3be   :  { %v3585_v18 = vadd.f32 %v3584_v27, %v14292_v9  ;;  %v14297_v9 = vld [vmem:[#allocation71_spill] sm:$0xff] }
 0x3bf   :  { %v3716_v50 = vadd.f32 %v3715_v51, %v3653_v45  ;;  %v3658_v51 = vmul.f32 %v14295_v36, %v14295_v36 }
 0x3c0   :  { %v3586_v32 = vadd.f32 %v3585_v18, %v14293_v3  ;;  %v14298_v3 = vld [vmem:[#allocation72_spill] sm:$0xff] }
 0x3c1   :  { %v3717_v47 = vadd.f32 %v3716_v50, %v3654_v49  ;;  %v3659_v50 = vmul.f32 %v14296_v48, %v14296_v48 }
 0x3c2   :  { %v3587_v52 = vadd.f32 %v3586_v32, %v14294_v8  ;;  %v14299_v8 = vld [vmem:[#allocation73_spill] sm:$0xff] }
 0x3c3   :  { %v3718_v58 = vadd.f32 %v3717_v47, %v3655_v54  ;;  %v3660_v47 = vmul.f32 %v14297_v9, %v14297_v9 }
 0x3c4   :  { %v3588_v37 = vadd.f32 %v3587_v52, %v14295_v36 }
 0x3c5   :  { %v3719_v27 = vadd.f32 %v3718_v58, %v3656_v21  ;;  %v3661_v58 = vmul.f32 %v14298_v3, %v14298_v3 }
 0x3c6   :  { %v3589_v45 = vadd.f32 %v3588_v37, %v14296_v48 }
 0x3c7   :  { %v3720_v18 = vadd.f32 %v3719_v27, %v3657_v5  ;;  %v3662_v27 = vmul.f32 %v14299_v8, %v14299_v8 }
 0x3c8   :  { %v3590_v49 = vadd.f32 %v3589_v45, %v14297_v9 }
 0x3c9   :  { %v3721_v32 = vadd.f32 %v3720_v18, %v3658_v51  ;;  %v3663_v18 = vmul.f32 %v9794_v20, %v9794_v20 }
 0x3ca   :  { %v3591_v54 = vadd.f32 %v3590_v49, %v14298_v3 }
 0x3cb   :  { %v3722_v52 = vadd.f32 %v3721_v32, %v3659_v50  ;;  %v3664_v50 = vmul.f32 %v9797_v29, %v9797_v29 }
 0x3cc   :  { %v3592_v21 = vadd.f32 %v3591_v54, %v14299_v8 }
 0x3cd   :  { %v3723_v37 = vadd.f32 %v3722_v52, %v3660_v47 }
 0x3ce   :  { %v3593_v5 = vadd.f32 %v3592_v21, %v9794_v20 }
 0x3cf   :  { %v3724_v45 = vadd.f32 %v3723_v37, %v3661_v58 }
 0x3d0   :  { %v3594_v51 = vadd.f32 %v3593_v5, %v9797_v29 }
 0x3d1   :  { %v3725_v49 = vadd.f32 %v3724_v45, %v3662_v27 }
 0x3d2   :  { %v3595_v9 = vrot.slane %v3594_v51, 4 }
 0x3d3   :  { %v3726_v32 = vadd.f32 %v3725_v49, %v3663_v18 }
 0x3d4   :  { %v3596_v54 = vadd.f32 %v3595_v9, %v3594_v51 }
 0x3d5   :  { %v3727_v3 = vadd.f32 %v3726_v32, %v3664_v50 }
 0x3d6   :  { %v3597_v47 = vrot.slane %v3596_v54, 2 }
 0x3d7   :  { %v3728_v52 = vrot.slane %v3727_v3, 4 }
 0x3d8   :  { %v3598_v21 = vadd.f32 %v3597_v47, %v3596_v54 }
 0x3d9   :  { %v3729_v48 = vadd.f32 %v3728_v52, %v3727_v3 }
 0x3da   :  { %v3599_v36 = vrot.slane %v3598_v21, 1 }
 0x3db   :  { %v3730_v8 = vrot.slane %v3729_v48, 2 }
 0x3dc   :  { %v3600_v58 = vadd.f32 %v3599_v36, %v3598_v21  ;;  %v14300_v21 = vld [vmem:[#allocation98_spill] sm:$0xff] }
 0x3dd   :  { %v3731_v37 = vadd.f32 %v3730_v8, %v3729_v48 }
 0x3de   :  { %v10171_v5 = vmul.f32 0.001953125, %v3600_v58 }
 0x3df   :  { %v3732_v39 = vrot.slane %v3731_v37, 1 }
 0x3e0   :  { %v3736_v27 = vmul.f32 %v10171_v5, %v10171_v5  ;;  %v14320_v52 = vsub.f32 %v9777_v22, %v10171_v5  ;;  %v14321_v47 = vsub.f32 %v9779_v1, %v10171_v5  ;;  %v14322_v8 = vsub.f32 %v9828_v13, %v10171_v5 }
 0x3e1   :  { %v3733_v20 = vadd.f32 %v3732_v39, %v3731_v37  ;;  %v14323_v3 = vsub.f32 %v9838_v24, %v10171_v5  ;;  %v14324_v22 = vsub.f32 %v9782_v57, %v10171_v5  ;;  %v14325_v1 = vsub.f32 %v9812_v42, %v10171_v5 }
 0x3e2   :  { %v14326_v13 = vsub.f32 %v9849_v59, %v10171_v5  ;;  %v14327_v24 = vsub.f32 %v9860_v6, %v10171_v5 }
 0x3e3   :  { %v3735_v45 = vmul.f32 0.001953125, %v3733_v20 }
 0x3e5   :  { %v3737_v29 = vsub.f32 %v3735_v45, %v3736_v27 }
 0x3e7   :  { %v3738_v18 = vmax.f32 %v3737_v29, 0.0 }
 0x3e9   :  { %v3739_v9 = vadd.f32 1e-05, %v3738_v18 }
 0x3eb   :  { %5331 = vrsqrt.f32 %v3739_v9 }
 0x3f8   :  { %v10291_v9 = vpop.eup %5331 }
 0x3f9   :  { %v3805_v29 = vmul.f32 %v10291_v9, %v14320_v52  ;;  %v3806_v20 = vmul.f32 %v10291_v9, %v14321_v47  ;;  %v3809_v48 = vmul.f32 %v10291_v9, %v14322_v8  ;;  %v3810_v51 = vmul.f32 %v10291_v9, %v14323_v3 }
 0x3fa   :  { %v3807_v52 = vmul.f32 %v10291_v9, %v14324_v22  ;;  %v3808_v47 = vmul.f32 %v10291_v9, %v14325_v1  ;;  %v3811_v8 = vmul.f32 %v10291_v9, %v14326_v13  ;;  %v3812_v3 = vmul.f32 %v10291_v9, %v14327_v24 }
 0x3fb   :  { %v3869_v49 = vmax.f32 %v3805_v29, 0.0  ;;  %v3870_v50 = vmax.f32 %v3806_v20, 0.0  ;;  %v3873_v57 = vmax.f32 %v3809_v48, 0.0  ;;  %v3874_v32 = vmax.f32 %v3810_v51, 0.0 }
 0x3fc   :  { %v3871_v22 = vmax.f32 %v3807_v52, 0.0  ;;  %v3872_v39 = vmax.f32 %v3808_v47, 0.0  ;;  %v3875_v36 = vmax.f32 %v3811_v8, 0.0  ;;  %v3876_v42 = vmax.f32 %v3812_v3, 0.0 }
 0x3fd   :  { %v3933_v54 = vmin.f32 %v3869_v49, 6.0  ;;  %v3934_v1 = vmin.f32 %v3870_v50, 6.0  ;;  %v3937_v18 = vmin.f32 %v3873_v57, 6.0  ;;  %v3938_v45 = vmin.f32 %v3874_v32, 6.0 }
 0x3fe   :  { %v3935_v59 = vmin.f32 %v3871_v22, 6.0  ;;  %v3936_v27 = vmin.f32 %v3872_v39, 6.0  ;;  %v3939_v13 = vmin.f32 %v3875_v36, 6.0  ;;  %v3940_v37 = vmin.f32 %v3876_v42, 6.0 }
 0x3ff   :  { %v3997_v58 = vpack.c.bf16 %v3934_v1, %v3933_v54  ;;  %v3999_v6 = vpack.c.bf16 %v3938_v45, %v3937_v18  ;;  %v14328_v29 = vsub.f32 %v9871_v19, %v10171_v5  ;;  %v14329_v51 = vsub.f32 %v9882_v31, %v10171_v5 }
 0x400   :  { %v3998_v49 = vpack.c.bf16 %v3936_v27, %v3935_v59  ;;  %v4000_v50 = vpack.c.bf16 %v3940_v37, %v3939_v13  ;;  %v14330_v32 = vsub.f32 %v9893_v44, %v10171_v5  ;;  %v14331_v36 = vsub.f32 %v9904_v53, %v10171_v5 }
 0x401   :  { %v3813_v48 = vmul.f32 %v10291_v9, %v14328_v29  ;;  %v3814_v20 = vmul.f32 %v10291_v9, %v14329_v51  ;;  %5239 = vmatprep.mubr.bf16.mxu0 %v3997_v58  ;;  %5243 = vmatprep.mubr.bf16.mxu1 %v3999_v6  ;;  %v14332_v31 = vsub.f32 %v9915_v11, %v10171_v5 }
 0x402   :  { %v3815_v39 = vmul.f32 %v10291_v9, %v14330_v32  ;;  %v3816_v54 = vmul.f32 %v10291_v9, %v14331_v36  ;;  %v14333_v37 = vsub.f32 %v9926_v30, %v10171_v5  ;;  %5240 = vmatmul.mubr.bf16.vlgmr.msra.gmra.mxu0 %v3998_v49  ;;  %5244 = vmatmul.mubr.bf16.vlgmr.msra.gmra.mxu1 %v4000_v50  ;;  %v14338_v49 = vld [vmem:[#allocation120_spill] sm:$0xff] }
 0x403   :  { %v3877_v19 = vmax.f32 %v3813_v48, 0.0  ;;  %v3878_v45 = vmax.f32 %v3814_v20, 0.0  ;;  %v3817_v27 = vmul.f32 %v10291_v9, %v14332_v31  ;;  %v14334_v58 = vsub.f32 %v9937_v34, %v10171_v5 }
 0x404   :  { %v3818_v44 = vmul.f32 %v10291_v9, %v14333_v37  ;;  %v3879_v18 = vmax.f32 %v3815_v39, 0.0  ;;  %v3880_v53 = vmax.f32 %v3816_v54, 0.0  ;;  %v14335_v47 = vsub.f32 %v9948_v61, %v10171_v5 }
 0x405   :  { %v3819_v52 = vmul.f32 %v10291_v9, %v14334_v58  ;;  %v3941_v8 = vmin.f32 %v3877_v19, 6.0  ;;  %v3942_v24 = vmin.f32 %v3878_v45, 6.0  ;;  %v3881_v3 = vmax.f32 %v3817_v27, 0.0 }
 0x406   :  { %v3820_v11 = vmul.f32 %v10291_v9, %v14335_v47  ;;  %v3882_v30 = vmax.f32 %v3818_v44, 0.0  ;;  %v3943_v57 = vmin.f32 %v3879_v18, 6.0  ;;  %v3944_v22 = vmin.f32 %v3880_v53, 6.0 }
 0x407   :  { %v3883_v42 = vmax.f32 %v3819_v52, 0.0  ;;  %v4001_v59 = vpack.c.bf16 %v3942_v24, %v3941_v8  ;;  %v3945_v13 = vmin.f32 %v3881_v3, 6.0  ;;  %v14336_v34 = vsub.f32 %v9959_v62, %v10171_v5 }
 0x408   :  { %v3884_v1 = vmax.f32 %v3820_v11, 0.0  ;;  %v3946_v6 = vmin.f32 %v3882_v30, 6.0  ;;  %v4002_v48 = vpack.c.bf16 %v3944_v22, %v3943_v57  ;;  %v14337_v51 = vsub.f32 %v9970_v2, %v10171_v5 }
 0x409   :  { %v3821_v29 = vmul.f32 %v10291_v9, %v14336_v34  ;;  %v3947_v61 = vmin.f32 %v3883_v42, 6.0  ;;  %v3803_v50 = vsub.f32 %v14338_v49, %v10171_v5  ;;  %5247 = vmatprep.mubr.bf16.mxu1 %v4001_v59  ;;  %v14339_v36 = vsub.f32 %v9981_v35, %v10171_v5 }
 0x40a   :  { %v3822_v20 = vmul.f32 %v10291_v9, %v14337_v51  ;;  %v3948_v32 = vmin.f32 %v3884_v1, 6.0  ;;  %v14340_v54 = vsub.f32 %v9992_v7, %v10171_v5  ;;  %v4003_v45 = vpack.c.bf16 %v3946_v6, %v3945_v13  ;;  %5248 = vmatmul.mubr.bf16.gmra.mxu1 %v4002_v48  ;;  %v14346_v1 = vld [vmem:[#allocation19_spill] sm:$0xff] }
 0x40b   :  { %v3885_v39 = vmax.f32 %v3821_v29, 0.0  ;;  %v3823_v62 = vmul.f32 %v10291_v9, %v14339_v36  ;;  %v14341_v31 = vsub.f32 %v10003_v46, %v10171_v5  ;;  %v14342_v37 = vsub.f32 %v10014_v60, %v10171_v5 }
 0x40c   :  { %v3824_v19 = vmul.f32 %v10291_v9, %v14340_v54  ;;  %v3886_v2 = vmax.f32 %v3822_v20, 0.0  ;;  %v14343_v7 = vsub.f32 %v10025_v33, %v10171_v5  ;;  %v14344_v46 = vsub.f32 %v10033_v41, %v10171_v5  ;;  %5251 = vmatprep.mubr.bf16.mxu1 %v4003_v45 }
 0x40d   :  { %v3825_v27 = vmul.f32 %v10291_v9, %v14341_v31  ;;  %v3826_v44 = vmul.f32 %v10291_v9, %v14342_v37  ;;  %v3949_v35 = vmin.f32 %v3885_v39, 6.0  ;;  %v3887_v18 = vmax.f32 %v3823_v62, 0.0 }
 0x40e   :  { %v3888_v53 = vmax.f32 %v3824_v19, 0.0  ;;  %v3827_v58 = vmul.f32 %v10291_v9, %v14343_v7  ;;  %v3950_v52 = vmin.f32 %v3886_v2, 6.0  ;;  %v3828_v8 = vmul.f32 %v10291_v9, %v14344_v46 }
 0x40f   :  { %v3889_v47 = vmax.f32 %v3825_v27, 0.0  ;;  %v3890_v11 = vmax.f32 %v3826_v44, 0.0  ;;  %v3951_v60 = vmin.f32 %v3887_v18, 6.0  ;;  %v14345_v30 = vsub.f32 %v10038_v14, %v10171_v5 }
 0x410   :  { %v3952_v24 = vmin.f32 %v3888_v53, 6.0  ;;  %v3891_v3 = vmax.f32 %v3827_v58, 0.0  ;;  %v4004_v57 = vpack.c.bf16 %v3948_v32, %v3947_v61  ;;  %v4005_v22 = vpack.c.bf16 %v3950_v52, %v3949_v35 }
 0x411   :  { %v3829_v33 = vmul.f32 %v10291_v9, %v14345_v30  ;;  %v3892_v42 = vmax.f32 %v3828_v8, 0.0  ;;  %v3804_v59 = vsub.f32 %v14346_v1, %v10171_v5  ;;  %v3953_v13 = vmin.f32 %v3889_v47, 6.0 }
 0x412   :  { %v3954_v6 = vmin.f32 %v3890_v11, 6.0  ;;  %v14347_v41 = vsub.f32 %v10043_v0, %v10171_v5  ;;  %v4006_v48 = vpack.c.bf16 %v3952_v24, %v3951_v60  ;;  %v10409_v51 = vmin.f32 %v3891_v3, 6.0  ;;  %5252 = vmatmul.mubr.bf16.gmra.mxu1 %v4004_v57 }
 0x413   :  { %v3893_v29 = vmax.f32 %v3829_v33, 0.0  ;;  %v14348_v14 = vsub.f32 %v14267_v26, %v10171_v5  ;;  %v14349_v20 = vsub.f32 %v14268_v15, %v10171_v5  ;;  %v10419_v39 = vmin.f32 %v3892_v42, 6.0  ;;  %5255 = vmatprep.mubr.bf16.mxu1 %v4005_v22 }
 0x414   :  { %v3830_v34 = vmul.f32 %v10291_v9, %v14347_v41  ;;  %v14350_v0 = vsub.f32 %v14269_v16, %v10171_v5  ;;  %v14351_v54 = vsub.f32 %v14271_v40, %v10171_v5  ;;  %v14352_v15 = vsub.f32 %v10062_v43, %v10171_v5 }
 0x415   :  { %v3831_v61 = vmul.f32 %v10291_v9, %v14348_v14  ;;  %v3832_v32 = vmul.f32 %v10291_v9, %v14349_v20  ;;  %v10429_v19 = vmin.f32 %v3893_v29, 6.0  ;;  %v14353_v44 = vsub.f32 %v9785_v10, %v10171_v5 }
 0x416   :  { %v3894_v36 = vmax.f32 %v3830_v34, 0.0  ;;  %v3833_v62 = vmul.f32 %v10291_v9, %v14350_v0  ;;  %v3834_v26 = vmul.f32 %v10291_v9, %v14351_v54  ;;  %v3835_v31 = vmul.f32 %v10291_v9, %v14352_v15 }
 0x417   :  { %v3895_v45 = vmax.f32 %v3831_v61, 0.0  ;;  %v3896_v2 = vmax.f32 %v3832_v32, 0.0  ;;  %v3836_v40 = vmul.f32 %v10291_v9, %v14353_v44  ;;  %v14354_v43 = vsub.f32 %v9790_v38, %v10171_v5  ;;  %v14365_v44 = vld [vmem:[#allocation57_spill] sm:$0xff] }
 0x418   :  { %v10435_v27 = vmin.f32 %v3894_v36, 6.0  ;;  %v3897_v37 = vmax.f32 %v3833_v62, 0.0  ;;  %v3898_v16 = vmax.f32 %v3834_v26, 0.0  ;;  %v3899_v53 = vmax.f32 %v3835_v31, 0.0 }
 0x419   :  { %v10441_v35 = vmin.f32 %v3895_v45, 6.0  ;;  %v10443_v18 = vmin.f32 %v3896_v2, 6.0  ;;  %v3837_v7 = vmul.f32 %v10291_v9, %v14354_v43  ;;  %v4007_v58 = vpack.c.bf16 %v3954_v6, %v3953_v13 }
 0x41a   :  { %v10449_v52 = vmin.f32 %v3897_v37, 6.0  ;;  %v10451_v47 = vmin.f32 %v3898_v16, 6.0  ;;  %v3900_v10 = vmax.f32 %v3836_v40, 0.0  ;;  %v4008_v11 = vpack.c.bf16 %v10419_v39, %v10409_v51  ;;  %5256 = vmatmul.mubr.bf16.gmra.mxu1 %v4006_v48 }
 0x41b   :  { %v4009_v46 = vpack.c.bf16 %v10435_v27, %v10429_v19  ;;  %v14355_v8 = vsub.f32 %v9788_v56, %v10171_v5  ;;  %v3901_v60 = vmax.f32 %v3837_v7, 0.0  ;;  %v4010_v24 = vpack.c.bf16 %v10443_v18, %v10441_v35  ;;  %5259 = vmatprep.mubr.bf16.mxu1 %v4007_v58  ;;  %v14367_v7 = vld [vmem:[#allocation99_spill] sm:$0xff]  ;;  %v14399_v35 = vld [vmem:[#allocation72_spill] sm:$0xff] }
 0x41c   :  { %v10463_v3 = vmin.f32 %v3899_v53, 6.0  ;;  %v14356_v30 = vsub.f32 %v14272_v12, %v10171_v5  ;;  %v14357_v57 = vsub.f32 %v14273_v63, %v10171_v5  ;;  %v4011_v56 = vpack.c.bf16 %v10451_v47, %v10449_v52 }
 0x41d   :  { %v3838_v38 = vmul.f32 %v10291_v9, %v14355_v8  ;;  %v14358_v13 = vsub.f32 %v14274_v25, %v10171_v5  ;;  %v14359_v41 = vsub.f32 %v14275_v17, %v10171_v5  ;;  %v10483_v34 = vmin.f32 %v3900_v10, 6.0  ;;  %v14369_v8 = vld [vmem:[#allocation63_spill] sm:$0xff] }
 0x41e   :  { %v3839_v33 = vmul.f32 %v10291_v9, %v14356_v30  ;;  %v3840_v22 = vmul.f32 %v10291_v9, %v14357_v57  ;;  %v14360_v51 = vsub.f32 %v14276_v4, %v10171_v5  ;;  %v10489_v61 = vmin.f32 %v3901_v60, 6.0  ;;  %v14371_v57 = vld [vmem:[#allocation58_spill] sm:$0xff] }
 0x41f   :  { %v3902_v42 = vmax.f32 %v3838_v38, 0.0  ;;  %v3841_v6 = vmul.f32 %v10291_v9, %v14358_v13  ;;  %v3842_v12 = vmul.f32 %v10291_v9, %v14359_v41  ;;  %v14361_v32 = vsub.f32 %v14277_v28, %v10171_v5 }
 0x420   :  { %v3903_v29 = vmax.f32 %v3839_v33, 0.0  ;;  %v3904_v63 = vmax.f32 %v3840_v22, 0.0  ;;  %v3843_v14 = vmul.f32 %v10291_v9, %v14360_v51  ;;  %v14362_v62 = vsub.f32 %v14278_v55, %v10171_v5 }
 0x421   :  { %v3905_v20 = vmax.f32 %v3841_v6, 0.0  ;;  %v3906_v25 = vmax.f32 %v3842_v12, 0.0  ;;  %v3844_v17 = vmul.f32 %v10291_v9, %v14361_v32  ;;  %v10503_v54 = vmin.f32 %v3902_v42, 6.0  ;;  %v14373_v12 = vld [vmem:[#allocation61_spill] sm:$0xff] }
 0x422   :  { %v10495_v39 = vmin.f32 %v3903_v29, 6.0  ;;  %v10497_v36 = vmin.f32 %v3904_v63, 6.0  ;;  %v3907_v0 = vmax.f32 %v3843_v14, 0.0  ;;  %v3845_v4 = vmul.f32 %v10291_v9, %v14362_v62  ;;  %5260 = vmatmul.mubr.bf16.gmra.mxu1 %v4008_v11 }
 0x423   :  { %v10505_v26 = vmin.f32 %v3905_v20, 6.0  ;;  %v10507_v19 = vmin.f32 %v3906_v25, 6.0  ;;  %v3908_v28 = vmax.f32 %v3844_v17, 0.0  ;;  %v14363_v15 = vsub.f32 %v14279_v23, %v10171_v5  ;;  %v14375_v25 = vld [vmem:[#allocation59_spill] sm:$0xff]  ;;  %5263 = vmatprep.mubr.bf16.mxu1 %v4009_v46 }
 0x424   :  { %v4014_v45 = vpack.c.bf16 %v10497_v36, %v10495_v39  ;;  %v10511_v2 = vmin.f32 %v3907_v0, 6.0  ;;  %v3909_v31 = vmax.f32 %v3845_v4, 0.0  ;;  %v14364_v37 = vsub.f32 %v14300_v21, %v10171_v5 }
 0x425   :  { %v3846_v55 = vmul.f32 %v10291_v9, %v14363_v15  ;;  %v4015_v48 = vpack.c.bf16 %v10507_v19, %v10505_v26  ;;  %v10519_v27 = vmin.f32 %v3908_v28, 6.0  ;;  %v14366_v40 = vsub.f32 %v14365_v44, %v10171_v5 }
 0x426   :  { %v3847_v16 = vmul.f32 %v10291_v9, %v14364_v37  ;;  %v10529_v23 = vmin.f32 %v3909_v31, 6.0  ;;  %v14368_v58 = vsub.f32 %v14367_v7, %v10171_v5  ;;  %v14370_v38 = vsub.f32 %v14369_v8, %v10171_v5  ;;  %v14377_v31 = vld [vmem:[#allocation192_spill] sm:$0xff] }
 0x427   :  { %v3848_v53 = vmul.f32 %v10291_v9, %v14366_v40  ;;  %v3910_v43 = vmax.f32 %v3846_v55, 0.0  ;;  %v4016_v60 = vpack.c.bf16 %v10519_v27, %v10511_v2  ;;  %v14372_v22 = vsub.f32 %v14371_v57, %v10171_v5  ;;  %v14385_v57 = vld [vmem:[#allocation194_spill] sm:$0xff] }
 0x428   :  { %v3849_v10 = vmul.f32 %v10291_v9, %v14368_v58  ;;  %v3850_v21 = vmul.f32 %v10291_v9, %v14370_v38  ;;  %v3911_v30 = vmax.f32 %v3847_v16, 0.0  ;;  %v14374_v29 = vsub.f32 %v14373_v12, %v10171_v5  ;;  %v14381_v58 = vld [vmem:[#allocation193_spill] sm:$0xff] }
 0x429   :  { %v3912_v33 = vmax.f32 %v3848_v53, 0.0  ;;  %v3851_v42 = vmul.f32 %v10291_v9, %v14372_v22  ;;  %v10545_v13 = vmin.f32 %v3910_v43, 6.0  ;;  %v14376_v32 = vsub.f32 %v14375_v25, %v10171_v5  ;;  %v14379_v43 = vld [vmem:[#allocation200_spill] sm:$0xff] }
 0x42a   :  { %v3913_v6 = vmax.f32 %v3849_v10, 0.0  ;;  %v3914_v41 = vmax.f32 %v3850_v21, 0.0  ;;  %v3852_v63 = vmul.f32 %v10291_v9, %v14374_v29  ;;  %v10551_v51 = vmin.f32 %v3911_v30, 6.0  ;;  %v14383_v30 = vld [vmem:[#allocation201_spill] sm:$0xff]  ;;  %v14387_v29 = vld [vmem:[#allocation202_spill] sm:$0xff]  ;;  %5264 = vmatmul.mubr.bf16.gmra.mxu1 %v4010_v24 }
 0x42b   :  { %v10553_v14 = vmin.f32 %v3912_v33, 6.0  ;;  %v3915_v20 = vmax.f32 %v3851_v42, 0.0  ;;  %v3853_v17 = vmul.f32 %v10291_v9, %v14376_v32  ;;  %v4017_v0 = vpack.c.bf16 %v10545_v13, %v10529_v23  ;;  %5267 = vmatprep.mubr.bf16.mxu1 %v4011_v56 }
 0x42c   :  { %v10561_v62 = vmin.f32 %v3913_v6, 6.0  ;;  %v10563_v4 = vmin.f32 %v3914_v41, 6.0  ;;  %v3916_v28 = vmax.f32 %v3852_v63, 0.0  ;;  %v14378_v37 = vsub.f32 %v14377_v31, %v10171_v5 }
 0x42d   :  { %v4018_v15 = vpack.c.bf16 %v10553_v14, %v10551_v51  ;;  %v10567_v55 = vmin.f32 %v3915_v20, 6.0  ;;  %v3917_v44 = vmax.f32 %v3853_v17, 0.0  ;;  %v14380_v11 = vsub.f32 %v14379_v43, %v10171_v5 }
 0x42e   :  { %v3854_v16 = vmul.f32 %v10291_v9, %v14378_v37  ;;  %v4019_v40 = vpack.c.bf16 %v10563_v4, %v10561_v62  ;;  %v10575_v53 = vmin.f32 %v3916_v28, 6.0  ;;  %v14382_v10 = vsub.f32 %v14381_v58, %v10171_v5  ;;  %v14389_v28 = vld [vmem:[#allocation195_spill] sm:$0xff] }
 0x42f   :  { %v3855_v7 = vmul.f32 %v10291_v9, %v14380_v11  ;;  %v10585_v21 = vmin.f32 %v3917_v44, 6.0  ;;  %v14384_v46 = vsub.f32 %v14383_v30, %v10171_v5  ;;  %v14386_v22 = vsub.f32 %v14385_v57, %v10171_v5  ;;  %v14391_v11 = vld [vmem:[#allocation203_spill] sm:$0xff] }
 0x430   :  { %v3856_v8 = vmul.f32 %v10291_v9, %v14382_v10  ;;  %v3918_v38 = vmax.f32 %v3854_v16, 0.0  ;;  %v4020_v6 = vpack.c.bf16 %v10575_v53, %v10567_v55  ;;  %v14388_v63 = vsub.f32 %v14387_v29, %v10171_v5 }
 0x431   :  { %v3857_v33 = vmul.f32 %v10291_v9, %v14384_v46  ;;  %v3858_v42 = vmul.f32 %v10291_v9, %v14386_v22  ;;  %v3919_v41 = vmax.f32 %v3855_v7, 0.0  ;;  %v14390_v31 = vsub.f32 %v14389_v28, %v10171_v5  ;;  %v14393_v46 = vld [vmem:[#allocation196_spill] sm:$0xff]  ;;  %v14401_v28 = vld [vmem:[#allocation73_spill] sm:$0xff] }
 0x432   :  { %v3920_v12 = vmax.f32 %v3856_v8, 0.0  ;;  %v3859_v20 = vmul.f32 %v10291_v9, %v14388_v63  ;;  %v3982_v25 = vmin.f32 %v3918_v38, 6.0  ;;  %v14392_v55 = vsub.f32 %v14391_v11, %v10171_v5  ;;  %v14397_v63 = vld [vmem:[#allocation71_spill] sm:$0xff] }
 0x433   :  { %v3921_v32 = vmax.f32 %v3857_v33, 0.0  ;;  %v3922_v17 = vmax.f32 %v3858_v42, 0.0  ;;  %v3860_v37 = vmul.f32 %v10291_v9, %v14390_v31  ;;  %v3983_v16 = vmin.f32 %v3919_v41, 6.0 }
 0x434   :  { %v3984_v44 = vmin.f32 %v3920_v12, 6.0  ;;  %v3923_v43 = vmax.f32 %v3859_v20, 0.0  ;;  %v3861_v53 = vmul.f32 %v10291_v9, %v14392_v55  ;;  %v4021_v7 = vpack.c.bf16 %v3982_v25, %v10585_v21  ;;  %v14395_v12 = vld [vmem:[#allocation70_spill] sm:$0xff] }
 0x435   :  { %v3985_v58 = vmin.f32 %v3921_v32, 6.0  ;;  %v3986_v10 = vmin.f32 %v3922_v17, 6.0  ;;  %v3924_v8 = vmax.f32 %v3860_v37, 0.0  ;;  %v14394_v33 = vsub.f32 %v14393_v46, %v10171_v5 }
 0x436   :  { %v4022_v38 = vpack.c.bf16 %v3984_v44, %v3983_v16  ;;  %v3987_v30 = vmin.f32 %v3923_v43, 6.0  ;;  %v3925_v22 = vmax.f32 %v3861_v53, 0.0  ;;  %v14396_v21 = vsub.f32 %v14395_v12, %v10171_v5 }
 0x437   :  { %v3862_v57 = vmul.f32 %v10291_v9, %v14394_v33  ;;  %v4023_v42 = vpack.c.bf16 %v3986_v10, %v3985_v58  ;;  %v3988_v41 = vmin.f32 %v3924_v8, 6.0  ;;  %v14398_v20 = vsub.f32 %v14397_v63, %v10171_v5 }
 0x438   :  { %v3863_v29 = vmul.f32 %v10291_v9, %v14396_v21  ;;  %v3989_v17 = vmin.f32 %v3925_v22, 6.0  ;;  %v14400_v18 = vsub.f32 %v14399_v35, %v10171_v5  ;;  %v14402_v31 = vsub.f32 %v14401_v28, %v10171_v5 }
 0x439   :  { %v3864_v25 = vmul.f32 %v10291_v9, %v14398_v20  ;;  %v3926_v32 = vmax.f32 %v3862_v57, 0.0  ;;  %v4024_v16 = vpack.c.bf16 %v3988_v41, %v3987_v30  ;;  %v3867_v52 = vmul.f32 %v10291_v9, %v3803_v50 }
 0x43a   :  { %v3865_v24 = vmul.f32 %v10291_v9, %v14400_v18  ;;  %v3866_v37 = vmul.f32 %v10291_v9, %v14402_v31  ;;  %v3927_v44 = vmax.f32 %v3863_v29, 0.0  ;;  %v3868_v55 = vmul.f32 %v10291_v9, %v3804_v59 }
 0x43b   :  { %v3928_v43 = vmax.f32 %v3864_v25, 0.0  ;;  %v3990_v47 = vmin.f32 %v3926_v32, 6.0  ;;  %v3931_v10 = vmax.f32 %v3867_v52, 0.0  ;;  %v4012_v49 = vpack.c.bf16 %v10483_v34, %v10463_v3 }
 0x43c   :  { %v3929_v56 = vmax.f32 %v3865_v24, 0.0  ;;  %v3930_v11 = vmax.f32 %v3866_v37, 0.0  ;;  %v3991_v53 = vmin.f32 %v3927_v44, 6.0  ;;  %v3932_v33 = vmax.f32 %v3868_v55, 0.0 }
 0x43d   :  { %v3992_v58 = vmin.f32 %v3928_v43, 6.0  ;;  %v4025_v8 = vpack.c.bf16 %v3990_v47, %v3989_v17  ;;  %v3995_v50 = vmin.f32 %v3931_v10, 6.0  ;;  %v4013_v22 = vpack.c.bf16 %v10503_v54, %v10489_v61  ;;  %5268 = vmatmul.mubr.bf16.gmra.mxu1 %v4012_v49 }
 0x43e   :  { %v3993_v30 = vmin.f32 %v3929_v56, 6.0  ;;  %v3994_v46 = vmin.f32 %v3930_v11, 6.0  ;;  %v3996_v12 = vmin.f32 %v3932_v33, 6.0 }
 0x43f   :  { %v4026_v57 = vpack.c.bf16 %v3992_v58, %v3991_v53  ;;  %5271 = vmatprep.mubr.bf16.mxu1 %v4013_v22 }
 0x440   :  { %v4027_v41 = vpack.c.bf16 %v3994_v46, %v3993_v30  ;;  %v4028_v5 = vpack.c.bf16 %v3996_v12, %v3995_v50 }
 0x445   :  { %5272 = vmatmul.mubr.bf16.gmra.mxu1 %v4014_v45 }
 0x446   :  { %5275 = vmatprep.mubr.bf16.mxu1 %v4015_v48 }
 0x44d   :  { %5276 = vmatmul.mubr.bf16.gmra.mxu1 %v4016_v60 }
 0x44e   :  { %5279 = vmatprep.mubr.bf16.mxu1 %v4017_v0 }
 0x455   :  { %5280 = vmatmul.mubr.bf16.gmra.mxu1 %v4018_v15 }
 0x456   :  { %5283 = vmatprep.mubr.bf16.mxu1 %v4019_v40 }
 0x45d   :  { %5284 = vmatmul.mubr.bf16.gmra.mxu1 %v4020_v6 }
 0x45e   :  { %5287 = vmatprep.mubr.bf16.mxu1 %v4021_v7 }
 0x465   :  { %5288 = vmatmul.mubr.bf16.gmra.mxu1 %v4022_v38 }
 0x466   :  { %5291 = vmatprep.mubr.bf16.mxu1 %v4023_v42 }
 0x46d   :  { %5292 = vmatmul.mubr.bf16.gmra.mxu1 %v4024_v16 }
 0x46e   :  { %5295 = vmatprep.mubr.bf16.mxu1 %v4025_v8 }
 0x475   :  { %5296 = vmatmul.mubr.bf16.gmra.mxu1 %v4026_v57 }
 0x476   :  { %5299 = vmatprep.mubr.bf16.mxu1 %v4027_v41 }
 0x47d   :  { %5300 = vmatmul.mubr.bf16.gmra.mxu1 %v4028_v5 }
 0x4c2   :  { %v10666_v9 = vpop.f32.mrf.mxu0  ;;  %v10668_v1 = vpop.f32.mrf.mxu1 }
 0x4c3   :  { %v4517_v26 = vmul.f32 %v10666_v9, %v10666_v9  ;;  %v4385_v23 = vsel %vm115_vm1, %v10666_v9, 0.0  ;;  %v4521_v32 = vmul.f32 %v10668_v1, %v10668_v1  ;;  %v4393_v31 = vsel %vm115_vm1, %v10668_v1, 0.0 }
 0x4c4   :  { %v10670_v59 = vpop.f32.mrf.mxu0  ;;  %v10672_v3 = vpop.f32.mrf.mxu1 }
 0x4c5   :  { %v4515_v39 = vmul.f32 %v10670_v59, %v10670_v59  ;;  %v4382_v19 = vsel %vm115_vm1, %v10670_v59, 0.0  ;;  %v4582_v4 = vsel %vm115_vm1, %v4517_v26, 0.0  ;;  %v4519_v15 = vmul.f32 %v10672_v3, %v10672_v3 }
 0x4c6   :  { %v10674_v34 = vpop.f32.mrf.mxu0  ;;  %v10676_v61 = vpop.f32.mrf.mxu1  ;;  %v4389_v42 = vsel %vm115_vm1, %v10672_v3, 0.0  ;;  %v4590_v47 = vsel %vm115_vm1, %v4521_v32, 0.0 }
 0x4c7   :  { %v4579_v60 = vsel %vm115_vm1, %v4515_v39, 0.0  ;;  %v4518_v13 = vmul.f32 %v10674_v34, %v10674_v34  ;;  %v4387_v40 = vsel %vm115_vm1, %v10674_v34, 0.0  ;;  %v4586_v17 = vsel %vm115_vm1, %v4519_v15, 0.0 }
 0x4c8   :  { %v10680_v36 = vpop.f32.mrf.mxu0  ;;  %v10682_v54 = vpop.f32.mrf.mxu1  ;;  %v4522_v37 = vmul.f32 %v10676_v61, %v10676_v61  ;;  %v4395_v56 = vsel %vm115_vm1, %v10676_v61, 0.0 }
 0x4c9   :  { %v4383_v45 = vsel %vm115_vm1, %v10680_v36, 0.0  ;;  %v4516_v2 = vmul.f32 %v10680_v36, %v10680_v36  ;;  %v4584_v21 = vsel %vm115_vm1, %v4518_v13, 0.0  ;;  %v4520_v29 = vmul.f32 %v10682_v54, %v10682_v54 }
 0x4ca   :  { %v4384_v48 = vadd.f32 %v4383_v45, %v4382_v19  ;;  %v10692_v27 = vpop.f32.mrf.mxu1  ;;  %v4391_v35 = vsel %vm115_vm1, %v10682_v54, 0.0  ;;  %v4592_v10 = vsel %vm115_vm1, %v4522_v37, 0.0 }
 0x4cb   :  { %v4580_v51 = vsel %vm115_vm1, %v4516_v2, 0.0  ;;  %v4588_v16 = vsel %vm115_vm1, %v4520_v29, 0.0  ;;  %v4525_v57 = vmul.f32 %v10692_v27, %v10692_v27  ;;  %v4401_v39 = vsel %vm115_vm1, %v10692_v27, 0.0 }
 0x4cc   :  { %v4386_v14 = vadd.f32 %v4385_v23, %v4384_v48  ;;  %v4581_v0 = vadd.f32 %v4580_v51, %v4579_v60  ;;  %v10700_v62 = vpop.f32.mrf.mxu1 }
 0x4cd   :  { %v4523_v11 = vmul.f32 %v10700_v62, %v10700_v62  ;;  %v4397_v8 = vsel %vm115_vm1, %v10700_v62, 0.0  ;;  %v4598_v23 = vsel %vm115_vm1, %v4525_v57, 0.0 }
 0x4ce   :  { %v4388_v6 = vadd.f32 %v4387_v40, %v4386_v14  ;;  %v4583_v7 = vadd.f32 %v4582_v4, %v4581_v0  ;;  %v10707_v38 = vpop.f32.mrf.mxu1 }
 0x4cf   :  { %v4594_v50 = vsel %vm115_vm1, %v4523_v11, 0.0  ;;  %v4526_v26 = vmul.f32 %v10707_v38, %v10707_v38  ;;  %v4403_v60 = vsel %vm115_vm1, %v10707_v38, 0.0 }
 0x4d0   :  { %v4585_v63 = vadd.f32 %v4584_v21, %v4583_v7  ;;  %v4390_v20 = vadd.f32 %v4389_v42, %v4388_v6  ;;  %v10714_v25 = vpop.f32.mrf.mxu1 }
 0x4d1   :  { %v4524_v30 = vmul.f32 %v10714_v25, %v10714_v25  ;;  %v4399_v22 = vsel %vm115_vm1, %v10714_v25, 0.0  ;;  %v4600_v4 = vsel %vm115_vm1, %v4526_v26, 0.0 }
 0x4d2   :  { %v4392_v18 = vadd.f32 %v4391_v35, %v4390_v20  ;;  %v4587_v24 = vadd.f32 %v4586_v17, %v4585_v63  ;;  %v10721_v28 = vpop.f32.mrf.mxu1 }
 0x4d3   :  { %v4596_v19 = vsel %vm115_vm1, %v4524_v30, 0.0  ;;  %v4529_v21 = vmul.f32 %v10721_v28, %v10721_v28  ;;  %v4409_v35 = vsel %vm115_vm1, %v10721_v28, 0.0 }
 0x4d4   :  { %v4394_v44 = vadd.f32 %v4393_v31, %v4392_v18  ;;  %v4589_v43 = vadd.f32 %v4588_v16, %v4587_v24  ;;  %v10728_v52 = vpop.f32.mrf.mxu1 }
 0x4d5   :  { %v4527_v13 = vmul.f32 %v10728_v52, %v10728_v52  ;;  %v4405_v15 = vsel %vm115_vm1, %v10728_v52, 0.0 }
 0x4d6   :  { %v4591_v55 = vadd.f32 %v4590_v47, %v4589_v43  ;;  %v4396_v53 = vadd.f32 %v4395_v56, %v4394_v44  ;;  %v10735_v58 = vpop.f32.mrf.mxu1  ;;  %v4606_v44 = vsel %vm115_vm1, %v4529_v21, 0.0 }
 0x4d7   :  { %v4602_v29 = vsel %vm115_vm1, %v4527_v13, 0.0  ;;  %v4530_v18 = vmul.f32 %v10735_v58, %v10735_v58  ;;  %v4411_v43 = vsel %vm115_vm1, %v10735_v58, 0.0 }
 0x4d8   :  { %v4398_v46 = vadd.f32 %v4397_v8, %v4396_v53  ;;  %v4593_v33 = vadd.f32 %v4592_v10, %v4591_v55  ;;  %v10742_v49 = vpop.f32.mrf.mxu1 }
 0x4d9   :  { %v4528_v40 = vmul.f32 %v10742_v49, %v10742_v49  ;;  %v4407_v63 = vsel %vm115_vm1, %v10742_v49, 0.0  ;;  %v4608_v53 = vsel %vm115_vm1, %v4530_v18, 0.0 }
 0x4da   :  { %v4595_v41 = vadd.f32 %v4594_v50, %v4593_v33  ;;  %v4400_v12 = vadd.f32 %v4399_v22, %v4398_v46  ;;  %v10749_v5 = vpop.f32.mrf.mxu1 }
 0x4db   :  { %v4604_v24 = vsel %vm115_vm1, %v4528_v40, 0.0  ;;  %v4533_v57 = vmul.f32 %v10749_v5, %v10749_v5  ;;  %v4417_v26 = vsel %vm115_vm1, %v10749_v5, 0.0 }
 0x4dc   :  { %v4402_v45 = vadd.f32 %v4401_v39, %v4400_v12  ;;  %v4597_v2 = vadd.f32 %v4596_v19, %v4595_v41  ;;  %v10756_v48 = vpop.f32.mrf.mxu1 }
 0x4dd   :  { %v4531_v47 = vmul.f32 %v10756_v48, %v10756_v48  ;;  %v4413_v10 = vsel %vm115_vm1, %v10756_v48, 0.0  ;;  %v4614_v13 = vsel %vm115_vm1, %v4533_v57, 0.0 }
 0x4de   :  { %v4599_v51 = vadd.f32 %v4598_v23, %v4597_v2  ;;  %v4404_v14 = vadd.f32 %v4403_v60, %v4402_v45  ;;  %v10763_v0 = vpop.f32.mrf.mxu1 }
 0x4df   :  { %v4610_v50 = vsel %vm115_vm1, %v4531_v47, 0.0  ;;  %v4534_v19 = vmul.f32 %v10763_v0, %v10763_v0 }
 0x4e0   :  { %v4406_v6 = vadd.f32 %v4405_v15, %v4404_v14  ;;  %v4601_v7 = vadd.f32 %v4600_v4, %v4599_v51  ;;  %v10770_v42 = vpop.f32.mrf.mxu1  ;;  %v4419_v51 = vsel %vm115_vm1, %v10763_v0, 0.0 }
 0x4e1   :  { %v4532_v8 = vmul.f32 %v10770_v42, %v10770_v42  ;;  %v4415_v22 = vsel %vm115_vm1, %v10770_v42, 0.0 }
 0x4e2   :  { %v4603_v20 = vadd.f32 %v4602_v29, %v4601_v7  ;;  %v4408_v32 = vadd.f32 %v4407_v63, %v4406_v6  ;;  %v10777_v17 = vpop.f32.mrf.mxu1  ;;  %v4616_v6 = vsel %vm115_vm1, %v4534_v19, 0.0 }
 0x4e3   :  { %v4612_v45 = vsel %vm115_vm1, %v4532_v8, 0.0 }
 0x4e4   :  { %v4410_v31 = vadd.f32 %v4409_v35, %v4408_v32  ;;  %v4605_v37 = vadd.f32 %v4604_v24, %v4603_v20  ;;  %v10784_v16 = vpop.f32.mrf.mxu1  ;;  %v4537_v32 = vmul.f32 %v10777_v17, %v10777_v17 }
 0x4e5   :  { %v4535_v14 = vmul.f32 %v10784_v16, %v10784_v16  ;;  %v4421_v7 = vsel %vm115_vm1, %v10784_v16, 0.0 }
 0x4e6   :  { %v4607_v56 = vadd.f32 %v4606_v44, %v4605_v37  ;;  %v4412_v11 = vadd.f32 %v4411_v43, %v4410_v31  ;;  %v10791_v55 = vpop.f32.mrf.mxu1  ;;  %v4425_v44 = vsel %vm115_vm1, %v10777_v17, 0.0 }
 0x4e7   :  { %v4618_v35 = vsel %vm115_vm1, %v4535_v14, 0.0  ;;  %v4538_v43 = vmul.f32 %v10791_v55, %v10791_v55  ;;  %v4427_v8 = vsel %vm115_vm1, %v10791_v55, 0.0 }
 0x4e8   :  { %v4414_v30 = vadd.f32 %v4413_v10, %v4412_v11  ;;  %v4609_v46 = vadd.f32 %v4608_v53, %v4607_v56  ;;  %v10798_v33 = vpop.f32.mrf.mxu1  ;;  %v4622_v10 = vsel %vm115_vm1, %v4537_v32, 0.0 }
 0x4e9   :  { %v4536_v21 = vmul.f32 %v10798_v33, %v10798_v33  ;;  %v4423_v18 = vsel %vm115_vm1, %v10798_v33, 0.0 }
 0x4ea   :  { %v4611_v41 = vadd.f32 %v4610_v50, %v4609_v46  ;;  %v4416_v12 = vadd.f32 %v4415_v22, %v4414_v30  ;;  %v10805_v39 = vpop.f32.mrf.mxu1  ;;  %v4624_v22 = vsel %vm115_vm1, %v4538_v43, 0.0 }
 0x4eb   :  { %v4620_v47 = vsel %vm115_vm1, %v4536_v21, 0.0 }
 0x4ec   :  { %v4418_v2 = vadd.f32 %v4417_v26, %v4416_v12  ;;  %v4613_v23 = vadd.f32 %v4612_v45, %v4611_v41  ;;  %v10812_v60 = vpop.f32.mrf.mxu1 }
 0x4ed   :  { %v4539_v30 = vmul.f32 %v10812_v60, %v10812_v60  ;;  %v4429_v41 = vsel %vm115_vm1, %v10812_v60, 0.0 }
 0x4ee   :  { %v4615_v4 = vadd.f32 %v4614_v13, %v4613_v23  ;;  %v4420_v15 = vadd.f32 %v4419_v51, %v4418_v2  ;;  %v10819_v40 = vpop.f32.mrf.mxu1  ;;  %v4541_v2 = vmul.f32 %v10805_v39, %v10805_v39 }
 0x4ef   :  { %v4626_v23 = vsel %vm115_vm1, %v4539_v30, 0.0 }
 0x4f0   :  { %v4422_v29 = vadd.f32 %v4421_v7, %v4420_v15  ;;  %v4617_v63 = vadd.f32 %v4616_v6, %v4615_v4  ;;  %v10826_v20 = vpop.f32.mrf.mxu1  ;;  %v4433_v15 = vsel %vm115_vm1, %v10805_v39, 0.0  ;;  %v4542_v6 = vmul.f32 %v10819_v40, %v10819_v40 }
 0x4f1   :  { %v4540_v12 = vmul.f32 %v10826_v20, %v10826_v20  ;;  %v4431_v13 = vsel %vm115_vm1, %v10826_v20, 0.0  ;;  %v4630_v32 = vsel %vm115_vm1, %v4541_v2, 0.0 }
 0x4f2   :  { %v4619_v24 = vadd.f32 %v4618_v35, %v4617_v63  ;;  %v4424_v31 = vadd.f32 %v4423_v18, %v4422_v29  ;;  %v4435_v35 = vsel %vm115_vm1, %v10819_v40, 0.0  ;;  %v4632_v43 = vsel %vm115_vm1, %v4542_v6, 0.0 }
 0x4f3   :  { %v4628_v7 = vsel %vm115_vm1, %v4540_v12, 0.0 }
 0x4f4   :  { %v4426_v56 = vadd.f32 %v4425_v44, %v4424_v31  ;;  %v4621_v11 = vadd.f32 %v4620_v47, %v4619_v24 }
 0x4f6   :  { %v4623_v46 = vadd.f32 %v4622_v10, %v4621_v11  ;;  %v4428_v57 = vadd.f32 %v4427_v8, %v4426_v56 }
 0x4f8   :  { %v4430_v26 = vadd.f32 %v4429_v41, %v4428_v57  ;;  %v4625_v19 = vadd.f32 %v4624_v22, %v4623_v46 }
 0x4fa   :  { %v4627_v51 = vadd.f32 %v4626_v23, %v4625_v19  ;;  %v4432_v14 = vadd.f32 %v4431_v13, %v4430_v26 }
 0x4fc   :  { %v4434_v21 = vadd.f32 %v4433_v15, %v4432_v14  ;;  %v4629_v29 = vadd.f32 %v4628_v7, %v4627_v51 }
 0x4fd   :  { %v10833_v37 = vpop.f32.mrf.mxu1 }
 0x4fe   :  { %v4631_v24 = vadd.f32 %v4630_v32, %v4629_v29  ;;  %v4436_v31 = vadd.f32 %v4435_v35, %v4434_v21  ;;  %v4545_v30 = vmul.f32 %v10833_v37, %v10833_v37  ;;  %v4441_v26 = vsel %vm115_vm1, %v10833_v37, 0.0 }
 0x4ff   :  { %v10840_v53 = vpop.f32.mrf.mxu1 }
 0x500   :  { %v4543_v18 = vmul.f32 %v10840_v53, %v10840_v53  ;;  %v4437_v47 = vsel %vm115_vm1, %v10840_v53, 0.0  ;;  %v4633_v10 = vadd.f32 %v4632_v43, %v4631_v24  ;;  %v4638_v14 = vsel %vm115_vm1, %v4545_v30, 0.0 }
 0x501   :  { %v10847_v50 = vpop.f32.mrf.mxu1  ;;  %v4438_v11 = vadd.f32 %v4437_v47, %v4436_v31 }
 0x502   :  { %v4634_v46 = vsel %vm115_vm1, %v4543_v18, 0.0  ;;  %v4546_v19 = vmul.f32 %v10847_v50, %v10847_v50  ;;  %v4443_v15 = vsel %vm115_vm1, %v10847_v50, 0.0 }
 0x503   :  { %v10854_v45 = vpop.f32.mrf.mxu1  ;;  %v4635_v22 = vadd.f32 %v4634_v46, %v4633_v10 }
 0x504   :  { %v4544_v56 = vmul.f32 %v10854_v45, %v10854_v45  ;;  %v4439_v57 = vsel %vm115_vm1, %v10854_v45, 0.0  ;;  %v4640_v32 = vsel %vm115_vm1, %v4546_v19, 0.0 }
 0x505   :  { %v10861_v4 = vpop.f32.mrf.mxu1  ;;  %v4440_v41 = vadd.f32 %v4439_v57, %v4438_v11 }
 0x506   :  { %v4636_v2 = vsel %vm115_vm1, %v4544_v56, 0.0  ;;  %v4549_v47 = vmul.f32 %v10861_v4, %v10861_v4  ;;  %v4449_v57 = vsel %vm115_vm1, %v10861_v4, 0.0 }
 0x507   :  { %v10868_v63 = vpop.f32.mrf.mxu1  ;;  %v4442_v23 = vadd.f32 %v4441_v26, %v4440_v41  ;;  %v4637_v13 = vadd.f32 %v4636_v2, %v4635_v22 }
 0x508   :  { %v4547_v6 = vmul.f32 %v10868_v63, %v10868_v63  ;;  %v4445_v35 = vsel %vm115_vm1, %v10868_v63, 0.0 }
 0x509   :  { %v10875_v44 = vpop.f32.mrf.mxu1  ;;  %v4639_v7 = vadd.f32 %v4638_v14, %v4637_v13  ;;  %v4444_v21 = vadd.f32 %v4443_v15, %v4442_v23  ;;  %v4646_v23 = vsel %vm115_vm1, %v4549_v47, 0.0 }
 0x50a   :  { %v4642_v56 = vsel %vm115_vm1, %v4547_v6, 0.0  ;;  %v4550_v22 = vmul.f32 %v10875_v44, %v10875_v44  ;;  %v4451_v13 = vsel %vm115_vm1, %v10875_v44, 0.0 }
 0x50b   :  { %v10882_v8 = vpop.f32.mrf.mxu1  ;;  %v4446_v24 = vadd.f32 %v4445_v35, %v4444_v21  ;;  %v4641_v31 = vadd.f32 %v4640_v32, %v4639_v7 }
 0x50c   :  { %v4548_v18 = vmul.f32 %v10882_v8, %v10882_v8  ;;  %v4447_v11 = vsel %vm115_vm1, %v10882_v8, 0.0  ;;  %v4648_v21 = vsel %vm115_vm1, %v4550_v22, 0.0 }
 0x50d   :  { %v10889_v12 = vpop.f32.mrf.mxu1  ;;  %v4643_v10 = vadd.f32 %v4642_v56, %v4641_v31  ;;  %v4448_v30 = vadd.f32 %v4447_v11, %v4446_v24 }
 0x50e   :  { %v4644_v41 = vsel %vm115_vm1, %v4548_v18, 0.0  ;;  %v4553_v47 = vmul.f32 %v10889_v12, %v10889_v12  ;;  %v4457_v22 = vsel %vm115_vm1, %v10889_v12, 0.0 }
 0x50f   :  { %v10896_v51 = vpop.f32.mrf.mxu1  ;;  %v4450_v26 = vadd.f32 %v4449_v57, %v4448_v30  ;;  %v4645_v19 = vadd.f32 %v4644_v41, %v4643_v10 }
 0x510   :  { %v4551_v14 = vmul.f32 %v10896_v51, %v10896_v51  ;;  %v4453_v32 = vsel %vm115_vm1, %v10896_v51, 0.0 }
 0x511   :  { %v10903_v29 = vpop.f32.mrf.mxu1  ;;  %v4647_v15 = vadd.f32 %v4646_v23, %v4645_v19  ;;  %v4452_v6 = vadd.f32 %v4451_v13, %v4450_v26 }
 0x512   :  { %v4650_v56 = vsel %vm115_vm1, %v4551_v14, 0.0  ;;  %v4554_v41 = vmul.f32 %v10903_v29, %v10903_v29  ;;  %v4654_v14 = vsel %vm115_vm1, %v4553_v47, 0.0 }
 0x513   :  { %v10910_v43 = vpop.f32.mrf.mxu1  ;;  %v4454_v18 = vadd.f32 %v4453_v32, %v4452_v6  ;;  %v4649_v24 = vadd.f32 %v4648_v21, %v4647_v15  ;;  %v4459_v15 = vsel %vm115_vm1, %v10903_v29, 0.0 }
 0x514   :  { %v4552_v35 = vmul.f32 %v10910_v43, %v10910_v43  ;;  %v4455_v11 = vsel %vm115_vm1, %v10910_v43, 0.0 }
 0x515   :  { %v10917_v46 = vpop.f32.mrf.mxu1  ;;  %v4651_v10 = vadd.f32 %v4650_v56, %v4649_v24  ;;  %v4456_v30 = vadd.f32 %v4455_v11, %v4454_v18  ;;  %v4656_v24 = vsel %vm115_vm1, %v4554_v41, 0.0 }
 0x516   :  { %14403 = vst [vmem:[#allocation121_spill] sm:$0xff] %v10917_v46  ;;  %v4652_v26 = vsel %vm115_vm1, %v4552_v35, 0.0 }
 0x517   :  { %v10924_v2 = vpop.f32.mrf.mxu1  ;;  %v4458_v19 = vadd.f32 %v4457_v22, %v4456_v30  ;;  %v4653_v23 = vadd.f32 %v4652_v26, %v4651_v10  ;;  %v4557_v30 = vmul.f32 %v10917_v46, %v10917_v46 }
 0x518   :  { %v4555_v6 = vmul.f32 %v10924_v2, %v10924_v2  ;;  %v4461_v35 = vsel %vm115_vm1, %v10924_v2, 0.0 }
 0x519   :  { %v10931_v7 = vpop.f32.mrf.mxu1  ;;  %v4655_v21 = vadd.f32 %v4654_v14, %v4653_v23  ;;  %v4460_v32 = vadd.f32 %v4459_v15, %v4458_v19  ;;  %v4465_v14 = vsel %vm115_vm1, %v10917_v46, 0.0 }
 0x51a   :  { %14404 = vst [vmem:[#allocation21_spill] sm:$0xff] %v10931_v7  ;;  %v4658_v22 = vsel %vm115_vm1, %v4555_v6, 0.0  ;;  %v4558_v15 = vmul.f32 %v10931_v7, %v10931_v7  ;;  %v4662_v6 = vsel %vm115_vm1, %v4557_v30, 0.0 }
 0x51b   :  { %v10938_v31 = vpop.f32.mrf.mxu1  ;;  %v4462_v11 = vadd.f32 %v4461_v35, %v4460_v32  ;;  %v4657_v47 = vadd.f32 %v4656_v24, %v4655_v21 }
 0x51c   :  { %14405 = vst [vmem:[#allocation122_spill] sm:$0xff] %v10938_v31  ;;  %v4556_v56 = vmul.f32 %v10938_v31, %v10938_v31  ;;  %v4463_v26 = vsel %vm115_vm1, %v10938_v31, 0.0  ;;  %v4664_v31 = vsel %vm115_vm1, %v4558_v15, 0.0 }
 0x51d   :  { %v10945_v57 = vpop.f32.mrf.mxu1  ;;  %v4659_v19 = vadd.f32 %v4658_v22, %v4657_v47  ;;  %v4464_v41 = vadd.f32 %v4463_v26, %v4462_v11  ;;  %v4467_v47 = vsel %vm115_vm1, %v10931_v7, 0.0 }
 0x51e   :  { %14406 = vst [vmem:[#allocation24_spill] sm:$0xff] %v10945_v57  ;;  %v4660_v21 = vsel %vm115_vm1, %v4556_v56, 0.0 }
 0x51f   :  { %v10952_v13 = vpop.f32.mrf.mxu1  ;;  %v4466_v32 = vadd.f32 %v4465_v14, %v4464_v41  ;;  %v4661_v24 = vadd.f32 %v4660_v21, %v4659_v19  ;;  %v4561_v21 = vmul.f32 %v10945_v57, %v10945_v57 }
 0x520   :  { %14407 = vst [vmem:[#allocation123_spill] sm:$0xff] %v10952_v13  ;;  %v4559_v11 = vmul.f32 %v10952_v13, %v10952_v13  ;;  %v4469_v56 = vsel %vm115_vm1, %v10952_v13, 0.0  ;;  %v4473_v13 = vsel %vm115_vm1, %v10945_v57, 0.0 }
 0x521   :  { %v10959_v18 = vpop.f32.mrf.mxu1  ;;  %v4663_v22 = vadd.f32 %v4662_v6, %v4661_v24  ;;  %v4468_v26 = vadd.f32 %v4467_v47, %v4466_v32 }
 0x522   :  { %14408 = vst [vmem:[#allocation26_spill] sm:$0xff] %v10959_v18  ;;  %v4666_v24 = vsel %vm115_vm1, %v4559_v11, 0.0  ;;  %v4670_v11 = vsel %vm115_vm1, %v4561_v21, 0.0 }
 0x523   :  { %v10966_v10 = vpop.f32.mrf.mxu1  ;;  %v4470_v41 = vadd.f32 %v4469_v56, %v4468_v26  ;;  %v4665_v30 = vadd.f32 %v4664_v31, %v4663_v22  ;;  %v4562_v31 = vmul.f32 %v10959_v18, %v10959_v18 }
 0x524   :  { %14409 = vst [vmem:[#allocation124_spill] sm:$0xff] %v10966_v10  ;;  %v4560_v19 = vmul.f32 %v10966_v10, %v10966_v10  ;;  %v4471_v32 = vsel %vm115_vm1, %v10966_v10, 0.0 }
 0x525   :  { %v10973_v23 = vpop.f32.mrf.mxu1  ;;  %v4667_v6 = vadd.f32 %v4666_v24, %v4665_v30  ;;  %v4472_v15 = vadd.f32 %v4471_v32, %v4470_v41  ;;  %v4475_v30 = vsel %vm115_vm1, %v10959_v18, 0.0  ;;  %v4672_v10 = vsel %vm115_vm1, %v4562_v31, 0.0 }
 0x526   :  { %14410 = vst [vmem:[#allocation23_spill] sm:$0xff] %v10973_v23  ;;  %v4668_v22 = vsel %vm115_vm1, %v4560_v19, 0.0 }
 0x527   :  { %v10980_v35 = vpop.f32.mrf.mxu1  ;;  %v4474_v26 = vadd.f32 %v4473_v13, %v4472_v15  ;;  %v4669_v56 = vadd.f32 %v4668_v22, %v4667_v6  ;;  %v4565_v22 = vmul.f32 %v10973_v23, %v10973_v23 }
 0x528   :  { %14411 = vst [vmem:[#allocation125_spill] sm:$0xff] %v10980_v35  ;;  %v4563_v41 = vmul.f32 %v10980_v35, %v10980_v35  ;;  %v4477_v13 = vsel %vm115_vm1, %v10980_v35, 0.0  ;;  %v4481_v35 = vsel %vm115_vm1, %v10973_v23, 0.0 }
 0x529   :  { %v10987_v46 = vpop.f32.mrf.mxu1  ;;  %v4671_v24 = vadd.f32 %v4670_v11, %v4669_v56  ;;  %v4476_v32 = vadd.f32 %v4475_v30, %v4474_v26 }
 0x52a   :  { %14412 = vst [vmem:[#allocation31_spill] sm:$0xff] %v10987_v46  ;;  %v4674_v56 = vsel %vm115_vm1, %v4563_v41, 0.0  ;;  %v4678_v41 = vsel %vm115_vm1, %v4565_v22, 0.0 }
 0x52b   :  { %v10994_v14 = vpop.f32.mrf.mxu1  ;;  %v4478_v6 = vadd.f32 %v4477_v13, %v4476_v32  ;;  %v4673_v21 = vadd.f32 %v4672_v10, %v4671_v24  ;;  %v4566_v10 = vmul.f32 %v10987_v46, %v10987_v46 }
 0x52c   :  { %14413 = vst [vmem:[#allocation126_spill] sm:$0xff] %v10994_v14  ;;  %v4564_v19 = vmul.f32 %v10994_v14, %v10994_v14  ;;  %v4479_v26 = vsel %vm115_vm1, %v10994_v14, 0.0 }
 0x52d   :  { %v11001_v47 = vpop.f32.mrf.mxu1  ;;  %v4675_v11 = vadd.f32 %v4674_v56, %v4673_v21  ;;  %v4480_v31 = vadd.f32 %v4479_v26, %v4478_v6  ;;  %v4483_v21 = vsel %vm115_vm1, %v10987_v46, 0.0  ;;  %v4680_v14 = vsel %vm115_vm1, %v4566_v10, 0.0 }
 0x52e   :  { %14414 = vst [vmem:[#allocation102_spill] sm:$0xff] %v11001_v47  ;;  %v4676_v24 = vsel %vm115_vm1, %v4564_v19, 0.0 }
 0x52f   :  { %v11008_v7 = vpop.f32.mrf.mxu1  ;;  %v4482_v32 = vadd.f32 %v4481_v35, %v4480_v31  ;;  %v4677_v13 = vadd.f32 %v4676_v24, %v4675_v11  ;;  %v4569_v24 = vmul.f32 %v11001_v47, %v11001_v47 }
 0x530   :  { %14415 = vst [vmem:[#allocation127_spill] sm:$0xff] %v11008_v7  ;;  %v4567_v6 = vmul.f32 %v11008_v7, %v11008_v7  ;;  %v4485_v35 = vsel %vm115_vm1, %v11008_v7, 0.0  ;;  %v4489_v7 = vsel %vm115_vm1, %v11001_v47, 0.0 }
 0x531   :  { %v11015_v57 = vpop.f32.mrf.mxu1  ;;  %v4679_v56 = vadd.f32 %v4678_v41, %v4677_v13  ;;  %v4484_v26 = vadd.f32 %v4483_v21, %v4482_v32 }
 0x532   :  { %14416 = vst [vmem:[#allocation103_spill] sm:$0xff] %v11015_v57  ;;  %v4682_v13 = vsel %vm115_vm1, %v4567_v6, 0.0  ;;  %v4686_v6 = vsel %vm115_vm1, %v4569_v24, 0.0 }
 0x533   :  { %v11022_v15 = vpop.f32.mrf.mxu1  ;;  %v4486_v11 = vadd.f32 %v4485_v35, %v4484_v26  ;;  %v4681_v22 = vadd.f32 %v4680_v14, %v4679_v56  ;;  %v4570_v14 = vmul.f32 %v11015_v57, %v11015_v57 }
 0x534   :  { %14417 = vst [vmem:[#allocation129_spill] sm:$0xff] %v11022_v15  ;;  %v4568_v19 = vmul.f32 %v11022_v15, %v11022_v15  ;;  %v4487_v32 = vsel %vm115_vm1, %v11022_v15, 0.0 }
 0x535   :  { %v11029_v30 = vpop.f32.mrf.mxu1  ;;  %v4683_v41 = vadd.f32 %v4682_v13, %v4681_v22  ;;  %v4488_v10 = vadd.f32 %v4487_v32, %v4486_v11  ;;  %v4491_v22 = vsel %vm115_vm1, %v11015_v57, 0.0  ;;  %v4688_v47 = vsel %vm115_vm1, %v4570_v14, 0.0 }
 0x536   :  { %14418 = vst [vmem:[#allocation104_spill] sm:$0xff] %v11029_v30  ;;  %v4684_v56 = vsel %vm115_vm1, %v4568_v19, 0.0  ;;  %v4573_v24 = vmul.f32 %v11029_v30, %v11029_v30 }
 0x537   :  { %v11036_v18 = vpop.f32.mrf.mxu1  ;;  %v4490_v26 = vadd.f32 %v4489_v7, %v4488_v10  ;;  %v4685_v35 = vadd.f32 %v4684_v56, %v4683_v41 }
 0x538   :  { %14419 = vst [vmem:[#allocation130_spill] sm:$0xff] %v11036_v18  ;;  %v4571_v11 = vmul.f32 %v11036_v18, %v11036_v18  ;;  %v4493_v15 = vsel %vm115_vm1, %v11036_v18, 0.0  ;;  %v4694_v18 = vsel %vm115_vm1, %v4573_v24, 0.0 }
 0x539   :  { %v11043_v23 = vpop.f32.mrf.mxu1  ;;  %v4687_v13 = vadd.f32 %v4686_v6, %v4685_v35  ;;  %v4492_v32 = vadd.f32 %v4491_v22, %v4490_v26  ;;  %v4497_v6 = vsel %vm115_vm1, %v11029_v30, 0.0 }
 0x53a   :  { %14420 = vst [vmem:[#allocation107_spill] sm:$0xff] %v11043_v23  ;;  %v4690_v56 = vsel %vm115_vm1, %v4571_v11, 0.0  ;;  %v4574_v22 = vmul.f32 %v11043_v23, %v11043_v23  ;;  %v4499_v11 = vsel %vm115_vm1, %v11043_v23, 0.0 }
 0x53b   :  { %v11050_v31 = vpop.f32.mrf.mxu1  ;;  %v4494_v19 = vadd.f32 %v4493_v15, %v4492_v32  ;;  %v4689_v41 = vadd.f32 %v4688_v47, %v4687_v13 }
 0x53c   :  { %14421 = vst [vmem:[#allocation131_spill] sm:$0xff] %v11050_v31  ;;  %v4572_v7 = vmul.f32 %v11050_v31, %v11050_v31  ;;  %v4495_v26 = vsel %vm115_vm1, %v11050_v31, 0.0 }
 0x53d   :  { %v11057_v21 = vpop.f32.mrf.mxu1  ;;  %v4691_v35 = vadd.f32 %v4690_v56, %v4689_v41  ;;  %v4496_v14 = vadd.f32 %v4495_v26, %v4494_v19  ;;  %v4696_v26 = vsel %vm115_vm1, %v4574_v22, 0.0 }
 0x53e   :  { %14422 = vst [vmem:[#allocation100_spill] sm:$0xff] %v11057_v21  ;;  %v4692_v47 = vsel %vm115_vm1, %v4572_v7, 0.0  ;;  %v4577_v24 = vmul.f32 %v11057_v21, %v11057_v21  ;;  %v4505_v22 = vsel %vm115_vm1, %v11057_v21, 0.0 }
 0x53f   :  { %v11064_v46 = vpop.f32.mrf.mxu1  ;;  %v4498_v15 = vadd.f32 %v4497_v6, %v4496_v14  ;;  %v4693_v13 = vadd.f32 %v4692_v47, %v4691_v35 }
 0x540   :  { %14423 = vst [vmem:[#allocation101_spill] sm:$0xff] %v11064_v46  ;;  %v4575_v19 = vmul.f32 %v11064_v46, %v11064_v46  ;;  %v4501_v30 = vsel %vm115_vm1, %v11064_v46, 0.0 }
 0x541   :  { %v11076_v10 = vpop.f32.mrf.mxu1  ;;  %v4695_v41 = vadd.f32 %v4694_v18, %v4693_v13  ;;  %v4500_v56 = vadd.f32 %v4499_v11, %v4498_v15 }
 0x542   :  { %14424 = vst [vmem:[#allocation65_spill] sm:$0xff] %v11076_v10  ;;  %v4698_v6 = vsel %vm115_vm1, %v4575_v19, 0.0  ;;  %v4578_v13 = vmul.f32 %v11076_v10, %v11076_v10  ;;  %v4507_v19 = vsel %vm115_vm1, %v11076_v10, 0.0 }
 0x543   :  { %v11088_v32 = vpop.f32.mrf.mxu1  ;;  %v4502_v35 = vadd.f32 %v4501_v30, %v4500_v56  ;;  %v4697_v14 = vadd.f32 %v4696_v26, %v4695_v41  ;;  %v4702_v56 = vsel %vm115_vm1, %v4577_v24, 0.0 }
 0x544   :  { %14425 = vst [vmem:[#allocation75_spill] sm:$0xff] %v11088_v32  ;;  %v4576_v7 = vmul.f32 %v11088_v32, %v11088_v32  ;;  %v4503_v47 = vsel %vm115_vm1, %v11088_v32, 0.0 }
 0x545   :  { %v4699_v18 = vadd.f32 %v4698_v6, %v4697_v14  ;;  %v4504_v15 = vadd.f32 %v4503_v47, %v4502_v35  ;;  %v4704_v14 = vsel %vm115_vm1, %v4578_v13, 0.0 }
 0x546   :  { %v4700_v11 = vsel %vm115_vm1, %v4576_v7, 0.0 }
 0x547   :  { %v4506_v30 = vadd.f32 %v4505_v22, %v4504_v15  ;;  %v4701_v41 = vadd.f32 %v4700_v11, %v4699_v18 }
 0x549   :  { %v4508_v26 = vadd.f32 %v4507_v19, %v4506_v30  ;;  %v4703_v46 = vadd.f32 %v4702_v56, %v4701_v41  ;;  %v14447_v19 = vld [vmem:[#allocation100_spill] sm:$0xff]  ;;  %v14448_v56 = vld [vmem:[#allocation65_spill] sm:$0xff] }
 0x54b   :  { %v4509_v35 = vrot.slane %v4508_v26, 4  ;;  %v4705_v6 = vadd.f32 %v4704_v14, %v4703_v46  ;;  %v14438_v14 = vld [vmem:[#allocation129_spill] sm:$0xff] }
 0x54d   :  { %v4510_v47 = vadd.f32 %v4509_v35, %v4508_v26  ;;  %v4706_v21 = vrot.slane %v4705_v6, 4  ;;  %v14446_v26 = vld [vmem:[#allocation75_spill] sm:$0xff] }
 0x54f   :  { %v4511_v32 = vrot.slane %v4510_v47, 2  ;;  %v4707_v23 = vadd.f32 %v4706_v21, %v4705_v6 }
 0x551   :  { %v4512_v31 = vadd.f32 %v4511_v32, %v4510_v47  ;;  %v4708_v57 = vrot.slane %v4707_v23, 2 }
 0x553   :  { %v4513_v7 = vrot.slane %v4512_v31, 1  ;;  %v4709_v15 = vadd.f32 %v4708_v57, %v4707_v23  ;;  %v14444_v23 = vld [vmem:[#allocation107_spill] sm:$0xff]  ;;  %v14445_v57 = vld [vmem:[#allocation101_spill] sm:$0xff] }
 0x555   :  { %v4514_v18 = vadd.f32 %v4513_v7, %v4512_v31  ;;  %v4710_v22 = vrot.slane %v4709_v15, 1 }
 0x557   :  { %v4711_v24 = vadd.f32 %v4710_v22, %v4709_v15  ;;  %v11114_v11 = vmul.f32 0.001953125, %v4514_v18  ;;  %v14428_v18 = vld [vmem:[#allocation21_spill] sm:$0xff]  ;;  %v14429_v22 = vld [vmem:[#allocation123_spill] sm:$0xff] }
 0x559   :  { %v4713_v10 = vmul.f32 0.001953125, %v4711_v24  ;;  %v4714_v30 = vmul.f32 %v11114_v11, %v11114_v11  ;;  %v14430_v24 = vld [vmem:[#allocation124_spill] sm:$0xff]  ;;  %v14449_v6 = vsub.f32 %v10670_v59, %v11114_v11  ;;  %v14450_v35 = vsub.f32 %v10680_v36, %v11114_v11 }
 0x55a   :  { %v14451_v46 = vsub.f32 %v10666_v9, %v11114_v11  ;;  %v14452_v47 = vsub.f32 %v10674_v34, %v11114_v11 }
 0x55b   :  { %v4715_v13 = vsub.f32 %v4713_v10, %v4714_v30  ;;  %v14431_v30 = vld [vmem:[#allocation24_spill] sm:$0xff]  ;;  %v14442_v10 = vld [vmem:[#allocation131_spill] sm:$0xff] }
 0x55d   :  { %v4716_v41 = vmax.f32 %v4715_v13, 0.0  ;;  %v14432_v13 = vld [vmem:[#allocation26_spill] sm:$0xff] }
 0x55f   :  { %v4717_v32 = vadd.f32 1e-05, %v4716_v41  ;;  %v14426_v41 = vld [vmem:[#allocation122_spill] sm:$0xff] }
 0x561   :  { %5333 = vrsqrt.f32 %v4717_v32  ;;  %v14427_v32 = vld [vmem:[#allocation121_spill] sm:$0xff] }
 0x56e   :  { %v11238_v15 = vpop.eup %5333 }
 0x56f   :  { %v11252_v31 = vmul.f32 %v11238_v15, %v14449_v6  ;;  %v11258_v21 = vmul.f32 %v11238_v15, %v14450_v35  ;;  %v11264_v7 = vmul.f32 %v11238_v15, %v14451_v46  ;;  %v11270_v59 = vmul.f32 %v11238_v15, %v14452_v47 }
 0x570   :  { %v14453_v6 = vsub.f32 %v10672_v3, %v11114_v11  ;;  %v14454_v35 = vsub.f32 %v10682_v54, %v11114_v11  ;;  %v14455_v46 = vsub.f32 %v10668_v1, %v11114_v11  ;;  %v14456_v47 = vsub.f32 %v10676_v61, %v11114_v11 }
 0x572   :  { %v11276_v36 = vmul.f32 %v11238_v15, %v14453_v6  ;;  %v11282_v9 = vmul.f32 %v11238_v15, %v14454_v35  ;;  %v11288_v34 = vmul.f32 %v11238_v15, %v14455_v46  ;;  %v11294_v3 = vmul.f32 %v11238_v15, %v14456_v47 }
 0x573   :  { %v14457_v6 = vsub.f32 %v10700_v62, %v11114_v11  ;;  %v14458_v35 = vsub.f32 %v10714_v25, %v11114_v11  ;;  %v14459_v46 = vsub.f32 %v10692_v27, %v11114_v11  ;;  %v14460_v47 = vsub.f32 %v10707_v38, %v11114_v11 }
 0x575   :  { %v11300_v54 = vmul.f32 %v11238_v15, %v14457_v6  ;;  %v11306_v1 = vmul.f32 %v11238_v15, %v14458_v35  ;;  %v11312_v61 = vmul.f32 %v11238_v15, %v14459_v46  ;;  %v11318_v62 = vmul.f32 %v11238_v15, %v14460_v47 }
 0x576   :  { %v14461_v6 = vsub.f32 %v10728_v52, %v11114_v11  ;;  %v14462_v35 = vsub.f32 %v10742_v49, %v11114_v11  ;;  %v14463_v46 = vsub.f32 %v10721_v28, %v11114_v11  ;;  %v14464_v47 = vsub.f32 %v10735_v58, %v11114_v11 }
 0x578   :  { %v11324_v25 = vmul.f32 %v11238_v15, %v14461_v6  ;;  %v11330_v27 = vmul.f32 %v11238_v15, %v14462_v35  ;;  %v11336_v38 = vmul.f32 %v11238_v15, %v14463_v46  ;;  %v11342_v52 = vmul.f32 %v11238_v15, %v14464_v47 }
 0x579   :  { %v14465_v6 = vsub.f32 %v10756_v48, %v11114_v11  ;;  %v14466_v35 = vsub.f32 %v10770_v42, %v11114_v11  ;;  %v14467_v46 = vsub.f32 %v10749_v5, %v11114_v11  ;;  %v14468_v47 = vsub.f32 %v10763_v0, %v11114_v11 }
 0x57b   :  { %v11348_v49 = vmul.f32 %v11238_v15, %v14465_v6  ;;  %v11354_v28 = vmul.f32 %v11238_v15, %v14466_v35  ;;  %v11360_v58 = vmul.f32 %v11238_v15, %v14467_v46  ;;  %v11366_v48 = vmul.f32 %v11238_v15, %v14468_v47 }
 0x57c   :  { %v14469_v6 = vsub.f32 %v10784_v16, %v11114_v11  ;;  %v14470_v35 = vsub.f32 %v10798_v33, %v11114_v11  ;;  %v14471_v46 = vsub.f32 %v10777_v17, %v11114_v11  ;;  %v14472_v47 = vsub.f32 %v10791_v55, %v11114_v11 }
 0x57e   :  { %v11372_v42 = vmul.f32 %v11238_v15, %v14469_v6  ;;  %v11378_v5 = vmul.f32 %v11238_v15, %v14470_v35  ;;  %v11384_v0 = vmul.f32 %v11238_v15, %v14471_v46  ;;  %v11390_v16 = vmul.f32 %v11238_v15, %v14472_v47 }
 0x57f   :  { %v14473_v6 = vsub.f32 %v10812_v60, %v11114_v11  ;;  %v14474_v35 = vsub.f32 %v10826_v20, %v11114_v11  ;;  %v14475_v46 = vsub.f32 %v10805_v39, %v11114_v11  ;;  %v14476_v47 = vsub.f32 %v10819_v40, %v11114_v11 }
 0x581   :  { %v11396_v33 = vmul.f32 %v11238_v15, %v14473_v6  ;;  %v11402_v17 = vmul.f32 %v11238_v15, %v14474_v35  ;;  %v11408_v55 = vmul.f32 %v11238_v15, %v14475_v46  ;;  %v11414_v60 = vmul.f32 %v11238_v15, %v14476_v47 }
 0x582   :  { %v14477_v6 = vsub.f32 %v10840_v53, %v11114_v11  ;;  %v14478_v35 = vsub.f32 %v10854_v45, %v11114_v11  ;;  %v14479_v46 = vsub.f32 %v10833_v37, %v11114_v11  ;;  %v14480_v47 = vsub.f32 %v10847_v50, %v11114_v11 }
 0x584   :  { %v11420_v20 = vmul.f32 %v11238_v15, %v14477_v6  ;;  %v11426_v39 = vmul.f32 %v11238_v15, %v14478_v35  ;;  %v11432_v40 = vmul.f32 %v11238_v15, %v14479_v46  ;;  %v11438_v53 = vmul.f32 %v11238_v15, %v14480_v47 }
 0x585   :  { %v14482_v6 = vsub.f32 %v10868_v63, %v11114_v11  ;;  %v14484_v35 = vsub.f32 %v10882_v8, %v11114_v11  ;;  %v14486_v46 = vsub.f32 %v10861_v4, %v11114_v11  ;;  %v14488_v47 = vsub.f32 %v10875_v44, %v11114_v11 }
 0x586   :  { %14481 = vst [vmem:[#allocation67_spill] sm:$0xff] %v11438_v53  ;;  %v14545_v53 = vsub.f32 %v14444_v23, %v11114_v11  ;;  %v14547_v23 = vsub.f32 %v14445_v57, %v11114_v11 }
 0x587   :  { %v11444_v45 = vmul.f32 %v11238_v15, %v14482_v6  ;;  %v11450_v37 = vmul.f32 %v11238_v15, %v14484_v35  ;;  %v11456_v50 = vmul.f32 %v11238_v15, %v14486_v46  ;;  %v11462_v63 = vmul.f32 %v11238_v15, %v14488_v47 }
 0x588   :  { %v14490_v6 = vsub.f32 %v10896_v51, %v11114_v11  ;;  %v14492_v35 = vsub.f32 %v10910_v43, %v11114_v11  ;;  %v14494_v46 = vsub.f32 %v10889_v12, %v11114_v11  ;;  %v14496_v47 = vsub.f32 %v10903_v29, %v11114_v11 }
 0x589   :  { %14483 = vst [vmem:[#allocation217_spill] sm:$0xff] %v11444_v45  ;;  %14485 = vst [vmem:[#allocation78_spill] sm:$0xff] %v11450_v37 }
 0x58a   :  { %14487 = vst [vmem:[#allocation105_spill] sm:$0xff] %v11456_v50  ;;  %14489 = vst [vmem:[#allocation89_spill] sm:$0xff] %v11462_v63  ;;  %v11468_v8 = vmul.f32 %v11238_v15, %v14490_v6  ;;  %v11474_v4 = vmul.f32 %v11238_v15, %v14492_v35  ;;  %v11480_v44 = vmul.f32 %v11238_v15, %v14494_v46  ;;  %v14534_v50 = vld [vmem:[#allocation103_spill] sm:$0xff] }
 0x58b   :  { %v11486_v51 = vmul.f32 %v11238_v15, %v14496_v47  ;;  %v14498_v6 = vsub.f32 %v10924_v2, %v11114_v11  ;;  %v14500_v35 = vsub.f32 %v14426_v41, %v11114_v11  ;;  %v14502_v46 = vsub.f32 %v14427_v32, %v11114_v11  ;;  %v4720_v41 = vld [vmem:[%s12145_s0 + $0x8] sm:$0xff]  ;;  %v4721_v32 = vld [vmem:[%s12145_s0 + $0x10] sm:$0xff] }
 0x58c   :  { %14491 = vst [vmem:[#allocation51_spill] sm:$0xff] %v11468_v8  ;;  %14493 = vst [vmem:[#allocation79_spill] sm:$0xff] %v11474_v4  ;;  %v14504_v47 = vsub.f32 %v14428_v18, %v11114_v11  ;;  %v14506_v18 = vsub.f32 %v14429_v22, %v11114_v11  ;;  %v14523_v4 = vld [vmem:[#allocation31_spill] sm:$0xff]  ;;  %v14535_v37 = vsub.f32 %v14534_v50, %v11114_v11  ;;  %v14537_v50 = vld [vmem:[#allocation130_spill] sm:$0xff] }
 0x58d   :  { %14495 = vst [vmem:[#allocation106_spill] sm:$0xff] %v11480_v44  ;;  %14497 = vst [vmem:[#allocation90_spill] sm:$0xff] %v11486_v51  ;;  %v11492_v43 = vmul.f32 %v11238_v15, %v14498_v6  ;;  %v11498_v12 = vmul.f32 %v11238_v15, %v14500_v35  ;;  %v11504_v29 = vmul.f32 %v11238_v15, %v14502_v46  ;;  %v4719_v6 = vld [vmem:[%s12145_s0] sm:$0xff]  ;;  %v4722_v35 = vld [vmem:[%s12145_s0 + $0x18] sm:$0xff] }
 0x58e   :  { %v11510_v2 = vmul.f32 %v11238_v15, %v14504_v47  ;;  %v11528_v46 = vmul.f32 %v11238_v15, %v14506_v18  ;;  %v14508_v47 = vsub.f32 %v14430_v24, %v11114_v11  ;;  %v4723_v18 = vld [vmem:[%s12145_s0 + $0x20] sm:$0xff]  ;;  %v4724_v24 = vld [vmem:[%s12145_s0 + $0x28] sm:$0xff]  ;;  %v14524_v8 = vsub.f32 %v14523_v4, %v11114_v11 }
 0x58f   :  { %14499 = vst [vmem:[#allocation64_spill] sm:$0xff] %v11492_v43  ;;  %14501 = vst [vmem:[#allocation80_spill] sm:$0xff] %v11498_v12  ;;  %v14512_v43 = vsub.f32 %v14432_v13, %v11114_v11  ;;  %v14514_v13 = vld [vmem:[#allocation125_spill] sm:$0xff]  ;;  %v14526_v4 = vld [vmem:[#allocation127_spill] sm:$0xff] }
 0x590   :  { %14503 = vst [vmem:[#allocation266_spill] sm:$0xff] %v11504_v29  ;;  %14505 = vst [vmem:[#allocation91_spill] sm:$0xff] %v11510_v2  ;;  %v11534_v2 = vmul.f32 %v11238_v15, %v14508_v47  ;;  %v14510_v29 = vsub.f32 %v14431_v30, %v11114_v11  ;;  %v4725_v30 = vld [vmem:[%s12145_s0 + $0x30] sm:$0xff] }
 0x591   :  { %14507 = vst [vmem:[#allocation238_spill] sm:$0xff] %v11528_v46  ;;  %v11546_v22 = vmul.f32 %v11238_v15, %v14512_v43  ;;  %v14515_v43 = vsub.f32 %v14514_v13, %v11114_v11  ;;  %v14520_v46 = vld [vmem:[#allocation23_spill] sm:$0xff]  ;;  %v11582_v13 = vmul.f32 %v11238_v15, %v14524_v8  ;;  %v14527_v8 = vsub.f32 %v14526_v4, %v11114_v11 }
 0x592   :  { %14509 = vst [vmem:[#allocation52_spill] sm:$0xff] %v11534_v2  ;;  %v11540_v12 = vmul.f32 %v11238_v15, %v14510_v29  ;;  %v4726_v29 = vld [vmem:[%s12145_s0 + $0x38] sm:$0xff]  ;;  %v14521_v51 = vsub.f32 %v14520_v46, %v11114_v11  ;;  %v4729_v46 = vld [vmem:[%s12145_s0 + $0x50] sm:$0xff]  ;;  %v11618_v4 = vmul.f32 %v11238_v15, %v14535_v37  ;;  %v14538_v37 = vsub.f32 %v14537_v50, %v11114_v11 }
 0x593   :  { %14513 = vst [vmem:[#allocation38_spill] sm:$0xff] %v11546_v22  ;;  %v11564_v47 = vmul.f32 %v11238_v15, %v14515_v43  ;;  %v14517_v22 = vld [vmem:[#allocation126_spill] sm:$0xff]  ;;  %14525 = vst [vmem:[#allocation92_spill] sm:$0xff] %v11582_v13  ;;  %v4727_v43 = vld [vmem:[%s12145_s0 + $0x40] sm:$0xff]  ;;  %v14529_v13 = vsub.f32 %v14438_v14, %v11114_v11  ;;  %v11654_v50 = vmul.f32 %v11238_v15, %v14545_v53 }
 0x594   :  { %14511 = vst [vmem:[#allocation244_spill] sm:$0xff] %v11540_v12  ;;  %v14518_v12 = vsub.f32 %v14517_v22, %v11114_v11  ;;  %v11576_v44 = vmul.f32 %v11238_v15, %v14521_v51  ;;  %v4730_v51 = vld [vmem:[%s12145_s0 + $0x58] sm:$0xff]  ;;  %v11600_v22 = vmul.f32 %v11238_v15, %v14527_v8  ;;  %14536 = vst [vmem:[#allocation84_spill] sm:$0xff] %v11618_v4  ;;  %v4731_v8 = vld [vmem:[%s12145_s0 + $0x60] sm:$0xff] }
 0x595   :  { %14516 = vst [vmem:[#allocation218_spill] sm:$0xff] %v11564_v47  ;;  %v4732_v14 = vld [vmem:[%s12145_s0 + $0x68] sm:$0xff]  ;;  %v14540_v4 = vsub.f32 %v14442_v10, %v11114_v11  ;;  %14546 = vst [vmem:[#allocation85_spill] sm:$0xff] %v11654_v50  ;;  %v11672_v53 = vmul.f32 %v11238_v15, %v14547_v23  ;;  %v4739_v23 = vld [vmem:[%s12145_s0 + $0xa0] sm:$0xff] }
 0x596   :  { %v11570_v2 = vmul.f32 %v11238_v15, %v14518_v12  ;;  %14522 = vst [vmem:[#allocation77_spill] sm:$0xff] %v11576_v44  ;;  %v4728_v12 = vld [vmem:[%s12145_s0 + $0x48] sm:$0xff]  ;;  %14528 = vst [vmem:[#allocation88_spill] sm:$0xff] %v11600_v22  ;;  %v11606_v44 = vmul.f32 %v11238_v15, %v14529_v13  ;;  %v11636_v13 = vmul.f32 %v11238_v15, %v14538_v37  ;;  %v4735_v37 = vld [vmem:[%s12145_s0 + $0x80] sm:$0xff] }
 0x597   :  { %v4736_v10 = vld [vmem:[%s12145_s0 + $0x88] sm:$0xff] }
 0x598   :  { %14519 = vst [vmem:[#allocation81_spill] sm:$0xff] %v11570_v2  ;;  %14530 = vst [vmem:[#allocation82_spill] sm:$0xff] %v11606_v44  ;;  %v14531_v2 = vld [vmem:[#allocation102_spill] sm:$0xff]  ;;  %v14542_v44 = vld [vmem:[#allocation104_spill] sm:$0xff] }
 0x599   :  { %v14532_v47 = vsub.f32 %v14531_v2, %v11114_v11  ;;  %v4733_v2 = vld [vmem:[%s12145_s0 + $0x70] sm:$0xff]  ;;  %14539 = vst [vmem:[#allocation66_spill] sm:$0xff] %v11636_v13  ;;  %v14543_v22 = vsub.f32 %v14542_v44, %v11114_v11  ;;  %v14551_v13 = vsub.f32 %v14448_v56, %v11114_v11  ;;  %v4912_v56 = vadd.f32 %v11258_v21, %v4720_v41  ;;  %v4746_v21 = vld [vmem:[%s12145_s0 + $0xd8] sm:$0xff]  ;;  %v4747_v41 = vld [vmem:[%s12145_s0 + $0xe0] sm:$0xff] }
 0x59a   :  { %v4737_v44 = vld [vmem:[%s12145_s0 + $0x90] sm:$0xff] }
 0x59b   :  { %v11612_v63 = vmul.f32 %v11238_v15, %v14532_v47  ;;  %v4734_v47 = vld [vmem:[%s12145_s0 + $0x78] sm:$0xff]  ;;  %v11648_v45 = vmul.f32 %v11238_v15, %v14543_v22  ;;  %v11690_v57 = vmul.f32 %v11238_v15, %v14551_v13  ;;  %v4914_v13 = vadd.f32 %v11270_v59, %v4722_v35  ;;  %v4749_v35 = vld [vmem:[%s12145_s0 + $0xf0] sm:$0xff]  ;;  %4976 = vst.msk [vmem:[%s12148_s4 + $0x8] sm:$0xff] %vm115_vm1, %v4912_v56 }
 0x59c   :  { %v4738_v22 = vld [vmem:[%s12145_s0 + $0x98] sm:$0xff]  ;;  %v4917_v59 = vadd.f32 %v11288_v34, %v4725_v30  ;;  %v4920_v34 = vadd.f32 %v11306_v1, %v4728_v12  ;;  %v4752_v1 = vld [vmem:[%s12145_s0 + $0x108] sm:$0xff]  ;;  %v4924_v30 = vadd.f32 %v11330_v27, %v4732_v14  ;;  %v4927_v12 = vadd.f32 %v11348_v49, %v4735_v37  ;;  %v4759_v49 = vld [vmem:[%s12145_s0 + $0x140] sm:$0xff] }
 0x59d   :  { %14533 = vst [vmem:[#allocation270_spill] sm:$0xff] %v11612_v63  ;;  %v11642_v63 = vmul.f32 %v11238_v15, %v14540_v4  ;;  %14544 = vst [vmem:[#allocation271_spill] sm:$0xff] %v11648_v45  ;;  %v14548_v4 = vsub.f32 %v14446_v26, %v11114_v11  ;;  %v14549_v45 = vsub.f32 %v14447_v19, %v11114_v11  ;;  %v4740_v26 = vld [vmem:[%s12145_s0 + $0xa8] sm:$0xff]  ;;  %v4741_v19 = vld [vmem:[%s12145_s0 + $0xb0] sm:$0xff] }
 0x59e   :  { %14552 = vst [vmem:[#allocation96_spill] sm:$0xff] %v11690_v57  ;;  %v4911_v11 = vadd.f32 %v11252_v31, %v4719_v6  ;;  %v4744_v57 = vld [vmem:[%s12145_s0 + $0xc8] sm:$0xff]  ;;  %v4915_v31 = vadd.f32 %v11276_v36, %v4723_v18  ;;  %v4918_v6 = vadd.f32 %v11294_v3, %v4726_v29  ;;  %v4750_v36 = vld [vmem:[%s12145_s0 + $0xf8] sm:$0xff]  ;;  %v4921_v3 = vadd.f32 %v11312_v61, %v4729_v46  ;;  %v4753_v61 = vld [vmem:[%s12145_s0 + $0x110] sm:$0xff] }
 0x59f   :  { %14541 = vst [vmem:[#allocation95_spill] sm:$0xff] %v11642_v63  ;;  %v11678_v50 = vmul.f32 %v11238_v15, %v14548_v4  ;;  %v11684_v63 = vmul.f32 %v11238_v15, %v14549_v45  ;;  %v4742_v45 = vld [vmem:[%s12145_s0 + $0xb8] sm:$0xff]  ;;  %v4913_v15 = vadd.f32 %v11264_v7, %v4721_v32  ;;  %v4743_v4 = vld [vmem:[%s12145_s0 + $0xc0] sm:$0xff]  ;;  %v4916_v7 = vadd.f32 %v11282_v9, %v4724_v24  ;;  %v4748_v32 = vld [vmem:[%s12145_s0 + $0xe8] sm:$0xff] }
 0x5a0   :  { %v4919_v9 = vadd.f32 %v11300_v54, %v4727_v43  ;;  %v4922_v18 = vadd.f32 %v11318_v62, %v4730_v51  ;;  %4975 = vst.msk [vmem:[%s12148_s4] sm:$0xff] %vm115_vm1, %v4911_v11  ;;  %4978 = vst.msk [vmem:[%s12148_s4 + $0x18] sm:$0xff] %vm115_vm1, %v4914_v13  ;;  %v4751_v54 = vld [vmem:[%s12145_s0 + $0x100] sm:$0xff]  ;;  %v4754_v62 = vld [vmem:[%s12145_s0 + $0x118] sm:$0xff]  ;;  %v4923_v24 = vadd.f32 %v11324_v25, %v4731_v8 }
 0x5a1   :  { %14550 = vst [vmem:[#allocation235_spill] sm:$0xff] %v11684_v63  ;;  %v4745_v63 = vld [vmem:[%s12145_s0 + $0xd0] sm:$0xff]  ;;  %4977 = vst.msk [vmem:[%s12148_s4 + $0x10] sm:$0xff] %vm115_vm1, %v4913_v15  ;;  %v4925_v29 = vadd.f32 %v11336_v38, %v4733_v2  ;;  %v4926_v43 = vadd.f32 %v11342_v52, %v4734_v47  ;;  %v4755_v25 = vld [vmem:[%s12145_s0 + $0x120] sm:$0xff]  ;;  %v4928_v46 = vadd.f32 %v11354_v28, %v4736_v10 }
 0x5a2   :  { %4979 = vst.msk [vmem:[%s12148_s4 + $0x20] sm:$0xff] %vm115_vm1, %v4915_v31  ;;  %4980 = vst.msk [vmem:[%s12148_s4 + $0x28] sm:$0xff] %vm115_vm1, %v4916_v7  ;;  %v4756_v27 = vld [vmem:[%s12145_s0 + $0x128] sm:$0xff]  ;;  %v4757_v38 = vld [vmem:[%s12145_s0 + $0x130] sm:$0xff]  ;;  %v4929_v51 = vadd.f32 %v11360_v58, %v4737_v44  ;;  %v4930_v8 = vadd.f32 %v11366_v48, %v4738_v22  ;;  %v4931_v48 = vadd.f32 %v11372_v42, %v4739_v23 }
 0x5a3   :  { %4981 = vst.msk [vmem:[%s12148_s4 + $0x30] sm:$0xff] %vm115_vm1, %v4917_v59  ;;  %4982 = vst.msk [vmem:[%s12148_s4 + $0x38] sm:$0xff] %vm115_vm1, %v4918_v6  ;;  %v4758_v52 = vld [vmem:[%s12145_s0 + $0x138] sm:$0xff]  ;;  %v4760_v28 = vld [vmem:[%s12145_s0 + $0x148] sm:$0xff]  ;;  %v4932_v14 = vadd.f32 %v11378_v5, %v4740_v26  ;;  %v4933_v2 = vadd.f32 %v11384_v0, %v4741_v19  ;;  %v4934_v47 = vadd.f32 %v11390_v16, %v4742_v45 }
 0x5a4   :  { %4983 = vst.msk [vmem:[%s12148_s4 + $0x40] sm:$0xff] %vm115_vm1, %v4919_v9  ;;  %4984 = vst.msk [vmem:[%s12148_s4 + $0x48] sm:$0xff] %vm115_vm1, %v4920_v34  ;;  %v4761_v58 = vld [vmem:[%s12145_s0 + $0x150] sm:$0xff]  ;;  %v4762_v42 = vld [vmem:[%s12145_s0 + $0x158] sm:$0xff]  ;;  %v4935_v16 = vadd.f32 %v11396_v33, %v4743_v4  ;;  %v4936_v37 = vadd.f32 %v11402_v17, %v4744_v57  ;;  %v4937_v10 = vadd.f32 %v11408_v55, %v4745_v63 }
 0x5a5   :  { %4985 = vst.msk [vmem:[%s12148_s4 + $0x50] sm:$0xff] %vm115_vm1, %v4921_v3  ;;  %4986 = vst.msk [vmem:[%s12148_s4 + $0x58] sm:$0xff] %vm115_vm1, %v4922_v18  ;;  %v4763_v5 = vld [vmem:[%s12145_s0 + $0x160] sm:$0xff]  ;;  %v4764_v0 = vld [vmem:[%s12145_s0 + $0x168] sm:$0xff]  ;;  %v4938_v44 = vadd.f32 %v11414_v60, %v4746_v21  ;;  %v4939_v60 = vadd.f32 %v11420_v20, %v4747_v41  ;;  %v4940_v63 = vadd.f32 %v11426_v39, %v4748_v32 }
 0x5a6   :  { %4987 = vst.msk [vmem:[%s12148_s4 + $0x60] sm:$0xff] %vm115_vm1, %v4923_v24  ;;  %4988 = vst.msk [vmem:[%s12148_s4 + $0x68] sm:$0xff] %vm115_vm1, %v4924_v30  ;;  %v4765_v33 = vld [vmem:[%s12145_s0 + $0x170] sm:$0xff]  ;;  %v4766_v17 = vld [vmem:[%s12145_s0 + $0x178] sm:$0xff]  ;;  %v4941_v22 = vadd.f32 %v11432_v40, %v4749_v35 }
 0x5a7   :  { %4989 = vst.msk [vmem:[%s12148_s4 + $0x70] sm:$0xff] %vm115_vm1, %v4925_v29  ;;  %4990 = vst.msk [vmem:[%s12148_s4 + $0x78] sm:$0xff] %vm115_vm1, %v4926_v43  ;;  %v4767_v55 = vld [vmem:[%s12145_s0 + $0x180] sm:$0xff]  ;;  %v4768_v20 = vld [vmem:[%s12145_s0 + $0x188] sm:$0xff] }
 0x5a8   :  { %4991 = vst.msk [vmem:[%s12148_s4 + $0x80] sm:$0xff] %vm115_vm1, %v4927_v12  ;;  %4992 = vst.msk [vmem:[%s12148_s4 + $0x88] sm:$0xff] %vm115_vm1, %v4928_v46  ;;  %v14553_v57 = vld [vmem:[#allocation67_spill] sm:$0xff]  ;;  %v4769_v39 = vld [vmem:[%s12145_s0 + $0x190] sm:$0xff] }
 0x5a9   :  { %4993 = vst.msk [vmem:[%s12148_s4 + $0x90] sm:$0xff] %vm115_vm1, %v4929_v51  ;;  %4994 = vst.msk [vmem:[%s12148_s4 + $0x98] sm:$0xff] %vm115_vm1, %v4930_v8  ;;  %v4942_v23 = vadd.f32 %v14553_v57, %v4750_v36  ;;  %v4770_v40 = vld [vmem:[%s12145_s0 + $0x198] sm:$0xff]  ;;  %v14554_v26 = vld [vmem:[#allocation217_spill] sm:$0xff] }
 0x5aa   :  { %4995 = vst.msk [vmem:[%s12148_s4 + $0xa0] sm:$0xff] %vm115_vm1, %v4931_v48  ;;  %4996 = vst.msk [vmem:[%s12148_s4 + $0xa8] sm:$0xff] %vm115_vm1, %v4932_v14  ;;  %v4943_v19 = vadd.f32 %v14554_v26, %v4751_v54  ;;  %v14555_v45 = vld [vmem:[#allocation78_spill] sm:$0xff]  ;;  %v14556_v56 = vld [vmem:[#allocation105_spill] sm:$0xff] }
 0x5ab   :  { %4997 = vst.msk [vmem:[%s12148_s4 + $0xb0] sm:$0xff] %vm115_vm1, %v4933_v2  ;;  %4998 = vst.msk [vmem:[%s12148_s4 + $0xb8] sm:$0xff] %vm115_vm1, %v4934_v47  ;;  %v4944_v11 = vadd.f32 %v14555_v45, %v4752_v1  ;;  %v4945_v15 = vadd.f32 %v14556_v56, %v4753_v61  ;;  %v14557_v13 = vld [vmem:[#allocation89_spill] sm:$0xff]  ;;  %v4771_v21 = vld [vmem:[%s12145_s0 + $0x1a0] sm:$0xff] }
 0x5ac   :  { %v4946_v4 = vadd.f32 %v14557_v13, %v4754_v62  ;;  %4999 = vst.msk [vmem:[%s12148_s4 + $0xc0] sm:$0xff] %vm115_vm1, %v4935_v16  ;;  %5000 = vst.msk [vmem:[%s12148_s4 + $0xc8] sm:$0xff] %vm115_vm1, %v4936_v37  ;;  %v4772_v31 = vld [vmem:[%s12145_s0 + $0x1a8] sm:$0xff]  ;;  %v4773_v7 = vld [vmem:[%s12145_s0 + $0x1b0] sm:$0xff] }
 0x5ad   :  { %5001 = vst.msk [vmem:[%s12148_s4 + $0xd0] sm:$0xff] %vm115_vm1, %v4937_v10  ;;  %5002 = vst.msk [vmem:[%s12148_s4 + $0xd8] sm:$0xff] %vm115_vm1, %v4938_v44  ;;  %v14558_v59 = vld [vmem:[#allocation51_spill] sm:$0xff]  ;;  %v14560_v35 = vld [vmem:[#allocation106_spill] sm:$0xff] }
 0x5ae   :  { %v4947_v6 = vadd.f32 %v14558_v59, %v4755_v25  ;;  %v14559_v41 = vld [vmem:[#allocation79_spill] sm:$0xff]  ;;  %v4949_v36 = vadd.f32 %v14560_v35, %v4757_v38  ;;  %v14561_v9 = vld [vmem:[#allocation90_spill] sm:$0xff]  ;;  %5003 = vst.msk [vmem:[%s12148_s4 + $0xe0] sm:$0xff] %vm115_vm1, %v4939_v60  ;;  %5004 = vst.msk [vmem:[%s12148_s4 + $0xe8] sm:$0xff] %vm115_vm1, %v4940_v63 }
 0x5af   :  { %v4948_v32 = vadd.f32 %v14559_v41, %v4756_v27  ;;  %v4950_v34 = vadd.f32 %v14561_v9, %v4758_v52  ;;  %5005 = vst.msk [vmem:[%s12148_s4 + $0xf0] sm:$0xff] %vm115_vm1, %v4941_v22  ;;  %5006 = vst.msk [vmem:[%s12148_s4 + $0xf8] sm:$0xff] %vm115_vm1, %v4942_v23  ;;  %v4774_v3 = vld [vmem:[%s12145_s0 + $0x1b8] sm:$0xff]  ;;  %v4775_v18 = vld [vmem:[%s12145_s0 + $0x1c0] sm:$0xff] }
 0x5b0   :  { %v4776_v54 = vld [vmem:[%s12145_s0 + $0x1c8] sm:$0xff]  ;;  %v14564_v30 = vld [vmem:[#allocation266_spill] sm:$0xff]  ;;  %v14565_v43 = vld [vmem:[#allocation91_spill] sm:$0xff]  ;;  %5007 = vst.msk [vmem:[%s12148_s4 + $0x100] sm:$0xff] %vm115_vm1, %v4943_v19 }
 0x5b1   :  { %v14562_v1 = vld [vmem:[#allocation64_spill] sm:$0xff]  ;;  %v4953_v29 = vadd.f32 %v14564_v30, %v4761_v58  ;;  %v4954_v25 = vadd.f32 %v14565_v43, %v4762_v42  ;;  %5008 = vst.msk [vmem:[%s12148_s4 + $0x108] sm:$0xff] %vm115_vm1, %v4944_v11  ;;  %5009 = vst.msk [vmem:[%s12148_s4 + $0x110] sm:$0xff] %vm115_vm1, %v4945_v15  ;;  %v4777_v27 = vld [vmem:[%s12145_s0 + $0x1d0] sm:$0xff] }
 0x5b2   :  { %v4951_v61 = vadd.f32 %v14562_v1, %v4759_v49  ;;  %v14563_v62 = vld [vmem:[#allocation80_spill] sm:$0xff]  ;;  %5010 = vst.msk [vmem:[%s12148_s4 + $0x118] sm:$0xff] %vm115_vm1, %v4946_v4  ;;  %v4778_v38 = vld [vmem:[%s12145_s0 + $0x1d8] sm:$0xff]  ;;  %v4779_v52 = vld [vmem:[%s12145_s0 + $0x1e0] sm:$0xff] }
 0x5b3   :  { %v4952_v24 = vadd.f32 %v14563_v62, %v4760_v28  ;;  %v14566_v12 = vld [vmem:[#allocation238_spill] sm:$0xff]  ;;  %v14567_v51 = vld [vmem:[#allocation52_spill] sm:$0xff]  ;;  %5011 = vst.msk [vmem:[%s12148_s4 + $0x120] sm:$0xff] %vm115_vm1, %v4947_v6  ;;  %5012 = vst.msk [vmem:[%s12148_s4 + $0x128] sm:$0xff] %vm115_vm1, %v4948_v32  ;;  %v4971_v13 = vadd.f32 %v11672_v53, %v4779_v52 }
 0x5b4   :  { %v4955_v46 = vadd.f32 %v14566_v12, %v4763_v5  ;;  %v4956_v8 = vadd.f32 %v14567_v51, %v4764_v0  ;;  %v14568_v49 = vld [vmem:[#allocation244_spill] sm:$0xff]  ;;  %v14569_v58 = vld [vmem:[#allocation38_spill] sm:$0xff]  ;;  %5013 = vst.msk [vmem:[%s12148_s4 + $0x130] sm:$0xff] %vm115_vm1, %v4949_v36  ;;  %5014 = vst.msk [vmem:[%s12148_s4 + $0x138] sm:$0xff] %vm115_vm1, %v4950_v34 }
 0x5b5   :  { %v4957_v28 = vadd.f32 %v14568_v49, %v4765_v33  ;;  %v4958_v48 = vadd.f32 %v14569_v58, %v4766_v17  ;;  %v4780_v14 = vld [vmem:[%s12145_s0 + $0x1e8] sm:$0xff]  ;;  %v4781_v2 = vld [vmem:[%s12145_s0 + $0x1f0] sm:$0xff]  ;;  %v4782_v47 = vld [vmem:[%s12145_s0 + $0x1f8] sm:$0xff]  ;;  %5015 = vst.msk [vmem:[%s12148_s4 + $0x140] sm:$0xff] %vm115_vm1, %v4951_v61 }
 0x5b6   :  { %v14570_v42 = vld [vmem:[#allocation218_spill] sm:$0xff]  ;;  %v14571_v0 = vld [vmem:[#allocation81_spill] sm:$0xff]  ;;  %v14573_v44 = vld [vmem:[#allocation92_spill] sm:$0xff]  ;;  %5016 = vst.msk [vmem:[%s12148_s4 + $0x148] sm:$0xff] %vm115_vm1, %v4952_v24  ;;  %v4972_v4 = vadd.f32 %v11678_v50, %v4780_v14 }
 0x5b7   :  { %v4959_v5 = vadd.f32 %v14570_v42, %v4767_v55  ;;  %v4960_v16 = vadd.f32 %v14571_v0, %v4768_v20  ;;  %v14572_v37 = vld [vmem:[#allocation77_spill] sm:$0xff]  ;;  %v4962_v33 = vadd.f32 %v14573_v44, %v4770_v40  ;;  %5017 = vst.msk [vmem:[%s12148_s4 + $0x150] sm:$0xff] %vm115_vm1, %v4953_v29  ;;  %5018 = vst.msk [vmem:[%s12148_s4 + $0x158] sm:$0xff] %vm115_vm1, %v4954_v25  ;;  %v14574_v17 = vld [vmem:[#allocation88_spill] sm:$0xff] }
 0x5b8   :  { %v4961_v10 = vadd.f32 %v14572_v37, %v4769_v39  ;;  %v4963_v55 = vadd.f32 %v14574_v17, %v4771_v21  ;;  %v14575_v60 = vld [vmem:[#allocation82_spill] sm:$0xff]  ;;  %v14577_v23 = vld [vmem:[#allocation84_spill] sm:$0xff]  ;;  %5019 = vst.msk [vmem:[%s12148_s4 + $0x160] sm:$0xff] %vm115_vm1, %v4955_v46  ;;  %5020 = vst.msk [vmem:[%s12148_s4 + $0x168] sm:$0xff] %vm115_vm1, %v4956_v8 }
 0x5b9   :  { %v4964_v63 = vadd.f32 %v14575_v60, %v4772_v31  ;;  %v14576_v22 = vld [vmem:[#allocation270_spill] sm:$0xff]  ;;  %v4966_v20 = vadd.f32 %v14577_v23, %v4774_v3  ;;  %5021 = vst.msk [vmem:[%s12148_s4 + $0x170] sm:$0xff] %vm115_vm1, %v4957_v28  ;;  %5022 = vst.msk [vmem:[%s12148_s4 + $0x178] sm:$0xff] %vm115_vm1, %v4958_v48  ;;  %v14579_v26 = vld [vmem:[#allocation95_spill] sm:$0xff] }
 0x5ba   :  { %v4965_v57 = vadd.f32 %v14576_v22, %v4773_v7  ;;  %v14578_v39 = vld [vmem:[#allocation66_spill] sm:$0xff]  ;;  %v4968_v19 = vadd.f32 %v14579_v26, %v4776_v54  ;;  %v14580_v45 = vld [vmem:[#allocation271_spill] sm:$0xff]  ;;  %v14581_v56 = vld [vmem:[#allocation85_spill] sm:$0xff]  ;;  %5023 = vst.msk [vmem:[%s12148_s4 + $0x180] sm:$0xff] %vm115_vm1, %v4959_v5 }
 0x5bb   :  { %v4967_v40 = vadd.f32 %v14578_v39, %v4775_v18  ;;  %v4969_v11 = vadd.f32 %v14580_v45, %v4777_v27  ;;  %v4970_v15 = vadd.f32 %v14581_v56, %v4778_v38  ;;  %5024 = vst.msk [vmem:[%s12148_s4 + $0x188] sm:$0xff] %vm115_vm1, %v4960_v16  ;;  %5025 = vst.msk [vmem:[%s12148_s4 + $0x190] sm:$0xff] %vm115_vm1, %v4961_v10  ;;  %v14582_v21 = vld [vmem:[#allocation235_spill] sm:$0xff]  ;;  %v14583_v7 = vld [vmem:[#allocation96_spill] sm:$0xff] }
 0x5bc   :  { %5026 = vst.msk [vmem:[%s12148_s4 + $0x198] sm:$0xff] %vm115_vm1, %v4962_v33  ;;  %v4973_v31 = vadd.f32 %v14582_v21, %v4781_v2  ;;  %v4974_v59 = vadd.f32 %v14583_v7, %v4782_v47  ;;  %5027 = vst.msk [vmem:[%s12148_s4 + $0x1a0] sm:$0xff] %vm115_vm1, %v4963_v55 }
 0x5bd   :  { %5028 = vst.msk [vmem:[%s12148_s4 + $0x1a8] sm:$0xff] %vm115_vm1, %v4964_v63  ;;  %5029 = vst.msk [vmem:[%s12148_s4 + $0x1b0] sm:$0xff] %vm115_vm1, %v4965_v57 }
 0x5be   :  { %5030 = vst.msk [vmem:[%s12148_s4 + $0x1b8] sm:$0xff] %vm115_vm1, %v4966_v20  ;;  %5031 = vst.msk [vmem:[%s12148_s4 + $0x1c0] sm:$0xff] %vm115_vm1, %v4967_v40 }
 0x5bf   :  { %5032 = vst.msk [vmem:[%s12148_s4 + $0x1c8] sm:$0xff] %vm115_vm1, %v4968_v19  ;;  %5033 = vst.msk [vmem:[%s12148_s4 + $0x1d0] sm:$0xff] %vm115_vm1, %v4969_v11 }
 0x5c0   :  { %5034 = vst.msk [vmem:[%s12148_s4 + $0x1d8] sm:$0xff] %vm115_vm1, %v4970_v15  ;;  %5035 = vst.msk [vmem:[%s12148_s4 + $0x1e0] sm:$0xff] %vm115_vm1, %v4971_v13 }
 0x5c1   :  { %5036 = vst.msk [vmem:[%s12148_s4 + $0x1e8] sm:$0xff] %vm115_vm1, %v4972_v4  ;;  %5037 = vst.msk [vmem:[%s12148_s4 + $0x1f0] sm:$0xff] %vm115_vm1, %v4973_v31 }
 0x5c2   :  { %5038 = vst.msk [vmem:[%s12148_s4 + $0x1f8] sm:$0xff] %vm115_vm1, %v4974_v59 }

</bundles_post_ra>
